<compile_context>
chip_gen: v7x
topology: tpu7x:2x2x1
jax: 0.10.0
libtpu: 0.0.40
codegen_flags: <defaults>
</compile_context>

<pallas_src>
import jax
import jax.numpy as jnp
from jax.experimental import pallas as pl
from jax.experimental.pallas import tpu as pltpu

# Logical (PyTorch) dims.
N_ITEMS = 256     # rating_matrix.shape[1] (already a lane multiple)
HIDDEN = 600      # self.layers = [600]
LAT = 148         # self.lat_dim
HALF = 74         # split point used in forward()

# Lane-aligned padded dims used inside the kernel.
HIDDEN_PAD = 640  # 5 * 128
LAT_PAD = 256     # 2 * 128
HALF_PAD = 128    # decoder-input contraction dim

BATCH = 256


def _device_kind():
    try:
        return jax.devices()[0].device_kind.lower()
    except Exception:
        return ""


_KIND = _device_kind()
# v7x has 2 TensorCores/chip -> 2 "parallel" batch tiles (one per TC); every
# other generation handled here runs the whole batch as a single grid step.
_NUM_BATCH_TILES = 2 if "v7" in _KIND else 1
# bf16 VPU/EUP exists on v6e/v7x only; older chips (v5e, ...) do tanh in f32.
_TANH_DTYPE = jnp.bfloat16 if ("v6" in _KIND or "v7" in _KIND) else jnp.float32


def make_multivae_kernel(tanh_dtype):
    def multivae_kernel(x_ref,
                        w1_ref, b1_ref, w2_ref, b2_ref,
                        w3_ref, b3_ref, w4_ref, b4_ref,
                        logits_ref, h2_ref):
        # x arrives as bf16 (exact for 0/1 or small-integer ratings).
        x = x_ref[...].astype(jnp.float32)  # (TILE_B, N_ITEMS)

        # F.normalize(rating_matrix): L2-normalize along dim=1, eps=1e-12 clamp
        # on the norm -> clamp sum-of-squares at 1e-24, single rsqrt (EUP).
        sumsq = jnp.sum(x * x, axis=1, keepdims=True)
        h = x * jax.lax.rsqrt(jnp.maximum(sumsq, 1e-24))

        # F.dropout(p=0.5, training=False) is the identity in eval mode.
        # TODO(synk): training-mode dropout mask and reparameterization noise
        # are not implemented (eval-mode semantics only).

        # Encoder: Linear -> Tanh -> Linear.
        # MXU operands bf16, f32 accumulate; tanh in tanh_dtype (bf16 on
        # v6e/v7x, f32 on v5e).  When tanh_dtype==bf16 the trailing astype is a
        # no-op, so the tanh output feeds the next dot with no extra convert.
        h1_pre = jnp.dot(h.astype(jnp.bfloat16), w1_ref[...],
                         preferred_element_type=jnp.float32) + b1_ref[...]
        h1 = jnp.tanh(h1_pre.astype(tanh_dtype)).astype(jnp.bfloat16)
        h2 = jnp.dot(h1, w2_ref[...],
                     preferred_element_type=jnp.float32) + b2_ref[...]

        # Lane-dense f32 store of the full padded encoder output; mu/logvar/z1
        # are sliced outside the kernel.
        h2_ref[...] = h2

        # Decoder input: lane-aligned first 128 lanes of h2.  Rows 74:128 of
        # the padded w3 are zero, so this equals jnp.dot(mu, w3) exactly.
        z_in = h2[:, :HALF_PAD].astype(jnp.bfloat16)

        # Decoder: Linear -> Tanh -> Linear.
        d1_pre = jnp.dot(z_in, w3_ref[...],
                         preferred_element_type=jnp.float32) + b3_ref[...]
        d1 = jnp.tanh(d1_pre.astype(tanh_dtype)).astype(jnp.bfloat16)
        logits = jnp.dot(d1, w4_ref[...],
                         preferred_element_type=jnp.float32) + b4_ref[...]
        logits_ref[...] = logits.astype(logits_ref.dtype)

    return multivae_kernel


def prepare_params(w1, b1, w2, b2, w3, b3, w4, b4):
    """Zero-pad to lane-aligned dims; weights -> bf16, biases stay f32."""
    def pad2(a, shape):
        out = jnp.zeros(shape, a.dtype)
        return out.at[: a.shape[0], : a.shape[1]].set(a)

    w1p = pad2(w1, (N_ITEMS, HIDDEN_PAD)).astype(jnp.bfloat16)
    b1p = pad2(b1, (1, HIDDEN_PAD))
    w2p = pad2(w2, (HIDDEN_PAD, LAT_PAD)).astype(jnp.bfloat16)
    b2p = pad2(b2, (1, LAT_PAD))
    w3p = pad2(w3, (HALF_PAD, HIDDEN_PAD)).astype(jnp.bfloat16)
    b3p = pad2(b3, (1, HIDDEN_PAD))
    w4p = pad2(w4, (HIDDEN_PAD, N_ITEMS)).astype(jnp.bfloat16)
    b4p = pad2(b4, (1, N_ITEMS))
    return (w1p, b1p, w2p, b2p, w3p, b3p, w4p, b4p)


def multivae_forward(x, padded_params, training=False):
    """Returns (z, mu, logvar, z_1) exactly like MultiVAE.forward (eval mode)."""
    assert not training, "Pallas kernel implements eval-mode forward only"
    B = x.shape[0]
    n_tiles = _NUM_BATCH_TILES
    assert B % n_tiles == 0, "batch must divide evenly across TensorCores"
    tile_b = B // n_tiles
    assert tile_b == B or tile_b % 8 == 0, "batch tile must be sublane-aligned"

    # Binary / small-integer rating rows are exact in bf16 -> halve x traffic.
    x_bf16 = x.astype(jnp.bfloat16)

    kernel = make_multivae_kernel(_TANH_DTYPE)

    # Advisory cost estimate so XLA schedules this tiny call sensibly.
    mxu_macs = (N_ITEMS * HIDDEN_PAD + HIDDEN_PAD * LAT_PAD
                + HALF_PAD * HIDDEN_PAD + HIDDEN_PAD * N_ITEMS)
    weight_bytes = 2 * mxu_macs                                    # bf16 weights
    bias_bytes = 4 * (HIDDEN_PAD + LAT_PAD + HIDDEN_PAD + N_ITEMS)
    io_bytes = B * N_ITEMS * 2 + B * N_ITEMS * 2 + B * LAT_PAD * 4
    cost = pl.CostEstimate(
        flops=2 * B * mxu_macs,
        transcendentals=2 * B * HIDDEN_PAD + B,   # two tanh layers + rsqrt
        bytes_accessed=weight_bytes + bias_bytes + io_bytes,
    )

    # Batch-tiled x / outputs.
    x_spec = pl.BlockSpec((tile_b, N_ITEMS), lambda i: (i, 0))
    out_specs = (
        pl.BlockSpec((tile_b, N_ITEMS), lambda i: (i, 0)),   # decoder logits
        pl.BlockSpec((tile_b, LAT_PAD), lambda i: (i, 0)),   # padded h2
    )
    out_shape = (
        jax.ShapeDtypeStruct((B, N_ITEMS), jnp.bfloat16),
        jax.ShapeDtypeStruct((B, LAT_PAD), jnp.float32),
    )

    # NOTE(scale-up): at N_ITEMS=256 whole-array weight blocks fit VMEM easily.
    # For a realistic rating matrix (n_items ~ 10k-40k) w1/w4 become tens of
    # MiB: tile w1 along K and w4 along N with an extra "arbitrary" grid axis
    # plus an f32 VMEM scratch accumulator, keeping weight tiles <= ~8 MiB on
    # v7x and <= ~16 MiB on v5e/v6e.
    def run(single_buffer_weights):
        def whole(shape):
            if single_buffer_weights:
                # Grid-invariant block: one buffer suffices (index never
                # changes), halving resident-weight VMEM.
                return pl.BlockSpec(shape, lambda i: (0, 0),
                                    pipeline_mode=pl.Buffered(1))
            return pl.BlockSpec(shape, lambda i: (0, 0))

        in_specs = [x_spec] + [whole(p.shape) for p in padded_params]
        return pl.pallas_call(
            kernel,
            out_shape=out_shape,
            grid_spec=pltpu.PrefetchScalarGridSpec(
                num_scalar_prefetch=0,
                grid=(n_tiles,),
                in_specs=in_specs,
                out_specs=out_specs,
            ),
            compiler_params=pltpu.CompilerParams(
                dimension_semantics=("parallel",),
            ),
            cost_estimate=cost,
        )(x_bf16, *padded_params)

    try:
        logits, h2 = run(True)
    except Exception:
        # pipeline_mode=pl.Buffered(1) not supported by this jax/Mosaic build
        # for top-level pallas_call specs; fall back to default buffering.
        logits, h2 = run(False)

    mu = h2[:, :HALF]
    logvar = h2[:, HALF:LAT]
    z1 = mu                       # eval-mode reparameterize(mu, logvar) == mu
    return logits, mu, logvar, z1


def _xavier_normal(key, shape):
    fan_in, fan_out = shape
    std = (2.0 / (fan_in + fan_out)) ** 0.5
    return std * jax.random.normal(key, shape, dtype=jnp.float32)


def _reference_forward(x, params):
    """Pure-JAX f32 reference (original, unpadded weights)."""
    w1, b1, w2, b2, w3, b3, w4, b4 = params
    norm = jnp.sqrt(jnp.sum(x * x, axis=1, keepdims=True))
    h = x / jnp.maximum(norm, 1e-12)
    h1 = jnp.tanh(h @ w1 + b1)
    h2 = h1 @ w2 + b2
    mu, logvar = h2[:, :HALF], h2[:, HALF:]
    z1 = mu
    d1 = jnp.tanh(z1 @ w3 + b3)
    out = d1 @ w4 + b4
    return out, mu, logvar, z1


if __name__ == "__main__":
    key = jax.random.PRNGKey(0)
    k1, k2, k3, k4, kx = jax.random.split(key, 5)

    # Deterministic xavier-normal weights, zero biases (as in the module init).
    w1 = _xavier_normal(k1, (N_ITEMS, HIDDEN)); b1 = jnp.zeros((1, HIDDEN), jnp.float32)
    w2 = _xavier_normal(k2, (HIDDEN, LAT));     b2 = jnp.zeros((1, LAT), jnp.float32)
    w3 = _xavier_normal(k3, (HALF, HIDDEN));    b3 = jnp.zeros((1, HIDDEN), jnp.float32)
    w4 = _xavier_normal(k4, (HIDDEN, N_ITEMS)); b4 = jnp.zeros((1, N_ITEMS), jnp.float32)
    params = (w1, b1, w2, b2, w3, b3, w4, b4)
    padded_params = prepare_params(*params)

    # Sparse binary "rating matrix" rows.
    x = (jax.random.uniform(kx, (BATCH, N_ITEMS)) < 0.1).astype(jnp.float32)

    z, mu, logvar, z1 = multivae_forward(x, padded_params)
    jax.block_until_ready((z, mu, logvar, z1))

    # Correctness check against pure-f32 reference (looser tol for bf16 paths).
    z_r, mu_r, lv_r, z1_r = _reference_forward(x, params)
    for a, b in ((z, z_r), (mu, mu_r), (logvar, lv_r), (z1, z1_r)):
        assert a.shape == b.shape, "shape mismatch vs reference"
        a32 = a.astype(jnp.float32)
        assert jnp.allclose(a32, b, atol=2e-2, rtol=2e-2), "mismatch vs reference"

    print("KERNEL_OK")
</pallas_src>

<mosaic_0001>
module attributes {stable_mosaic.version = 11 : i64} {
  func.func @multivae_kernel(%arg0: i32, %arg1: memref<256x256xbf16, #tpu.memory_space<vmem>>, %arg2: memref<256x640xbf16, #tpu.memory_space<vmem>>, %arg3: memref<1x640xf32, #tpu.memory_space<vmem>>, %arg4: memref<640x256xbf16, #tpu.memory_space<vmem>>, %arg5: memref<1x256xf32, #tpu.memory_space<vmem>>, %arg6: memref<128x640xbf16, #tpu.memory_space<vmem>>, %arg7: memref<1x640xf32, #tpu.memory_space<vmem>>, %arg8: memref<640x256xbf16, #tpu.memory_space<vmem>>, %arg9: memref<1x256xf32, #tpu.memory_space<vmem>>, %arg10: memref<256x256xbf16, #tpu.memory_space<vmem>>, %arg11: memref<256x256xf32, #tpu.memory_space<vmem>>) attributes {dimension_semantics = [#tpu.dimension_semantics<parallel>], iteration_bounds = array<i64: 1>, scalar_prefetch = 0 : i64, scratch_operands = 0 : i64, tpu.core_type = #tpu.core_type<tc>, window_params = [{transform_indices = @transform_0, window_bounds = array<i64: 256, 256>}, {pipeline_mode = #tpu.pipeline_mode<synchronous>, transform_indices = @transform_1, window_bounds = array<i64: 256, 640>}, {pipeline_mode = #tpu.pipeline_mode<synchronous>, transform_indices = @transform_2, window_bounds = array<i64: 1, 640>}, {pipeline_mode = #tpu.pipeline_mode<synchronous>, transform_indices = @transform_3, window_bounds = array<i64: 640, 256>}, {pipeline_mode = #tpu.pipeline_mode<synchronous>, transform_indices = @transform_4, window_bounds = array<i64: 1, 256>}, {pipeline_mode = #tpu.pipeline_mode<synchronous>, transform_indices = @transform_5, window_bounds = array<i64: 128, 640>}, {pipeline_mode = #tpu.pipeline_mode<synchronous>, transform_indices = @transform_6, window_bounds = array<i64: 1, 640>}, {pipeline_mode = #tpu.pipeline_mode<synchronous>, transform_indices = @transform_7, window_bounds = array<i64: 640, 256>}, {pipeline_mode = #tpu.pipeline_mode<synchronous>, transform_indices = @transform_8, window_bounds = array<i64: 1, 256>}, {transform_indices = @transform_9, window_bounds = array<i64: 256, 256>}, {transform_indices = @transform_10, window_bounds = array<i64: 256, 256>}]} {
    %c0 = arith.constant 0 : index
    %c0_0 = arith.constant 0 : index
    %0 = vector.load %arg1[%c0, %c0_0] : memref<256x256xbf16, #tpu.memory_space<vmem>>, vector<256x256xbf16>
    %1 = arith.extf %0 : vector<256x256xbf16> to vector<256x256xf32>
    %2 = arith.mulf %1, %1 : vector<256x256xf32>
    %cst = arith.constant dense<0.000000e+00> : vector<256xf32>
    %3 = vector.multi_reduction <add>, %2, %cst [1] : vector<256x256xf32> to vector<256xf32>
    %4 = vector.shape_cast %3 : vector<256xf32> to vector<256x1xf32>
    %cst_1 = arith.constant 1.000000e-24 : f32
    %5 = vector.broadcast %cst_1 : f32 to vector<256x1xf32>
    %6 = arith.maximumf %4, %5 : vector<256x1xf32>
    %7 = math.rsqrt %6 : vector<256x1xf32>
    %8 = vector.broadcast %7 : vector<256x1xf32> to vector<256x256xf32>
    %9 = arith.mulf %1, %8 : vector<256x256xf32>
    %10 = arith.truncf %9 : vector<256x256xf32> to vector<256x256xbf16>
    %c0_2 = arith.constant 0 : index
    %c0_3 = arith.constant 0 : index
    %11 = vector.load %arg2[%c0_2, %c0_3] : memref<256x640xbf16, #tpu.memory_space<vmem>>, vector<256x640xbf16>
    %cst_4 = arith.constant dense<0.000000e+00> : vector<256x640xf32>
    %12 = tpu.matmul %10, %11, %cst_4 {dimension_numbers = #tpu.dot_dimension_numbers<[1], [0], [0], [1], [0, 0, 1, 1], [], []>} : vector<256x256xbf16>, vector<256x640xbf16>, vector<256x640xf32> -> vector<256x640xf32>
    %c0_5 = arith.constant 0 : index
    %c0_6 = arith.constant 0 : index
    %13 = vector.load %arg3[%c0_5, %c0_6] : memref<1x640xf32, #tpu.memory_space<vmem>>, vector<1x640xf32>
    %14 = vector.broadcast %13 : vector<1x640xf32> to vector<256x640xf32>
    %15 = arith.addf %12, %14 : vector<256x640xf32>
    %16 = math.tanh %15 : vector<256x640xf32>
    %17 = arith.truncf %16 : vector<256x640xf32> to vector<256x640xbf16>
    %c0_7 = arith.constant 0 : index
    %c0_8 = arith.constant 0 : index
    %18 = vector.load %arg4[%c0_7, %c0_8] : memref<640x256xbf16, #tpu.memory_space<vmem>>, vector<640x256xbf16>
    %cst_9 = arith.constant dense<0.000000e+00> : vector<256x256xf32>
    %19 = tpu.matmul %17, %18, %cst_9 {dimension_numbers = #tpu.dot_dimension_numbers<[1], [0], [0], [1], [0, 0, 1, 1], [], []>} : vector<256x640xbf16>, vector<640x256xbf16>, vector<256x256xf32> -> vector<256x256xf32>
    %c0_10 = arith.constant 0 : index
    %c0_11 = arith.constant 0 : index
    %20 = vector.load %arg5[%c0_10, %c0_11] : memref<1x256xf32, #tpu.memory_space<vmem>>, vector<1x256xf32>
    %21 = vector.broadcast %20 : vector<1x256xf32> to vector<256x256xf32>
    %22 = arith.addf %19, %21 : vector<256x256xf32>
    %c0_12 = arith.constant 0 : index
    %c0_13 = arith.constant 0 : index
    %23 = vector.load %arg11[%c0_12, %c0_13] : memref<256x256xf32, #tpu.memory_space<vmem>>, vector<256x256xf32>
    tpu.vector_store %arg11[%c0_12, %c0_13], %22 {strides = array<i32>} : memref<256x256xf32, #tpu.memory_space<vmem>>, vector<256x256xf32>,
    %24 = vector.extract_strided_slice %22 {offsets = [0, 0], sizes = [256, 128], strides = [1, 1]} : vector<256x256xf32> to vector<256x128xf32>
    %25 = arith.truncf %24 : vector<256x128xf32> to vector<256x128xbf16>
    %c0_14 = arith.constant 0 : index
    %c0_15 = arith.constant 0 : index
    %26 = vector.load %arg6[%c0_14, %c0_15] : memref<128x640xbf16, #tpu.memory_space<vmem>>, vector<128x640xbf16>
    %cst_16 = arith.constant dense<0.000000e+00> : vector<256x640xf32>
    %27 = tpu.matmul %25, %26, %cst_16 {dimension_numbers = #tpu.dot_dimension_numbers<[1], [0], [0], [1], [0, 0, 1, 1], [], []>} : vector<256x128xbf16>, vector<128x640xbf16>, vector<256x640xf32> -> vector<256x640xf32>
    %c0_17 = arith.constant 0 : index
    %c0_18 = arith.constant 0 : index
    %28 = vector.load %arg7[%c0_17, %c0_18] : memref<1x640xf32, #tpu.memory_space<vmem>>, vector<1x640xf32>
    %29 = vector.broadcast %28 : vector<1x640xf32> to vector<256x640xf32>
    %30 = arith.addf %27, %29 : vector<256x640xf32>
    %31 = math.tanh %30 : vector<256x640xf32>
    %32 = arith.truncf %31 : vector<256x640xf32> to vector<256x640xbf16>
    %c0_19 = arith.constant 0 : index
    %c0_20 = arith.constant 0 : index
    %33 = vector.load %arg8[%c0_19, %c0_20] : memref<640x256xbf16, #tpu.memory_space<vmem>>, vector<640x256xbf16>
    %cst_21 = arith.constant dense<0.000000e+00> : vector<256x256xf32>
    %34 = tpu.matmul %32, %33, %cst_21 {dimension_numbers = #tpu.dot_dimension_numbers<[1], [0], [0], [1], [0, 0, 1, 1], [], []>} : vector<256x640xbf16>, vector<640x256xbf16>, vector<256x256xf32> -> vector<256x256xf32>
    %c0_22 = arith.constant 0 : index
    %c0_23 = arith.constant 0 : index
    %35 = vector.load %arg9[%c0_22, %c0_23] : memref<1x256xf32, #tpu.memory_space<vmem>>, vector<1x256xf32>
    %36 = vector.broadcast %35 : vector<1x256xf32> to vector<256x256xf32>
    %37 = arith.addf %34, %36 : vector<256x256xf32>
    %38 = arith.truncf %37 : vector<256x256xf32> to vector<256x256xbf16>
    %c0_24 = arith.constant 0 : index
    %c0_25 = arith.constant 0 : index
    %39 = vector.load %arg10[%c0_24, %c0_25] : memref<256x256xbf16, #tpu.memory_space<vmem>>, vector<256x256xbf16>
    tpu.vector_store %arg10[%c0_24, %c0_25], %38 {strides = array<i32>} : memref<256x256xbf16, #tpu.memory_space<vmem>>, vector<256x256xbf16>,
    return
  }
  func.func @transform_0(%arg0: i32) -> (i32, i32) {
    %c0_i32 = arith.constant 0 : i32
    %c0_i32_0 = arith.constant 0 : i32
    return %arg0, %c0_i32 : i32, i32
  }
  func.func @transform_1(%arg0: i32) -> (i32, i32) {
    %c0_i32 = arith.constant 0 : i32
    %c0_i32_0 = arith.constant 0 : i32
    %c0_i32_1 = arith.constant 0 : i32
    return %c0_i32, %c0_i32_0 : i32, i32
  }
  func.func @transform_2(%arg0: i32) -> (i32, i32) {
    %c0_i32 = arith.constant 0 : i32
    %c0_i32_0 = arith.constant 0 : i32
    %c0_i32_1 = arith.constant 0 : i32
    return %c0_i32, %c0_i32_0 : i32, i32
  }
  func.func @transform_3(%arg0: i32) -> (i32, i32) {
    %c0_i32 = arith.constant 0 : i32
    %c0_i32_0 = arith.constant 0 : i32
    %c0_i32_1 = arith.constant 0 : i32
    return %c0_i32, %c0_i32_0 : i32, i32
  }
  func.func @transform_4(%arg0: i32) -> (i32, i32) {
    %c0_i32 = arith.constant 0 : i32
    %c0_i32_0 = arith.constant 0 : i32
    %c0_i32_1 = arith.constant 0 : i32
    return %c0_i32, %c0_i32_0 : i32, i32
  }
  func.func @transform_5(%arg0: i32) -> (i32, i32) {
    %c0_i32 = arith.constant 0 : i32
    %c0_i32_0 = arith.constant 0 : i32
    %c0_i32_1 = arith.constant 0 : i32
    return %c0_i32, %c0_i32_0 : i32, i32
  }
  func.func @transform_6(%arg0: i32) -> (i32, i32) {
    %c0_i32 = arith.constant 0 : i32
    %c0_i32_0 = arith.constant 0 : i32
    %c0_i32_1 = arith.constant 0 : i32
    return %c0_i32, %c0_i32_0 : i32, i32
  }
  func.func @transform_7(%arg0: i32) -> (i32, i32) {
    %c0_i32 = arith.constant 0 : i32
    %c0_i32_0 = arith.constant 0 : i32
    %c0_i32_1 = arith.constant 0 : i32
    return %c0_i32, %c0_i32_0 : i32, i32
  }
  func.func @transform_8(%arg0: i32) -> (i32, i32) {
    %c0_i32 = arith.constant 0 : i32
    %c0_i32_0 = arith.constant 0 : i32
    %c0_i32_1 = arith.constant 0 : i32
    return %c0_i32, %c0_i32_0 : i32, i32
  }
  func.func @transform_9(%arg0: i32) -> (i32, i32) {
    %c0_i32 = arith.constant 0 : i32
    %c0_i32_0 = arith.constant 0 : i32
    return %arg0, %c0_i32 : i32, i32
  }
  func.func @transform_10(%arg0: i32) -> (i32, i32) {
    %c0_i32 = arith.constant 0 : i32
    %c0_i32_0 = arith.constant 0 : i32
    return %arg0, %c0_i32 : i32, i32
  }
}

module attributes {stable_mosaic.version = 11 : i64} {
  func.func @multivae_kernel(%arg0: i32, %arg1: memref<256x256xbf16, #tpu.memory_space<vmem>>, %arg2: memref<256x640xbf16, #tpu.memory_space<vmem>>, %arg3: memref<1x640xf32, #tpu.memory_space<vmem>>, %arg4: memref<640x256xbf16, #tpu.memory_space<vmem>>, %arg5: memref<1x256xf32, #tpu.memory_space<vmem>>, %arg6: memref<128x640xbf16, #tpu.memory_space<vmem>>, %arg7: memref<1x640xf32, #tpu.memory_space<vmem>>, %arg8: memref<640x256xbf16, #tpu.memory_space<vmem>>, %arg9: memref<1x256xf32, #tpu.memory_space<vmem>>, %arg10: memref<256x256xbf16, #tpu.memory_space<vmem>>, %arg11: memref<256x256xf32, #tpu.memory_space<vmem>>) attributes {dimension_semantics = [#tpu.dimension_semantics<parallel>], iteration_bounds = array<i64: 1>, scalar_prefetch = 0 : i64, scratch_operands = 0 : i64, tpu.core_type = #tpu.core_type<tc>, window_params = [{transform_indices = @transform_0, window_bounds = array<i64: 256, 256>}, {pipeline_mode = #tpu.pipeline_mode<synchronous>, transform_indices = @transform_1, window_bounds = array<i64: 256, 640>}, {pipeline_mode = #tpu.pipeline_mode<synchronous>, transform_indices = @transform_2, window_bounds = array<i64: 1, 640>}, {pipeline_mode = #tpu.pipeline_mode<synchronous>, transform_indices = @transform_3, window_bounds = array<i64: 640, 256>}, {pipeline_mode = #tpu.pipeline_mode<synchronous>, transform_indices = @transform_4, window_bounds = array<i64: 1, 256>}, {pipeline_mode = #tpu.pipeline_mode<synchronous>, transform_indices = @transform_5, window_bounds = array<i64: 128, 640>}, {pipeline_mode = #tpu.pipeline_mode<synchronous>, transform_indices = @transform_6, window_bounds = array<i64: 1, 640>}, {pipeline_mode = #tpu.pipeline_mode<synchronous>, transform_indices = @transform_7, window_bounds = array<i64: 640, 256>}, {pipeline_mode = #tpu.pipeline_mode<synchronous>, transform_indices = @transform_8, window_bounds = array<i64: 1, 256>}, {transform_indices = @transform_9, window_bounds = array<i64: 256, 256>}, {transform_indices = @transform_10, window_bounds = array<i64: 256, 256>}]} {
    %c0 = arith.constant 0 : index
    %c0_0 = arith.constant 0 : index
    %0 = vector.load %arg1[%c0, %c0_0] : memref<256x256xbf16, #tpu.memory_space<vmem>>, vector<256x256xbf16>
    %1 = arith.extf %0 : vector<256x256xbf16> to vector<256x256xf32>
    %2 = arith.mulf %1, %1 : vector<256x256xf32>
    %cst = arith.constant dense<0.000000e+00> : vector<256xf32>
    %3 = vector.multi_reduction <add>, %2, %cst [1] : vector<256x256xf32> to vector<256xf32>
    %4 = vector.shape_cast %3 : vector<256xf32> to vector<256x1xf32>
    %cst_1 = arith.constant 1.000000e-24 : f32
    %5 = vector.broadcast %cst_1 : f32 to vector<256x1xf32>
    %6 = arith.maximumf %4, %5 : vector<256x1xf32>
    %7 = math.rsqrt %6 : vector<256x1xf32>
    %8 = vector.broadcast %7 : vector<256x1xf32> to vector<256x256xf32>
    %9 = arith.mulf %1, %8 : vector<256x256xf32>
    %10 = arith.truncf %9 : vector<256x256xf32> to vector<256x256xbf16>
    %c0_2 = arith.constant 0 : index
    %c0_3 = arith.constant 0 : index
    %11 = vector.load %arg2[%c0_2, %c0_3] : memref<256x640xbf16, #tpu.memory_space<vmem>>, vector<256x640xbf16>
    %cst_4 = arith.constant dense<0.000000e+00> : vector<256x640xf32>
    %12 = tpu.matmul %10, %11, %cst_4 {dimension_numbers = #tpu.dot_dimension_numbers<[1], [0], [0], [1], [0, 0, 1, 1], [], []>} : vector<256x256xbf16>, vector<256x640xbf16>, vector<256x640xf32> -> vector<256x640xf32>
    %c0_5 = arith.constant 0 : index
    %c0_6 = arith.constant 0 : index
    %13 = vector.load %arg3[%c0_5, %c0_6] : memref<1x640xf32, #tpu.memory_space<vmem>>, vector<1x640xf32>
    %14 = vector.broadcast %13 : vector<1x640xf32> to vector<256x640xf32>
    %15 = arith.addf %12, %14 : vector<256x640xf32>
    %16 = math.tanh %15 : vector<256x640xf32>
    %17 = arith.truncf %16 : vector<256x640xf32> to vector<256x640xbf16>
    %c0_7 = arith.constant 0 : index
    %c0_8 = arith.constant 0 : index
    %18 = vector.load %arg4[%c0_7, %c0_8] : memref<640x256xbf16, #tpu.memory_space<vmem>>, vector<640x256xbf16>
    %cst_9 = arith.constant dense<0.000000e+00> : vector<256x256xf32>
    %19 = tpu.matmul %17, %18, %cst_9 {dimension_numbers = #tpu.dot_dimension_numbers<[1], [0], [0], [1], [0, 0, 1, 1], [], []>} : vector<256x640xbf16>, vector<640x256xbf16>, vector<256x256xf32> -> vector<256x256xf32>
    %c0_10 = arith.constant 0 : index
    %c0_11 = arith.constant 0 : index
    %20 = vector.load %arg5[%c0_10, %c0_11] : memref<1x256xf32, #tpu.memory_space<vmem>>, vector<1x256xf32>
    %21 = vector.broadcast %20 : vector<1x256xf32> to vector<256x256xf32>
    %22 = arith.addf %19, %21 : vector<256x256xf32>
    %c0_12 = arith.constant 0 : index
    %c0_13 = arith.constant 0 : index
    %23 = vector.load %arg11[%c0_12, %c0_13] : memref<256x256xf32, #tpu.memory_space<vmem>>, vector<256x256xf32>
    tpu.vector_store %arg11[%c0_12, %c0_13], %22 {strides = array<i32>} : memref<256x256xf32, #tpu.memory_space<vmem>>, vector<256x256xf32>,
    %24 = vector.extract_strided_slice %22 {offsets = [0, 0], sizes = [256, 128], strides = [1, 1]} : vector<256x256xf32> to vector<256x128xf32>
    %25 = arith.truncf %24 : vector<256x128xf32> to vector<256x128xbf16>
    %c0_14 = arith.constant 0 : index
    %c0_15 = arith.constant 0 : index
    %26 = vector.load %arg6[%c0_14, %c0_15] : memref<128x640xbf16, #tpu.memory_space<vmem>>, vector<128x640xbf16>
    %cst_16 = arith.constant dense<0.000000e+00> : vector<256x640xf32>
    %27 = tpu.matmul %25, %26, %cst_16 {dimension_numbers = #tpu.dot_dimension_numbers<[1], [0], [0], [1], [0, 0, 1, 1], [], []>} : vector<256x128xbf16>, vector<128x640xbf16>, vector<256x640xf32> -> vector<256x640xf32>
    %c0_17 = arith.constant 0 : index
    %c0_18 = arith.constant 0 : index
    %28 = vector.load %arg7[%c0_17, %c0_18] : memref<1x640xf32, #tpu.memory_space<vmem>>, vector<1x640xf32>
    %29 = vector.broadcast %28 : vector<1x640xf32> to vector<256x640xf32>
    %30 = arith.addf %27, %29 : vector<256x640xf32>
    %31 = math.tanh %30 : vector<256x640xf32>
    %32 = arith.truncf %31 : vector<256x640xf32> to vector<256x640xbf16>
    %c0_19 = arith.constant 0 : index
    %c0_20 = arith.constant 0 : index
    %33 = vector.load %arg8[%c0_19, %c0_20] : memref<640x256xbf16, #tpu.memory_space<vmem>>, vector<640x256xbf16>
    %cst_21 = arith.constant dense<0.000000e+00> : vector<256x256xf32>
    %34 = tpu.matmul %32, %33, %cst_21 {dimension_numbers = #tpu.dot_dimension_numbers<[1], [0], [0], [1], [0, 0, 1, 1], [], []>} : vector<256x640xbf16>, vector<640x256xbf16>, vector<256x256xf32> -> vector<256x256xf32>
    %c0_22 = arith.constant 0 : index
    %c0_23 = arith.constant 0 : index
    %35 = vector.load %arg9[%c0_22, %c0_23] : memref<1x256xf32, #tpu.memory_space<vmem>>, vector<1x256xf32>
    %36 = vector.broadcast %35 : vector<1x256xf32> to vector<256x256xf32>
    %37 = arith.addf %34, %36 : vector<256x256xf32>
    %38 = arith.truncf %37 : vector<256x256xf32> to vector<256x256xbf16>
    %c0_24 = arith.constant 0 : index
    %c0_25 = arith.constant 0 : index
    %39 = vector.load %arg10[%c0_24, %c0_25] : memref<256x256xbf16, #tpu.memory_space<vmem>>, vector<256x256xbf16>
    tpu.vector_store %arg10[%c0_24, %c0_25], %38 {strides = array<i32>} : memref<256x256xbf16, #tpu.memory_space<vmem>>, vector<256x256xbf16>,
    return
  }
  func.func @transform_0(%arg0: i32) -> (i32, i32) {
    %c0_i32 = arith.constant 0 : i32
    %c0_i32_0 = arith.constant 0 : i32
    return %arg0, %c0_i32 : i32, i32
  }
  func.func @transform_1(%arg0: i32) -> (i32, i32) {
    %c0_i32 = arith.constant 0 : i32
    %c0_i32_0 = arith.constant 0 : i32
    %c0_i32_1 = arith.constant 0 : i32
    return %c0_i32, %c0_i32_0 : i32, i32
  }
  func.func @transform_2(%arg0: i32) -> (i32, i32) {
    %c0_i32 = arith.constant 0 : i32
    %c0_i32_0 = arith.constant 0 : i32
    %c0_i32_1 = arith.constant 0 : i32
    return %c0_i32, %c0_i32_0 : i32, i32
  }
  func.func @transform_3(%arg0: i32) -> (i32, i32) {
    %c0_i32 = arith.constant 0 : i32
    %c0_i32_0 = arith.constant 0 : i32
    %c0_i32_1 = arith.constant 0 : i32
    return %c0_i32, %c0_i32_0 : i32, i32
  }
  func.func @transform_4(%arg0: i32) -> (i32, i32) {
    %c0_i32 = arith.constant 0 : i32
    %c0_i32_0 = arith.constant 0 : i32
    %c0_i32_1 = arith.constant 0 : i32
    return %c0_i32, %c0_i32_0 : i32, i32
  }
  func.func @transform_5(%arg0: i32) -> (i32, i32) {
    %c0_i32 = arith.constant 0 : i32
    %c0_i32_0 = arith.constant 0 : i32
    %c0_i32_1 = arith.constant 0 : i32
    return %c0_i32, %c0_i32_0 : i32, i32
  }
  func.func @transform_6(%arg0: i32) -> (i32, i32) {
    %c0_i32 = arith.constant 0 : i32
    %c0_i32_0 = arith.constant 0 : i32
    %c0_i32_1 = arith.constant 0 : i32
    return %c0_i32, %c0_i32_0 : i32, i32
  }
  func.func @transform_7(%arg0: i32) -> (i32, i32) {
    %c0_i32 = arith.constant 0 : i32
    %c0_i32_0 = arith.constant 0 : i32
    %c0_i32_1 = arith.constant 0 : i32
    return %c0_i32, %c0_i32_0 : i32, i32
  }
  func.func @transform_8(%arg0: i32) -> (i32, i32) {
    %c0_i32 = arith.constant 0 : i32
    %c0_i32_0 = arith.constant 0 : i32
    %c0_i32_1 = arith.constant 0 : i32
    return %c0_i32, %c0_i32_0 : i32, i32
  }
  func.func @transform_9(%arg0: i32) -> (i32, i32) {
    %c0_i32 = arith.constant 0 : i32
    %c0_i32_0 = arith.constant 0 : i32
    return %arg0, %c0_i32 : i32, i32
  }
  func.func @transform_10(%arg0: i32) -> (i32, i32) {
    %c0_i32 = arith.constant 0 : i32
    %c0_i32_0 = arith.constant 0 : i32
    return %arg0, %c0_i32 : i32, i32
  }
}

</mosaic_0001>

<bundles_post_ra>
// kernel: tpu_custom_call.1
= control target key start
LH: loop header
LB: loop body
LE: loop exit
PB: predicated region body
PF: predicated region fallthrough
CT: control target
= control target key end

     0   :  { %16 = vsyncpa [#allocation3], 0  ;;  %s9215_s0 = inlined_call_operand.hbm [shape: bf16[256,256], index: 0, kind: input, shape index: {}]   ;;  %s9216_s1 = inlined_call_operand.hbm [shape: bf16[256,640], index: 1, kind: input, shape index: {}]   ;;  %s9217_s2 = inlined_call_operand.vmem [shape: f32[1,640], index: 2, kind: input, shape index: {}]   ;;  %s9218_s3 = inlined_call_operand.hbm [shape: bf16[640,256], index: 3, kind: input, shape index: {}]   ;;  %s9219_s4 = inlined_call_operand.vmem [shape: f32[1,256], index: 4, kind: input, shape index: {}]   ;;  %s9220_s5 = inlined_call_operand.hbm [shape: bf16[128,640], index: 5, kind: input, shape index: {}]   ;;  %s9221_s6 = inlined_call_operand.vmem [shape: f32[1,640], index: 6, kind: input, shape index: {}]   ;;  %s9222_s7 = inlined_call_operand.hbm [shape: bf16[640,256], index: 7, kind: input, shape index: {}]   ;;  %s9223_s8 = inlined_call_operand.vmem [shape: f32[1,256], index: 8, kind: input, shape index: {}]   ;;  %s9224_s9 = inlined_call_operand.hbm [shape: bf16[256,256], index: 9, kind: output, shape index: {0}]   ;;  %s9225_s10 = inlined_call_operand.hbm [shape: f32[256,256], index: 10, kind: output, shape index: {1}]  }
   0x1   :  { %17 = vsyncpa [#allocation6], 0 }
   0x2   :  { %18 = vsyncpa [#allocation9], 0 }
   0x3   :  { %19 = vsyncpa [#allocation4], 0 }
   0x4   :  { %20 = vsyncpa [#allocation13], 0  ;;  %s7634_s13 = smov [#allocation5]   ;;  %s7470_s17 = scalar_lea.hbm %s9216_s1, 10240 }
   0x5   :  { %s38_s14 = sshll.u32 %s7634_s13, 4  ;;  %p7471_p0 = scmp.ne.s32.totalorder %s9216_s1, %s7470_s17  ;;  %s39_s14 = int_to_ptr.vmem [resolvable:$true] %s38_s14 }
   0x6   :  { %p7474_p1 = scmp.lt.u32.totalorder %s7470_s17, %s9216_s1 }
   0x8   :  { %p7476_p2 = pnand %p7474_p1, %p7471_p0 }
   0xa   :  { %7479 = shalt.err (!%p7476_p2)
}
   0xb   :  { %s7480_s22 = scalar_lea.vmem %s39_s14, 10240  ;;  %p7485_p4 = scmp.lt.s32.totalorder %s39_s14, %s39_s14 }
   0xc   :  { %p7481_p3 = scmp.ne.s32.totalorder %s39_s14, %s7480_s22  ;;  %p7486_p5 = scmp.lt.s32.totalorder %s7480_s22, %s7480_s22 }
   0xe   :  { %p7487_p6 = por %p7486_p5, %p7485_p4 }
  0x10   :  { %p7488_p7 = pnand %p7487_p6, %p7481_p3 }
  0x12   :  { %7491 = shalt.err (!%p7488_p7)
}
  0x13   :  { %s7635_s23 = smov 320   ;;  %s7636_s24 = smov 20  }
  0x14   :  { %44 = dma.hbm_to_vmem [thread:$0]  %s9216_s1, 10240, %s39_s14, [#allocation6], %s7635_s23, %s7635_s23, %s7636_s24  }
  0x15   :  { %s7637_s27 = smov [#allocation8]   ;;  %s7638_s29 = smov [#allocation2]  }
  0x16   :  { %s66_s28 = sshll.u32 %s7637_s27, 4  ;;  %s26_s30 = sshll.u32 %s7638_s29, 4  ;;  %s67_s28 = int_to_ptr.vmem [resolvable:$true] %s66_s28  ;;  %s27_s30 = int_to_ptr.vmem [resolvable:$true] %s26_s30 }
  0x17   :  { %s7492_s13 = scalar_lea.hbm %s9220_s5, 5120 }
  0x18   :  { %p7493_p8 = scmp.ne.s32.totalorder %s9220_s5, %s7492_s13  ;;  %p7496_p9 = scmp.lt.u32.totalorder %s7492_s13, %s9220_s5 }
  0x1a   :  { %p7498_p10 = pnand %p7496_p9, %p7493_p8 }
  0x1c   :  { %7501 = shalt.err (!%p7498_p10)
}
  0x1d   :  { %s7502_s1 = scalar_lea.vmem %s67_s28, 5120  ;;  %p7507_p12 = scmp.lt.s32.totalorder %s67_s28, %s67_s28 }
  0x1e   :  { %p7503_p11 = scmp.ne.s32.totalorder %s67_s28, %s7502_s1  ;;  %p7508_p13 = scmp.lt.s32.totalorder %s7502_s1, %s7502_s1 }
  0x20   :  { %p7509_p0 = por %p7508_p13, %p7507_p12 }
  0x22   :  { %p7510_p1 = pnand %p7509_p0, %p7503_p11 }
  0x24   :  { %7513 = shalt.err (!%p7510_p1)
}
  0x25   :  { %72 = dma.hbm_to_vmem [thread:$0]  %s9220_s5, 5120, %s67_s28, [#allocation9], %s7635_s23, %s7635_s23, %s7636_s24  }
  0x26   :  { %s7514_s22 = scalar_lea.hbm %s9215_s0, 4096 }
  0x27   :  { %p7515_p2 = scmp.ne.s32.totalorder %s9215_s0, %s7514_s22  ;;  %p7518_p3 = scmp.lt.u32.totalorder %s7514_s22, %s9215_s0 }
  0x29   :  { %p7520_p4 = pnand %p7518_p3, %p7515_p2 }
  0x2b   :  { %7523 = shalt.err (!%p7520_p4)
}
  0x2c   :  { %s7524_s11 = scalar_lea.vmem %s27_s30, 4096  ;;  %p7529_p6 = scmp.lt.s32.totalorder %s27_s30, %s27_s30 }
  0x2d   :  { %p7525_p5 = scmp.ne.s32.totalorder %s27_s30, %s7524_s11  ;;  %p7530_p7 = scmp.lt.s32.totalorder %s7524_s11, %s7524_s11 }
  0x2f   :  { %p7531_p8 = por %p7530_p7, %p7529_p6 }
  0x31   :  { %p7532_p9 = pnand %p7531_p8, %p7525_p5 }
  0x33   :  { %7535 = shalt.err (!%p7532_p9)
}
  0x34   :  { %s7639_s5 = smov 128   ;;  %s7640_s23 = smov 8  }
  0x35   :  { %32 = dma.hbm_to_vmem [thread:$0]  %s9215_s0, 4096, %s27_s30, [#allocation3], %s7639_s5, %s7639_s5, %s7640_s23  }
  0x36   :  { %s7641_s12 = smov [#allocation7]   ;;  %s7642_s15 = smov [#allocation10]  }
  0x37   :  { %s52_s13 = sshll.u32 %s7641_s12, 4  ;;  %s80_s16 = sshll.u32 %s7642_s15, 4  ;;  %s53_s13 = int_to_ptr.vmem [resolvable:$true] %s52_s13  ;;  %s81_s16 = int_to_ptr.vmem [resolvable:$true] %s80_s16 }
  0x38   :  { %s7536_s1 = scalar_lea.hbm %s9218_s3, 10240 }
  0x39   :  { %p7537_p10 = scmp.ne.s32.totalorder %s9218_s3, %s7536_s1  ;;  %p7540_p11 = scmp.lt.u32.totalorder %s7536_s1, %s9218_s3 }
  0x3b   :  { %p7542_p12 = pnand %p7540_p11, %p7537_p10 }
  0x3d   :  { %7545 = shalt.err (!%p7542_p12)
}
  0x3e   :  { %s7546_s0 = scalar_lea.vmem %s53_s13, 10240  ;;  %p7551_p0 = scmp.lt.s32.totalorder %s53_s13, %s53_s13 }
  0x3f   :  { %p7547_p13 = scmp.ne.s32.totalorder %s53_s13, %s7546_s0  ;;  %p7552_p1 = scmp.lt.s32.totalorder %s7546_s0, %s7546_s0 }
  0x41   :  { %p7553_p2 = por %p7552_p1, %p7551_p0 }
  0x43   :  { %p7554_p3 = pnand %p7553_p2, %p7547_p13 }
  0x45   :  { %7557 = shalt.err (!%p7554_p3)
}
  0x46   :  { %58 = dma.hbm_to_vmem [thread:$0]  %s9218_s3, 10240, %s53_s13, [#allocation6], %s7639_s5, %s7639_s5, %s7640_s23  }
  0x47   :  { %s7558_s27 = scalar_lea.hbm %s9222_s7, 10240 }
  0x48   :  { %p7559_p4 = scmp.ne.s32.totalorder %s9222_s7, %s7558_s27  ;;  %p7562_p5 = scmp.lt.u32.totalorder %s7558_s27, %s9222_s7 }
  0x4a   :  { %p7564_p6 = pnand %p7562_p5, %p7559_p4 }
  0x4c   :  { %7567 = shalt.err (!%p7564_p6)
}
  0x4d   :  { %s7568_s12 = scalar_lea.vmem %s81_s16, 10240  ;;  %p7573_p8 = scmp.lt.s32.totalorder %s81_s16, %s81_s16 }
  0x4e   :  { %p7569_p7 = scmp.ne.s32.totalorder %s81_s16, %s7568_s12  ;;  %p7574_p9 = scmp.lt.s32.totalorder %s7568_s12, %s7568_s12 }
  0x50   :  { %p7575_p10 = por %p7574_p9, %p7573_p8 }
  0x52   :  { %p7576_p11 = pnand %p7575_p10, %p7569_p7 }
  0x54   :  { %7579 = shalt.err (!%p7576_p11)
}
  0x55   :  { %86 = dma.hbm_to_vmem [thread:$0]  %s9222_s7, 10240, %s81_s16, [#allocation9], %s7639_s5, %s7639_s5, %s7640_s23  }
  0x56   :  { %7624 = dma.done.wait [#allocation3], 4096  }
  0x57   :  { %7625 = vsyncadd [#allocation3], 4294963200 }
  0x58   :  { %7626 = dma.done.wait [#allocation6], 20480  }
  0x59   :  { %7627 = vsyncadd [#allocation6], 4294946816 }
  0x5a   :  { %7628 = dma.done.wait [#allocation9], 15360  }
  0x5b   :  { %7629 = vsyncadd [#allocation9], 4294951936  ;;  %v105_v0 = vld [vmem:[#allocation2] sm:$0xff]  ;;  %v107_v1 = vld [vmem:[#allocation2 + $0x10] sm:$0xff]  ;;  %s7644_s21 = smov [#allocation12]  }
  0x5c   :  { %v106_v2 = vld [vmem:[#allocation2 + $0x8] sm:$0xff]  ;;  %v7772_v3 = vunpack.c.l.bf16 %v105_v0  ;;  %v7774_v4 = vunpack.c.h.bf16 %v105_v0  ;;  %v7776_v5 = vunpack.c.l.bf16 %v107_v1  ;;  %v7778_v6 = vunpack.c.h.bf16 %v107_v1  ;;  %v108_v7 = vld [vmem:[#allocation2 + $0x18] sm:$0xff]  ;;  %v109_v17 = vld [vmem:[#allocation2 + $0x20] sm:$0xff]  ;;  %s5380_s0 = sshll.u32 %s7644_s21, 4  ;;  %s5381_s0 = int_to_ptr.vmem [resolvable:$true] %s5380_s0 }
  0x5d   :  { %v7780_v8 = vunpack.c.l.bf16 %v106_v2  ;;  %v7782_v9 = vunpack.c.h.bf16 %v106_v2  ;;  %v7784_v10 = vunpack.c.l.bf16 %v108_v7  ;;  %v7786_v11 = vunpack.c.h.bf16 %v108_v7  ;;  %v110_v12 = vld [vmem:[#allocation2 + $0x28] sm:$0xff]  ;;  %v112_v22 = vld [vmem:[#allocation2 + $0x38] sm:$0xff]  ;;  %v111_v27 = vld [vmem:[#allocation2 + $0x30] sm:$0xff]  ;;  %s7580_s30 = scalar_lea.vmem %s5381_s0, 8192  ;;  %p7585_p13 = scmp.lt.s32.totalorder %s5381_s0, %s5381_s0 }
  0x5e   :  { %v201_v13 = vmul.f32 %v7772_v3, %v7772_v3  ;;  %v202_v14 = vmul.f32 %v7774_v4, %v7774_v4  ;;  %v205_v15 = vmul.f32 %v7776_v5, %v7776_v5  ;;  %v206_v16 = vmul.f32 %v7778_v6, %v7778_v6  ;;  %v114_v32 = vld [vmem:[#allocation2 + $0x48] sm:$0xff]  ;;  %v113_v37 = vld [vmem:[#allocation2 + $0x40] sm:$0xff]  ;;  %v116_v46 = vld [vmem:[#allocation2 + $0x58] sm:$0xff]  ;;  %p7581_p12 = scmp.ne.s32.totalorder %s5381_s0, %s7580_s30  ;;  %p7586_p0 = scmp.lt.s32.totalorder %s7580_s30, %s7580_s30 }
  0x5f   :  { %v203_v18 = vmul.f32 %v7780_v8, %v7780_v8  ;;  %v204_v19 = vmul.f32 %v7782_v9, %v7782_v9  ;;  %v207_v20 = vmul.f32 %v7784_v10, %v7784_v10  ;;  %v208_v21 = vmul.f32 %v7786_v11, %v7786_v11  ;;  %v6356_v42 = vld [vmem:[#allocation5 + $0x4] ss:$20 sps:$4 sm:$0xff]   ;;  %v6358_v47 = vld [vmem:[#allocation5] ss:$20 sps:$4 sm:$0xff]   ;;  %v6361_v57 = vld [vmem:[#allocation5 + $0x28] ss:$20 sps:$4 sm:$0xff]  }
  0x60   :  { %v265_v23 = vadd.f32 %v202_v14, %v201_v13  ;;  %v271_v24 = vadd.f32 %v206_v16, %v205_v15  ;;  %v7804_v25 = vunpack.c.l.bf16 %v110_v12  ;;  %v7806_v26 = vunpack.c.h.bf16 %v110_v12  ;;  %1060 = vmatprep.subr.bf16.mxu0 %v6356_v42  ;;  %v6359_v51 = vld [vmem:[#allocation5 + $0x2c] ss:$20 sps:$4 sm:$0xff]   ;;  %v115_v56 = vld [vmem:[#allocation2 + $0x50] sm:$0xff]  ;;  %v6368_v42 = vld [vmem:[#allocation5 + $0xa4] ss:$20 sps:$4 sm:$0xff]   ;;  %p7587_p1 = por %p7586_p0, %p7585_p13 }
  0x61   :  { %v268_v28 = vadd.f32 %v204_v19, %v203_v18  ;;  %v274_v29 = vadd.f32 %v208_v21, %v207_v20  ;;  %v7808_v30 = vunpack.c.l.bf16 %v109_v17  ;;  %v7810_v31 = vunpack.c.h.bf16 %v109_v17  ;;  %1061 = vmatpush1.bf16.msra.mxu0 %v6358_v47  ;;  %v6362_v61 = vld [vmem:[#allocation5 + $0x54] ss:$20 sps:$4 sm:$0xff]   ;;  %v117_v14 = vld [vmem:[#allocation2 + $0x60] sm:$0xff]  ;;  %v6365_v18 = vld [vmem:[#allocation5 + $0x7c] ss:$20 sps:$4 sm:$0xff]  }
  0x62   :  { %266 = vadd.xlane.f32.xlu0 %v265_v23  ;;  %272 = vadd.xlane.f32.xlu1 %v271_v24  ;;  %v211_v33 = vmul.f32 %v7804_v25, %v7804_v25  ;;  %v212_v34 = vmul.f32 %v7806_v26, %v7806_v26  ;;  %v7816_v35 = vunpack.c.l.bf16 %v112_v22  ;;  %v7818_v36 = vunpack.c.h.bf16 %v112_v22  ;;  %v118_v2 = vld [vmem:[#allocation2 + $0x68] sm:$0xff]  ;;  %v6364_v15 = vld [vmem:[#allocation5 + $0x50] ss:$20 sps:$4 sm:$0xff]   ;;  %v120_v23 = vld [vmem:[#allocation2 + $0x78] sm:$0xff]  ;;  %p7588_p2 = pnand %p7587_p1, %p7581_p12 }
  0x63   :  { %v209_v38 = vmul.f32 %v7808_v30, %v7808_v30  ;;  %v210_v39 = vmul.f32 %v7810_v31, %v7810_v31  ;;  %v7824_v40 = vunpack.c.l.bf16 %v111_v27  ;;  %v7826_v41 = vunpack.c.h.bf16 %v111_v27  ;;  %1062 = vmatprep.subr.bf16.mxu0 %v6359_v51  ;;  %v121_v51 = vld [vmem:[#allocation2 + $0x80] sm:$0xff] }
  0x64   :  { %v215_v43 = vmul.f32 %v7816_v35, %v7816_v35  ;;  %v216_v44 = vmul.f32 %v7818_v36, %v7818_v36  ;;  %v7832_v45 = vunpack.c.l.bf16 %v114_v32  ;;  %v280_v48 = vadd.f32 %v212_v34, %v211_v33  ;;  %v6367_v33 = vld [vmem:[#allocation5 + $0x78] ss:$20 sps:$4 sm:$0xff]  }
  0x65   :  { %v213_v49 = vmul.f32 %v7824_v40, %v7824_v40  ;;  %v214_v50 = vmul.f32 %v7826_v41, %v7826_v41  ;;  %v277_v52 = vadd.f32 %v210_v39, %v209_v38  ;;  %v7838_v53 = vunpack.c.h.bf16 %v114_v32  ;;  %1063 = vmatpush1.bf16.msra.mxu0 %v6361_v57  ;;  %v119_v32 = vld [vmem:[#allocation2 + $0x70] sm:$0xff] }
  0x66   :  { %269 = vadd.xlane.f32.xlu0 %v268_v28  ;;  %275 = vadd.xlane.f32.xlu1 %v274_v29  ;;  %v7840_v54 = vunpack.c.l.bf16 %v113_v37  ;;  %v7842_v55 = vunpack.c.h.bf16 %v113_v37  ;;  %v286_v58 = vadd.f32 %v216_v44, %v215_v43  ;;  %v219_v60 = vmul.f32 %v7832_v45, %v7832_v45 }
  0x67   :  { %v283_v59 = vadd.f32 %v214_v50, %v213_v49  ;;  %v7846_v62 = vunpack.c.l.bf16 %v116_v46  ;;  %v7848_v63 = vunpack.c.h.bf16 %v116_v46  ;;  %v7850_v0 = vunpack.c.l.bf16 %v115_v56  ;;  %1064 = vmatprep.subr.bf16.mxu0 %v6362_v61  ;;  %v122_v50 = vld [vmem:[#allocation2 + $0x88] sm:$0xff] }
  0x68   :  { %v7852_v1 = vunpack.c.h.bf16 %v115_v56  ;;  %v220_v7 = vmul.f32 %v7838_v53, %v7838_v53  ;;  %v217_v12 = vmul.f32 %v7840_v54, %v7840_v54  ;;  %v218_v13 = vmul.f32 %v7842_v55, %v7842_v55 }
  0x69   :  { %v7860_v16 = vunpack.c.l.bf16 %v118_v2  ;;  %v7862_v17 = vunpack.c.h.bf16 %v118_v2  ;;  %v223_v19 = vmul.f32 %v7846_v62, %v7846_v62  ;;  %v224_v20 = vmul.f32 %v7848_v63, %v7848_v63  ;;  %1065 = vmatpush1.bf16.msra.mxu0 %v6364_v15 }
  0x6a   :  { %281 = vadd.xlane.f32.xlu1 %v280_v48  ;;  %278 = vadd.xlane.f32.xlu0 %v277_v52  ;;  %v221_v21 = vmul.f32 %v7850_v0, %v7850_v0  ;;  %v222_v22 = vmul.f32 %v7852_v1, %v7852_v1  ;;  %v292_v24 = vadd.f32 %v220_v7, %v219_v60  ;;  %v7872_v28 = vunpack.c.l.bf16 %v117_v14  ;;  %v6370_v52 = vld [vmem:[#allocation5 + $0xa0] ss:$20 sps:$4 sm:$0xff]  }
  0x6b   :  { %v289_v27 = vadd.f32 %v218_v13, %v217_v12  ;;  %v7874_v29 = vunpack.c.h.bf16 %v117_v14  ;;  %v227_v34 = vmul.f32 %v7860_v16, %v7860_v16  ;;  %v228_v37 = vmul.f32 %v7862_v17, %v7862_v17  ;;  %1066 = vmatprep.subr.bf16.mxu0 %v6365_v18  ;;  %v124_v12 = vld [vmem:[#allocation2 + $0x98] sm:$0xff]  ;;  %v123_v18 = vld [vmem:[#allocation2 + $0x90] sm:$0xff] }
  0x6c   :  { %v7880_v38 = vunpack.c.l.bf16 %v120_v23  ;;  %v7882_v39 = vunpack.c.h.bf16 %v120_v23  ;;  %v298_v43 = vadd.f32 %v224_v20, %v223_v19  ;;  %v295_v44 = vadd.f32 %v222_v22, %v221_v21  ;;  %v6373_v19 = vld [vmem:[#allocation5 + $0xc8] ss:$20 sps:$4 sm:$0xff]  }
  0x6d   :  { %v225_v46 = vmul.f32 %v7872_v28, %v7872_v28  ;;  %v226_v47 = vmul.f32 %v7874_v29, %v7874_v29  ;;  %v7888_v48 = vunpack.c.l.bf16 %v119_v32  ;;  %v7890_v49 = vunpack.c.h.bf16 %v119_v32  ;;  %1067 = vmatpush1.bf16.msra.mxu0 %v6367_v33  ;;  %v6374_v22 = vld [vmem:[#allocation5 + $0xf4] ss:$20 sps:$4 sm:$0xff]  }
  0x6e   :  { %287 = vadd.xlane.f32.xlu1 %v286_v58  ;;  %284 = vadd.xlane.f32.xlu0 %v283_v59  ;;  %v304_v56 = vadd.f32 %v228_v37, %v227_v34  ;;  %v231_v57 = vmul.f32 %v7880_v38, %v7880_v38  ;;  %v232_v58 = vmul.f32 %v7882_v39, %v7882_v39  ;;  %v6371_v59 = vld [vmem:[#allocation5 + $0xcc] ss:$20 sps:$4 sm:$0xff]   ;;  %v7896_v60 = vunpack.c.l.bf16 %v122_v50 }
  0x6f   :  { %1068 = vmatprep.subr.bf16.mxu0 %v6368_v42  ;;  %v7898_v61 = vunpack.c.h.bf16 %v122_v50  ;;  %v7900_v2 = vunpack.c.l.bf16 %v121_v51  ;;  %v7902_v7 = vunpack.c.h.bf16 %v121_v51  ;;  %v301_v13 = vadd.f32 %v226_v47, %v225_v46  ;;  %v126_v33 = vld [vmem:[#allocation2 + $0xa8] sm:$0xff]  ;;  %v125_v34 = vld [vmem:[#allocation2 + $0xa0] sm:$0xff]  ;;  %v6377_v47 = vld [vmem:[#allocation5 + $0x11c] ss:$20 sps:$4 sm:$0xff]  }
  0x70   :  { %v229_v14 = vmul.f32 %v7888_v48, %v7888_v48  ;;  %v230_v15 = vmul.f32 %v7890_v49, %v7890_v49  ;;  %v7908_v20 = vunpack.c.l.bf16 %v124_v12  ;;  %v7910_v21 = vunpack.c.h.bf16 %v124_v12  ;;  %v6376_v46 = vld [vmem:[#allocation5 + $0xf0] ss:$20 sps:$4 sm:$0xff]   ;;  %v128_v50 = vld [vmem:[#allocation2 + $0xb8] sm:$0xff] }
  0x71   :  { %1069 = vmatpush1.bf16.msra.mxu0 %v6370_v52  ;;  %v235_v23 = vmul.f32 %v7896_v60, %v7896_v60  ;;  %v234_v32 = vmul.f32 %v7902_v7, %v7902_v7  ;;  %v310_v37 = vadd.f32 %v232_v58, %v231_v57  ;;  %v7928_v57 = vunpack.c.l.bf16 %v126_v33 }
  0x72   :  { %293 = vadd.xlane.f32.xlu1 %v292_v24  ;;  %290 = vadd.xlane.f32.xlu0 %v289_v27  ;;  %9282 = vst [vmem:[#allocation19_spill] sm:$0xff] %v7908_v20  ;;  %9283 = vst [vmem:[#allocation20_spill] sm:$0xff] %v7910_v21  ;;  %v236_v24 = vmul.f32 %v7898_v61, %v7898_v61  ;;  %v233_v27 = vmul.f32 %v7900_v2, %v7900_v2  ;;  %v7930_v58 = vunpack.c.h.bf16 %v126_v33 }
  0x73   :  { %1070 = vmatprep.subr.bf16.mxu0 %v6371_v59  ;;  %v307_v42 = vadd.f32 %v230_v15, %v229_v14  ;;  %v239_v51 = vmul.f32 %v7908_v20, %v7908_v20  ;;  %v240_v52 = vmul.f32 %v7910_v21, %v7910_v21  ;;  %v127_v59 = vld [vmem:[#allocation2 + $0xb0] sm:$0xff]  ;;  %9285 = vst [vmem:[#allocation22_spill] sm:$0xff] %v7928_v57 }
  0x74   :  { %v313_v12 = vadd.f32 %v234_v32, %v233_v27  ;;  %9286 = vst [vmem:[#allocation23_spill] sm:$0xff] %v7930_v58  ;;  %v7942_v27 = vunpack.c.h.bf16 %v128_v50  ;;  %v130_v32 = vld [vmem:[#allocation2 + $0xc8] sm:$0xff]  ;;  %v243_v33 = vmul.f32 %v7928_v57, %v7928_v57  ;;  %v7950_v20 = vunpack.c.h.bf16 %v127_v59 }
  0x75   :  { %1071 = vmatpush1.bf16.msra.mxu0 %v6373_v19  ;;  %v7938_v19 = vunpack.c.h.bf16 %v125_v34 }
  0x76   :  { %299 = vadd.xlane.f32.xlu1 %v298_v43  ;;  %296 = vadd.xlane.f32.xlu0 %v295_v44  ;;  %v7920_v43 = vunpack.c.l.bf16 %v123_v18  ;;  %v7922_v44 = vunpack.c.h.bf16 %v123_v18  ;;  %v7936_v18 = vunpack.c.l.bf16 %v125_v34  ;;  %9290 = vst [vmem:[#allocation27_spill] sm:$0xff] %v7942_v27  ;;  %9292 = vst [vmem:[#allocation29_spill] sm:$0xff] %v7950_v20  ;;  %v129_v34 = vld [vmem:[#allocation2 + $0xc0] sm:$0xff] }
  0x77   :  { %1072 = vmatprep.subr.bf16.mxu0 %v6374_v22  ;;  %9288 = vst [vmem:[#allocation25_spill] sm:$0xff] %v7938_v19  ;;  %v6380_v22 = vld [vmem:[#allocation5 + $0x144] ss:$20 sps:$4 sm:$0xff]  }
  0x78   :  { %9284 = vst [vmem:[#allocation21_spill] sm:$0xff] %v7920_v43  ;;  %v237_v14 = vmul.f32 %v7920_v43, %v7920_v43  ;;  %v238_v15 = vmul.f32 %v7922_v44, %v7922_v44  ;;  %9287 = vst [vmem:[#allocation24_spill] sm:$0xff] %v7936_v18  ;;  %v6382_v43 = vld [vmem:[#allocation5 + $0x140] ss:$20 sps:$4 sm:$0xff]  }
  0x79   :  { %1073 = vmatpush1.bf16.msra.mxu0 %v6376_v46 }
  0x7a   :  { %305 = vadd.xlane.f32.xlu1 %v304_v56  ;;  %302 = vadd.xlane.f32.xlu0 %v301_v13  ;;  %v316_v56 = vadd.f32 %v236_v24, %v235_v23  ;;  %v6379_v13 = vld [vmem:[#allocation5 + $0x118] ss:$20 sps:$4 sm:$0xff]   ;;  %v322_v23 = vadd.f32 %v240_v52, %v239_v51  ;;  %v7940_v24 = vunpack.c.l.bf16 %v128_v50  ;;  %v319_v46 = vadd.f32 %v238_v15, %v237_v14 }
  0x7b   :  { %1074 = vmatprep.subr.bf16.mxu0 %v6377_v47  ;;  %v241_v50 = vmul.f32 %v7936_v18, %v7936_v18  ;;  %v242_v47 = vmul.f32 %v7938_v19, %v7938_v19  ;;  %v6383_v51 = vld [vmem:[#allocation5 + $0x16c] ss:$20 sps:$4 sm:$0xff]   ;;  %v7964_v14 = vunpack.c.l.bf16 %v130_v32  ;;  %v132_v15 = vld [vmem:[#allocation2 + $0xd8] sm:$0xff]  ;;  %v131_v18 = vld [vmem:[#allocation2 + $0xd0] sm:$0xff] }
  0x7c   :  { %9289 = vst [vmem:[#allocation26_spill] sm:$0xff] %v7940_v24  ;;  %v247_v52 = vmul.f32 %v7940_v24, %v7940_v24  ;;  %v7968_v24 = vunpack.c.l.bf16 %v129_v34  ;;  %v7972_v19 = vunpack.c.l.bf16 %v132_v15 }
  0x7d   :  { %1075 = vmatpush1.bf16.msra.mxu0 %v6379_v13  ;;  %9293 = vst [vmem:[#allocation30_spill] sm:$0xff] %v7964_v14  ;;  %v325_v13 = vadd.f32 %v242_v47, %v241_v50  ;;  %v6388_v50 = vld [vmem:[#allocation5 + $0x190] ss:$20 sps:$4 sm:$0xff]  }
  0x7e   :  { %311 = vadd.xlane.f32.xlu1 %v310_v37  ;;  %308 = vadd.xlane.f32.xlu0 %v307_v42  ;;  %v244_v37 = vmul.f32 %v7930_v58, %v7930_v58  ;;  %v7948_v42 = vunpack.c.l.bf16 %v127_v59  ;;  %v248_v59 = vmul.f32 %v7942_v27, %v7942_v27  ;;  %v7966_v58 = vunpack.c.h.bf16 %v130_v32  ;;  %9295 = vst [vmem:[#allocation32_spill] sm:$0xff] %v7968_v24 }
  0x7f   :  { %1076 = vmatprep.subr.bf16.mxu0 %v6380_v22  ;;  %v7970_v27 = vunpack.c.h.bf16 %v129_v34  ;;  %v134_v22 = vld [vmem:[#allocation2 + $0xe8] sm:$0xff]  ;;  %9297 = vst [vmem:[#allocation34_spill] sm:$0xff] %v7972_v19  ;;  %v7978_v32 = vunpack.c.l.bf16 %v131_v18  ;;  %v133_v34 = vld [vmem:[#allocation2 + $0xe0] sm:$0xff]  ;;  %v249_v47 = vmul.f32 %v7968_v24, %v7968_v24 }
  0x80   :  { %9291 = vst [vmem:[#allocation28_spill] sm:$0xff] %v7948_v42  ;;  %v328_v57 = vadd.f32 %v244_v37, %v243_v33  ;;  %9294 = vst [vmem:[#allocation31_spill] sm:$0xff] %v7966_v58  ;;  %v6385_v33 = vld [vmem:[#allocation5 + $0x168] ss:$20 sps:$4 sm:$0xff]   ;;  %v8000_v24 = vunpack.c.l.bf16 %v133_v34 }
  0x81   :  { %9296 = vst [vmem:[#allocation33_spill] sm:$0xff] %v7970_v27  ;;  %1077 = vmatpush1.bf16.msra.mxu0 %v6382_v43  ;;  %v6386_v37 = vld [vmem:[#allocation5 + $0x194] ss:$20 sps:$4 sm:$0xff]   ;;  %9299 = vst [vmem:[#allocation36_spill] sm:$0xff] %v7978_v32  ;;  %v252_v43 = vmul.f32 %v7966_v58, %v7966_v58  ;;  %v6391_v58 = vld [vmem:[#allocation5 + $0x1b8] ss:$20 sps:$4 sm:$0xff]  }
  0x82   :  { %317 = vadd.xlane.f32.xlu1 %v316_v56  ;;  %314 = vadd.xlane.f32.xlu0 %v313_v12  ;;  %v245_v56 = vmul.f32 %v7948_v42, %v7948_v42  ;;  %v246_v12 = vmul.f32 %v7950_v20, %v7950_v20  ;;  %v334_v42 = vadd.f32 %v248_v59, %v247_v52  ;;  %v7974_v20 = vunpack.c.h.bf16 %v132_v15  ;;  %v6389_v52 = vld [vmem:[#allocation5 + $0x1bc] ss:$20 sps:$4 sm:$0xff]  }
  0x83   :  { %1078 = vmatprep.subr.bf16.mxu0 %v6383_v51  ;;  %v250_v51 = vmul.f32 %v7970_v27, %v7970_v27  ;;  %v255_v59 = vmul.f32 %v7972_v19, %v7972_v19 }
  0x84   :  { %9298 = vst [vmem:[#allocation35_spill] sm:$0xff] %v7974_v20  ;;  %v331_v21 = vadd.f32 %v246_v12, %v245_v56  ;;  %v7992_v56 = vunpack.c.l.bf16 %v134_v22  ;;  %v253_v12 = vmul.f32 %v7978_v32, %v7978_v32 }
  0x85   :  { %1079 = vmatpush1.bf16.msra.mxu0 %v6385_v33  ;;  %v337_v19 = vadd.f32 %v250_v51, %v249_v47  ;;  %v6395_v51 = vld [vmem:[#allocation5 + $0x20c] ss:$20 sps:$4 sm:$0xff]  }
  0x86   :  { %323 = vadd.xlane.f32.xlu1 %v322_v23  ;;  %320 = vadd.xlane.f32.xlu0 %v319_v46  ;;  %v251_v23 = vmul.f32 %v7964_v14, %v7964_v14  ;;  %v7980_v46 = vunpack.c.h.bf16 %v131_v18  ;;  %v256_v18 = vmul.f32 %v7974_v20, %v7974_v20  ;;  %v135_v14 = vld [vmem:[#allocation2 + $0xf0] sm:$0xff]  ;;  %v8002_v20 = vunpack.c.h.bf16 %v133_v34 }
  0x87   :  { %1080 = vmatprep.subr.bf16.mxu0 %v6386_v37  ;;  %v6392_v37 = vld [vmem:[#allocation5 + $0x1e4] ss:$20 sps:$4 sm:$0xff]   ;;  %v259_v32 = vmul.f32 %v7992_v56, %v7992_v56  ;;  %v257_v34 = vmul.f32 %v8000_v24, %v8000_v24  ;;  %v8018_v47 = vunpack.c.h.bf16 %v135_v14 }
  0x88   :  { %9300 = vst [vmem:[#allocation37_spill] sm:$0xff] %v7980_v46  ;;  %v254_v15 = vmul.f32 %v7980_v46, %v7980_v46  ;;  %v340_v33 = vadd.f32 %v252_v43, %v251_v23  ;;  %v346_v27 = vadd.f32 %v256_v18, %v255_v59  ;;  %v6394_v23 = vld [vmem:[#allocation5 + $0x1e0] ss:$20 sps:$4 sm:$0xff]   ;;  %v8016_v43 = vunpack.c.l.bf16 %v135_v14 }
  0x89   :  { %1081 = vmatpush1.bf16.msra.mxu0 %v6388_v50  ;;  %v258_v50 = vmul.f32 %v8002_v20, %v8002_v20  ;;  %v262_v14 = vmul.f32 %v8018_v47, %v8018_v47 }
  0x8a   :  { %329 = vadd.xlane.f32.xlu1 %v328_v57  ;;  %326 = vadd.xlane.f32.xlu0 %v325_v13  ;;  %v136_v57 = vld [vmem:[#allocation2 + $0xf8] sm:$0xff]  ;;  %v7998_v13 = vunpack.c.h.bf16 %v134_v22  ;;  %v343_v46 = vadd.f32 %v254_v15, %v253_v12 }
  0x8b   :  { %1082 = vmatprep.subr.bf16.mxu0 %v6389_v52  ;;  %v349_v18 = vadd.f32 %v258_v50, %v257_v34  ;;  %v6397_v12 = vld [vmem:[#allocation5 + $0x208] ss:$20 sps:$4 sm:$0xff]  }
  0x8c   :  { %v260_v22 = vmul.f32 %v7998_v13, %v7998_v13 }
  0x8d   :  { %1083 = vmatpush1.bf16.msra.mxu0 %v6391_v58  ;;  %v6398_v58 = vld [vmem:[#allocation5 + $0x234] ss:$20 sps:$4 sm:$0xff]  }
  0x8e   :  { %335 = vadd.xlane.f32.xlu1 %v334_v42  ;;  %332 = vadd.xlane.f32.xlu0 %v331_v21  ;;  %v8008_v42 = vunpack.c.l.bf16 %v136_v57  ;;  %v8010_v21 = vunpack.c.h.bf16 %v136_v57  ;;  %v352_v52 = vadd.f32 %v260_v22, %v259_v32  ;;  %v261_v57 = vmul.f32 %v8016_v43, %v8016_v43  ;;  %v6400_v32 = vld [vmem:[#allocation5 + $0x230] ss:$20 sps:$4 sm:$0xff]  }
  0x8f   :  { %1084 = vmatprep.subr.bf16.mxu0 %v6392_v37  ;;  %v6401_v37 = vld [vmem:[#allocation5 + $0x25c] ss:$20 sps:$4 sm:$0xff]  }
  0x90   :  { %v263_v59 = vmul.f32 %v8008_v42, %v8008_v42 }
  0x91   :  { %1085 = vmatpush1.bf16.msra.mxu0 %v6394_v23 }
  0x92   :  { %341 = vadd.xlane.f32.xlu1 %v340_v33  ;;  %338 = vadd.xlane.f32.xlu0 %v337_v19  ;;  %v264_v19 = vmul.f32 %v8010_v21, %v8010_v21  ;;  %v355_v33 = vadd.f32 %v262_v14, %v261_v57 }
  0x93   :  { %1086 = vmatprep.subr.bf16.mxu0 %v6395_v51 }
  0x94   :  { %v358_v15 = vadd.f32 %v264_v19, %v263_v59 }
  0x95   :  { %1087 = vmatpush1.bf16.msra.mxu0 %v6397_v12 }
  0x96   :  { %347 = vadd.xlane.f32.xlu1 %v346_v27  ;;  %344 = vadd.xlane.f32.xlu0 %v343_v46  ;;  %v6403_v27 = vld [vmem:[#allocation5 + $0x258] ss:$20 sps:$4 sm:$0xff]  }
  0x97   :  { %1088 = vmatprep.subr.bf16.mxu0 %v6398_v58  ;;  %v6406_v46 = vld [vmem:[#allocation5 + $0xc] ss:$20 sps:$4 sm:$0xff]  }
  0x99   :  { %1089 = vmatpush1.bf16.msra.mxu0 %v6400_v32 }
  0x9a   :  { %353 = vadd.xlane.f32.xlu1 %v352_v52  ;;  %350 = vadd.xlane.f32.xlu0 %v349_v18 }
  0x9b   :  { %1090 = vmatprep.subr.bf16.mxu0 %v6401_v37 }
  0x9d   :  { %1091 = vmatpush1.bf16.msra.mxu0 %v6403_v27 }
  0x9e   :  { %359 = vadd.xlane.f32.xlu1 %v358_v15  ;;  %356 = vadd.xlane.f32.xlu0 %v355_v33 }
  0x9f   :  { %1253 = vmatprep.subr.bf16.mxu0 %v6406_v46 }
  0xef   :  { %v267_v22 = vpop.xlane.xlu0 %266  ;;  %v273_v23 = vpop.xlane.xlu1 %272 }
  0xf0   :  { %v361_v34 = vmax.f32 %v267_v22, 1e-24  ;;  %v363_v50 = vmax.f32 %v273_v23, 1e-24 }
  0xf2   :  { %6764 = vrsqrt.f32 %v361_v34 }
  0xf3   :  { %6766 = vrsqrt.f32 %v363_v50  ;;  %v270_v51 = vpop.xlane.xlu0 %269  ;;  %v276_v52 = vpop.xlane.xlu1 %275 }
  0xf4   :  { %v362_v59 = vmax.f32 %v270_v51, 1e-24  ;;  %v364_v19 = vmax.f32 %v276_v52, 1e-24 }
  0xf6   :  { %6768 = vrsqrt.f32 %v362_v59 }
  0xf7   :  { %6770 = vrsqrt.f32 %v364_v19  ;;  %v282_v18 = vpop.xlane.xlu1 %281  ;;  %v279_v57 = vpop.xlane.xlu0 %278 }
  0xf8   :  { %v366_v14 = vmax.f32 %v282_v18, 1e-24  ;;  %v365_v12 = vmax.f32 %v279_v57, 1e-24  ;;  %v6404_v57 = vld [vmem:[#allocation5 + $0x8] ss:$20 sps:$4 sm:$0xff]  }
  0xfa   :  { %6772 = vrsqrt.f32 %v366_v14 }
  0xfb   :  { %6774 = vrsqrt.f32 %v365_v12  ;;  %v288_v58 = vpop.xlane.xlu1 %287  ;;  %v285_v32 = vpop.xlane.xlu0 %284 }
  0xfc   :  { %v6765_v15 = vpop.eup %6764  ;;  %v368_v37 = vmax.f32 %v288_v58, 1e-24  ;;  %v367_v27 = vmax.f32 %v285_v32, 1e-24  ;;  %v6409_v58 = vld [vmem:[#allocation5 + $0x34] ss:$20 sps:$4 sm:$0xff]  }
  0xfd   :  { %v6767_v33 = vpop.eup %6766  ;;  %v426_v22 = vmul.f32 %v6765_v15, %v7774_v4  ;;  %v425_v51 = vmul.f32 %v6765_v15, %v7772_v3 }
  0xfe   :  { %v430_v23 = vmul.f32 %v6767_v33, %v7778_v6  ;;  %6776 = vrsqrt.f32 %v368_v37  ;;  %v429_v37 = vmul.f32 %v6767_v33, %v7776_v5 }
  0xff   :  { %6778 = vrsqrt.f32 %v367_v27  ;;  %v294_v19 = vpop.xlane.xlu1 %293  ;;  %v291_v4 = vpop.xlane.xlu0 %290 }
 0x100   :  { %v6769_v46 = vpop.eup %6768  ;;  %v370_v3 = vmax.f32 %v294_v19, 1e-24 }
 0x101   :  { %v6771_v34 = vpop.eup %6770  ;;  %v428_v50 = vmul.f32 %v6769_v46, %v7782_v9  ;;  %v427_v52 = vmul.f32 %v6769_v46, %v7780_v8  ;;  %v369_v8 = vmax.f32 %v291_v4, 1e-24  ;;  %v6412_v46 = vld [vmem:[#allocation5 + $0x5c] ss:$20 sps:$4 sm:$0xff]   ;;  %v6413_v4 = vld [vmem:[#allocation5 + $0x80] ss:$20 sps:$4 sm:$0xff]  }
 0x102   :  { %v432_v59 = vmul.f32 %v6771_v34, %v7786_v11  ;;  %v6407_v11 = vld [vmem:[#allocation5 + $0x30] ss:$20 sps:$4 sm:$0xff]   ;;  %v431_v27 = vmul.f32 %v6771_v34, %v7784_v10  ;;  %6780 = vrsqrt.f32 %v370_v3 }
 0x103   :  { %v8034_v18 = vpack.c.bf16 %v428_v50, %v426_v22  ;;  %v8036_v14 = vpack.c.bf16 %v427_v52, %v425_v51  ;;  %6782 = vrsqrt.f32 %v369_v8  ;;  %v300_v22 = vpop.xlane.xlu1 %299  ;;  %v6410_v51 = vld [vmem:[#allocation5 + $0x58] ss:$20 sps:$4 sm:$0xff]   ;;  %v297_v52 = vpop.xlane.xlu0 %296 }
 0x104   :  { %v6773_v12 = vpop.eup %6772  ;;  %v8038_v6 = vpack.c.bf16 %v432_v59, %v430_v23  ;;  %v8049_v19 = vpack.c.bf16 %v431_v27, %v429_v37  ;;  %v371_v33 = vmax.f32 %v297_v52, 1e-24 }
 0x105   :  { %v6775_v9 = vpop.eup %6774  ;;  %1092 = vmatprep.mubr.bf16.mxu0 %v8034_v18  ;;  %v436_v15 = vmul.f32 %v6773_v12, %v7806_v26  ;;  %v6415_v26 = vld [vmem:[#allocation5 + $0x84] ss:$20 sps:$4 sm:$0xff]   ;;  %v435_v10 = vmul.f32 %v6773_v12, %v7804_v25  ;;  %v6416_v12 = vld [vmem:[#allocation5 + $0xa8] ss:$20 sps:$4 sm:$0xff]  }
 0x106   :  { %1093 = vmatmul.mubr.bf16.vlgmr.msra.gmra.mrb[0].mxu0 %v8036_v14  ;;  %v434_v32 = vmul.f32 %v6775_v9, %v7810_v31  ;;  %v372_v31 = vmax.f32 %v300_v22, 1e-24  ;;  %v433_v5 = vmul.f32 %v6775_v9, %v7808_v30  ;;  %v6419_v22 = vld [vmem:[#allocation5 + $0xd0] ss:$20 sps:$4 sm:$0xff]  }
 0x107   :  { %1254 = vmatpush1.bf16.msra.mxu0 %v6404_v57  ;;  %1102 = vmatprep.mubr.bf16.mxu0 %v8038_v6  ;;  %v306_v8 = vpop.xlane.xlu1 %305  ;;  %v303_v25 = vpop.xlane.xlu0 %302 }
 0x108   :  { %1255 = vmatprep.subr.bf16.mxu0 %v6409_v58  ;;  %v6777_v23 = vpop.eup %6776  ;;  %v8047_v50 = vpack.c.bf16 %v436_v15, %v434_v32  ;;  %v6418_v58 = vld [vmem:[#allocation5 + $0xac] ss:$20 sps:$4 sm:$0xff]   ;;  %6784 = vrsqrt.f32 %v372_v31  ;;  %v8057_v3 = vpack.c.bf16 %v435_v10, %v433_v5  ;;  %v6421_v32 = vld [vmem:[#allocation5 + $0xd4] ss:$20 sps:$4 sm:$0xff]   ;;  %v373_v37 = vmax.f32 %v303_v25, 1e-24 }
 0x109   :  { %v6779_v59 = vpop.eup %6778  ;;  %v440_v57 = vmul.f32 %v6777_v23, %v7818_v36  ;;  %6786 = vrsqrt.f32 %v371_v33  ;;  %v439_v15 = vmul.f32 %v6777_v23, %v7816_v35  ;;  %v6422_v23 = vld [vmem:[#allocation5 + $0xf8] ss:$20 sps:$4 sm:$0xff]  }
 0x10a   :  { %v438_v34 = vmul.f32 %v6779_v59, %v7826_v41  ;;  %v374_v41 = vmax.f32 %v306_v8, 1e-24  ;;  %v437_v36 = vmul.f32 %v6779_v59, %v7824_v40 }
 0x10b   :  { %1256 = vmatpush1.bf16.msra.mxu0 %v6407_v11  ;;  %v309_v35 = vpop.xlane.xlu0 %308 }
 0x10c   :  { %1257 = vmatprep.subr.bf16.mxu0 %v6412_v46  ;;  %v6781_v11 = vpop.eup %6780  ;;  %v8059_v30 = vpack.c.bf16 %v440_v57, %v438_v34  ;;  %6788 = vrsqrt.f32 %v374_v41  ;;  %v8067_v52 = vpack.c.bf16 %v439_v15, %v437_v36  ;;  %v375_v33 = vmax.f32 %v309_v35, 1e-24 }
 0x10d   :  { %v6783_v9 = vpop.eup %6782  ;;  %v444_v46 = vmul.f32 %v6781_v11, %v7838_v53  ;;  %6790 = vrsqrt.f32 %v373_v37  ;;  %v443_v10 = vmul.f32 %v6781_v11, %v7832_v45  ;;  %v6428_v11 = vld [vmem:[#allocation5 + $0x148] ss:$20 sps:$4 sm:$0xff]  }
 0x10e   :  { %1103 = vmatmul.mubr.bf16.gmra.mrb[4].mxu0 %v8049_v19  ;;  %v442_v27 = vmul.f32 %v6783_v9, %v7842_v55  ;;  %v6427_v55 = vld [vmem:[#allocation5 + $0x124] ss:$20 sps:$4 sm:$0xff]   ;;  %v441_v53 = vmul.f32 %v6783_v9, %v7840_v54 }
 0x10f   :  { %1112 = vmatprep.mubr.bf16.mxu0 %v8047_v50  ;;  %1258 = vmatpush1.bf16.msra.mxu0 %v6410_v51  ;;  %v6424_v51 = vld [vmem:[#allocation5 + $0xfc] ss:$20 sps:$4 sm:$0xff]   ;;  %v315_v45 = vpop.xlane.xlu0 %314 }
 0x110   :  { %1259 = vmatprep.subr.bf16.mxu0 %v6415_v26  ;;  %v312_v26 = vpop.xlane.xlu1 %311  ;;  %v8069_v40 = vpack.c.bf16 %v444_v46, %v442_v27  ;;  %v8077_v8 = vpack.c.bf16 %v443_v10, %v441_v53  ;;  %v377_v36 = vmax.f32 %v315_v45, 1e-24  ;;  %v6431_v27 = vld [vmem:[#allocation5 + $0x170] ss:$20 sps:$4 sm:$0xff]   ;;  %v6437_v10 = vld [vmem:[#allocation5 + $0x1c0] ss:$20 sps:$4 sm:$0xff]  }
 0x111   :  { %v376_v5 = vmax.f32 %v312_v26, 1e-24  ;;  %v6436_v46 = vld [vmem:[#allocation5 + $0x19c] ss:$20 sps:$4 sm:$0xff]  }
 0x112   :  { %v6785_v31 = vpop.eup %6784 }
 0x113   :  { %1260 = vmatpush1.bf16.msra.mxu0 %v6413_v4  ;;  %v6787_v59 = vpop.eup %6786  ;;  %v448_v57 = vmul.f32 %v6785_v31, %v7848_v63  ;;  %v6425_v4 = vld [vmem:[#allocation5 + $0x120] ss:$20 sps:$4 sm:$0xff]   ;;  %6792 = vrsqrt.f32 %v376_v5  ;;  %v447_v41 = vmul.f32 %v6785_v31, %v7846_v62  ;;  %v321_v62 = vpop.xlane.xlu0 %320  ;;  %v6434_v31 = vld [vmem:[#allocation5 + $0x198] ss:$20 sps:$4 sm:$0xff]  }
 0x114   :  { %1261 = vmatprep.subr.bf16.mxu0 %v6418_v58  ;;  %v446_v34 = vmul.f32 %v6787_v59, %v7852_v1  ;;  %v6430_v58 = vld [vmem:[#allocation5 + $0x14c] ss:$20 sps:$4 sm:$0xff]   ;;  %6794 = vrsqrt.f32 %v375_v33  ;;  %v318_v25 = vpop.xlane.xlu1 %317  ;;  %v6433_v1 = vld [vmem:[#allocation5 + $0x174] ss:$20 sps:$4 sm:$0xff]   ;;  %v445_v63 = vmul.f32 %v6787_v59, %v7850_v0 }
 0x115   :  { %v6442_v33 = vld [vmem:[#allocation5 + $0x1ec] ss:$20 sps:$4 sm:$0xff]  }
 0x116   :  { %1113 = vmatmul.mubr.bf16.gmra.mrb[8].mxu0 %v8057_v3  ;;  %v8079_v54 = vpack.c.bf16 %v448_v57, %v446_v34 }
 0x117   :  { %1122 = vmatprep.mubr.bf16.mxu0 %v8059_v30  ;;  %1262 = vmatpush1.bf16.msra.mxu0 %v6416_v12  ;;  %v6789_v12 = vpop.eup %6788 }
 0x118   :  { %1263 = vmatprep.subr.bf16.mxu0 %v6421_v32  ;;  %v6791_v9 = vpop.eup %6790  ;;  %v378_v32 = vmax.f32 %v318_v25, 1e-24  ;;  %v452_v37 = vmul.f32 %v6789_v12, %v7862_v17  ;;  %v451_v59 = vmul.f32 %v6789_v12, %v7860_v16  ;;  %v327_v16 = vpop.xlane.xlu0 %326 }
 0x119   :  { %v450_v15 = vmul.f32 %v6791_v9, %v7874_v29  ;;  %v6439_v29 = vld [vmem:[#allocation5 + $0x1c4] ss:$20 sps:$4 sm:$0xff]   ;;  %v449_v17 = vmul.f32 %v6791_v9, %v7872_v28 }
 0x11a   :  { %6796 = vrsqrt.f32 %v378_v32  ;;  %v6443_v32 = vld [vmem:[#allocation5 + $0x210] ss:$20 sps:$4 sm:$0xff]  }
 0x11b   :  { %1264 = vmatpush1.bf16.msra.mxu0 %v6419_v22  ;;  %v8087_v22 = vpack.c.bf16 %v447_v41, %v445_v63  ;;  %6798 = vrsqrt.f32 %v377_v36  ;;  %v8089_v0 = vpack.c.bf16 %v452_v37, %v450_v15  ;;  %v8097_v34 = vpack.c.bf16 %v451_v59, %v449_v17  ;;  %v6448_v63 = vld [vmem:[#allocation5 + $0x23c] ss:$20 sps:$4 sm:$0xff]   ;;  %v6446_v37 = vld [vmem:[#allocation5 + $0x238] ss:$20 sps:$4 sm:$0xff]  }
 0x11c   :  { %1265 = vmatprep.subr.bf16.mxu0 %v6424_v51  ;;  %v324_v51 = vpop.xlane.xlu1 %323 }
 0x11d   :  { %v6793_v26 = vpop.eup %6792 }
 0x11e   :  { %1123 = vmatmul.mubr.bf16.gmra.mrb[12].mxu0 %v8067_v52  ;;  %v6795_v35 = vpop.eup %6794  ;;  %v456_v53 = vmul.f32 %v6793_v26, %v7882_v39  ;;  %v455_v45 = vmul.f32 %v6793_v26, %v7880_v38  ;;  %v333_v38 = vpop.xlane.xlu0 %332 }
 0x11f   :  { %1132 = vmatprep.mubr.bf16.mxu0 %v8069_v40  ;;  %1266 = vmatpush1.bf16.msra.mxu0 %v6422_v23  ;;  %v380_v23 = vmax.f32 %v324_v51, 1e-24  ;;  %v454_v5 = vmul.f32 %v6795_v35, %v7890_v49  ;;  %v6445_v49 = vld [vmem:[#allocation5 + $0x214] ss:$20 sps:$4 sm:$0xff]   ;;  %v453_v39 = vmul.f32 %v6795_v35, %v7888_v48  ;;  %v383_v26 = vmax.f32 %v333_v38, 1e-24 }
 0x120   :  { %1267 = vmatprep.subr.bf16.mxu0 %v6427_v55  ;;  %v379_v55 = vmax.f32 %v321_v62, 1e-24  ;;  %v330_v57 = vpop.xlane.xlu1 %329 }
 0x121   :  { %6800 = vrsqrt.f32 %v380_v23  ;;  %v8099_v28 = vpack.c.bf16 %v456_v53, %v454_v5  ;;  %v382_v12 = vmax.f32 %v330_v57, 1e-24  ;;  %v8107_v41 = vpack.c.bf16 %v455_v45, %v453_v39  ;;  %v6452_v23 = vld [vmem:[#allocation5 + $0x150] ss:$20 sps:$4 sm:$0xff]  }
 0x122   :  { %6802 = vrsqrt.f32 %v379_v55 }
 0x123   :  { %1268 = vmatpush1.bf16.msra.mxu0 %v6425_v4  ;;  %6804 = vrsqrt.f32 %v382_v12  ;;  %v8127_v12 = vld [vmem:[#allocation7 + $0x4] ss:$8 sps:$4 sm:$0xff]  }
 0x124   :  { %1269 = vmatprep.subr.bf16.mxu0 %v6430_v58  ;;  %v6797_v4 = vpop.eup %6796  ;;  %v6440_v58 = vld [vmem:[#allocation5 + $0x1e8] ss:$20 sps:$4 sm:$0xff]   ;;  %v336_v36 = vpop.xlane.xlu1 %335  ;;  %5926 = vmatprep.subr.bf16.mxu1 %v8127_v12 }
 0x125   :  { %v6799_v25 = vpop.eup %6798  ;;  %v459_v51 = vmul.f32 %v6797_v4, %v7896_v60  ;;  %v339_v60 = vpop.xlane.xlu0 %338 }
 0x126   :  { %1133 = vmatmul.mubr.bf16.gmra.mrb[16].mxu0 %v8077_v8  ;;  %v458_v9 = vmul.f32 %v6799_v25, %v7902_v7  ;;  %v6451_v7 = vld [vmem:[#allocation5 + $0x264] ss:$20 sps:$4 sm:$0xff]  }
 0x127   :  { %1142 = vmatprep.mubr.bf16.mxu0 %v8079_v54  ;;  %1270 = vmatpush1.bf16.msra.mxu0 %v6428_v11  ;;  %v381_v11 = vmax.f32 %v327_v16, 1e-24  ;;  %v9304_v16 = vld [vmem:[#allocation25_spill] sm:$0xff] }
 0x128   :  { %1271 = vmatprep.subr.bf16.mxu0 %v6433_v1  ;;  %v460_v1 = vmul.f32 %v6797_v4, %v7898_v61  ;;  %v457_v61 = vmul.f32 %v6799_v25, %v7900_v2  ;;  %v342_v59 = vpop.xlane.xlu1 %341  ;;  %v385_v4 = vmax.f32 %v339_v60, 1e-24  ;;  %v9305_v25 = vld [vmem:[#allocation23_spill] sm:$0xff] }
 0x129   :  { %6806 = vrsqrt.f32 %v381_v11  ;;  %v386_v53 = vmax.f32 %v342_v59, 1e-24 }
 0x12a   :  { %v8109_v48 = vpack.c.bf16 %v460_v1, %v458_v9  ;;  %v8117_v17 = vpack.c.bf16 %v459_v51, %v457_v61  ;;  %v345_v1 = vpop.xlane.xlu0 %344  ;;  %v9309_v51 = vld [vmem:[#allocation27_spill] sm:$0xff] }
 0x12b   :  { %1272 = vmatpush1.bf16.msra.mxu0 %v6431_v27  ;;  %v6801_v15 = vpop.eup %6800 }
 0x12c   :  { %1273 = vmatprep.subr.bf16.mxu0 %v6436_v46  ;;  %v6803_v27 = vpop.eup %6802  ;;  %v384_v46 = vmax.f32 %v336_v36, 1e-24  ;;  %v348_v45 = vpop.xlane.xlu1 %347 }
 0x12d   :  { %v462_v62 = vmul.f32 %v6803_v27, %v7922_v44  ;;  %v6805_v55 = vpop.eup %6804  ;;  %v9302_v44 = vld [vmem:[#allocation21_spill] sm:$0xff]  ;;  %v388_v36 = vmax.f32 %v348_v45, 1e-24 }
 0x12e   :  { %1143 = vmatmul.mubr.bf16.gmra.mrb[20].mxu0 %v8087_v22  ;;  %6808 = vrsqrt.f32 %v384_v46  ;;  %v9308_v46 = vld [vmem:[#allocation29_spill] sm:$0xff]  ;;  %v351_v60 = vpop.xlane.xlu0 %350 }
 0x12f   :  { %1152 = vmatprep.mubr.bf16.mxu0 %v8089_v0  ;;  %1274 = vmatpush1.bf16.msra.mxu0 %v6434_v31  ;;  %v9301_v31 = vld [vmem:[#allocation20_spill] sm:$0xff]  ;;  %6810 = vrsqrt.f32 %v383_v26 }
 0x130   :  { %1275 = vmatprep.subr.bf16.mxu0 %v6439_v29  ;;  %v464_v35 = vmul.f32 %v6801_v15, %v9301_v31  ;;  %v6449_v29 = vld [vmem:[#allocation5 + $0x260] ss:$20 sps:$4 sm:$0xff]   ;;  %6812 = vrsqrt.f32 %v386_v53  ;;  %v8145_v31 = vld [vmem:[#allocation7 + $0x10] ss:$8 sps:$4 sm:$0xff]  }
 0x131   :  { %6814 = vrsqrt.f32 %v385_v4  ;;  %v8156_v53 = vld [vmem:[#allocation7 + $0x20] ss:$8 sps:$4 sm:$0xff]  }
 0x132   :  { %v8119_v2 = vpack.c.bf16 %v464_v35, %v462_v62  ;;  %v8143_v62 = vld [vmem:[#allocation7 + $0x14] ss:$8 sps:$4 sm:$0xff]   ;;  %v8147_v35 = vld [vmem:[#allocation7 + $0x24] ss:$8 sps:$4 sm:$0xff]   ;;  %6816 = vrsqrt.f32 %v388_v36  ;;  %v8167_v36 = vld [vmem:[#allocation7 + $0x30] ss:$8 sps:$4 sm:$0xff]  }
 0x133   :  { %1276 = vmatpush1.bf16.msra.mxu0 %v6437_v10  ;;  %v6807_v5 = vpop.eup %6806  ;;  %v461_v10 = vmul.f32 %v6803_v27, %v9302_v44 }
 0x134   :  { %1277 = vmatprep.subr.bf16.mxu0 %v6442_v33  ;;  %v9303_v33 = vld [vmem:[#allocation19_spill] sm:$0xff] }
 0x135   :  { %v463_v57 = vmul.f32 %v6801_v15, %v9303_v33  ;;  %v9306_v15 = vld [vmem:[#allocation24_spill] sm:$0xff] }
 0x136   :  { %1153 = vmatmul.mubr.bf16.gmra.mrb[24].mxu0 %v8097_v34  ;;  %v465_v38 = vmul.f32 %v6807_v5, %v9306_v15 }
 0x137   :  { %1162 = vmatprep.mubr.bf16.mxu0 %v8099_v28  ;;  %1278 = vmatpush1.bf16.msra.mxu0 %v6440_v58  ;;  %v466_v58 = vmul.f32 %v6807_v5, %v9304_v16  ;;  %v8130_v39 = vpack.c.bf16 %v463_v57, %v461_v10  ;;  %v9312_v10 = vld [vmem:[#allocation28_spill] sm:$0xff]  ;;  %v9313_v57 = vld [vmem:[#allocation26_spill] sm:$0xff]  ;;  %v389_v16 = vmax.f32 %v351_v60, 1e-24 }
 0x138   :  { %1279 = vmatprep.subr.bf16.mxu0 %v6445_v49  ;;  %v468_v49 = vmul.f32 %v6805_v55, %v9305_v25  ;;  %v6809_v11 = vpop.eup %6808 }
 0x139   :  { %v472_v26 = vmul.f32 %v6809_v11, %v9309_v51  ;;  %v471_v4 = vmul.f32 %v6809_v11, %v9313_v57  ;;  %v9318_v51 = vld [vmem:[#allocation32_spill] sm:$0xff]  ;;  %v9321_v57 = vld [vmem:[#allocation35_spill] sm:$0xff] }
 0x13a   :  { %v8132_v9 = vpack.c.bf16 %v468_v49, %v466_v58  ;;  %v9314_v58 = vld [vmem:[#allocation33_spill] sm:$0xff]  ;;  %v9315_v49 = vld [vmem:[#allocation31_spill] sm:$0xff] }
 0x13b   :  { %1280 = vmatpush1.bf16.msra.mxu0 %v6443_v32  ;;  %v6811_v32 = vpop.eup %6810 }
 0x13c   :  { %1281 = vmatprep.subr.bf16.mxu0 %v6448_v63  ;;  %v8134_v63 = vld [vmem:[#allocation7] ss:$8 sps:$4 sm:$0xff]   ;;  %v470_v61 = vmul.f32 %v6811_v32, %v9308_v46  ;;  %v6813_v59 = vpop.eup %6812  ;;  %v469_v33 = vmul.f32 %v6811_v32, %v9312_v10  ;;  %v9320_v10 = vld [vmem:[#allocation37_spill] sm:$0xff] }
 0x13d   :  { %5942 = vmatpush1.bf16.msra.mxu1 %v8134_v63  ;;  %v6815_v5 = vpop.eup %6814  ;;  %v476_v45 = vmul.f32 %v6813_v59, %v9315_v49  ;;  %v8177_v46 = vld [vmem:[#allocation7 + $0x40] ss:$8 sps:$4 sm:$0xff]   ;;  %v8197_v49 = vld [vmem:[#allocation7 + $0x64] ss:$8 sps:$4 sm:$0xff]  }
 0x13e   :  { %1163 = vmatmul.mubr.bf16.gmra.mrb[28].mxu0 %v8107_v41  ;;  %5927 = vmatprep.subr.bf16.mxu1 %v8143_v62  ;;  %v474_v25 = vmul.f32 %v6815_v5, %v9314_v58  ;;  %v8170_v15 = vpack.c.bf16 %v471_v4, %v469_v33  ;;  %v6817_v32 = vpop.eup %6816  ;;  %v8189_v58 = vld [vmem:[#allocation7 + $0x50] ss:$8 sps:$4 sm:$0xff]  }
 0x13f   :  { %1172 = vmatprep.mubr.bf16.mxu0 %v8109_v48  ;;  %1282 = vmatpush1.bf16.msra.mxu0 %v6446_v37  ;;  %v9307_v37 = vld [vmem:[#allocation22_spill] sm:$0xff]  ;;  %v480_v4 = vmul.f32 %v6817_v32, %v9321_v57  ;;  %v8219_v57 = vld [vmem:[#allocation7 + $0x84] ss:$8 sps:$4 sm:$0xff]  }
 0x140   :  { %1283 = vmatprep.subr.bf16.mxu0 %v6451_v7  ;;  %v467_v27 = vmul.f32 %v6805_v55, %v9307_v37  ;;  %v387_v7 = vmax.f32 %v345_v1, 1e-24  ;;  %v8153_v55 = vpack.c.bf16 %v472_v26, %v470_v61  ;;  %v8165_v1 = vld [vmem:[#allocation7 + $0x34] ss:$8 sps:$4 sm:$0xff]   ;;  %9316 = vst [vmem:[#allocation19_spill] sm:$0xff] %v8170_v15  ;;  %v357_v37 = vpop.xlane.xlu0 %356  ;;  %v473_v26 = vmul.f32 %v6815_v5, %v9318_v51 }
 0x141   :  { %5943 = vmatpush1.bf16.msra.mxu1 %v8145_v31  ;;  %v9325_v51 = vld [vmem:[#allocation34_spill] sm:$0xff] }
 0x142   :  { %6818 = vrsqrt.f32 %v387_v7  ;;  %9311 = vst [vmem:[#allocation21_spill] sm:$0xff] %v8153_v55  ;;  %5928 = vmatprep.subr.bf16.mxu1 %v8147_v35 }
 0x143   :  { %1284 = vmatpush1.bf16.msra.mxu0 %v6449_v29  ;;  %v8150_v29 = vpack.c.bf16 %v467_v27, %v465_v38  ;;  %v8173_v38 = vpack.c.bf16 %v476_v45, %v474_v25  ;;  %v8175_v27 = vld [vmem:[#allocation7 + $0x44] ss:$8 sps:$4 sm:$0xff]  }
 0x144   :  { %5742 = vmatprep.subr.bf16.mxu0 %v6452_v23  ;;  %v354_v23 = vpop.xlane.xlu1 %353 }
 0x145   :  { %9310 = vst [vmem:[#allocation20_spill] sm:$0xff] %v8150_v29  ;;  %v390_v44 = vmax.f32 %v354_v23, 1e-24  ;;  %5944 = vmatpush1.bf16.msra.mxu1 %v8156_v53  ;;  %9317 = vst [vmem:[#allocation25_spill] sm:$0xff] %v8173_v38  ;;  %v9319_v23 = vld [vmem:[#allocation30_spill] sm:$0xff] }
 0x146   :  { %1173 = vmatmul.mubr.bf16.gmra.mrb[32].mxu0 %v8117_v17  ;;  %5929 = vmatprep.subr.bf16.mxu1 %v8165_v1  ;;  %v475_v60 = vmul.f32 %v6813_v59, %v9319_v23 }
 0x147   :  { %1182 = vmatprep.mubr.bf16.mxu0 %v8119_v2  ;;  %6820 = vrsqrt.f32 %v390_v44  ;;  %v391_v44 = vmax.f32 %v357_v37, 1e-24  ;;  %v9324_v37 = vld [vmem:[#allocation36_spill] sm:$0xff] }
 0x148   :  { %6822 = vrsqrt.f32 %v389_v16  ;;  %v360_v11 = vpop.xlane.xlu1 %359  ;;  %v8187_v16 = vld [vmem:[#allocation7 + $0x54] ss:$8 sps:$4 sm:$0xff]   ;;  %v8192_v25 = vpack.c.bf16 %v475_v60, %v473_v26  ;;  %v479_v26 = vmul.f32 %v6817_v32, %v9325_v51 }
 0x149   :  { %5945 = vmatpush1.bf16.msra.mxu1 %v8167_v36  ;;  %v392_v61 = vmax.f32 %v360_v11, 1e-24  ;;  %v8199_v11 = vld [vmem:[#allocation7 + $0x60] ss:$8 sps:$4 sm:$0xff]  }
 0x14a   :  { %5930 = vmatprep.subr.bf16.mxu1 %v8175_v27  ;;  %9322 = vst [vmem:[#allocation23_spill] sm:$0xff] %v8192_v25 }
 0x14b   :  { %6824 = vrsqrt.f32 %v392_v61 }
 0x14c   :  { %v6819_v7 = vpop.eup %6818  ;;  %6826 = vrsqrt.f32 %v391_v44  ;;  %v8209_v44 = vld [vmem:[#allocation7 + $0x74] ss:$8 sps:$4 sm:$0xff]  }
 0x14d   :  { %5946 = vmatpush1.bf16.msra.mxu1 %v8177_v46  ;;  %v478_v33 = vmul.f32 %v6819_v7, %v9320_v10  ;;  %v477_v61 = vmul.f32 %v6819_v7, %v9324_v37  ;;  %v8211_v10 = vld [vmem:[#allocation7 + $0x70] ss:$8 sps:$4 sm:$0xff]   ;;  %v8221_v37 = vld [vmem:[#allocation7 + $0x80] ss:$8 sps:$4 sm:$0xff]  }
 0x14e   :  { %1183 = vmatmul.mubr.bf16.gmra.mrb[36].mxu0 %v8130_v39  ;;  %5931 = vmatprep.subr.bf16.mxu1 %v8187_v16 }
 0x14f   :  { %1192 = vmatprep.mubr.bf16.mxu0 %v8132_v9  ;;  %v8195_v5 = vpack.c.bf16 %v480_v4, %v478_v33  ;;  %v8214_v33 = vpack.c.bf16 %v479_v26, %v477_v61  ;;  %v8231_v26 = vld [vmem:[#allocation7 + $0x94] ss:$8 sps:$4 sm:$0xff]  }
 0x151   :  { %5947 = vmatpush1.bf16.msra.mxu1 %v8189_v58  ;;  %v6821_v59 = vpop.eup %6820  ;;  %9323 = vst [vmem:[#allocation24_spill] sm:$0xff] %v8195_v5 }
 0x152   :  { %v6823_v45 = vpop.eup %6822  ;;  %5932 = vmatprep.subr.bf16.mxu1 %v8197_v49  ;;  %v484_v60 = vmul.f32 %v6821_v59, %v7998_v13  ;;  %v483_v13 = vmul.f32 %v6821_v59, %v7992_v56  ;;  %v8241_v56 = vld [vmem:[#allocation7 + $0xa4] ss:$8 sps:$4 sm:$0xff]   ;;  %v8243_v59 = vld [vmem:[#allocation7 + $0xa0] ss:$8 sps:$4 sm:$0xff]  }
 0x153   :  { %v482_v23 = vmul.f32 %v6823_v45, %v8002_v20  ;;  %v481_v20 = vmul.f32 %v6823_v45, %v8000_v24  ;;  %v8251_v45 = vld [vmem:[#allocation7 + $0xb4] ss:$8 sps:$4 sm:$0xff]  }
 0x154   :  { %9326 = vst [vmem:[#allocation22_spill] sm:$0xff] %v8251_v45 }
 0x155   :  { %5948 = vmatpush1.bf16.msra.mxu1 %v8199_v11  ;;  %v6825_v7 = vpop.eup %6824  ;;  %v8217_v32 = vpack.c.bf16 %v484_v60, %v482_v23  ;;  %v8233_v23 = vld [vmem:[#allocation7 + $0x90] ss:$8 sps:$4 sm:$0xff]   ;;  %v8236_v60 = vpack.c.bf16 %v483_v13, %v481_v20 }
 0x156   :  { %1193 = vmatmul.mubr.bf16.gmra.mrb[40].mxu0 %v8150_v29  ;;  %5933 = vmatprep.subr.bf16.mxu1 %v8209_v44  ;;  %v6827_v4 = vpop.eup %6826  ;;  %v488_v51 = vmul.f32 %v6825_v7, %v8010_v21  ;;  %v8253_v20 = vld [vmem:[#allocation7 + $0xb0] ss:$8 sps:$4 sm:$0xff]  }
 0x157   :  { %1202 = vmatprep.mubr.bf16.mxu0 %v8153_v55  ;;  %v486_v61 = vmul.f32 %v6827_v4, %v8018_v47  ;;  %v485_v21 = vmul.f32 %v6827_v4, %v8016_v43  ;;  %v487_v47 = vmul.f32 %v6825_v7, %v8008_v42  ;;  %9327 = vst [vmem:[#allocation29_spill] sm:$0xff] %v8253_v20  ;;  %v8267_v42 = vld [vmem:[#allocation7 + $0xd4] ss:$8 sps:$4 sm:$0xff]   ;;  %v8269_v43 = vld [vmem:[#allocation7 + $0xd0] ss:$8 sps:$4 sm:$0xff]  }
 0x158   :  { %9330 = vst [vmem:[#allocation26_spill] sm:$0xff] %v8267_v42  ;;  %9331 = vst [vmem:[#allocation33_spill] sm:$0xff] %v8269_v43  ;;  %v6453_v7 = vld [vmem:[#allocation5 + $0x10] ss:$20 sps:$4 sm:$0xff]  }
 0x159   :  { %5949 = vmatpush1.bf16.msra.mxu1 %v8211_v10  ;;  %v8239_v24 = vpack.c.bf16 %v488_v51, %v486_v61  ;;  %v8256_v13 = vpack.c.bf16 %v487_v47, %v485_v21  ;;  %v8259_v61 = vld [vmem:[#allocation7 + $0xc4] ss:$8 sps:$4 sm:$0xff]   ;;  %v8261_v51 = vld [vmem:[#allocation7 + $0xc0] ss:$8 sps:$4 sm:$0xff]  }
 0x15a   :  { %5934 = vmatprep.subr.bf16.mxu1 %v8219_v57  ;;  %9328 = vst [vmem:[#allocation27_spill] sm:$0xff] %v8259_v61  ;;  %9329 = vst [vmem:[#allocation28_spill] sm:$0xff] %v8261_v51  ;;  %v8273_v4 = vld [vmem:[#allocation7 + $0xe4] ss:$8 sps:$4 sm:$0xff]   ;;  %v8275_v47 = vld [vmem:[#allocation7 + $0xe0] ss:$8 sps:$4 sm:$0xff]  }
 0x15b   :  { %9332 = vst [vmem:[#allocation31_spill] sm:$0xff] %v8273_v4  ;;  %v6454_v21 = vld [vmem:[#allocation5 + $0x178] ss:$20 sps:$4 sm:$0xff]   ;;  %9333 = vst [vmem:[#allocation32_spill] sm:$0xff] %v8275_v47 }
 0x15d   :  { %5950 = vmatpush1.bf16.msra.mxu1 %v8221_v37 }
 0x15e   :  { %1203 = vmatmul.mubr.bf16.gmra.mrb[44].mxu0 %v8170_v15  ;;  %5935 = vmatprep.subr.bf16.mxu1 %v8231_v26 }
 0x15f   :  { %1212 = vmatprep.mubr.bf16.mxu0 %v8173_v38 }
 0x161   :  { %5951 = vmatpush1.bf16.msra.mxu1 %v8233_v23 }
 0x162   :  { %5936 = vmatprep.subr.bf16.mxu1 %v8241_v56 }
 0x165   :  { %5952 = vmatpush1.bf16.msra.mxu1 %v8243_v59 }
 0x166   :  { %1213 = vmatmul.mubr.bf16.gmra.mrb[48].mxu0 %v8192_v25  ;;  %5937 = vmatprep.subr.bf16.mxu1 %v8251_v45  ;;  %v6461_v45 = vld [vmem:[#allocation5 + $0xb0] ss:$20 sps:$4 sm:$0xff]  }
 0x167   :  { %1222 = vmatprep.mubr.bf16.mxu0 %v8195_v5 }
 0x169   :  { %5953 = vmatpush1.bf16.msra.mxu1 %v8253_v20  ;;  %v6458_v20 = vld [vmem:[#allocation5 + $0x1c8] ss:$20 sps:$4 sm:$0xff]  }
 0x16a   :  { %5938 = vmatprep.subr.bf16.mxu1 %v8259_v61  ;;  %v8281_v61 = vld [vmem:[#allocation7 + $0xf4] ss:$8 sps:$4 sm:$0xff]  }
 0x16b   :  { %9334 = vst [vmem:[#allocation30_spill] sm:$0xff] %v8281_v61 }
 0x16d   :  { %5954 = vmatpush1.bf16.msra.mxu1 %v8261_v51  ;;  %v6455_v51 = vld [vmem:[#allocation5 + $0x38] ss:$20 sps:$4 sm:$0xff]  }
 0x16e   :  { %1223 = vmatmul.mubr.bf16.gmra.mrb[52].mxu0 %v8214_v33  ;;  %5939 = vmatprep.subr.bf16.mxu1 %v8267_v42  ;;  %v8283_v42 = vld [vmem:[#allocation7 + $0xf0] ss:$8 sps:$4 sm:$0xff]  }
 0x16f   :  { %1232 = vmatprep.mubr.bf16.mxu0 %v8217_v32  ;;  %9335 = vst [vmem:[#allocation37_spill] sm:$0xff] %v8283_v42 }
 0x171   :  { %5955 = vmatpush1.bf16.msra.mxu1 %v8269_v43  ;;  %v6456_v43 = vld [vmem:[#allocation5 + $0x1a0] ss:$20 sps:$4 sm:$0xff]  }
 0x172   :  { %5940 = vmatprep.subr.bf16.mxu1 %v8273_v4  ;;  %v6457_v4 = vld [vmem:[#allocation5 + $0x60] ss:$20 sps:$4 sm:$0xff]  }
 0x175   :  { %5956 = vmatpush1.bf16.msra.mxu1 %v8275_v47  ;;  %v6518_v47 = vld [vmem:[#allocation7 + $0x104] ss:$8 sps:$4 sm:$0xff]  }
 0x176   :  { %1233 = vmatmul.mubr.bf16.gmra.mrb[56].mxu0 %v8236_v60  ;;  %5941 = vmatprep.subr.bf16.mxu1 %v8281_v61  ;;  %v6468_v61 = vld [vmem:[#allocation5 + $0x218] ss:$20 sps:$4 sm:$0xff]  }
 0x177   :  { %1242 = vmatprep.mubr.bf16.mxu0 %v8239_v24 }
 0x179   :  { %5957 = vmatpush1.bf16.msra.mxu1 %v8283_v42  ;;  %v6485_v42 = vld [vmem:[#allocation5 + $0x100] ss:$20 sps:$4 sm:$0xff]  }
 0x17a   :  { %2532 = vmatprep.subr.bf16.mxu1 %v6518_v47 }
 0x17e   :  { %1243 = vmatmul.mubr.bf16.gmra.mrb[60].mxu0 %v8256_v13 }
 0x17f   :  { %1285 = vmatprep.mubr.bf16.mxu0 %v8034_v18 }
 0x186   :  { %1286 = vmatmul.mubr.bf16.vlgmr.msra.gmra.mrb[64].mxu0 %v8036_v14 }
 0x187   :  { %5743 = vmatpush3.bf16.msra.mxu0 %v6453_v7  ;;  %1295 = vmatprep.mubr.bf16.mxu0 %v8038_v6  ;;  %v6459_v7 = vld [vmem:[#allocation5 + $0x88] ss:$20 sps:$4 sm:$0xff]  }
 0x188   :  { %5744 = vmatprep.subr.bf16.mxu0 %v6454_v21  ;;  %v6460_v21 = vld [vmem:[#allocation5 + $0x1f0] ss:$20 sps:$4 sm:$0xff]  }
 0x18b   :  { %5745 = vmatpush3.bf16.msra.mxu0 %v6455_v51  ;;  %v6471_v51 = vld [vmem:[#allocation5 + $0xd8] ss:$20 sps:$4 sm:$0xff]  }
 0x18c   :  { %5746 = vmatprep.subr.bf16.mxu0 %v6456_v43  ;;  %v6482_v43 = vld [vmem:[#allocation5 + $0x240] ss:$20 sps:$4 sm:$0xff]  }
 0x18e   :  { %1296 = vmatmul.mubr.bf16.gmra.mrb[68].mxu0 %v8049_v19 }
 0x18f   :  { %1305 = vmatprep.mubr.bf16.mxu0 %v8047_v50  ;;  %5747 = vmatpush3.bf16.msra.mxu0 %v6457_v4  ;;  %v6496_v4 = vld [vmem:[#allocation5 + $0x268] ss:$20 sps:$4 sm:$0xff]  }
 0x190   :  { %5748 = vmatprep.subr.bf16.mxu0 %v6458_v20  ;;  %v6499_v20 = vld [vmem:[#allocation5 + $0x128] ss:$20 sps:$4 sm:$0xff]  }
 0x193   :  { %5749 = vmatpush3.bf16.msra.mxu0 %v6459_v7 }
 0x194   :  { %5750 = vmatprep.subr.bf16.mxu0 %v6460_v21 }
 0x196   :  { %1306 = vmatmul.mubr.bf16.gmra.mrb[72].mxu0 %v8057_v3 }
 0x197   :  { %1315 = vmatprep.mubr.bf16.mxu0 %v8059_v30  ;;  %5751 = vmatpush3.bf16.msra.mxu0 %v6461_v45 }
 0x198   :  { %5752 = vmatprep.subr.bf16.mxu0 %v6468_v61 }
 0x19b   :  { %5753 = vmatpush3.bf16.msra.mxu0 %v6471_v51 }
 0x19c   :  { %5754 = vmatprep.subr.bf16.mxu0 %v6482_v43 }
 0x19e   :  { %1316 = vmatmul.mubr.bf16.gmra.mrb[76].mxu0 %v8067_v52 }
 0x19f   :  { %1325 = vmatprep.mubr.bf16.mxu0 %v8069_v40  ;;  %5755 = vmatpush3.bf16.msra.mxu0 %v6485_v42  ;;  %v8314_v42 = vld [vmem:[%s9217_s2] sm:$0x1f] }
 0x1a0   :  { %5756 = vmatprep.subr.bf16.mxu0 %v6496_v4  ;;  %9338 = vst [vmem:[#allocation34_spill] sm:$0xff] %v8314_v42 }
 0x1a3   :  { %5757 = vmatpush3.bf16.msra.mxu0 %v6499_v20 }
 0x1a4   :  { %2339 = vmatprep.subr.bf16.mxu0 %v8127_v12  ;;  %v619_v12 = vlaneseq }
 0x1a6   :  { %1326 = vmatmul.mubr.bf16.gmra.mrb[80].mxu0 %v8077_v8  ;;  %v8305_v45 = vshrl.u32 %v619_v12, 7 }
 0x1a7   :  { %1335 = vmatprep.mubr.bf16.mxu0 %v8079_v54 }
 0x1a8   :  { %9336 = vst [vmem:[#allocation35_spill] sm:$0xff] %v8305_v45  ;;  %v8309_v61 = vsub.s32 0, %v8305_v45  ;;  %v8317_v47 = vsub.s32 1, %v8305_v45 }
 0x1aa   :  { %9337 = vst [vmem:[#allocation36_spill] sm:$0xff] %v8309_v61  ;;  %9339 = vst [vmem:[#allocation38_spill] sm:$0xff] %v8317_v47  ;;  %v8322_v7 = vrot.slane %v8314_v42, %v8309_v61  ;;  %v8327_v21 = vrot.slane %v8314_v42, %v8317_v47 }
 0x1ae   :  { %1336 = vmatmul.mubr.bf16.gmra.mrb[84].mxu0 %v8087_v22 }
 0x1af   :  { %1345 = vmatprep.mubr.bf16.mxu0 %v8089_v0 }
 0x1b6   :  { %1346 = vmatmul.mubr.bf16.gmra.mrb[88].mxu0 %v8097_v34 }
 0x1b7   :  { %1355 = vmatprep.mubr.bf16.mxu0 %v8099_v28 }
 0x1be   :  { %1356 = vmatmul.mubr.bf16.gmra.mrb[92].mxu0 %v8107_v41 }
 0x1bf   :  { %1365 = vmatprep.mubr.bf16.mxu0 %v8109_v48 }
 0x1c6   :  { %1366 = vmatmul.mubr.bf16.gmra.mrb[96].mxu0 %v8117_v17 }
 0x1c7   :  { %1375 = vmatprep.mubr.bf16.mxu0 %v8119_v2 }
 0x1ce   :  { %1376 = vmatmul.mubr.bf16.gmra.mrb[100].mxu0 %v8130_v39 }
 0x1cf   :  { %1385 = vmatprep.mubr.bf16.mxu0 %v8132_v9 }
 0x1d6   :  { %1386 = vmatmul.mubr.bf16.gmra.mrb[104].mxu0 %v8150_v29 }
 0x1d7   :  { %1395 = vmatprep.mubr.bf16.mxu0 %v8153_v55 }
 0x1d9   :  { %v1094_v51 = vpop.f32.mrb[0].mxu0 }
 0x1da   :  { %v1095_v43 = vadd.f32 %v1094_v51, %v8322_v7  ;;  %v1096_v4 = vpop.f32.mrb[1].mxu0 }
 0x1db   :  { %v1097_v20 = vadd.f32 %v1096_v4, %v8327_v21  ;;  %v1098_v12 = vpop.f32.mrb[2].mxu0 }
 0x1dc   :  { %6828 = vtanh.f32 %v1095_v43  ;;  %v1099_v29 = vadd.f32 %v1098_v12, %v8322_v7  ;;  %v1100_v45 = vpop.f32.mrb[3].mxu0 }
 0x1dd   :  { %6830 = vtanh.f32 %v1097_v20  ;;  %v1101_v61 = vadd.f32 %v1100_v45, %v8327_v21 }
 0x1de   :  { %6832 = vtanh.f32 %v1099_v29  ;;  %1396 = vmatmul.mubr.bf16.gmra.mrb[108].mxu0 %v8170_v15 }
 0x1df   :  { %6834 = vtanh.f32 %v1101_v61  ;;  %1405 = vmatprep.mubr.bf16.mxu0 %v8173_v38 }
 0x1e1   :  { %v1104_v47 = vpop.f32.mrb[4].mxu0 }
 0x1e2   :  { %v1105_v51 = vadd.f32 %v1104_v47, %v8322_v7  ;;  %v1106_v55 = vpop.f32.mrb[5].mxu0 }
 0x1e3   :  { %v1107_v4 = vadd.f32 %v1106_v55, %v8327_v21  ;;  %v1108_v42 = vpop.f32.mrb[6].mxu0 }
 0x1e4   :  { %6836 = vtanh.f32 %v1105_v51  ;;  %v1109_v43 = vadd.f32 %v1108_v42, %v8322_v7  ;;  %v1110_v12 = vpop.f32.mrb[7].mxu0 }
 0x1e5   :  { %6838 = vtanh.f32 %v1107_v4  ;;  %v1111_v45 = vadd.f32 %v1110_v12, %v8327_v21 }
 0x1e6   :  { %v8339_v29 = vpop.eup %6828  ;;  %6840 = vtanh.f32 %v1109_v43  ;;  %1406 = vmatmul.mubr.bf16.gmra.mrb[112].mxu0 %v8192_v25 }
 0x1e7   :  { %9340 = vst [vmem:[#allocation39_spill] sm:$0xff] %v8339_v29  ;;  %v8342_v61 = vpop.eup %6830  ;;  %6842 = vtanh.f32 %v1111_v45  ;;  %1415 = vmatprep.mubr.bf16.mxu0 %v8195_v5 }
 0x1e8   :  { %9341 = vst [vmem:[#allocation40_spill] sm:$0xff] %v8342_v61  ;;  %v8345_v47 = vpop.eup %6832 }
 0x1e9   :  { %9342 = vst [vmem:[#allocation41_spill] sm:$0xff] %v8345_v47  ;;  %v8347_v55 = vpop.eup %6834  ;;  %v1114_v20 = vpop.f32.mrb[8].mxu0 }
 0x1ea   :  { %9343 = vst [vmem:[#allocation42_spill] sm:$0xff] %v8347_v55  ;;  %v1115_v51 = vadd.f32 %v1114_v20, %v8322_v7  ;;  %v1116_v4 = vpop.f32.mrb[9].mxu0 }
 0x1eb   :  { %v1117_v12 = vadd.f32 %v1116_v4, %v8327_v21  ;;  %v1118_v25 = vpop.f32.mrb[10].mxu0 }
 0x1ec   :  { %6844 = vtanh.f32 %v1115_v51  ;;  %v1119_v45 = vadd.f32 %v1118_v25, %v8322_v7  ;;  %v1120_v5 = vpop.f32.mrb[11].mxu0 }
 0x1ed   :  { %6846 = vtanh.f32 %v1117_v12  ;;  %v1121_v38 = vadd.f32 %v1120_v5, %v8327_v21 }
 0x1ee   :  { %v8357_v15 = vpop.eup %6836  ;;  %6848 = vtanh.f32 %v1119_v45  ;;  %1416 = vmatmul.mubr.bf16.gmra.mrb[116].mxu0 %v8214_v33 }
 0x1ef   :  { %9344 = vst [vmem:[#allocation43_spill] sm:$0xff] %v8357_v15  ;;  %v8360_v20 = vpop.eup %6838  ;;  %6850 = vtanh.f32 %v1121_v38  ;;  %1425 = vmatprep.mubr.bf16.mxu0 %v8217_v32 }
 0x1f0   :  { %9345 = vst [vmem:[#allocation44_spill] sm:$0xff] %v8360_v20  ;;  %v8363_v42 = vpop.eup %6840 }
 0x1f1   :  { %9346 = vst [vmem:[#allocation45_spill] sm:$0xff] %v8363_v42  ;;  %v8365_v4 = vpop.eup %6842  ;;  %v1124_v51 = vpop.f32.mrb[12].mxu0 }
 0x1f2   :  { %9347 = vst [vmem:[#allocation46_spill] sm:$0xff] %v8365_v4  ;;  %v1125_v5 = vadd.f32 %v1124_v51, %v8322_v7  ;;  %v1126_v12 = vpop.f32.mrb[13].mxu0 }
 0x1f3   :  { %v1127_v43 = vadd.f32 %v1126_v12, %v8327_v21  ;;  %v1128_v29 = vpop.f32.mrb[14].mxu0 }
 0x1f4   :  { %6852 = vtanh.f32 %v1125_v5  ;;  %v1129_v38 = vadd.f32 %v1128_v29, %v8322_v7  ;;  %v1130_v47 = vpop.f32.mrb[15].mxu0 }
 0x1f5   :  { %6854 = vtanh.f32 %v1127_v43  ;;  %v1131_v61 = vadd.f32 %v1130_v47, %v8327_v21 }
 0x1f6   :  { %v8375_v55 = vpop.eup %6844  ;;  %6856 = vtanh.f32 %v1129_v38  ;;  %1426 = vmatmul.mubr.bf16.gmra.mrb[120].mxu0 %v8236_v60 }
 0x1f7   :  { %9348 = vst [vmem:[#allocation47_spill] sm:$0xff] %v8375_v55  ;;  %v8378_v51 = vpop.eup %6846  ;;  %6858 = vtanh.f32 %v1131_v61  ;;  %1435 = vmatprep.mubr.bf16.mxu0 %v8239_v24 }
 0x1f8   :  { %9349 = vst [vmem:[#allocation48_spill] sm:$0xff] %v8378_v51  ;;  %v8381_v25 = vpop.eup %6848 }
 0x1f9   :  { %9350 = vst [vmem:[#allocation49_spill] sm:$0xff] %v8381_v25  ;;  %v8383_v12 = vpop.eup %6850  ;;  %v1134_v5 = vpop.f32.mrb[16].mxu0 }
 0x1fa   :  { %v1135_v47 = vadd.f32 %v1134_v5, %v8322_v7  ;;  %v1136_v43 = vpop.f32.mrb[17].mxu0 }
 0x1fb   :  { %v1137_v45 = vadd.f32 %v1136_v43, %v8327_v21  ;;  %v1138_v15 = vpop.f32.mrb[18].mxu0 }
 0x1fc   :  { %6860 = vtanh.f32 %v1135_v47  ;;  %v1139_v61 = vadd.f32 %v1138_v15, %v8322_v7  ;;  %v1140_v42 = vpop.f32.mrb[19].mxu0 }
 0x1fd   :  { %6862 = vtanh.f32 %v1137_v45  ;;  %v1141_v20 = vadd.f32 %v1140_v42, %v8327_v21 }
 0x1fe   :  { %v8393_v4 = vpop.eup %6852  ;;  %6864 = vtanh.f32 %v1139_v61  ;;  %1436 = vmatmul.mubr.bf16.gmra.mrb[124].mxu0 %v8256_v13 }
 0x1ff   :  { %9351 = vst [vmem:[#allocation50_spill] sm:$0xff] %v8393_v4  ;;  %v8396_v5 = vpop.eup %6854  ;;  %6866 = vtanh.f32 %v1141_v20  ;;  %1478 = vmatprep.mubr.bf16.mxu0 %v8034_v18  ;;  %v6516_v4 = vld [vmem:[#allocation7 + $0x100] ss:$8 sps:$4 sm:$0xff]  }
 0x200   :  { %v8399_v29 = vpop.eup %6856 }
 0x201   :  { %9352 = vst [vmem:[#allocation51_spill] sm:$0xff] %v8399_v29  ;;  %v8401_v43 = vpop.eup %6858  ;;  %v1144_v47 = vpop.f32.mrb[20].mxu0  ;;  %v6521_v29 = vld [vmem:[#allocation7 + $0x114] ss:$8 sps:$4 sm:$0xff]  }
 0x202   :  { %v1145_v42 = vadd.f32 %v1144_v47, %v8322_v7  ;;  %v1146_v45 = vpop.f32.mrb[21].mxu0 }
 0x203   :  { %v1147_v38 = vadd.f32 %v1146_v45, %v8327_v21  ;;  %v1148_v55 = vpop.f32.mrb[22].mxu0 }
 0x204   :  { %6868 = vtanh.f32 %v1145_v42  ;;  %v1149_v18 = vadd.f32 %v1148_v55, %v8322_v7  ;;  %v1150_v20 = vpop.f32.mrb[23].mxu0 }
 0x205   :  { %6870 = vtanh.f32 %v1147_v38  ;;  %v1151_v25 = vadd.f32 %v1150_v20, %v8327_v21 }
 0x206   :  { %v6861_v51 = vpop.eup %6860  ;;  %6872 = vtanh.f32 %v1149_v18  ;;  %1479 = vmatmul.mubr.bf16.vlgmr.msra.gmra.mrb[128].mxu0 %v8036_v14 }
 0x207   :  { %v6863_v15 = vpop.eup %6862  ;;  %6874 = vtanh.f32 %v1151_v25  ;;  %1486 = vmatprep.mubr.bf16.mxu0 %v8038_v6  ;;  %2340 = vmatpush1.bf16.msra.mxu0 %v8134_v63 }
 0x208   :  { %v6865_v47 = vpop.eup %6864  ;;  %2341 = vmatprep.subr.bf16.mxu0 %v8143_v62 }
 0x209   :  { %v6867_v42 = vpop.eup %6866  ;;  %v1154_v45 = vpop.f32.mrb[24].mxu0  ;;  %v1787_v55 = vpack.c.bf16 %v6865_v47, %v6861_v51  ;;  %v6519_v51 = vld [vmem:[#allocation7 + $0x110] ss:$8 sps:$4 sm:$0xff]  }
 0x20a   :  { %v1155_v38 = vadd.f32 %v1154_v45, %v8322_v7  ;;  %v1156_v61 = vpop.f32.mrb[25].mxu0  ;;  %v1788_v20 = vpack.c.bf16 %v6867_v42, %v6863_v15 }
 0x20b   :  { %v1157_v18 = vadd.f32 %v1156_v61, %v8327_v21  ;;  %v1158_v14 = vpop.f32.mrb[26].mxu0  ;;  %2342 = vmatpush1.bf16.msra.mxu0 %v8145_v31  ;;  %v6524_v31 = vld [vmem:[#allocation7 + $0x124] ss:$8 sps:$4 sm:$0xff]  }
 0x20c   :  { %6876 = vtanh.f32 %v1155_v38  ;;  %v1159_v6 = vadd.f32 %v1158_v14, %v8322_v7  ;;  %v1160_v63 = vpop.f32.mrb[27].mxu0  ;;  %2411 = vmatprep.mubr.bf16.mxu1 %v1788_v20  ;;  %2343 = vmatprep.subr.bf16.mxu0 %v8147_v35  ;;  %v6525_v14 = vld [vmem:[#allocation7 + $0x130] ss:$8 sps:$4 sm:$0xff]  }
 0x20d   :  { %6878 = vtanh.f32 %v1157_v18  ;;  %v1161_v62 = vadd.f32 %v1160_v63, %v8327_v21  ;;  %2412 = vmatmul.mubr.bf16.vlgmr.msra.gmra.mrb[0].mxu1 %v1787_v55  ;;  %v6530_v63 = vld [vmem:[#allocation7 + $0x144] ss:$8 sps:$4 sm:$0xff]  }
 0x20e   :  { %v6869_v25 = vpop.eup %6868  ;;  %6880 = vtanh.f32 %v1159_v6  ;;  %1487 = vmatmul.mubr.bf16.gmra.mrb[132].mxu0 %v8049_v19  ;;  %2533 = vmatpush1.bf16.msra.mxu1 %v6516_v4  ;;  %v6522_v4 = vld [vmem:[#allocation7 + $0x120] ss:$8 sps:$4 sm:$0xff]  }
 0x20f   :  { %v6871_v15 = vpop.eup %6870  ;;  %6882 = vtanh.f32 %v1161_v62  ;;  %1494 = vmatprep.mubr.bf16.mxu0 %v8047_v50  ;;  %2534 = vmatprep.subr.bf16.mxu1 %v6521_v29  ;;  %v6527_v50 = vld [vmem:[#allocation7 + $0x134] ss:$8 sps:$4 sm:$0xff]  }
 0x210   :  { %v6873_v61 = vpop.eup %6872  ;;  %2344 = vmatpush1.bf16.msra.mxu0 %v8156_v53 }
 0x211   :  { %v6875_v35 = vpop.eup %6874  ;;  %v1164_v47 = vpop.f32.mrb[28].mxu0  ;;  %v1792_v42 = vpack.c.bf16 %v6873_v61, %v6869_v25  ;;  %2345 = vmatprep.subr.bf16.mxu0 %v8165_v1 }
 0x212   :  { %v1165_v45 = vadd.f32 %v1164_v47, %v8322_v7  ;;  %v1166_v55 = vpop.f32.mrb[29].mxu0  ;;  %v1793_v19 = vpack.c.bf16 %v6875_v35, %v6871_v15  ;;  %2535 = vmatpush1.bf16.msra.mxu1 %v6519_v51 }
 0x213   :  { %v1167_v38 = vadd.f32 %v1166_v55, %v8327_v21  ;;  %v1168_v20 = vpop.f32.mrb[30].mxu0  ;;  %2536 = vmatprep.subr.bf16.mxu1 %v6524_v31  ;;  %v6528_v31 = vld [vmem:[#allocation7 + $0x140] ss:$8 sps:$4 sm:$0xff]  }
 0x214   :  { %6884 = vtanh.f32 %v1165_v45  ;;  %v1169_v29 = vadd.f32 %v1168_v20, %v8322_v7  ;;  %v1170_v53 = vpop.f32.mrb[31].mxu0  ;;  %2421 = vmatprep.mubr.bf16.mxu1 %v1793_v19  ;;  %2346 = vmatpush1.bf16.msra.mxu0 %v8167_v36  ;;  %v6531_v45 = vld [vmem:[#allocation7 + $0x150] ss:$8 sps:$4 sm:$0xff]   ;;  %v6536_v19 = vld [vmem:[#allocation7 + $0x164] ss:$8 sps:$4 sm:$0xff]  }
 0x215   :  { %6886 = vtanh.f32 %v1167_v38  ;;  %v1171_v1 = vadd.f32 %v1170_v53, %v8327_v21  ;;  %2422 = vmatmul.mubr.bf16.gmra.mrb[4].mxu1 %v1792_v42  ;;  %2347 = vmatprep.subr.bf16.mxu0 %v8175_v27 }
 0x216   :  { %v6877_v18 = vpop.eup %6876  ;;  %6888 = vtanh.f32 %v1169_v29  ;;  %1495 = vmatmul.mubr.bf16.gmra.mrb[136].mxu0 %v8057_v3  ;;  %2537 = vmatpush1.bf16.msra.mxu1 %v6522_v4  ;;  %v6534_v29 = vld [vmem:[#allocation7 + $0x160] ss:$8 sps:$4 sm:$0xff]  }
 0x217   :  { %v6879_v6 = vpop.eup %6878  ;;  %6890 = vtanh.f32 %v1171_v1  ;;  %1502 = vmatprep.mubr.bf16.mxu0 %v8059_v30  ;;  %2538 = vmatprep.subr.bf16.mxu1 %v6527_v50  ;;  %v6533_v30 = vld [vmem:[#allocation7 + $0x154] ss:$8 sps:$4 sm:$0xff]  }
 0x218   :  { %v6881_v62 = vpop.eup %6880  ;;  %2348 = vmatpush1.bf16.msra.mxu0 %v8177_v46 }
 0x219   :  { %v6883_v36 = vpop.eup %6882  ;;  %v1174_v25 = vpop.f32.mrb[32].mxu0  ;;  %v1797_v51 = vpack.c.bf16 %v6881_v62, %v6877_v18  ;;  %2349 = vmatprep.subr.bf16.mxu0 %v8187_v16  ;;  %v6542_v62 = vld [vmem:[#allocation7 + $0x184] ss:$8 sps:$4 sm:$0xff]  }
 0x21a   :  { %v1175_v27 = vadd.f32 %v1174_v25, %v8322_v7  ;;  %v1176_v15 = vpop.f32.mrb[33].mxu0  ;;  %v1798_v3 = vpack.c.bf16 %v6883_v36, %v6879_v6  ;;  %2539 = vmatpush1.bf16.msra.mxu1 %v6525_v14  ;;  %v6537_v6 = vld [vmem:[#allocation7 + $0x170] ss:$8 sps:$4 sm:$0xff]  }
 0x21b   :  { %v1177_v61 = vadd.f32 %v1176_v15, %v8327_v21  ;;  %v1178_v35 = vpop.f32.mrb[34].mxu0  ;;  %2540 = vmatprep.subr.bf16.mxu1 %v6530_v63  ;;  %v6540_v15 = vld [vmem:[#allocation7 + $0x180] ss:$8 sps:$4 sm:$0xff]  }
 0x21c   :  { %6892 = vtanh.f32 %v1175_v27  ;;  %v1179_v47 = vadd.f32 %v1178_v35, %v8322_v7  ;;  %v1180_v46 = vpop.f32.mrb[35].mxu0  ;;  %2431 = vmatprep.mubr.bf16.mxu1 %v1798_v3  ;;  %2350 = vmatpush1.bf16.msra.mxu0 %v8189_v58 }
 0x21d   :  { %6894 = vtanh.f32 %v1177_v61  ;;  %v1181_v16 = vadd.f32 %v1180_v46, %v8327_v21  ;;  %2432 = vmatmul.mubr.bf16.gmra.mrb[8].mxu1 %v1797_v51  ;;  %2351 = vmatprep.subr.bf16.mxu0 %v8197_v49  ;;  %v6548_v46 = vld [vmem:[#allocation7 + $0x1a4] ss:$8 sps:$4 sm:$0xff]  }
 0x21e   :  { %v6885_v42 = vpop.eup %6884  ;;  %6896 = vtanh.f32 %v1179_v47  ;;  %1503 = vmatmul.mubr.bf16.gmra.mrb[140].mxu0 %v8067_v52  ;;  %2541 = vmatpush1.bf16.msra.mxu1 %v6528_v31 }
 0x21f   :  { %v6887_v55 = vpop.eup %6886  ;;  %6898 = vtanh.f32 %v1181_v16  ;;  %1510 = vmatprep.mubr.bf16.mxu0 %v8069_v40  ;;  %2542 = vmatprep.subr.bf16.mxu1 %v6533_v30  ;;  %v6539_v40 = vld [vmem:[#allocation7 + $0x174] ss:$8 sps:$4 sm:$0xff]   ;;  %v6543_v30 = vld [vmem:[#allocation7 + $0x190] ss:$8 sps:$4 sm:$0xff]  }
 0x220   :  { %v6889_v4 = vpop.eup %6888  ;;  %2352 = vmatpush1.bf16.msra.mxu0 %v8199_v11 }
 0x221   :  { %v6891_v58 = vpop.eup %6890  ;;  %v1184_v38 = vpop.f32.mrb[36].mxu0  ;;  %v1802_v20 = vpack.c.bf16 %v6889_v4, %v6885_v42  ;;  %2353 = vmatprep.subr.bf16.mxu0 %v8209_v44  ;;  %v6546_v4 = vld [vmem:[#allocation7 + $0x1a0] ss:$8 sps:$4 sm:$0xff]  }
 0x222   :  { %v1185_v49 = vadd.f32 %v1184_v38, %v8322_v7  ;;  %v1186_v50 = vpop.f32.mrb[37].mxu0  ;;  %v1803_v52 = vpack.c.bf16 %v6891_v58, %v6887_v55  ;;  %2543 = vmatpush1.bf16.msra.mxu1 %v6531_v45  ;;  %v9353_v55 = vld [vmem:[#allocation22_spill] sm:$0xff] }
 0x223   :  { %v1187_v53 = vadd.f32 %v1186_v50, %v8327_v21  ;;  %v1188_v1 = vpop.f32.mrb[38].mxu0  ;;  %2544 = vmatprep.subr.bf16.mxu1 %v6536_v19 }
 0x224   :  { %6900 = vtanh.f32 %v1185_v49  ;;  %v1189_v18 = vadd.f32 %v1188_v1, %v8322_v7  ;;  %v1190_v11 = vpop.f32.mrb[39].mxu0  ;;  %2441 = vmatprep.mubr.bf16.mxu1 %v1803_v52  ;;  %2354 = vmatpush1.bf16.msra.mxu0 %v8211_v10  ;;  %v9354_v49 = vld [vmem:[#allocation29_spill] sm:$0xff]  ;;  %v9355_v52 = vld [vmem:[#allocation27_spill] sm:$0xff] }
 0x225   :  { %6902 = vtanh.f32 %v1187_v53  ;;  %v1191_v44 = vadd.f32 %v1190_v11, %v8327_v21  ;;  %2442 = vmatmul.mubr.bf16.gmra.mrb[12].mxu1 %v1802_v20  ;;  %2355 = vmatprep.subr.bf16.mxu0 %v8219_v57  ;;  %v6549_v53 = vld [vmem:[#allocation7 + $0x1b0] ss:$8 sps:$4 sm:$0xff]   ;;  %v9356_v11 = vld [vmem:[#allocation28_spill] sm:$0xff] }
 0x226   :  { %v6893_v14 = vpop.eup %6892  ;;  %6904 = vtanh.f32 %v1189_v18  ;;  %1511 = vmatmul.mubr.bf16.gmra.mrb[144].mxu0 %v8077_v8  ;;  %2545 = vmatpush1.bf16.msra.mxu1 %v6534_v29 }
 0x227   :  { %v6895_v63 = vpop.eup %6894  ;;  %6906 = vtanh.f32 %v1191_v44  ;;  %1518 = vmatprep.mubr.bf16.mxu0 %v8079_v54  ;;  %2546 = vmatprep.subr.bf16.mxu1 %v6539_v40  ;;  %v6545_v54 = vld [vmem:[#allocation7 + $0x194] ss:$8 sps:$4 sm:$0xff]   ;;  %v6554_v40 = vld [vmem:[#allocation7 + $0x1c4] ss:$8 sps:$4 sm:$0xff]  }
 0x228   :  { %v6897_v36 = vpop.eup %6896  ;;  %2356 = vmatpush1.bf16.msra.mxu0 %v8221_v37 }
 0x229   :  { %v6899_v10 = vpop.eup %6898  ;;  %v1194_v25 = vpop.f32.mrb[40].mxu0  ;;  %v1807_v51 = vpack.c.bf16 %v6897_v36, %v6893_v14  ;;  %2357 = vmatprep.subr.bf16.mxu0 %v8231_v26 }
 0x22a   :  { %v1195_v57 = vadd.f32 %v1194_v25, %v8322_v7  ;;  %v1196_v27 = vpop.f32.mrb[41].mxu0  ;;  %v1808_v8 = vpack.c.bf16 %v6899_v10, %v6895_v63  ;;  %2547 = vmatpush1.bf16.msra.mxu1 %v6537_v6  ;;  %v9357_v63 = vld [vmem:[#allocation26_spill] sm:$0xff]  ;;  %v6552_v10 = vld [vmem:[#allocation7 + $0x1c0] ss:$8 sps:$4 sm:$0xff]  }
 0x22b   :  { %v1197_v3 = vadd.f32 %v1196_v27, %v8327_v21  ;;  %v1198_v31 = vpop.f32.mrb[42].mxu0  ;;  %2548 = vmatprep.subr.bf16.mxu1 %v6542_v62 }
 0x22c   :  { %6908 = vtanh.f32 %v1195_v57  ;;  %v1199_v61 = vadd.f32 %v1198_v31, %v8322_v7  ;;  %v1200_v37 = vpop.f32.mrb[43].mxu0  ;;  %2451 = vmatprep.mubr.bf16.mxu1 %v1808_v8  ;;  %2358 = vmatpush1.bf16.msra.mxu0 %v8233_v23  ;;  %v9358_v8 = vld [vmem:[#allocation33_spill] sm:$0xff] }
 0x22d   :  { %6910 = vtanh.f32 %v1197_v3  ;;  %v1201_v26 = vadd.f32 %v1200_v37, %v8327_v21  ;;  %2452 = vmatmul.mubr.bf16.gmra.mrb[16].mxu1 %v1807_v51  ;;  %2359 = vmatprep.subr.bf16.mxu0 %v8241_v56  ;;  %v9359_v3 = vld [vmem:[#allocation31_spill] sm:$0xff] }
 0x22e   :  { %v6901_v35 = vpop.eup %6900  ;;  %6912 = vtanh.f32 %v1199_v61  ;;  %1519 = vmatmul.mubr.bf16.gmra.mrb[148].mxu0 %v8087_v22  ;;  %2549 = vmatpush1.bf16.msra.mxu1 %v6540_v15  ;;  %v6560_v37 = vld [vmem:[#allocation7 + $0x1e4] ss:$8 sps:$4 sm:$0xff]  }
 0x22f   :  { %v6903_v47 = vpop.eup %6902  ;;  %6914 = vtanh.f32 %v1201_v26  ;;  %1526 = vmatprep.mubr.bf16.mxu0 %v8089_v0  ;;  %2550 = vmatprep.subr.bf16.mxu1 %v6545_v54  ;;  %v6551_v0 = vld [vmem:[#allocation7 + $0x1b4] ss:$8 sps:$4 sm:$0xff]   ;;  %v6555_v54 = vld [vmem:[#allocation7 + $0x1d0] ss:$8 sps:$4 sm:$0xff]  }
 0x230   :  { %v6905_v16 = vpop.eup %6904  ;;  %2360 = vmatpush1.bf16.msra.mxu0 %v8243_v59 }
 0x231   :  { %v6907_v23 = vpop.eup %6906  ;;  %v1204_v42 = vpop.f32.mrb[44].mxu0  ;;  %v1812_v45 = vpack.c.bf16 %v6905_v16, %v6901_v35  ;;  %2361 = vmatprep.subr.bf16.mxu0 %v9353_v55  ;;  %v9360_v35 = vld [vmem:[#allocation32_spill] sm:$0xff]  ;;  %v9361_v16 = vld [vmem:[#allocation30_spill] sm:$0xff] }
 0x232   :  { %v1205_v56 = vadd.f32 %v1204_v42, %v8322_v7  ;;  %v1206_v19 = vpop.f32.mrb[45].mxu0  ;;  %v1813_v22 = vpack.c.bf16 %v6907_v23, %v6903_v47  ;;  %2551 = vmatpush1.bf16.msra.mxu1 %v6543_v30 }
 0x233   :  { %v1207_v58 = vadd.f32 %v1206_v19, %v8327_v21  ;;  %v1208_v38 = vpop.f32.mrb[46].mxu0  ;;  %2552 = vmatprep.subr.bf16.mxu1 %v6548_v46 }
 0x234   :  { %6916 = vtanh.f32 %v1205_v56  ;;  %v1209_v20 = vadd.f32 %v1208_v38, %v8322_v7  ;;  %v1210_v59 = vpop.f32.mrb[47].mxu0  ;;  %2461 = vmatprep.mubr.bf16.mxu1 %v1813_v22  ;;  %2362 = vmatpush1.bf16.msra.mxu0 %v9354_v49 }
 0x235   :  { %6918 = vtanh.f32 %v1207_v58  ;;  %v1211_v50 = vadd.f32 %v1210_v59, %v8327_v21  ;;  %2462 = vmatmul.mubr.bf16.gmra.mrb[20].mxu1 %v1812_v45  ;;  %2363 = vmatprep.subr.bf16.mxu0 %v9355_v52  ;;  %v6558_v45 = vld [vmem:[#allocation7 + $0x1e0] ss:$8 sps:$4 sm:$0xff]   ;;  %v6566_v59 = vld [vmem:[#allocation7 + $0x204] ss:$8 sps:$4 sm:$0xff]  }
 0x236   :  { %v6909_v29 = vpop.eup %6908  ;;  %6920 = vtanh.f32 %v1209_v20  ;;  %1527 = vmatmul.mubr.bf16.gmra.mrb[152].mxu0 %v8097_v34  ;;  %2553 = vmatpush1.bf16.msra.mxu1 %v6546_v4  ;;  %v9362_v4 = vld [vmem:[#allocation37_spill] sm:$0xff] }
 0x237   :  { %v6911_v1 = vpop.eup %6910  ;;  %6922 = vtanh.f32 %v1211_v50  ;;  %1534 = vmatprep.mubr.bf16.mxu0 %v8099_v28  ;;  %2554 = vmatprep.subr.bf16.mxu1 %v6551_v0  ;;  %v6557_v28 = vld [vmem:[#allocation7 + $0x1d4] ss:$8 sps:$4 sm:$0xff]   ;;  %v6561_v0 = vld [vmem:[#allocation7 + $0x1f0] ss:$8 sps:$4 sm:$0xff]  }
 0x238   :  { %v6913_v18 = vpop.eup %6912  ;;  %2364 = vmatpush1.bf16.msra.mxu0 %v9356_v11 }
 0x239   :  { %v6915_v44 = vpop.eup %6914  ;;  %v1214_v14 = vpop.f32.mrb[48].mxu0  ;;  %v1817_v6 = vpack.c.bf16 %v6913_v18, %v6909_v29  ;;  %2365 = vmatprep.subr.bf16.mxu0 %v9357_v63 }
 0x23a   :  { %v1215_v62 = vadd.f32 %v1214_v14, %v8322_v7  ;;  %v1216_v36 = vpop.f32.mrb[49].mxu0  ;;  %v1818_v34 = vpack.c.bf16 %v6915_v44, %v6911_v1  ;;  %2555 = vmatpush1.bf16.msra.mxu1 %v6549_v53 }
 0x23b   :  { %v1217_v25 = vadd.f32 %v1216_v36, %v8327_v21  ;;  %v1218_v51 = vpop.f32.mrb[50].mxu0  ;;  %2556 = vmatprep.subr.bf16.mxu1 %v6554_v40 }
 0x23c   :  { %6924 = vtanh.f32 %v1215_v62  ;;  %v1219_v57 = vadd.f32 %v1218_v51, %v8322_v7  ;;  %v1220_v27 = vpop.f32.mrb[51].mxu0  ;;  %2471 = vmatprep.mubr.bf16.mxu1 %v1818_v34  ;;  %2366 = vmatpush1.bf16.msra.mxu0 %v9358_v8 }
 0x23d   :  { %6926 = vtanh.f32 %v1217_v25  ;;  %v1221_v15 = vadd.f32 %v1220_v27, %v8327_v21  ;;  %2472 = vmatmul.mubr.bf16.gmra.mrb[24].mxu1 %v1817_v6  ;;  %2367 = vmatprep.subr.bf16.mxu0 %v9359_v3 }
 0x23e   :  { %v6917_v31 = vpop.eup %6916  ;;  %6928 = vtanh.f32 %v1219_v57  ;;  %1535 = vmatmul.mubr.bf16.gmra.mrb[156].mxu0 %v8107_v41  ;;  %2557 = vmatpush1.bf16.msra.mxu1 %v6552_v10 }
 0x23f   :  { %v6919_v61 = vpop.eup %6918  ;;  %6930 = vtanh.f32 %v1221_v15  ;;  %1542 = vmatprep.mubr.bf16.mxu0 %v8109_v48  ;;  %2558 = vmatprep.subr.bf16.mxu1 %v6557_v28  ;;  %v6563_v48 = vld [vmem:[#allocation7 + $0x1f4] ss:$8 sps:$4 sm:$0xff]   ;;  %v9363_v28 = vld [vmem:[#allocation35_spill] sm:$0xff] }
 0x240   :  { %v6921_v26 = vpop.eup %6920  ;;  %2368 = vmatpush1.bf16.msra.mxu0 %v9360_v35  ;;  %v629_v57 = vsub.s32 2, %v9363_v28  ;;  %v633_v15 = vsub.s32 3, %v9363_v28  ;;  %v9366_v35 = vld [vmem:[#allocation21_spill] sm:$0xff] }
 0x241   :  { %v6923_v30 = vpop.eup %6922  ;;  %v1224_v47 = vpop.f32.mrb[52].mxu0  ;;  %v1822_v46 = vpack.c.bf16 %v6921_v26, %v6917_v31  ;;  %2369 = vmatprep.subr.bf16.mxu0 %v9361_v16 }
 0x242   :  { %v1225_v23 = vadd.f32 %v1224_v47, %v8322_v7  ;;  %v1226_v42 = vpop.f32.mrb[53].mxu0  ;;  %v1823_v41 = vpack.c.bf16 %v6923_v30, %v6919_v61  ;;  %2559 = vmatpush1.bf16.msra.mxu1 %v6555_v54  ;;  %v9364_v54 = vld [vmem:[#allocation20_spill] sm:$0xff]  ;;  %v9365_v61 = vld [vmem:[#allocation34_spill] sm:$0xff] }
 0x243   :  { %v1227_v55 = vadd.f32 %v1226_v42, %v8327_v21  ;;  %v1228_v56 = vpop.f32.mrb[54].mxu0  ;;  %2560 = vmatprep.subr.bf16.mxu1 %v6560_v37  ;;  %v8508_v37 = vrot.slane %v9365_v61, %v629_v57 }
 0x244   :  { %6932 = vtanh.f32 %v1225_v23  ;;  %v1229_v19 = vadd.f32 %v1228_v56, %v8322_v7  ;;  %v1230_v22 = vpop.f32.mrb[55].mxu0  ;;  %2481 = vmatprep.mubr.bf16.mxu1 %v1823_v41  ;;  %2370 = vmatpush1.bf16.msra.mxu0 %v9362_v4 }
 0x245   :  { %6934 = vtanh.f32 %v1227_v55  ;;  %v1231_v58 = vadd.f32 %v1230_v22, %v8327_v21  ;;  %2482 = vmatmul.mubr.bf16.gmra.mrb[28].mxu1 %v1822_v46  ;;  %v9367_v22 = vld [vmem:[#allocation19_spill] sm:$0xff] }
 0x246   :  { %v6925_v38 = vpop.eup %6924  ;;  %6936 = vtanh.f32 %v1229_v19  ;;  %1543 = vmatmul.mubr.bf16.gmra.mrb[160].mxu0 %v8117_v17  ;;  %2561 = vmatpush1.bf16.msra.mxu1 %v6558_v45 }
 0x247   :  { %v6927_v20 = vpop.eup %6926  ;;  %6938 = vtanh.f32 %v1231_v58  ;;  %1550 = vmatprep.mubr.bf16.mxu0 %v8119_v2  ;;  %2562 = vmatprep.subr.bf16.mxu1 %v6563_v48  ;;  %v9368_v58 = vld [vmem:[#allocation25_spill] sm:$0xff] }
 0x248   :  { %v6929_v49 = vpop.eup %6928 }
 0x249   :  { %v6931_v50 = vpop.eup %6930  ;;  %v1234_v52 = vpop.f32.mrb[56].mxu0  ;;  %v1827_v29 = vpack.c.bf16 %v6929_v49, %v6925_v38 }
 0x24a   :  { %v1235_v53 = vadd.f32 %v1234_v52, %v8322_v7  ;;  %v1236_v1 = vpop.f32.mrb[57].mxu0  ;;  %v1828_v40 = vpack.c.bf16 %v6931_v50, %v6927_v20  ;;  %2563 = vmatpush1.bf16.msra.mxu1 %v6561_v0 }
 0x24b   :  { %v1237_v18 = vadd.f32 %v1236_v1, %v8327_v21  ;;  %v1238_v17 = vpop.f32.mrb[58].mxu0  ;;  %2725 = vmatprep.subr.bf16.mxu1 %v6566_v59 }
 0x24c   :  { %6940 = vtanh.f32 %v1235_v53  ;;  %v1239_v11 = vadd.f32 %v1238_v17, %v8322_v7  ;;  %v1240_v44 = vpop.f32.mrb[59].mxu0  ;;  %2491 = vmatprep.mubr.bf16.mxu1 %v1828_v40 }
 0x24d   :  { %6942 = vtanh.f32 %v1237_v18  ;;  %v1241_v2 = vadd.f32 %v1240_v44, %v8327_v21  ;;  %2492 = vmatmul.mubr.bf16.gmra.mrb[32].mxu1 %v1827_v29 }
 0x24e   :  { %v6933_v14 = vpop.eup %6932  ;;  %6944 = vtanh.f32 %v1239_v11  ;;  %1551 = vmatmul.mubr.bf16.gmra.mrb[164].mxu0 %v8130_v39  ;;  %v9369_v11 = vld [vmem:[#allocation23_spill] sm:$0xff] }
 0x24f   :  { %v6935_v6 = vpop.eup %6934  ;;  %6946 = vtanh.f32 %v1241_v2  ;;  %1558 = vmatprep.mubr.bf16.mxu0 %v8132_v9  ;;  %v9370_v2 = vld [vmem:[#allocation24_spill] sm:$0xff] }
 0x250   :  { %v6937_v63 = vpop.eup %6936 }
 0x251   :  { %v6939_v62 = vpop.eup %6938  ;;  %v1244_v36 = vpop.f32.mrb[60].mxu0  ;;  %v1832_v34 = vpack.c.bf16 %v6937_v63, %v6933_v14 }
 0x252   :  { %v1245_v10 = vadd.f32 %v1244_v36, %v8322_v7  ;;  %v1246_v25 = vpop.f32.mrb[61].mxu0  ;;  %v1833_v51 = vpack.c.bf16 %v6939_v62, %v6935_v6 }
 0x253   :  { %v1247_v27 = vadd.f32 %v1246_v25, %v8327_v21  ;;  %v1248_v8 = vpop.f32.mrb[62].mxu0  ;;  %v6564_v25 = vld [vmem:[#allocation7 + $0x200] ss:$8 sps:$4 sm:$0xff]  }
 0x254   :  { %6948 = vtanh.f32 %v1245_v10  ;;  %v1249_v39 = vadd.f32 %v1248_v8, %v8322_v7  ;;  %v1250_v3 = vpop.f32.mrb[63].mxu0  ;;  %2501 = vmatprep.mubr.bf16.mxu1 %v1833_v51  ;;  %v8514_v7 = vrot.slane %v9365_v61, %v633_v15  ;;  %v6569_v8 = vld [vmem:[#allocation7 + $0x214] ss:$8 sps:$4 sm:$0xff]  }
 0x255   :  { %6950 = vtanh.f32 %v1247_v27  ;;  %v1251_v9 = vadd.f32 %v1250_v3, %v8327_v21  ;;  %2502 = vmatmul.mubr.bf16.gmra.mrb[36].mxu1 %v1832_v34 }
 0x256   :  { %v6941_v31 = vpop.eup %6940  ;;  %6952 = vtanh.f32 %v1249_v39  ;;  %1559 = vmatmul.mubr.bf16.gmra.mrb[168].mxu0 %v9364_v54  ;;  %v6567_v54 = vld [vmem:[#allocation7 + $0x210] ss:$8 sps:$4 sm:$0xff]  }
 0x257   :  { %v6943_v26 = vpop.eup %6942  ;;  %6954 = vtanh.f32 %v1251_v9  ;;  %1566 = vmatprep.mubr.bf16.mxu0 %v9366_v35 }
 0x258   :  { %v6945_v21 = vpop.eup %6944 }
 0x259   :  { %v6947_v30 = vpop.eup %6946  ;;  %v1287_v47 = vpop.f32.mrb[64].mxu0  ;;  %v1837_v46 = vpack.c.bf16 %v6945_v21, %v6941_v31 }
 0x25a   :  { %v1288_v16 = vadd.f32 %v1287_v47, %v8508_v37  ;;  %v1289_v23 = vpop.f32.mrb[65].mxu0  ;;  %v1838_v42 = vpack.c.bf16 %v6947_v30, %v6943_v26  ;;  %v6572_v26 = vld [vmem:[#allocation7 + $0x224] ss:$8 sps:$4 sm:$0xff]  }
 0x25b   :  { %v1290_v41 = vadd.f32 %v1289_v23, %v8514_v7  ;;  %v1291_v45 = vpop.f32.mrb[66].mxu0 }
 0x25c   :  { %6956 = vtanh.f32 %v1288_v16  ;;  %v1292_v55 = vadd.f32 %v1291_v45, %v8508_v37  ;;  %v1293_v56 = vpop.f32.mrb[67].mxu0  ;;  %2511 = vmatprep.mubr.bf16.mxu1 %v1838_v42  ;;  %v6570_v42 = vld [vmem:[#allocation7 + $0x220] ss:$8 sps:$4 sm:$0xff]   ;;  %v6575_v45 = vld [vmem:[#allocation7 + $0x234] ss:$8 sps:$4 sm:$0xff]  }
 0x25d   :  { %6958 = vtanh.f32 %v1290_v41  ;;  %v1294_v48 = vadd.f32 %v1293_v56, %v8514_v7  ;;  %2512 = vmatmul.mubr.bf16.gmra.mrb[40].mxu1 %v1837_v46 }
 0x25e   :  { %v6949_v19 = vpop.eup %6948  ;;  %6960 = vtanh.f32 %v1292_v55  ;;  %1567 = vmatmul.mubr.bf16.gmra.mrb[172].mxu0 %v9367_v22 }
 0x25f   :  { %v6951_v4 = vpop.eup %6950  ;;  %6962 = vtanh.f32 %v1294_v48  ;;  %1574 = vmatprep.mubr.bf16.mxu0 %v9368_v58 }
 0x260   :  { %v6953_v38 = vpop.eup %6952 }
 0x261   :  { %v6955_v0 = vpop.eup %6954  ;;  %v1297_v20 = vpop.f32.mrb[68].mxu0  ;;  %v1842_v59 = vpack.c.bf16 %v6953_v38, %v6949_v19  ;;  %v6573_v19 = vld [vmem:[#allocation7 + $0x230] ss:$8 sps:$4 sm:$0xff]  }
 0x262   :  { %v1298_v49 = vadd.f32 %v1297_v20, %v8508_v37  ;;  %v1299_v50 = vpop.f32.mrb[69].mxu0  ;;  %v1843_v52 = vpack.c.bf16 %v6955_v0, %v6951_v4  ;;  %v6578_v4 = vld [vmem:[#allocation7 + $0x244] ss:$8 sps:$4 sm:$0xff]  }
 0x263   :  { %v1300_v29 = vadd.f32 %v1299_v50, %v8514_v7  ;;  %v1301_v53 = vpop.f32.mrb[70].mxu0 }
 0x264   :  { %6964 = vtanh.f32 %v1298_v49  ;;  %v1302_v1 = vadd.f32 %v1301_v53, %v8508_v37  ;;  %v1303_v40 = vpop.f32.mrb[71].mxu0  ;;  %2521 = vmatprep.mubr.bf16.mxu1 %v1843_v52  ;;  %v6576_v52 = vld [vmem:[#allocation7 + $0x240] ss:$8 sps:$4 sm:$0xff]   ;;  %v6581_v53 = vld [vmem:[#allocation7 + $0x254] ss:$8 sps:$4 sm:$0xff]  }
 0x265   :  { %6966 = vtanh.f32 %v1300_v29  ;;  %v1304_v18 = vadd.f32 %v1303_v40, %v8514_v7  ;;  %2522 = vmatmul.mubr.bf16.gmra.mrb[44].mxu1 %v1842_v59 }
 0x266   :  { %v6957_v17 = vpop.eup %6956  ;;  %6968 = vtanh.f32 %v1302_v1  ;;  %1575 = vmatmul.mubr.bf16.gmra.mrb[176].mxu0 %v9369_v11 }
 0x267   :  { %v6959_v44 = vpop.eup %6958  ;;  %6970 = vtanh.f32 %v1304_v18  ;;  %1582 = vmatprep.mubr.bf16.mxu0 %v9370_v2  ;;  %v9372_v2 = vld [vmem:[#allocation40_spill] sm:$0xff] }
 0x268   :  { %v6961_v14 = vpop.eup %6960 }
 0x269   :  { %v6963_v6 = vpop.eup %6962  ;;  %v1307_v63 = vpop.f32.mrb[72].mxu0  ;;  %v1769_v62 = vpack.c.bf16 %v6961_v14, %v6957_v17  ;;  %v6579_v17 = vld [vmem:[#allocation7 + $0x250] ss:$8 sps:$4 sm:$0xff]  }
 0x26a   :  { %v1308_v36 = vadd.f32 %v1307_v63, %v8508_v37  ;;  %v1309_v34 = vpop.f32.mrb[73].mxu0  ;;  %v1770_v10 = vpack.c.bf16 %v6963_v6, %v6959_v44  ;;  %v9371_v44 = vld [vmem:[#allocation42_spill] sm:$0xff]  ;;  %v6584_v6 = vld [vmem:[#allocation7 + $0x264] ss:$8 sps:$4 sm:$0xff]  }
 0x26b   :  { %v1310_v51 = vadd.f32 %v1309_v34, %v8514_v7  ;;  %v1311_v27 = vpop.f32.mrb[74].mxu0  ;;  %v9373_v14 = vpack.c.bf16 %v9371_v44, %v9372_v2 }
 0x26c   :  { %6972 = vtanh.f32 %v1308_v36  ;;  %v1312_v39 = vadd.f32 %v1311_v27, %v8508_v37  ;;  %v1313_v3 = vpop.f32.mrb[75].mxu0  ;;  %2564 = vmatprep.mubr.bf16.mxu1 %v1770_v10 }
 0x26d   :  { %6974 = vtanh.f32 %v1310_v51  ;;  %v1314_v9 = vadd.f32 %v1313_v3, %v8514_v7  ;;  %2565 = vmatmul.mubr.bf16.vlgmr.msra.gmra.mrb[48].mxu1 %v1769_v62 }
 0x26e   :  { %v6965_v31 = vpop.eup %6964  ;;  %6976 = vtanh.f32 %v1312_v39  ;;  %1583 = vmatmul.mubr.bf16.gmra.mrb[180].mxu0 %v8214_v33  ;;  %2726 = vmatpush1.bf16.msra.mxu1 %v6564_v25  ;;  %v6587_v39 = vld [vmem:[#allocation7 + $0x274] ss:$8 sps:$4 sm:$0xff]  }
 0x26f   :  { %v6967_v61 = vpop.eup %6966  ;;  %6978 = vtanh.f32 %v1314_v9  ;;  %1590 = vmatprep.mubr.bf16.mxu0 %v8217_v32  ;;  %2727 = vmatprep.subr.bf16.mxu1 %v6569_v8 }
 0x270   :  { %v6969_v35 = vpop.eup %6968 }
 0x271   :  { %v6971_v21 = vpop.eup %6970  ;;  %v1317_v30 = vpop.f32.mrb[76].mxu0  ;;  %v1774_v47 = vpack.c.bf16 %v6969_v35, %v6965_v31 }
 0x272   :  { %v1318_v46 = vadd.f32 %v1317_v30, %v8508_v37  ;;  %v1319_v16 = vpop.f32.mrb[77].mxu0  ;;  %v1775_v23 = vpack.c.bf16 %v6971_v21, %v6967_v61  ;;  %2728 = vmatpush1.bf16.msra.mxu1 %v6567_v54  ;;  %v9374_v61 = vld [vmem:[#allocation41_spill] sm:$0xff] }
 0x273   :  { %v1320_v33 = vadd.f32 %v1319_v16, %v8514_v7  ;;  %v1321_v41 = vpop.f32.mrb[78].mxu0  ;;  %2729 = vmatprep.subr.bf16.mxu1 %v6572_v26  ;;  %v9375_v26 = vld [vmem:[#allocation39_spill] sm:$0xff]  ;;  %v6585_v21 = vld [vmem:[#allocation7 + $0x270] ss:$8 sps:$4 sm:$0xff]  }
 0x274   :  { %6980 = vtanh.f32 %v1318_v46  ;;  %v1322_v32 = vadd.f32 %v1321_v41, %v8508_v37  ;;  %v1323_v55 = vpop.f32.mrb[79].mxu0  ;;  %2574 = vmatprep.mubr.bf16.mxu1 %v1775_v23  ;;  %v9376_v35 = vpack.c.bf16 %v9374_v61, %v9375_v26  ;;  %v9378_v46 = vld [vmem:[#allocation44_spill] sm:$0xff]  ;;  %v9390_v61 = vld [vmem:[#allocation50_spill] sm:$0xff] }
 0x275   :  { %6982 = vtanh.f32 %v1320_v33  ;;  %v1324_v56 = vadd.f32 %v1323_v55, %v8514_v7  ;;  %2575 = vmatmul.mubr.bf16.gmra.mrb[52].mxu1 %v1774_v47  ;;  %v9377_v47 = vld [vmem:[#allocation46_spill] sm:$0xff] }
 0x276   :  { %v6973_v48 = vpop.eup %6972  ;;  %6984 = vtanh.f32 %v1322_v32  ;;  %1591 = vmatmul.mubr.bf16.gmra.mrb[184].mxu0 %v8236_v60  ;;  %2730 = vmatpush1.bf16.msra.mxu1 %v6570_v42  ;;  %v9379_v16 = vpack.c.bf16 %v9377_v47, %v9378_v46 }
 0x277   :  { %v6975_v22 = vpop.eup %6974  ;;  %6986 = vtanh.f32 %v1324_v56  ;;  %1598 = vmatprep.mubr.bf16.mxu0 %v8239_v24  ;;  %2731 = vmatprep.subr.bf16.mxu1 %v6575_v45 }
 0x278   :  { %v6977_v58 = vpop.eup %6976 }
 0x279   :  { %v6979_v38 = vpop.eup %6978  ;;  %v1327_v0 = vpop.f32.mrb[80].mxu0  ;;  %v1779_v20 = vpack.c.bf16 %v6977_v58, %v6973_v48 }
 0x27a   :  { %v1328_v59 = vadd.f32 %v1327_v0, %v8508_v37  ;;  %v1329_v49 = vpop.f32.mrb[81].mxu0  ;;  %v1780_v50 = vpack.c.bf16 %v6979_v38, %v6975_v22  ;;  %2732 = vmatpush1.bf16.msra.mxu1 %v6573_v19  ;;  %v9380_v38 = vld [vmem:[#allocation45_spill] sm:$0xff]  ;;  %v9381_v0 = vld [vmem:[#allocation43_spill] sm:$0xff] }
 0x27b   :  { %v1330_v60 = vadd.f32 %v1329_v49, %v8514_v7  ;;  %v1331_v29 = vpop.f32.mrb[82].mxu0  ;;  %2733 = vmatprep.subr.bf16.mxu1 %v6578_v4  ;;  %v9383_v49 = vld [vmem:[#allocation48_spill] sm:$0xff] }
 0x27c   :  { %6988 = vtanh.f32 %v1328_v59  ;;  %v1332_v24 = vadd.f32 %v1331_v29, %v8508_v37  ;;  %v1333_v1 = vpop.f32.mrb[83].mxu0  ;;  %2584 = vmatprep.mubr.bf16.mxu1 %v1780_v50  ;;  %v9384_v50 = vpack.c.bf16 %v8383_v12, %v9383_v49 }
 0x27d   :  { %6990 = vtanh.f32 %v1330_v60  ;;  %v1334_v40 = vadd.f32 %v1333_v1, %v8514_v7  ;;  %2585 = vmatmul.mubr.bf16.gmra.mrb[56].mxu1 %v1779_v20  ;;  %v9382_v20 = vpack.c.bf16 %v9380_v38, %v9381_v0 }
 0x27e   :  { %v6981_v18 = vpop.eup %6980  ;;  %6992 = vtanh.f32 %v1332_v24  ;;  %1599 = vmatmul.mubr.bf16.gmra.mrb[188].mxu0 %v8256_v13  ;;  %2734 = vmatpush1.bf16.msra.mxu1 %v6576_v52  ;;  %v6582_v13 = vld [vmem:[#allocation7 + $0x260] ss:$8 sps:$4 sm:$0xff]  }
 0x27f   :  { %v6983_v11 = vpop.eup %6982  ;;  %6994 = vtanh.f32 %v1334_v40  ;;  %2371 = vmatprep.mubr.bf16.mxu0 %v9373_v14  ;;  %2735 = vmatprep.subr.bf16.mxu1 %v6581_v53  ;;  %v9385_v14 = vld [vmem:[#allocation49_spill] sm:$0xff] }
 0x280   :  { %v6985_v63 = vpop.eup %6984 }
 0x281   :  { %v6987_v62 = vpop.eup %6986  ;;  %v1337_v36 = vpop.f32.mrb[84].mxu0  ;;  %v1784_v34 = vpack.c.bf16 %v6985_v63, %v6981_v18 }
 0x282   :  { %v1338_v10 = vadd.f32 %v1337_v36, %v8508_v37  ;;  %v1339_v25 = vpop.f32.mrb[85].mxu0  ;;  %v1785_v51 = vpack.c.bf16 %v6987_v62, %v6983_v11  ;;  %2736 = vmatpush1.bf16.msra.mxu1 %v6579_v17  ;;  %v9388_v36 = vpack.c.bf16 %v8401_v43, %v8396_v5 }
 0x283   :  { %v1340_v27 = vadd.f32 %v1339_v25, %v8514_v7  ;;  %v1341_v8 = vpop.f32.mrb[86].mxu0  ;;  %2737 = vmatprep.subr.bf16.mxu1 %v6584_v6  ;;  %v9386_v6 = vld [vmem:[#allocation47_spill] sm:$0xff] }
 0x284   :  { %6996 = vtanh.f32 %v1338_v10  ;;  %v1342_v3 = vadd.f32 %v1341_v8, %v8508_v37  ;;  %v1343_v9 = vpop.f32.mrb[87].mxu0  ;;  %2594 = vmatprep.mubr.bf16.mxu1 %v1785_v51  ;;  %v9387_v63 = vpack.c.bf16 %v9385_v14, %v9386_v6 }
 0x285   :  { %6998 = vtanh.f32 %v1340_v27  ;;  %v1344_v31 = vadd.f32 %v1343_v9, %v8514_v7  ;;  %2595 = vmatmul.mubr.bf16.gmra.mrb[60].mxu1 %v1784_v34 }
 0x286   :  { %v6989_v54 = vpop.eup %6988  ;;  %7000 = vtanh.f32 %v1342_v3  ;;  %2372 = vmatmul.mubr.bf16.vlgmr.msra.gmra.mrb[192].mxu0 %v9376_v35  ;;  %2738 = vmatpush1.bf16.msra.mxu1 %v6582_v13 }
 0x287   :  { %v6991_v30 = vpop.eup %6990  ;;  %7002 = vtanh.f32 %v1344_v31  ;;  %2381 = vmatprep.mubr.bf16.mxu0 %v9379_v16  ;;  %2739 = vmatprep.subr.bf16.mxu1 %v6587_v39 }
 0x288   :  { %v6993_v23 = vpop.eup %6992 }
 0x289   :  { %v6995_v42 = vpop.eup %6994  ;;  %v1347_v33 = vpop.f32.mrb[88].mxu0  ;;  %v1789_v41 = vpack.c.bf16 %v6993_v23, %v6989_v54  ;;  %v9389_v54 = vld [vmem:[#allocation51_spill] sm:$0xff] }
 0x28a   :  { %v1348_v45 = vadd.f32 %v1347_v33, %v8508_v37  ;;  %v1349_v32 = vpop.f32.mrb[89].mxu0  ;;  %v1790_v55 = vpack.c.bf16 %v6995_v42, %v6991_v30  ;;  %2740 = vmatpush1.bf16.msra.mxu1 %v6585_v21  ;;  %v9391_v26 = vpack.c.bf16 %v9389_v54, %v9390_v61  ;;  %v7643_v21 = vmov 0  }
 0x28b   :  { %v1350_v56 = vadd.f32 %v1349_v32, %v8514_v7  ;;  %v1351_v48 = vpop.f32.mrb[90].mxu0 }
 0x28c   :  { %7004 = vtanh.f32 %v1348_v45  ;;  %v1352_v19 = vadd.f32 %v1351_v48, %v8508_v37  ;;  %v1353_v22 = vpop.f32.mrb[91].mxu0  ;;  %2604 = vmatprep.mubr.bf16.mxu1 %v1790_v55 }
 0x28d   :  { %7006 = vtanh.f32 %v1350_v56  ;;  %v1354_v4 = vadd.f32 %v1353_v22, %v8514_v7  ;;  %2605 = vmatmul.mubr.bf16.gmra.mrb[0].mxu1 %v1789_v41 }
 0x28e   :  { %v6997_v58 = vpop.eup %6996  ;;  %7008 = vtanh.f32 %v1352_v19  ;;  %2382 = vmatmul.mubr.bf16.gmra.mrb[196].mxu0 %v9382_v20 }
 0x28f   :  { %v6999_v59 = vpop.eup %6998  ;;  %7010 = vtanh.f32 %v1354_v4  ;;  %2391 = vmatprep.mubr.bf16.mxu0 %v9384_v50 }
 0x290   :  { %v7001_v52 = vpop.eup %7000 }
 0x291   :  { %v7003_v60 = vpop.eup %7002  ;;  %v1357_v29 = vpop.f32.mrb[92].mxu0  ;;  %v1794_v53 = vpack.c.bf16 %v7001_v52, %v6997_v58 }
 0x292   :  { %v1358_v24 = vadd.f32 %v1357_v29, %v8508_v37  ;;  %v1359_v1 = vpop.f32.mrb[93].mxu0  ;;  %v1795_v40 = vpack.c.bf16 %v7003_v60, %v6999_v59 }
 0x293   :  { %v1360_v18 = vadd.f32 %v1359_v1, %v8514_v7  ;;  %v1361_v17 = vpop.f32.mrb[94].mxu0 }
 0x294   :  { %7012 = vtanh.f32 %v1358_v24  ;;  %v1362_v11 = vadd.f32 %v1361_v17, %v8508_v37  ;;  %v1363_v44 = vpop.f32.mrb[95].mxu0  ;;  %2614 = vmatprep.mubr.bf16.mxu1 %v1795_v40 }
 0x295   :  { %7014 = vtanh.f32 %v1360_v18  ;;  %v1364_v12 = vadd.f32 %v1363_v44, %v8514_v7  ;;  %2615 = vmatmul.mubr.bf16.gmra.mrb[4].mxu1 %v1794_v53 }
 0x296   :  { %v7005_v2 = vpop.eup %7004  ;;  %7016 = vtanh.f32 %v1362_v11  ;;  %2392 = vmatmul.mubr.bf16.gmra.mrb[200].mxu0 %v9387_v63 }
 0x297   :  { %v7007_v62 = vpop.eup %7006  ;;  %7018 = vtanh.f32 %v1364_v12  ;;  %2401 = vmatprep.mubr.bf16.mxu0 %v9388_v36 }
 0x298   :  { %v7009_v34 = vpop.eup %7008 }
 0x299   :  { %v7011_v10 = vpop.eup %7010  ;;  %v1367_v25 = vpop.f32.mrb[96].mxu0  ;;  %v1799_v51 = vpack.c.bf16 %v7009_v34, %v7005_v2 }
 0x29a   :  { %v1368_v13 = vadd.f32 %v1367_v25, %v8508_v37  ;;  %v1369_v27 = vpop.f32.mrb[97].mxu0  ;;  %v1800_v8 = vpack.c.bf16 %v7011_v10, %v7007_v62 }
 0x29b   :  { %v1370_v39 = vadd.f32 %v1369_v27, %v8514_v7  ;;  %v1371_v3 = vpop.f32.mrb[98].mxu0 }
 0x29c   :  { %7020 = vtanh.f32 %v1368_v13  ;;  %v1372_v9 = vadd.f32 %v1371_v3, %v8508_v37  ;;  %v1373_v31 = vpop.f32.mrb[99].mxu0  ;;  %2624 = vmatprep.mubr.bf16.mxu1 %v1800_v8 }
 0x29d   :  { %7022 = vtanh.f32 %v1370_v39  ;;  %v1374_v5 = vadd.f32 %v1373_v31, %v8514_v7  ;;  %2625 = vmatmul.mubr.bf16.gmra.mrb[8].mxu1 %v1799_v51 }
 0x29e   :  { %v7013_v43 = vpop.eup %7012  ;;  %7024 = vtanh.f32 %v1372_v9  ;;  %2402 = vmatmul.mubr.bf16.gmra.mrb[204].mxu0 %v9391_v26 }
 0x29f   :  { %v7015_v35 = vpop.eup %7014  ;;  %7026 = vtanh.f32 %v1374_v5  ;;  %3313 = vmatprep.mubr.bf16.mxu0 %v7643_v21 }
 0x2a0   :  { %v7017_v30 = vpop.eup %7016 }
 0x2a1   :  { %v7019_v47 = vpop.eup %7018  ;;  %v1377_v46 = vpop.f32.mrb[100].mxu0  ;;  %v1804_v16 = vpack.c.bf16 %v7017_v30, %v7013_v43 }
 0x2a2   :  { %v1378_v23 = vadd.f32 %v1377_v46, %v8508_v37  ;;  %v1379_v42 = vpop.f32.mrb[101].mxu0  ;;  %v1805_v33 = vpack.c.bf16 %v7019_v47, %v7015_v35 }
 0x2a3   :  { %v1380_v41 = vadd.f32 %v1379_v42, %v8514_v7  ;;  %v1381_v45 = vpop.f32.mrb[102].mxu0 }
 0x2a4   :  { %7028 = vtanh.f32 %v1378_v23  ;;  %v1382_v32 = vadd.f32 %v1381_v45, %v8508_v37  ;;  %v1383_v55 = vpop.f32.mrb[103].mxu0  ;;  %2634 = vmatprep.mubr.bf16.mxu1 %v1805_v33 }
 0x2a5   :  { %7030 = vtanh.f32 %v1380_v41  ;;  %v1384_v56 = vadd.f32 %v1383_v55, %v8514_v7  ;;  %2635 = vmatmul.mubr.bf16.gmra.mrb[12].mxu1 %v1804_v16 }
 0x2a6   :  { %v7021_v48 = vpop.eup %7020  ;;  %7032 = vtanh.f32 %v1382_v32 }
 0x2a7   :  { %v7023_v19 = vpop.eup %7022  ;;  %7034 = vtanh.f32 %v1384_v56 }
 0x2a8   :  { %v7025_v22 = vpop.eup %7024 }
 0x2a9   :  { %v7027_v4 = vpop.eup %7026  ;;  %v1387_v58 = vpop.f32.mrb[104].mxu0  ;;  %v1809_v38 = vpack.c.bf16 %v7025_v22, %v7021_v48 }
 0x2aa   :  { %v1388_v0 = vadd.f32 %v1387_v58, %v8508_v37  ;;  %v1389_v20 = vpop.f32.mrb[105].mxu0  ;;  %v1810_v59 = vpack.c.bf16 %v7027_v4, %v7023_v19 }
 0x2ab   :  { %v1390_v49 = vadd.f32 %v1389_v20, %v8514_v7  ;;  %v1391_v50 = vpop.f32.mrb[106].mxu0 }
 0x2ac   :  { %7036 = vtanh.f32 %v1388_v0  ;;  %v1392_v52 = vadd.f32 %v1391_v50, %v8508_v37  ;;  %v1393_v60 = vpop.f32.mrb[107].mxu0  ;;  %2644 = vmatprep.mubr.bf16.mxu1 %v1810_v59 }
 0x2ad   :  { %7038 = vtanh.f32 %v1390_v49  ;;  %v1394_v29 = vadd.f32 %v1393_v60, %v8514_v7  ;;  %2645 = vmatmul.mubr.bf16.gmra.mrb[16].mxu1 %v1809_v38 }
 0x2ae   :  { %v7029_v53 = vpop.eup %7028  ;;  %7040 = vtanh.f32 %v1392_v52 }
 0x2af   :  { %v7031_v24 = vpop.eup %7030  ;;  %7042 = vtanh.f32 %v1394_v29 }
 0x2b0   :  { %v7033_v1 = vpop.eup %7032 }
 0x2b1   :  { %v7035_v40 = vpop.eup %7034  ;;  %v1397_v18 = vpop.f32.mrb[108].mxu0  ;;  %v1814_v17 = vpack.c.bf16 %v7033_v1, %v7029_v53 }
 0x2b2   :  { %v1398_v11 = vadd.f32 %v1397_v18, %v8508_v37  ;;  %v1399_v44 = vpop.f32.mrb[109].mxu0  ;;  %v1815_v12 = vpack.c.bf16 %v7035_v40, %v7031_v24 }
 0x2b3   :  { %v1400_v2 = vadd.f32 %v1399_v44, %v8514_v7  ;;  %v1401_v14 = vpop.f32.mrb[110].mxu0 }
 0x2b4   :  { %7044 = vtanh.f32 %v1398_v11  ;;  %v1402_v6 = vadd.f32 %v1401_v14, %v8508_v37  ;;  %v1403_v63 = vpop.f32.mrb[111].mxu0  ;;  %2654 = vmatprep.mubr.bf16.mxu1 %v1815_v12 }
 0x2b5   :  { %7046 = vtanh.f32 %v1400_v2  ;;  %v1404_v62 = vadd.f32 %v1403_v63, %v8514_v7  ;;  %2655 = vmatmul.mubr.bf16.gmra.mrb[20].mxu1 %v1814_v17  ;;  %v637_v63 = vsub.s32 4, %v9363_v28 }
 0x2b6   :  { %v7037_v36 = vpop.eup %7036  ;;  %7048 = vtanh.f32 %v1402_v6 }
 0x2b7   :  { %v7039_v34 = vpop.eup %7038  ;;  %7050 = vtanh.f32 %v1404_v62 }
 0x2b8   :  { %v7041_v10 = vpop.eup %7040 }
 0x2b9   :  { %v7043_v25 = vpop.eup %7042  ;;  %v1407_v51 = vpop.f32.mrb[112].mxu0  ;;  %v1819_v13 = vpack.c.bf16 %v7041_v10, %v7037_v36 }
 0x2ba   :  { %v1408_v27 = vadd.f32 %v1407_v51, %v8508_v37  ;;  %v1409_v8 = vpop.f32.mrb[113].mxu0  ;;  %v1820_v39 = vpack.c.bf16 %v7043_v25, %v7039_v34  ;;  %v7468_v51 = vld [vmem:[%s9217_s2] sm:$0x1f] }
 0x2bb   :  { %v1410_v3 = vadd.f32 %v1409_v8, %v8514_v7  ;;  %v1411_v9 = vpop.f32.mrb[114].mxu0 }
 0x2bc   :  { %7052 = vtanh.f32 %v1408_v27  ;;  %v1412_v31 = vadd.f32 %v1411_v9, %v8508_v37  ;;  %v1413_v5 = vpop.f32.mrb[115].mxu0  ;;  %2664 = vmatprep.mubr.bf16.mxu1 %v1820_v39 }
 0x2bd   :  { %7054 = vtanh.f32 %v1410_v3  ;;  %v1414_v43 = vadd.f32 %v1413_v5, %v8514_v7  ;;  %2665 = vmatmul.mubr.bf16.gmra.mrb[24].mxu1 %v1819_v13 }
 0x2be   :  { %v7045_v54 = vpop.eup %7044  ;;  %7056 = vtanh.f32 %v1412_v31 }
 0x2bf   :  { %v7047_v61 = vpop.eup %7046  ;;  %7058 = vtanh.f32 %v1414_v43 }
 0x2c0   :  { %v7049_v26 = vpop.eup %7048 }
 0x2c1   :  { %v7051_v35 = vpop.eup %7050  ;;  %v1417_v30 = vpop.f32.mrb[116].mxu0  ;;  %v1824_v47 = vpack.c.bf16 %v7049_v26, %v7045_v54 }
 0x2c2   :  { %v1418_v46 = vadd.f32 %v1417_v30, %v8508_v37  ;;  %v1419_v16 = vpop.f32.mrb[117].mxu0  ;;  %v1825_v23 = vpack.c.bf16 %v7051_v35, %v7047_v61 }
 0x2c3   :  { %v1420_v42 = vadd.f32 %v1419_v16, %v8514_v7  ;;  %v1421_v33 = vpop.f32.mrb[118].mxu0 }
 0x2c4   :  { %7060 = vtanh.f32 %v1418_v46  ;;  %v1422_v41 = vadd.f32 %v1421_v33, %v8508_v37  ;;  %v1423_v45 = vpop.f32.mrb[119].mxu0  ;;  %2674 = vmatprep.mubr.bf16.mxu1 %v1825_v23 }
 0x2c5   :  { %7062 = vtanh.f32 %v1420_v42  ;;  %v1424_v32 = vadd.f32 %v1423_v45, %v8514_v7  ;;  %2675 = vmatmul.mubr.bf16.gmra.mrb[28].mxu1 %v1824_v47 }
 0x2c6   :  { %v7053_v55 = vpop.eup %7052  ;;  %7064 = vtanh.f32 %v1422_v41 }
 0x2c7   :  { %v7055_v56 = vpop.eup %7054  ;;  %7066 = vtanh.f32 %v1424_v32 }
 0x2c8   :  { %v7057_v48 = vpop.eup %7056 }
 0x2c9   :  { %v7059_v19 = vpop.eup %7058  ;;  %v1427_v22 = vpop.f32.mrb[120].mxu0  ;;  %v1829_v4 = vpack.c.bf16 %v7057_v48, %v7053_v55 }
 0x2ca   :  { %v1428_v58 = vadd.f32 %v1427_v22, %v8508_v37  ;;  %v1429_v38 = vpop.f32.mrb[121].mxu0  ;;  %v1830_v0 = vpack.c.bf16 %v7059_v19, %v7055_v56 }
 0x2cb   :  { %v1430_v20 = vadd.f32 %v1429_v38, %v8514_v7  ;;  %v1431_v59 = vpop.f32.mrb[122].mxu0 }
 0x2cc   :  { %7068 = vtanh.f32 %v1428_v58  ;;  %v1432_v49 = vadd.f32 %v1431_v59, %v8508_v37  ;;  %v1433_v50 = vpop.f32.mrb[123].mxu0  ;;  %2684 = vmatprep.mubr.bf16.mxu1 %v1830_v0 }
 0x2cd   :  { %7070 = vtanh.f32 %v1430_v20  ;;  %v1434_v52 = vadd.f32 %v1433_v50, %v8514_v7  ;;  %2685 = vmatmul.mubr.bf16.gmra.mrb[32].mxu1 %v1829_v4 }
 0x2ce   :  { %v7061_v60 = vpop.eup %7060  ;;  %7072 = vtanh.f32 %v1432_v49 }
 0x2cf   :  { %v7063_v29 = vpop.eup %7062  ;;  %7074 = vtanh.f32 %v1434_v52 }
 0x2d0   :  { %v7065_v53 = vpop.eup %7064 }
 0x2d1   :  { %v7067_v24 = vpop.eup %7066  ;;  %v1437_v1 = vpop.f32.mrb[124].mxu0  ;;  %v1834_v40 = vpack.c.bf16 %v7065_v53, %v7061_v60 }
 0x2d2   :  { %v1438_v18 = vadd.f32 %v1437_v1, %v8508_v37  ;;  %v1439_v17 = vpop.f32.mrb[125].mxu0  ;;  %v1835_v11 = vpack.c.bf16 %v7067_v24, %v7063_v29 }
 0x2d3   :  { %v1440_v44 = vadd.f32 %v1439_v17, %v8514_v7  ;;  %v1441_v12 = vpop.f32.mrb[126].mxu0  ;;  %v6590_v17 = vld [vmem:[#allocation8 + $0x4] ss:$20 sps:$4 sm:$0xff]  }
 0x2d4   :  { %7076 = vtanh.f32 %v1438_v18  ;;  %v1442_v2 = vadd.f32 %v1441_v12, %v8508_v37  ;;  %v1443_v14 = vpop.f32.mrb[127].mxu0  ;;  %2694 = vmatprep.mubr.bf16.mxu1 %v1835_v11  ;;  %v8620_v37 = vrot.slane %v7468_v51, %v637_v63  ;;  %v6588_v18 = vld [vmem:[#allocation8] ss:$20 sps:$4 sm:$0xff]   ;;  %3281 = vmatprep.subr.bf16.mxu0 %v6590_v17  ;;  %v6591_v12 = vld [vmem:[#allocation8 + $0x28] ss:$20 sps:$4 sm:$0xff]  }
 0x2d5   :  { %7078 = vtanh.f32 %v1440_v44  ;;  %v1444_v6 = vadd.f32 %v1443_v14, %v8514_v7  ;;  %2695 = vmatmul.mubr.bf16.gmra.mrb[36].mxu1 %v1834_v40  ;;  %v6593_v11 = vld [vmem:[#allocation8 + $0x2c] ss:$20 sps:$4 sm:$0xff]   ;;  %3282 = vmatpush1.bf16.msra.mxu0 %v6588_v18  ;;  %v6596_v14 = vld [vmem:[#allocation8 + $0x54] ss:$20 sps:$4 sm:$0xff]  }
 0x2d6   :  { %v7069_v62 = vpop.eup %7068  ;;  %7080 = vtanh.f32 %v1442_v2  ;;  %3283 = vmatprep.subr.bf16.mxu0 %v6593_v11 }
 0x2d7   :  { %v7071_v36 = vpop.eup %7070  ;;  %7082 = vtanh.f32 %v1444_v6 }
 0x2d8   :  { %v7073_v34 = vpop.eup %7072 }
 0x2d9   :  { %v7075_v10 = vpop.eup %7074  ;;  %v5758_v25 = vpop.f32.mrb[128].mxu0  ;;  %v1839_v13 = vpack.c.bf16 %v7073_v34, %v7069_v62  ;;  %3284 = vmatpush1.bf16.msra.mxu0 %v6591_v12 }
 0x2da   :  { %v5759_v7 = vpop.f32.mrb[129].mxu0  ;;  %v1840_v27 = vpack.c.bf16 %v7075_v10, %v7071_v36  ;;  %3285 = vmatprep.subr.bf16.mxu0 %v6596_v14 }
 0x2db   :  { %v5760_v8 = vadd.f32 %v5759_v7, %v5758_v25  ;;  %v5761_v39 = vpop.f32.mrb[130].mxu0 }
 0x2dc   :  { %v5762_v3 = vpop.f32.mrb[131].mxu0  ;;  %2704 = vmatprep.mubr.bf16.mxu1 %v1840_v27 }
 0x2dd   :  { %v1481_v9 = vadd.f32 %v5760_v8, %v8620_v37  ;;  %v5763_v31 = vadd.f32 %v5762_v3, %v5761_v39  ;;  %2705 = vmatmul.mubr.bf16.gmra.mrb[40].mxu1 %v1839_v13  ;;  %v6594_v13 = vld [vmem:[#allocation8 + $0x50] ss:$20 sps:$4 sm:$0xff]   ;;  %v6597_v3 = vld [vmem:[#allocation8 + $0x78] ss:$20 sps:$4 sm:$0xff]  }
 0x2de   :  { %v7077_v5 = vpop.eup %7076  ;;  %v6599_v8 = vld [vmem:[#allocation8 + $0x7c] ss:$20 sps:$4 sm:$0xff]   ;;  %3286 = vmatpush1.bf16.msra.mxu0 %v6594_v13 }
 0x2df   :  { %v7079_v43 = vpop.eup %7078  ;;  %v1484_v54 = vadd.f32 %v5763_v31, %v8620_v37  ;;  %7084 = vtanh.f32 %v1481_v9  ;;  %3287 = vmatprep.subr.bf16.mxu0 %v6599_v8  ;;  %v6602_v31 = vld [vmem:[#allocation8 + $0xa4] ss:$20 sps:$4 sm:$0xff]  }
 0x2e0   :  { %v7081_v61 = vpop.eup %7080 }
 0x2e1   :  { %v7083_v26 = vpop.eup %7082  ;;  %7086 = vtanh.f32 %v1484_v54  ;;  %v5764_v35 = vpop.f32.mrb[132].mxu0  ;;  %v1844_v30 = vpack.c.bf16 %v7081_v61, %v7077_v5 }
 0x2e2   :  { %v5765_v47 = vpop.f32.mrb[133].mxu0  ;;  %v1845_v46 = vpack.c.bf16 %v7083_v26, %v7079_v43  ;;  %3288 = vmatpush1.bf16.msra.mxu0 %v6597_v3 }
 0x2e3   :  { %v5766_v16 = vadd.f32 %v5765_v47, %v5764_v35  ;;  %v5767_v23 = vpop.f32.mrb[134].mxu0  ;;  %v6600_v47 = vld [vmem:[#allocation8 + $0xa0] ss:$20 sps:$4 sm:$0xff]   ;;  %3289 = vmatprep.subr.bf16.mxu0 %v6602_v31 }
 0x2e4   :  { %v5768_v42 = vpop.f32.mrb[135].mxu0  ;;  %2714 = vmatprep.mubr.bf16.mxu1 %v1845_v46 }
 0x2e5   :  { %v1489_v33 = vadd.f32 %v5766_v16, %v8620_v37  ;;  %v5769_v41 = vadd.f32 %v5768_v42, %v5767_v23  ;;  %2715 = vmatmul.mubr.bf16.gmra.mrb[44].mxu1 %v1844_v30  ;;  %v6605_v23 = vld [vmem:[#allocation8 + $0xcc] ss:$20 sps:$4 sm:$0xff]  }
 0x2e6   :  { %2757 = vmatprep.mubr.bf16.mxu1 %v7643_v21  ;;  %3290 = vmatpush1.bf16.msra.mxu0 %v6600_v47 }
 0x2e7   :  { %v1492_v45 = vadd.f32 %v5769_v41, %v8620_v37  ;;  %7088 = vtanh.f32 %v1489_v33  ;;  %v6603_v33 = vld [vmem:[#allocation8 + $0xc8] ss:$20 sps:$4 sm:$0xff]   ;;  %3291 = vmatprep.subr.bf16.mxu0 %v6605_v23 }
 0x2e9   :  { %7090 = vtanh.f32 %v1492_v45  ;;  %v5770_v32 = vpop.f32.mrb[136].mxu0  ;;  %v7085_v55 = vpop.eup %7084  ;;  %v6608_v45 = vld [vmem:[#allocation8 + $0xf4] ss:$20 sps:$4 sm:$0xff]  }
 0x2ea   :  { %v5771_v56 = vpop.f32.mrb[137].mxu0  ;;  %3292 = vmatpush1.bf16.msra.mxu0 %v6603_v33 }
 0x2eb   :  { %v7087_v48 = vpop.eup %7086  ;;  %v5772_v19 = vadd.f32 %v5771_v56, %v5770_v32  ;;  %v5773_v22 = vpop.f32.mrb[138].mxu0  ;;  %3293 = vmatprep.subr.bf16.mxu0 %v6608_v45 }
 0x2ec   :  { %v5774_v4 = vpop.f32.mrb[139].mxu0  ;;  %v1771_v58 = vpack.c.bf16 %v7087_v48, %v7085_v55 }
 0x2ed   :  { %v1497_v38 = vadd.f32 %v5772_v19, %v8620_v37  ;;  %v5775_v0 = vadd.f32 %v5774_v4, %v5773_v22 }
 0x2ee   :  { %2758 = vmatmul.mubr.bf16.vlgmr.msra.gmra.mrb[48].mxu1 %v1771_v58  ;;  %v6606_v58 = vld [vmem:[#allocation8 + $0xf0] ss:$20 sps:$4 sm:$0xff]  }
 0x2ef   :  { %v1500_v20 = vadd.f32 %v5775_v0, %v8620_v37  ;;  %2767 = vmatprep.mubr.bf16.mxu1 %v7643_v21  ;;  %7092 = vtanh.f32 %v1497_v38  ;;  %3294 = vmatpush1.bf16.msra.mxu0 %v6606_v58 }
 0x2f1   :  { %7094 = vtanh.f32 %v1500_v20  ;;  %v5776_v59 = vpop.f32.mrb[140].mxu0  ;;  %v7089_v49 = vpop.eup %7088 }
 0x2f2   :  { %v5777_v50 = vpop.f32.mrb[141].mxu0 }
 0x2f3   :  { %v7091_v52 = vpop.eup %7090  ;;  %v5778_v60 = vadd.f32 %v5777_v50, %v5776_v59  ;;  %v5779_v29 = vpop.f32.mrb[142].mxu0 }
 0x2f4   :  { %v5780_v53 = vpop.f32.mrb[143].mxu0  ;;  %v1776_v24 = vpack.c.bf16 %v7091_v52, %v7089_v49 }
 0x2f5   :  { %v1505_v1 = vadd.f32 %v5778_v60, %v8620_v37  ;;  %v5781_v40 = vadd.f32 %v5780_v53, %v5779_v29 }
 0x2f6   :  { %2768 = vmatmul.mubr.bf16.gmra.mrb[52].mxu1 %v1776_v24 }
 0x2f7   :  { %v1508_v44 = vadd.f32 %v5781_v40, %v8620_v37  ;;  %2777 = vmatprep.mubr.bf16.mxu1 %v7643_v21  ;;  %7096 = vtanh.f32 %v1505_v1 }
 0x2f9   :  { %7098 = vtanh.f32 %v1508_v44  ;;  %v5782_v2 = vpop.f32.mrb[144].mxu0  ;;  %v7093_v6 = vpop.eup %7092 }
 0x2fa   :  { %v5783_v62 = vpop.f32.mrb[145].mxu0 }
 0x2fb   :  { %v7095_v36 = vpop.eup %7094  ;;  %v5784_v34 = vadd.f32 %v5783_v62, %v5782_v2  ;;  %v5785_v10 = vpop.f32.mrb[146].mxu0 }
 0x2fc   :  { %v5786_v25 = vpop.f32.mrb[147].mxu0  ;;  %v1781_v51 = vpack.c.bf16 %v7095_v36, %v7093_v6 }
 0x2fd   :  { %v1513_v7 = vadd.f32 %v5784_v34, %v8620_v37  ;;  %v5787_v27 = vadd.f32 %v5786_v25, %v5785_v10 }
 0x2fe   :  { %2778 = vmatmul.mubr.bf16.gmra.mrb[56].mxu1 %v1781_v51 }
 0x2ff   :  { %v1516_v39 = vadd.f32 %v5787_v27, %v8620_v37  ;;  %2787 = vmatprep.mubr.bf16.mxu1 %v7643_v21  ;;  %7100 = vtanh.f32 %v1513_v7 }
 0x301   :  { %7102 = vtanh.f32 %v1516_v39  ;;  %v5788_v9 = vpop.f32.mrb[148].mxu0  ;;  %v7097_v5 = vpop.eup %7096 }
 0x302   :  { %v5789_v43 = vpop.f32.mrb[149].mxu0 }
 0x303   :  { %v7099_v54 = vpop.eup %7098  ;;  %v5790_v61 = vadd.f32 %v5789_v43, %v5788_v9  ;;  %v5791_v26 = vpop.f32.mrb[150].mxu0 }
 0x304   :  { %v5792_v35 = vpop.f32.mrb[151].mxu0  ;;  %v1786_v30 = vpack.c.bf16 %v7099_v54, %v7097_v5 }
 0x305   :  { %v1521_v46 = vadd.f32 %v5790_v61, %v8620_v37  ;;  %v5793_v16 = vadd.f32 %v5792_v35, %v5791_v26 }
 0x306   :  { %2788 = vmatmul.mubr.bf16.gmra.mrb[60].mxu1 %v1786_v30 }
 0x307   :  { %v1524_v42 = vadd.f32 %v5793_v16, %v8620_v37  ;;  %2797 = vmatprep.mubr.bf16.mxu1 %v7643_v21  ;;  %7104 = vtanh.f32 %v1521_v46 }
 0x309   :  { %7106 = vtanh.f32 %v1524_v42  ;;  %v5794_v41 = vpop.f32.mrb[152].mxu0  ;;  %v7101_v32 = vpop.eup %7100 }
 0x30a   :  { %v5795_v55 = vpop.f32.mrb[153].mxu0 }
 0x30b   :  { %v7103_v56 = vpop.eup %7102  ;;  %v5796_v48 = vadd.f32 %v5795_v55, %v5794_v41  ;;  %v5797_v19 = vpop.f32.mrb[154].mxu0 }
 0x30c   :  { %v5798_v22 = vpop.f32.mrb[155].mxu0  ;;  %v1791_v4 = vpack.c.bf16 %v7103_v56, %v7101_v32 }
 0x30d   :  { %v1529_v38 = vadd.f32 %v5796_v48, %v8620_v37  ;;  %v5799_v0 = vadd.f32 %v5798_v22, %v5797_v19 }
 0x30e   :  { %2798 = vmatmul.mubr.bf16.gmra.mrb[0].mxu1 %v1791_v4 }
 0x30f   :  { %v1532_v20 = vadd.f32 %v5799_v0, %v8620_v37  ;;  %2807 = vmatprep.mubr.bf16.mxu1 %v7643_v21  ;;  %7108 = vtanh.f32 %v1529_v38 }
 0x311   :  { %7110 = vtanh.f32 %v1532_v20  ;;  %v5800_v59 = vpop.f32.mrb[156].mxu0  ;;  %v7105_v49 = vpop.eup %7104 }
 0x312   :  { %v5801_v50 = vpop.f32.mrb[157].mxu0 }
 0x313   :  { %v7107_v52 = vpop.eup %7106  ;;  %v5802_v60 = vadd.f32 %v5801_v50, %v5800_v59  ;;  %v5803_v29 = vpop.f32.mrb[158].mxu0 }
 0x314   :  { %v5804_v53 = vpop.f32.mrb[159].mxu0  ;;  %v1796_v24 = vpack.c.bf16 %v7107_v52, %v7105_v49 }
 0x315   :  { %v1537_v1 = vadd.f32 %v5802_v60, %v8620_v37  ;;  %v5805_v40 = vadd.f32 %v5804_v53, %v5803_v29 }
 0x316   :  { %2808 = vmatmul.mubr.bf16.gmra.mrb[4].mxu1 %v1796_v24 }
 0x317   :  { %v1540_v18 = vadd.f32 %v5805_v40, %v8620_v37  ;;  %2817 = vmatprep.mubr.bf16.mxu1 %v7643_v21  ;;  %7112 = vtanh.f32 %v1537_v1 }
 0x319   :  { %7114 = vtanh.f32 %v1540_v18  ;;  %v5806_v17 = vpop.f32.mrb[160].mxu0  ;;  %v7109_v11 = vpop.eup %7108 }
 0x31a   :  { %v5807_v44 = vpop.f32.mrb[161].mxu0 }
 0x31b   :  { %v7111_v12 = vpop.eup %7110  ;;  %v5808_v2 = vadd.f32 %v5807_v44, %v5806_v17  ;;  %v5809_v14 = vpop.f32.mrb[162].mxu0  ;;  %v6611_v17 = vld [vmem:[#allocation8 + $0x11c] ss:$20 sps:$4 sm:$0xff]  }
 0x31c   :  { %v5810_v6 = vpop.f32.mrb[163].mxu0  ;;  %v1801_v62 = vpack.c.bf16 %v7111_v12, %v7109_v11  ;;  %3295 = vmatprep.subr.bf16.mxu0 %v6611_v17  ;;  %v1927_v17 = vld [vmem:[%s9219_s4] sm:$0x3] }
 0x31d   :  { %v1545_v36 = vadd.f32 %v5808_v2, %v8620_v37  ;;  %v5811_v34 = vadd.f32 %v5810_v6, %v5809_v14  ;;  %v6609_v2 = vld [vmem:[#allocation8 + $0x118] ss:$20 sps:$4 sm:$0xff]  }
 0x31e   :  { %2818 = vmatmul.mubr.bf16.gmra.mrb[8].mxu1 %v1801_v62  ;;  %3296 = vmatpush1.bf16.msra.mxu0 %v6609_v2 }
 0x31f   :  { %v1548_v10 = vadd.f32 %v5811_v34, %v8620_v37  ;;  %2827 = vmatprep.mubr.bf16.mxu1 %v7643_v21  ;;  %7116 = vtanh.f32 %v1545_v36 }
 0x321   :  { %7118 = vtanh.f32 %v1548_v10  ;;  %v5812_v25 = vpop.f32.mrb[164].mxu0  ;;  %v7113_v51 = vpop.eup %7112  ;;  %v6614_v10 = vld [vmem:[#allocation8 + $0xc] ss:$20 sps:$4 sm:$0xff]  }
 0x322   :  { %v5813_v13 = vpop.f32.mrb[165].mxu0  ;;  %3474 = vmatprep.subr.bf16.mxu0 %v6614_v10 }
 0x323   :  { %v7115_v7 = vpop.eup %7114  ;;  %v5814_v27 = vadd.f32 %v5813_v13, %v5812_v25  ;;  %v5815_v8 = vpop.f32.mrb[166].mxu0 }
 0x324   :  { %v5816_v39 = vpop.f32.mrb[167].mxu0  ;;  %v1806_v3 = vpack.c.bf16 %v7115_v7, %v7113_v51 }
 0x325   :  { %v1553_v9 = vadd.f32 %v5814_v27, %v8620_v37  ;;  %v5817_v31 = vadd.f32 %v5816_v39, %v5815_v8 }
 0x326   :  { %2828 = vmatmul.mubr.bf16.gmra.mrb[12].mxu1 %v1806_v3 }
 0x327   :  { %v1556_v5 = vadd.f32 %v5817_v31, %v8620_v37  ;;  %2837 = vmatprep.mubr.bf16.mxu1 %v7643_v21  ;;  %7120 = vtanh.f32 %v1553_v9 }
 0x329   :  { %7122 = vtanh.f32 %v1556_v5  ;;  %v5818_v43 = vpop.f32.mrb[168].mxu0  ;;  %v7117_v54 = vpop.eup %7116 }
 0x32a   :  { %v5819_v61 = vpop.f32.mrb[169].mxu0 }
 0x32b   :  { %v7119_v26 = vpop.eup %7118  ;;  %v5820_v35 = vadd.f32 %v5819_v61, %v5818_v43  ;;  %v5821_v30 = vpop.f32.mrb[170].mxu0 }
 0x32c   :  { %v5822_v47 = vpop.f32.mrb[171].mxu0  ;;  %v1811_v46 = vpack.c.bf16 %v7119_v26, %v7117_v54 }
 0x32d   :  { %v1561_v16 = vadd.f32 %v5820_v35, %v8620_v37  ;;  %v5823_v23 = vadd.f32 %v5822_v47, %v5821_v30 }
 0x32e   :  { %2838 = vmatmul.mubr.bf16.gmra.mrb[16].mxu1 %v1811_v46 }
 0x32f   :  { %v1564_v42 = vadd.f32 %v5823_v23, %v8620_v37  ;;  %2847 = vmatprep.mubr.bf16.mxu1 %v7643_v21  ;;  %7124 = vtanh.f32 %v1561_v16 }
 0x331   :  { %7126 = vtanh.f32 %v1564_v42  ;;  %v5824_v33 = vpop.f32.mrb[172].mxu0  ;;  %v7121_v41 = vpop.eup %7120 }
 0x332   :  { %v5825_v45 = vpop.f32.mrb[173].mxu0 }
 0x333   :  { %v7123_v32 = vpop.eup %7122  ;;  %v5826_v55 = vadd.f32 %v5825_v45, %v5824_v33  ;;  %v5827_v56 = vpop.f32.mrb[174].mxu0 }
 0x334   :  { %v5828_v48 = vpop.f32.mrb[175].mxu0  ;;  %v1816_v19 = vpack.c.bf16 %v7123_v32, %v7121_v41 }
 0x335   :  { %v1569_v22 = vadd.f32 %v5826_v55, %v8620_v37  ;;  %v5829_v4 = vadd.f32 %v5828_v48, %v5827_v56 }
 0x336   :  { %2848 = vmatmul.mubr.bf16.gmra.mrb[20].mxu1 %v1816_v19 }
 0x337   :  { %v1572_v58 = vadd.f32 %v5829_v4, %v8620_v37  ;;  %2857 = vmatprep.mubr.bf16.mxu1 %v7643_v21  ;;  %7128 = vtanh.f32 %v1569_v22 }
 0x339   :  { %7130 = vtanh.f32 %v1572_v58  ;;  %v5830_v38 = vpop.f32.mrb[176].mxu0  ;;  %v7125_v0 = vpop.eup %7124 }
 0x33a   :  { %v5831_v20 = vpop.f32.mrb[177].mxu0 }
 0x33b   :  { %v7127_v59 = vpop.eup %7126  ;;  %v5832_v49 = vadd.f32 %v5831_v20, %v5830_v38  ;;  %v5833_v50 = vpop.f32.mrb[178].mxu0 }
 0x33c   :  { %v5834_v52 = vpop.f32.mrb[179].mxu0  ;;  %v1821_v60 = vpack.c.bf16 %v7127_v59, %v7125_v0 }
 0x33d   :  { %v1577_v29 = vadd.f32 %v5832_v49, %v8620_v37  ;;  %v5835_v53 = vadd.f32 %v5834_v52, %v5833_v50 }
 0x33e   :  { %2858 = vmatmul.mubr.bf16.gmra.mrb[24].mxu1 %v1821_v60 }
 0x33f   :  { %v1580_v24 = vadd.f32 %v5835_v53, %v8620_v37  ;;  %2867 = vmatprep.mubr.bf16.mxu1 %v7643_v21  ;;  %7132 = vtanh.f32 %v1577_v29 }
 0x341   :  { %7134 = vtanh.f32 %v1580_v24  ;;  %v5836_v1 = vpop.f32.mrb[180].mxu0  ;;  %v7129_v40 = vpop.eup %7128  ;;  %v6633_v24 = vld [vmem:[#allocation10] ss:$8 sps:$4 sm:$0xff]  }
 0x342   :  { %v5837_v18 = vpop.f32.mrb[181].mxu0 }
 0x343   :  { %v7131_v11 = vpop.eup %7130  ;;  %v5838_v44 = vadd.f32 %v5837_v18, %v5836_v1  ;;  %v5839_v12 = vpop.f32.mrb[182].mxu0  ;;  %v6635_v1 = vld [vmem:[#allocation10 + $0x4] ss:$8 sps:$4 sm:$0xff]   ;;  %v6638_v18 = vld [vmem:[#allocation10 + $0x14] ss:$8 sps:$4 sm:$0xff]  }
 0x344   :  { %v5840_v14 = vpop.f32.mrb[183].mxu0  ;;  %v1826_v6 = vpack.c.bf16 %v7131_v11, %v7129_v40  ;;  %4560 = vmatprep.subr.bf16.mxu1 %v6635_v1  ;;  %v6636_v40 = vld [vmem:[#allocation10 + $0x10] ss:$8 sps:$4 sm:$0xff]   ;;  %v9392_v11 = vld [vmem:[#allocation36_spill] sm:$0xff]  ;;  %v6621_v1 = vld [vmem:[#allocation8 + $0x80] ss:$20 sps:$4 sm:$0xff]  }
 0x345   :  { %v1585_v62 = vadd.f32 %v5838_v44, %v8620_v37  ;;  %v5841_v36 = vadd.f32 %v5840_v14, %v5839_v12  ;;  %4561 = vmatpush1.bf16.msra.mxu1 %v6633_v24  ;;  %v8692_v44 = vrot.slane %v1927_v17, %v9392_v11  ;;  %v9393_v12 = vld [vmem:[#allocation38_spill] sm:$0xff]  ;;  %v6642_v14 = vld [vmem:[#allocation10 + $0x20] ss:$8 sps:$4 sm:$0xff]  }
 0x346   :  { %2868 = vmatmul.mubr.bf16.gmra.mrb[28].mxu1 %v1826_v6  ;;  %4562 = vmatprep.subr.bf16.mxu1 %v6638_v18  ;;  %v8695_v2 = vrot.slane %v1927_v17, %v9393_v12  ;;  %v6644_v6 = vld [vmem:[#allocation10 + $0x24] ss:$8 sps:$4 sm:$0xff]  }
 0x347   :  { %v1588_v34 = vadd.f32 %v5841_v36, %v8620_v37  ;;  %2877 = vmatprep.mubr.bf16.mxu1 %v7643_v21  ;;  %7136 = vtanh.f32 %v1585_v62  ;;  %v6647_v36 = vld [vmem:[#allocation10 + $0x34] ss:$8 sps:$4 sm:$0xff]  }
 0x349   :  { %7138 = vtanh.f32 %v1588_v34  ;;  %v5842_v25 = vpop.f32.mrb[184].mxu0  ;;  %v7133_v51 = vpop.eup %7132  ;;  %4563 = vmatpush1.bf16.msra.mxu1 %v6636_v40 }
 0x34a   :  { %v5843_v13 = vpop.f32.mrb[185].mxu0  ;;  %4564 = vmatprep.subr.bf16.mxu1 %v6644_v6 }
 0x34b   :  { %v7135_v7 = vpop.eup %7134  ;;  %v5844_v27 = vadd.f32 %v5843_v13, %v5842_v25  ;;  %v5845_v8 = vpop.f32.mrb[186].mxu0 }
 0x34c   :  { %v5846_v39 = vpop.f32.mrb[187].mxu0  ;;  %v1831_v3 = vpack.c.bf16 %v7135_v7, %v7133_v51  ;;  %v6645_v7 = vld [vmem:[#allocation10 + $0x30] ss:$8 sps:$4 sm:$0xff]  }
 0x34d   :  { %v1593_v9 = vadd.f32 %v5844_v27, %v8620_v37  ;;  %v5847_v31 = vadd.f32 %v5846_v39, %v5845_v8  ;;  %4565 = vmatpush1.bf16.msra.mxu1 %v6642_v14  ;;  %v6626_v14 = vld [vmem:[#allocation8 + $0xac] ss:$20 sps:$4 sm:$0xff]  }
 0x34e   :  { %2878 = vmatmul.mubr.bf16.gmra.mrb[32].mxu1 %v1831_v3  ;;  %4566 = vmatprep.subr.bf16.mxu1 %v6647_v36 }
 0x34f   :  { %v1596_v5 = vadd.f32 %v5847_v31, %v8620_v37  ;;  %2887 = vmatprep.mubr.bf16.mxu1 %v7643_v21  ;;  %7140 = vtanh.f32 %v1593_v9 }
 0x351   :  { %7142 = vtanh.f32 %v1596_v5  ;;  %v5848_v43 = vpop.f32.mrb[188].mxu0  ;;  %v7137_v54 = vpop.eup %7136  ;;  %v6612_v5 = vld [vmem:[#allocation8 + $0x8] ss:$20 sps:$4 sm:$0xff]   ;;  %4567 = vmatpush1.bf16.msra.mxu1 %v6645_v7 }
 0x352   :  { %v5849_v61 = vpop.f32.mrb[189].mxu0 }
 0x353   :  { %v7139_v26 = vpop.eup %7138  ;;  %v5850_v35 = vadd.f32 %v5849_v61, %v5848_v43  ;;  %v5851_v30 = vpop.f32.mrb[190].mxu0 }
 0x354   :  { %v5852_v47 = vpop.f32.mrb[191].mxu0  ;;  %v1836_v46 = vpack.c.bf16 %v7139_v26, %v7137_v54  ;;  %v6617_v54 = vld [vmem:[#allocation8 + $0x34] ss:$20 sps:$4 sm:$0xff]   ;;  %v6615_v26 = vld [vmem:[#allocation8 + $0x30] ss:$20 sps:$4 sm:$0xff]  }
 0x355   :  { %v1601_v16 = vadd.f32 %v5850_v35, %v8620_v37  ;;  %v5853_v23 = vadd.f32 %v5852_v47, %v5851_v30  ;;  %v6649_v47 = vld [vmem:[#allocation10 + $0x40] ss:$8 sps:$4 sm:$0xff]  }
 0x356   :  { %2888 = vmatmul.mubr.bf16.gmra.mrb[36].mxu1 %v1836_v46  ;;  %v6651_v46 = vld [vmem:[#allocation10 + $0x44] ss:$8 sps:$4 sm:$0xff]  }
 0x357   :  { %v1604_v42 = vadd.f32 %v5853_v23, %v8620_v37  ;;  %2897 = vmatprep.mubr.bf16.mxu1 %v7643_v21  ;;  %7144 = vtanh.f32 %v1601_v16  ;;  %4568 = vmatprep.subr.bf16.mxu1 %v6651_v46 }
 0x358   :  { %4569 = vmatpush1.bf16.msra.mxu1 %v6649_v47  ;;  %v6659_v47 = vld [vmem:[#allocation10 + $0x70] ss:$8 sps:$4 sm:$0xff]  }
 0x359   :  { %7146 = vtanh.f32 %v1604_v42  ;;  %v2373_v33 = vpop.f32.mrb[192].mxu0  ;;  %v7141_v41 = vpop.eup %7140 }
 0x35a   :  { %v2375_v45 = vpop.f32.mrb[193].mxu0  ;;  %v2374_v62 = vadd.f32 %v2373_v33, %v8692_v44  ;;  %v6620_v33 = vld [vmem:[#allocation8 + $0x5c] ss:$20 sps:$4 sm:$0xff]  }
 0x35b   :  { %v7143_v32 = vpop.eup %7142  ;;  %v2377_v55 = vpop.f32.mrb[194].mxu0  ;;  %v2376_v34 = vadd.f32 %v2375_v45, %v8695_v2 }
 0x35c   :  { %v2379_v56 = vpop.f32.mrb[195].mxu0  ;;  %v1841_v48 = vpack.c.bf16 %v7143_v32, %v7141_v41  ;;  %v2378_v25 = vadd.f32 %v2377_v55, %v8692_v44 }
 0x35d   :  { %v2380_v27 = vadd.f32 %v2379_v56, %v8695_v2 }
 0x35e   :  { %2898 = vmatmul.mubr.bf16.gmra.mrb[40].mxu1 %v1841_v48 }
 0x35f   :  { %2907 = vmatprep.mubr.bf16.mxu1 %v7643_v21 }
 0x361   :  { %v2383_v19 = vpop.f32.mrb[196].mxu0  ;;  %v7145_v22 = vpop.eup %7144 }
 0x362   :  { %v2385_v4 = vpop.f32.mrb[197].mxu0  ;;  %v2384_v61 = vadd.f32 %v2383_v19, %v8692_v44  ;;  %v6618_v19 = vld [vmem:[#allocation8 + $0x58] ss:$20 sps:$4 sm:$0xff]  }
 0x363   :  { %v7147_v58 = vpop.eup %7146  ;;  %v2387_v38 = vpop.f32.mrb[198].mxu0  ;;  %v2386_v35 = vadd.f32 %v2385_v4, %v8695_v2  ;;  %v6623_v4 = vld [vmem:[#allocation8 + $0x84] ss:$20 sps:$4 sm:$0xff]  }
 0x364   :  { %v8670_v37 = vpop.f32.mrb[199].mxu0  ;;  %v1846_v0 = vpack.c.bf16 %v7147_v58, %v7145_v22  ;;  %v2388_v16 = vadd.f32 %v2387_v38, %v8692_v44  ;;  %v6652_v38 = vld [vmem:[#allocation10 + $0x50] ss:$8 sps:$4 sm:$0xff]  }
 0x365   :  { %v2390_v41 = vadd.f32 %v8670_v37, %v8695_v2  ;;  %v6654_v37 = vld [vmem:[#allocation10 + $0x54] ss:$8 sps:$4 sm:$0xff]  }
 0x366   :  { %2908 = vmatmul.mubr.bf16.gmra.mrb[44].mxu1 %v1846_v0  ;;  %4570 = vmatprep.subr.bf16.mxu1 %v6654_v37 }
 0x367   :  { %4571 = vmatpush1.bf16.msra.mxu1 %v6652_v38 }
 0x369   :  { %v8672_v20 = vpop.f32.mrb[200].mxu0 }
 0x36a   :  { %v8674_v59 = vpop.f32.mrb[201].mxu0  ;;  %v2394_v58 = vadd.f32 %v8672_v20, %v8692_v44 }
 0x36b   :  { %v8676_v49 = vpop.f32.mrb[202].mxu0  ;;  %v2396_v0 = vadd.f32 %v8674_v59, %v8695_v2 }
 0x36c   :  { %v8678_v50 = vpop.f32.mrb[203].mxu0  ;;  %v2398_v40 = vadd.f32 %v8676_v49, %v8692_v44 }
 0x36d   :  { %v2400_v20 = vadd.f32 %v8678_v50, %v8695_v2  ;;  %v6656_v50 = vld [vmem:[#allocation10 + $0x60] ss:$8 sps:$4 sm:$0xff]  }
 0x371   :  { %v8680_v52 = vpop.f32.mrb[204].mxu0 }
 0x372   :  { %v8682_v60 = vpop.f32.mrb[205].mxu0 }
 0x373   :  { %v8684_v29 = vpop.f32.mrb[206].mxu0  ;;  %v2406_v7 = vadd.f32 %v8682_v60, %v8695_v2 }
 0x374   :  { %v8686_v53 = vpop.f32.mrb[207].mxu0 }
 0x3c1   :  { %v2759_v10 = vpop.f32.mrb[48].mxu1 }
 0x3c2   :  { %v5959_v51 = vadd.f32 %v2759_v10, %v2374_v62  ;;  %v2761_v13 = vpop.f32.mrb[49].mxu1  ;;  %v6624_v10 = vld [vmem:[#allocation8 + $0xa8] ss:$20 sps:$4 sm:$0xff]  }
 0x3c3   :  { %v5961_v8 = vadd.f32 %v2761_v13, %v2376_v34  ;;  %v2763_v39 = vpop.f32.mrb[50].mxu1  ;;  %v6658_v13 = vld [vmem:[#allocation10 + $0x64] ss:$8 sps:$4 sm:$0xff]  }
 0x3c4   :  { %2918 = vst [vmem:[#allocation12] sm:$0xff] %v5959_v51  ;;  %v5963_v3 = vadd.f32 %v2763_v39, %v2378_v25  ;;  %v2765_v9 = vpop.f32.mrb[51].mxu1  ;;  %v6629_v25 = vld [vmem:[#allocation8 + $0xd4] ss:$20 sps:$4 sm:$0xff]   ;;  %v2408_v39 = vadd.f32 %v8684_v29, %v8692_v44  ;;  %4572 = vmatprep.subr.bf16.mxu1 %v6658_v13 }
 0x3c5   :  { %2919 = vst [vmem:[#allocation12 + $0x8] sm:$0xff] %v5961_v8  ;;  %v5965_v31 = vadd.f32 %v2765_v9, %v2380_v27  ;;  %v6627_v8 = vld [vmem:[#allocation8 + $0xd0] ss:$20 sps:$4 sm:$0xff]   ;;  %4573 = vmatpush1.bf16.msra.mxu1 %v6656_v50  ;;  %v6670_v13 = vld [vmem:[#allocation10 + $0xa0] ss:$8 sps:$4 sm:$0xff]  }
 0x3c6   :  { %2920 = vst [vmem:[#allocation12 + $0x10] sm:$0xff] %v5963_v3  ;;  %v8701_v43 = vpack.c.bf16 %v5963_v3, %v5959_v51  ;;  %v2404_v51 = vadd.f32 %v8680_v52, %v8692_v44  ;;  %v2410_v52 = vadd.f32 %v8686_v53, %v8695_v2  ;;  %v6661_v53 = vld [vmem:[#allocation10 + $0x74] ss:$8 sps:$4 sm:$0xff]  }
 0x3c7   :  { %2921 = vst [vmem:[#allocation12 + $0x18] sm:$0xff] %v5965_v31  ;;  %v6632_v31 = vld [vmem:[#allocation8 + $0xfc] ss:$20 sps:$4 sm:$0xff]   ;;  %4574 = vmatprep.subr.bf16.mxu1 %v6661_v53 }
 0x3c8   :  { %3314 = vmatmul.mubr.bf16.vlgmr.msra.gmra.mrb[208].mxu0 %v8701_v43 }
 0x3c9   :  { %3475 = vmatpush1.bf16.msra.mxu0 %v6612_v5  ;;  %v2769_v30 = vpop.f32.mrb[52].mxu1  ;;  %3323 = vmatprep.mubr.bf16.mxu0 %v7643_v21 }
 0x3ca   :  { %v5967_v23 = vadd.f32 %v2769_v30, %v2384_v61  ;;  %v2771_v42 = vpop.f32.mrb[53].mxu1  ;;  %3476 = vmatprep.subr.bf16.mxu0 %v6617_v54  ;;  %v6641_v30 = vld [vmem:[#allocation8 + $0x124] ss:$20 sps:$4 sm:$0xff]   ;;  %4575 = vmatpush1.bf16.msra.mxu1 %v6659_v47 }
 0x3cb   :  { %v5969_v45 = vadd.f32 %v2771_v42, %v2386_v35  ;;  %v2773_v32 = vpop.f32.mrb[54].mxu1  ;;  %v6630_v35 = vld [vmem:[#allocation8 + $0xf8] ss:$20 sps:$4 sm:$0xff]  }
 0x3cc   :  { %2922 = vst [vmem:[#allocation12 + $0x20] sm:$0xff] %v5967_v23  ;;  %v5971_v55 = vadd.f32 %v2773_v32, %v2388_v16  ;;  %v2775_v56 = vpop.f32.mrb[55].mxu1  ;;  %v6639_v16 = vld [vmem:[#allocation8 + $0x120] ss:$20 sps:$4 sm:$0xff]  }
 0x3cd   :  { %2923 = vst [vmem:[#allocation12 + $0x28] sm:$0xff] %v5969_v45  ;;  %v5973_v48 = vadd.f32 %v2775_v56, %v2390_v41  ;;  %3477 = vmatpush1.bf16.msra.mxu0 %v6615_v26 }
 0x3ce   :  { %2924 = vst [vmem:[#allocation12 + $0x30] sm:$0xff] %v5971_v55  ;;  %v8710_v22 = vpack.c.bf16 %v5971_v55, %v5967_v23  ;;  %3478 = vmatprep.subr.bf16.mxu0 %v6620_v33  ;;  %v8739_v33 = vld [vmem:[#allocation8 + $0x10] ss:$20 sps:$4 sm:$0xff]  }
 0x3cf   :  { %2925 = vst [vmem:[#allocation12 + $0x38] sm:$0xff] %v5973_v48 }
 0x3d0   :  { %3324 = vmatmul.mubr.bf16.gmra.mrb[212].mxu0 %v8710_v22 }
 0x3d1   :  { %v2779_v24 = vpop.f32.mrb[56].mxu1  ;;  %3333 = vmatprep.mubr.bf16.mxu0 %v7643_v21  ;;  %3479 = vmatpush1.bf16.msra.mxu0 %v6618_v19  ;;  %v6663_v19 = vld [vmem:[#allocation10 + $0x80] ss:$8 sps:$4 sm:$0xff]  }
 0x3d2   :  { %v5975_v18 = vadd.f32 %v2779_v24, %v2394_v58  ;;  %v2781_v17 = vpop.f32.mrb[57].mxu1  ;;  %3480 = vmatprep.subr.bf16.mxu0 %v6623_v4  ;;  %v6665_v4 = vld [vmem:[#allocation10 + $0x84] ss:$8 sps:$4 sm:$0xff]  }
 0x3d3   :  { %v5977_v6 = vadd.f32 %v2781_v17, %v2396_v0  ;;  %v2783_v62 = vpop.f32.mrb[58].mxu1  ;;  %4576 = vmatprep.subr.bf16.mxu1 %v6665_v4 }
 0x3d4   :  { %2926 = vst [vmem:[#allocation12 + $0x40] sm:$0xff] %v5975_v18  ;;  %v5979_v59 = vadd.f32 %v2783_v62, %v2398_v40  ;;  %v2785_v36 = vpop.f32.mrb[59].mxu1  ;;  %4577 = vmatpush1.bf16.msra.mxu1 %v6663_v19 }
 0x3d5   :  { %2927 = vst [vmem:[#allocation12 + $0x48] sm:$0xff] %v5977_v6  ;;  %v5981_v34 = vadd.f32 %v2785_v36, %v2400_v20  ;;  %3481 = vmatpush1.bf16.msra.mxu0 %v6621_v1  ;;  %v6668_v20 = vld [vmem:[#allocation10 + $0x94] ss:$8 sps:$4 sm:$0xff]  }
 0x3d6   :  { %2928 = vst [vmem:[#allocation12 + $0x50] sm:$0xff] %v5979_v59  ;;  %v8722_v49 = vpack.c.bf16 %v5979_v59, %v5975_v18  ;;  %3482 = vmatprep.subr.bf16.mxu0 %v6626_v14  ;;  %v6666_v14 = vld [vmem:[#allocation10 + $0x90] ss:$8 sps:$4 sm:$0xff]   ;;  %4578 = vmatprep.subr.bf16.mxu1 %v6668_v20 }
 0x3d7   :  { %2929 = vst [vmem:[#allocation12 + $0x58] sm:$0xff] %v5981_v34 }
 0x3d8   :  { %3334 = vmatmul.mubr.bf16.gmra.mrb[216].mxu0 %v8722_v49  ;;  %4579 = vmatpush1.bf16.msra.mxu1 %v6666_v14 }
 0x3d9   :  { %v2789_v27 = vpop.f32.mrb[60].mxu1  ;;  %3343 = vmatprep.mubr.bf16.mxu0 %v7643_v21  ;;  %3483 = vmatpush1.bf16.msra.mxu0 %v6624_v10 }
 0x3da   :  { %v5983_v3 = vadd.f32 %v2789_v27, %v2404_v51  ;;  %v2791_v9 = vpop.f32.mrb[61].mxu1  ;;  %3484 = vmatprep.subr.bf16.mxu0 %v6629_v25 }
 0x3db   :  { %v5985_v5 = vadd.f32 %v2791_v9, %v2406_v7  ;;  %v2793_v54 = vpop.f32.mrb[62].mxu1  ;;  %v6672_v7 = vld [vmem:[#allocation10 + $0xa4] ss:$8 sps:$4 sm:$0xff]  }
 0x3dc   :  { %2930 = vst [vmem:[#allocation12 + $0x60] sm:$0xff] %v5983_v3  ;;  %v5987_v60 = vadd.f32 %v2793_v54, %v2408_v39  ;;  %v2795_v61 = vpop.f32.mrb[63].mxu1  ;;  %4580 = vmatprep.subr.bf16.mxu1 %v6672_v7 }
 0x3dd   :  { %2931 = vst [vmem:[#allocation12 + $0x68] sm:$0xff] %v5985_v5  ;;  %v5989_v26 = vadd.f32 %v2795_v61, %v2410_v52  ;;  %3485 = vmatpush1.bf16.msra.mxu0 %v6627_v8  ;;  %4581 = vmatpush1.bf16.msra.mxu1 %v6670_v13  ;;  %v6675_v61 = vld [vmem:[#allocation10 + $0xb4] ss:$8 sps:$4 sm:$0xff]  }
 0x3de   :  { %2932 = vst [vmem:[#allocation12 + $0x70] sm:$0xff] %v5987_v60  ;;  %v8734_v29 = vpack.c.bf16 %v5987_v60, %v5983_v3  ;;  %3486 = vmatprep.subr.bf16.mxu0 %v6632_v31  ;;  %v6673_v60 = vld [vmem:[#allocation10 + $0xb0] ss:$8 sps:$4 sm:$0xff]   ;;  %4582 = vmatprep.subr.bf16.mxu1 %v6675_v61 }
 0x3df   :  { %2933 = vst [vmem:[#allocation12 + $0x78] sm:$0xff] %v5989_v26 }
 0x3e0   :  { %3344 = vmatmul.mubr.bf16.gmra.mrb[220].mxu0 %v8734_v29 }
 0x3e1   :  { %v2799_v46 = vpop.f32.mrb[0].mxu1  ;;  %3353 = vmatprep.mubr.bf16.mxu0 %v7643_v21  ;;  %3487 = vmatpush1.bf16.msra.mxu0 %v6630_v35 }
 0x3e2   :  { %v5990_v23 = vadd.f32 %v2799_v46, %v8692_v44  ;;  %v2801_v42 = vpop.f32.mrb[1].mxu1  ;;  %3488 = vmatprep.subr.bf16.mxu0 %v6641_v30  ;;  %4583 = vmatpush1.bf16.msra.mxu1 %v6673_v60 }
 0x3e3   :  { %v5991_v41 = vadd.f32 %v2801_v42, %v8695_v2  ;;  %v2803_v45 = vpop.f32.mrb[2].mxu1 }
 0x3e4   :  { %2934 = vst [vmem:[#allocation12 + $0x80] sm:$0xff] %v5990_v23  ;;  %v5992_v32 = vadd.f32 %v2803_v45, %v8692_v44  ;;  %v2805_v55 = vpop.f32.mrb[3].mxu1  ;;  %v6679_v45 = vld [vmem:[#allocation10 + $0xc4] ss:$8 sps:$4 sm:$0xff]  }
 0x3e5   :  { %2935 = vst [vmem:[#allocation12 + $0x88] sm:$0xff] %v5991_v41  ;;  %v5993_v56 = vadd.f32 %v2805_v55, %v8695_v2  ;;  %3489 = vmatpush1.bf16.msra.mxu0 %v6639_v16  ;;  %v6677_v41 = vld [vmem:[#allocation10 + $0xc0] ss:$8 sps:$4 sm:$0xff]   ;;  %4584 = vmatprep.subr.bf16.mxu1 %v6679_v45 }
 0x3e6   :  { %2936 = vst [vmem:[#allocation12 + $0x90] sm:$0xff] %v5992_v32  ;;  %v8744_v48 = vpack.c.bf16 %v5992_v32, %v5990_v23  ;;  %5878 = vmatprep.subr.bf16.mxu0 %v8739_v33  ;;  %4585 = vmatpush1.bf16.msra.mxu1 %v6677_v41 }
 0x3e7   :  { %2937 = vst [vmem:[#allocation12 + $0x98] sm:$0xff] %v5993_v56 }
 0x3e8   :  { %3354 = vmatmul.mubr.bf16.gmra.mrb[224].mxu0 %v8744_v48 }
 0x3e9   :  { %v2809_v58 = vpop.f32.mrb[4].mxu1  ;;  %3363 = vmatprep.mubr.bf16.mxu0 %v7643_v21 }
 0x3ea   :  { %v5994_v38 = vadd.f32 %v2809_v58, %v8692_v44  ;;  %v2811_v37 = vpop.f32.mrb[5].mxu1 }
 0x3eb   :  { %v5995_v0 = vadd.f32 %v2811_v37, %v8695_v2  ;;  %v2813_v24 = vpop.f32.mrb[6].mxu1 }
 0x3ec   :  { %2938 = vst [vmem:[#allocation12 + $0xa0] sm:$0xff] %v5994_v38  ;;  %v5996_v1 = vadd.f32 %v2813_v24, %v8692_v44  ;;  %v2815_v40 = vpop.f32.mrb[7].mxu1  ;;  %v6680_v24 = vld [vmem:[#allocation10 + $0xd0] ss:$8 sps:$4 sm:$0xff]  }
 0x3ed   :  { %2939 = vst [vmem:[#allocation12 + $0xa8] sm:$0xff] %v5995_v0  ;;  %v5997_v18 = vadd.f32 %v2815_v40, %v8695_v2 }
 0x3ee   :  { %2940 = vst [vmem:[#allocation12 + $0xb0] sm:$0xff] %v5996_v1  ;;  %v8753_v17 = vpack.c.bf16 %v5996_v1, %v5994_v38  ;;  %v6682_v1 = vld [vmem:[#allocation10 + $0xd4] ss:$8 sps:$4 sm:$0xff]  }
 0x3ef   :  { %2941 = vst [vmem:[#allocation12 + $0xb8] sm:$0xff] %v5997_v18  ;;  %4586 = vmatprep.subr.bf16.mxu1 %v6682_v1 }
 0x3f0   :  { %3364 = vmatmul.mubr.bf16.gmra.mrb[228].mxu0 %v8753_v17  ;;  %4587 = vmatpush1.bf16.msra.mxu1 %v6680_v24 }
 0x3f1   :  { %v2819_v6 = vpop.f32.mrb[8].mxu1  ;;  %3373 = vmatprep.mubr.bf16.mxu0 %v7643_v21 }
 0x3f2   :  { %v5998_v62 = vadd.f32 %v2819_v6, %v8692_v44  ;;  %v2821_v59 = vpop.f32.mrb[9].mxu1 }
 0x3f3   :  { %v5999_v36 = vadd.f32 %v2821_v59, %v8695_v2  ;;  %v2823_v34 = vpop.f32.mrb[10].mxu1 }
 0x3f4   :  { %2942 = vst [vmem:[#allocation12 + $0xc0] sm:$0xff] %v5998_v62  ;;  %v6000_v10 = vadd.f32 %v2823_v34, %v8692_v44  ;;  %v2825_v25 = vpop.f32.mrb[11].mxu1 }
 0x3f5   :  { %2943 = vst [vmem:[#allocation12 + $0xc8] sm:$0xff] %v5999_v36  ;;  %v6001_v51 = vadd.f32 %v2825_v25, %v8695_v2 }
 0x3f6   :  { %2944 = vst [vmem:[#allocation12 + $0xd0] sm:$0xff] %v6000_v10  ;;  %v8761_v50 = vpack.c.bf16 %v6000_v10, %v5998_v62 }
 0x3f7   :  { %2945 = vst [vmem:[#allocation12 + $0xd8] sm:$0xff] %v6001_v51 }
 0x3f8   :  { %3374 = vmatmul.mubr.bf16.gmra.mrb[232].mxu0 %v8761_v50 }
 0x3f9   :  { %v2829_v27 = vpop.f32.mrb[12].mxu1  ;;  %3383 = vmatprep.mubr.bf16.mxu0 %v7643_v21 }
 0x3fa   :  { %v6002_v8 = vadd.f32 %v2829_v27, %v8692_v44  ;;  %v2831_v39 = vpop.f32.mrb[13].mxu1 }
 0x3fb   :  { %v6003_v3 = vadd.f32 %v2831_v39, %v8695_v2  ;;  %v2833_v9 = vpop.f32.mrb[14].mxu1 }
 0x3fc   :  { %2946 = vst [vmem:[#allocation12 + $0xe0] sm:$0xff] %v6002_v8  ;;  %v6004_v31 = vadd.f32 %v2833_v9, %v8692_v44  ;;  %v2835_v52 = vpop.f32.mrb[15].mxu1 }
 0x3fd   :  { %2947 = vst [vmem:[#allocation12 + $0xe8] sm:$0xff] %v6003_v3  ;;  %v6005_v5 = vadd.f32 %v2835_v52, %v8695_v2  ;;  %v6686_v52 = vld [vmem:[#allocation10 + $0xe4] ss:$8 sps:$4 sm:$0xff]  }
 0x3fe   :  { %2948 = vst [vmem:[#allocation12 + $0xf0] sm:$0xff] %v6004_v31  ;;  %v8769_v54 = vpack.c.bf16 %v6004_v31, %v6002_v8  ;;  %v6684_v31 = vld [vmem:[#allocation10 + $0xe0] ss:$8 sps:$4 sm:$0xff]   ;;  %4588 = vmatprep.subr.bf16.mxu1 %v6686_v52 }
 0x3ff   :  { %2949 = vst [vmem:[#allocation12 + $0xf8] sm:$0xff] %v6005_v5  ;;  %4589 = vmatpush1.bf16.msra.mxu1 %v6684_v31  ;;  %v6683_v31 = vld [vmem:[#allocation8 + $0xd8] ss:$20 sps:$4 sm:$0xff]   ;;  %v6697_v52 = vld [vmem:[#allocation8 + $0x128] ss:$20 sps:$4 sm:$0xff]  }
 0x400   :  { %3384 = vmatmul.mubr.bf16.gmra.mrb[236].mxu0 %v8769_v54 }
 0x401   :  { %v2839_v26 = vpop.f32.mrb[16].mxu1  ;;  %3393 = vmatprep.mubr.bf16.mxu0 %v7643_v21 }
 0x402   :  { %v6006_v35 = vadd.f32 %v2839_v26, %v8692_v44  ;;  %v2841_v30 = vpop.f32.mrb[17].mxu1 }
 0x403   :  { %v6007_v47 = vadd.f32 %v2841_v30, %v8695_v2  ;;  %v2843_v53 = vpop.f32.mrb[18].mxu1 }
 0x404   :  { %2950 = vst [vmem:[#allocation12 + $0x100] sm:$0xff] %v6006_v35  ;;  %v6008_v46 = vadd.f32 %v2843_v53, %v8692_v44  ;;  %v2845_v16 = vpop.f32.mrb[19].mxu1 }
 0x405   :  { %2951 = vst [vmem:[#allocation12 + $0x108] sm:$0xff] %v6007_v47  ;;  %v6009_v23 = vadd.f32 %v2845_v16, %v8695_v2  ;;  %v6687_v16 = vld [vmem:[#allocation10 + $0xf0] ss:$8 sps:$4 sm:$0xff]  }
 0x406   :  { %2952 = vst [vmem:[#allocation12 + $0x110] sm:$0xff] %v6008_v46  ;;  %v8777_v42 = vpack.c.bf16 %v6008_v46, %v6006_v35 }
 0x407   :  { %2953 = vst [vmem:[#allocation12 + $0x118] sm:$0xff] %v6009_v23  ;;  %v6689_v23 = vld [vmem:[#allocation10 + $0xf4] ss:$8 sps:$4 sm:$0xff]  }
 0x408   :  { %3394 = vmatmul.mubr.bf16.gmra.mrb[240].mxu0 %v8777_v42  ;;  %4590 = vmatprep.subr.bf16.mxu1 %v6689_v23 }
 0x409   :  { %v2849_v32 = vpop.f32.mrb[20].mxu1  ;;  %3403 = vmatprep.mubr.bf16.mxu0 %v7643_v21  ;;  %4591 = vmatpush1.bf16.msra.mxu1 %v6687_v16 }
 0x40a   :  { %v6010_v55 = vadd.f32 %v2849_v32, %v8692_v44  ;;  %v2851_v56 = vpop.f32.mrb[21].mxu1 }
 0x40b   :  { %v6011_v19 = vadd.f32 %v2851_v56, %v8695_v2  ;;  %v2853_v4 = vpop.f32.mrb[22].mxu1 }
 0x40c   :  { %2954 = vst [vmem:[#allocation12 + $0x120] sm:$0xff] %v6010_v55  ;;  %v6012_v58 = vadd.f32 %v2853_v4, %v8692_v44  ;;  %v2855_v38 = vpop.f32.mrb[23].mxu1 }
 0x40d   :  { %2955 = vst [vmem:[#allocation12 + $0x128] sm:$0xff] %v6011_v19  ;;  %v6013_v37 = vadd.f32 %v2855_v38, %v8695_v2 }
 0x40e   :  { %2956 = vst [vmem:[#allocation12 + $0x130] sm:$0xff] %v6012_v58  ;;  %v8785_v0 = vpack.c.bf16 %v6012_v58, %v6010_v55 }
 0x40f   :  { %2957 = vst [vmem:[#allocation12 + $0x138] sm:$0xff] %v6013_v37  ;;  %v6693_v37 = vld [vmem:[#allocation10 + $0x104] ss:$8 sps:$4 sm:$0xff]  }
 0x410   :  { %3404 = vmatmul.mubr.bf16.gmra.mrb[244].mxu0 %v8785_v0  ;;  %4753 = vmatprep.subr.bf16.mxu1 %v6693_v37 }
 0x411   :  { %v2859_v40 = vpop.f32.mrb[24].mxu1  ;;  %3413 = vmatprep.mubr.bf16.mxu0 %v7643_v21 }
 0x412   :  { %v6014_v18 = vadd.f32 %v2859_v40, %v8692_v44  ;;  %v2861_v14 = vpop.f32.mrb[25].mxu1 }
 0x413   :  { %v6015_v20 = vadd.f32 %v2861_v14, %v8695_v2  ;;  %v2863_v6 = vpop.f32.mrb[26].mxu1 }
 0x414   :  { %2958 = vst [vmem:[#allocation12 + $0x140] sm:$0xff] %v6014_v18  ;;  %v6016_v62 = vadd.f32 %v2863_v6, %v8692_v44  ;;  %v2865_v59 = vpop.f32.mrb[27].mxu1 }
 0x415   :  { %2959 = vst [vmem:[#allocation12 + $0x148] sm:$0xff] %v6015_v20  ;;  %v6017_v36 = vadd.f32 %v2865_v59, %v8695_v2 }
 0x416   :  { %2960 = vst [vmem:[#allocation12 + $0x150] sm:$0xff] %v6016_v62  ;;  %v8793_v34 = vpack.c.bf16 %v6016_v62, %v6014_v18 }
 0x417   :  { %2961 = vst [vmem:[#allocation12 + $0x158] sm:$0xff] %v6017_v36 }
 0x418   :  { %3414 = vmatmul.mubr.bf16.gmra.mrb[248].mxu0 %v8793_v34 }
 0x419   :  { %v2869_v10 = vpop.f32.mrb[28].mxu1  ;;  %3423 = vmatprep.mubr.bf16.mxu0 %v7643_v21 }
 0x41a   :  { %v6018_v25 = vadd.f32 %v2869_v10, %v8692_v44  ;;  %v2871_v51 = vpop.f32.mrb[29].mxu1 }
 0x41b   :  { %v6019_v13 = vadd.f32 %v2871_v51, %v8695_v2  ;;  %v2873_v7 = vpop.f32.mrb[30].mxu1 }
 0x41c   :  { %2962 = vst [vmem:[#allocation12 + $0x160] sm:$0xff] %v6018_v25  ;;  %v6020_v27 = vadd.f32 %v2873_v7, %v8692_v44  ;;  %v2875_v8 = vpop.f32.mrb[31].mxu1 }
 0x41d   :  { %2963 = vst [vmem:[#allocation12 + $0x168] sm:$0xff] %v6019_v13  ;;  %v6021_v39 = vadd.f32 %v2875_v8, %v8695_v2 }
 0x41e   :  { %2964 = vst [vmem:[#allocation12 + $0x170] sm:$0xff] %v6020_v27  ;;  %v8801_v3 = vpack.c.bf16 %v6020_v27, %v6018_v25 }
 0x41f   :  { %2965 = vst [vmem:[#allocation12 + $0x178] sm:$0xff] %v6021_v39  ;;  %v6655_v39 = vld [vmem:[#allocation8 + $0x38] ss:$20 sps:$4 sm:$0xff]  }
 0x420   :  { %3424 = vmatmul.mubr.bf16.gmra.mrb[252].mxu0 %v8801_v3 }
 0x421   :  { %v2879_v9 = vpop.f32.mrb[32].mxu1  ;;  %3433 = vmatprep.mubr.bf16.mxu0 %v7643_v21 }
 0x422   :  { %v6022_v5 = vadd.f32 %v2879_v9, %v8692_v44  ;;  %v2881_v60 = vpop.f32.mrb[33].mxu1  ;;  %v6676_v9 = vld [vmem:[#allocation8 + $0xb0] ss:$20 sps:$4 sm:$0xff]  }
 0x423   :  { %v6023_v61 = vadd.f32 %v2881_v60, %v8695_v2  ;;  %v2883_v26 = vpop.f32.mrb[34].mxu1 }
 0x424   :  { %2966 = vst [vmem:[#allocation12 + $0x180] sm:$0xff] %v6022_v5  ;;  %v6024_v35 = vadd.f32 %v2883_v26, %v8692_v44  ;;  %v2885_v30 = vpop.f32.mrb[35].mxu1 }
 0x425   :  { %2967 = vst [vmem:[#allocation12 + $0x188] sm:$0xff] %v6023_v61  ;;  %v6025_v47 = vadd.f32 %v2885_v30, %v8695_v2 }
 0x426   :  { %2968 = vst [vmem:[#allocation12 + $0x190] sm:$0xff] %v6024_v35  ;;  %v8809_v53 = vpack.c.bf16 %v6024_v35, %v6022_v5  ;;  %v8861_v5 = vld [vmem:[%s9221_s6] sm:$0x1f] }
 0x427   :  { %2969 = vst [vmem:[#allocation12 + $0x198] sm:$0xff] %v6025_v47  ;;  %v8866_v60 = vrot.slane %v8861_v5, %v9392_v11  ;;  %v8870_v61 = vrot.slane %v8861_v5, %v9393_v12 }
 0x428   :  { %3434 = vmatmul.mubr.bf16.gmra.mrb[0].mxu0 %v8809_v53 }
 0x429   :  { %v2889_v46 = vpop.f32.mrb[36].mxu1  ;;  %3443 = vmatprep.mubr.bf16.mxu0 %v7643_v21 }
 0x42a   :  { %v6026_v41 = vadd.f32 %v2889_v46, %v8692_v44  ;;  %v2891_v45 = vpop.f32.mrb[37].mxu1 }
 0x42b   :  { %v6027_v32 = vadd.f32 %v2891_v45, %v8695_v2  ;;  %v2893_v55 = vpop.f32.mrb[38].mxu1 }
 0x42c   :  { %2970 = vst [vmem:[#allocation12 + $0x1a0] sm:$0xff] %v6026_v41  ;;  %v6028_v56 = vadd.f32 %v2893_v55, %v8692_v44  ;;  %v2895_v19 = vpop.f32.mrb[39].mxu1 }
 0x42d   :  { %2971 = vst [vmem:[#allocation12 + $0x1a8] sm:$0xff] %v6027_v32  ;;  %v6029_v4 = vadd.f32 %v2895_v19, %v8695_v2 }
 0x42e   :  { %2972 = vst [vmem:[#allocation12 + $0x1b0] sm:$0xff] %v6028_v56  ;;  %v8817_v58 = vpack.c.bf16 %v6028_v56, %v6026_v41 }
 0x42f   :  { %2973 = vst [vmem:[#allocation12 + $0x1b8] sm:$0xff] %v6029_v4 }
 0x430   :  { %3444 = vmatmul.mubr.bf16.gmra.mrb[4].mxu0 %v8817_v58 }
 0x431   :  { %v2899_v38 = vpop.f32.mrb[40].mxu1  ;;  %3453 = vmatprep.mubr.bf16.mxu0 %v7643_v21 }
 0x432   :  { %v6030_v24 = vadd.f32 %v2899_v38, %v8692_v44  ;;  %v2901_v1 = vpop.f32.mrb[41].mxu1 }
 0x433   :  { %v6031_v40 = vadd.f32 %v2901_v1, %v8695_v2  ;;  %v2903_v18 = vpop.f32.mrb[42].mxu1 }
 0x434   :  { %2974 = vst [vmem:[#allocation12 + $0x1c0] sm:$0xff] %v6030_v24  ;;  %v6032_v14 = vadd.f32 %v2903_v18, %v8692_v44  ;;  %v2905_v20 = vpop.f32.mrb[43].mxu1 }
 0x435   :  { %2975 = vst [vmem:[#allocation12 + $0x1c8] sm:$0xff] %v6031_v40  ;;  %v6033_v6 = vadd.f32 %v2905_v20, %v8695_v2 }
 0x436   :  { %2976 = vst [vmem:[#allocation12 + $0x1d0] sm:$0xff] %v6032_v14  ;;  %v8825_v62 = vpack.c.bf16 %v6032_v14, %v6030_v24 }
 0x437   :  { %2977 = vst [vmem:[#allocation12 + $0x1d8] sm:$0xff] %v6033_v6 }
 0x438   :  { %3454 = vmatmul.mubr.bf16.gmra.mrb[8].mxu0 %v8825_v62 }
 0x439   :  { %v2909_v59 = vpop.f32.mrb[44].mxu1  ;;  %3463 = vmatprep.mubr.bf16.mxu0 %v7643_v21 }
 0x43a   :  { %v6034_v36 = vadd.f32 %v2909_v59, %v8692_v44  ;;  %v2911_v10 = vpop.f32.mrb[45].mxu1 }
 0x43b   :  { %v6035_v25 = vadd.f32 %v2911_v10, %v8695_v2  ;;  %v2913_v51 = vpop.f32.mrb[46].mxu1  ;;  %v6691_v10 = vld [vmem:[#allocation10 + $0x100] ss:$8 sps:$4 sm:$0xff]  }
 0x43c   :  { %2978 = vst [vmem:[#allocation12 + $0x1e0] sm:$0xff] %v6034_v36  ;;  %v6036_v13 = vadd.f32 %v2913_v51, %v8692_v44  ;;  %v2915_v7 = vpop.f32.mrb[47].mxu1  ;;  %v6662_v44 = vld [vmem:[#allocation8 + $0x60] ss:$20 sps:$4 sm:$0xff]  }
 0x43d   :  { %2979 = vst [vmem:[#allocation12 + $0x1e8] sm:$0xff] %v6035_v25  ;;  %v6037_v27 = vadd.f32 %v2915_v7, %v8695_v2  ;;  %v6669_v2 = vld [vmem:[#allocation8 + $0x88] ss:$20 sps:$4 sm:$0xff]  }
 0x43e   :  { %2980 = vst [vmem:[#allocation12 + $0x1f0] sm:$0xff] %v6036_v13  ;;  %v8833_v8 = vpack.c.bf16 %v6036_v13, %v6034_v36  ;;  %v6696_v13 = vld [vmem:[#allocation10 + $0x114] ss:$8 sps:$4 sm:$0xff]  }
 0x43f   :  { %2981 = vst [vmem:[#allocation12 + $0x1f8] sm:$0xff] %v6037_v27 }
 0x440   :  { %3464 = vmatmul.mubr.bf16.gmra.mrb[12].mxu0 %v8833_v8 }
 0x441   :  { %3506 = vmatprep.mubr.bf16.mxu0 %v7643_v21 }
 0x448   :  { %3507 = vmatmul.mubr.bf16.vlgmr.msra.gmra.mrb[16].mxu0 %v8701_v43 }
 0x449   :  { %5879 = vmatpush3.bf16.msra.mxu0 %v8739_v33  ;;  %3516 = vmatprep.mubr.bf16.mxu0 %v7643_v21  ;;  %v6690_v33 = vld [vmem:[#allocation8 + $0x100] ss:$20 sps:$4 sm:$0xff]  }
 0x44a   :  { %5880 = vmatprep.subr.bf16.mxu0 %v6655_v39 }
 0x44d   :  { %5881 = vmatpush3.bf16.msra.mxu0 %v6655_v39 }
 0x44e   :  { %5882 = vmatprep.subr.bf16.mxu0 %v6662_v44 }
 0x450   :  { %3517 = vmatmul.mubr.bf16.gmra.mrb[20].mxu0 %v8710_v22 }
 0x451   :  { %3526 = vmatprep.mubr.bf16.mxu0 %v7643_v21  ;;  %5883 = vmatpush3.bf16.msra.mxu0 %v6662_v44 }
 0x452   :  { %5884 = vmatprep.subr.bf16.mxu0 %v6669_v2 }
 0x455   :  { %5885 = vmatpush3.bf16.msra.mxu0 %v6669_v2  ;;  %v6694_v2 = vld [vmem:[#allocation10 + $0x110] ss:$8 sps:$4 sm:$0xff]  }
 0x456   :  { %5886 = vmatprep.subr.bf16.mxu0 %v6676_v9 }
 0x458   :  { %3527 = vmatmul.mubr.bf16.gmra.mrb[24].mxu0 %v8722_v49 }
 0x459   :  { %3536 = vmatprep.mubr.bf16.mxu0 %v7643_v21  ;;  %5887 = vmatpush3.bf16.msra.mxu0 %v6676_v9 }
 0x45a   :  { %5888 = vmatprep.subr.bf16.mxu0 %v6683_v31 }
 0x45d   :  { %5889 = vmatpush3.bf16.msra.mxu0 %v6683_v31  ;;  %v6700_v31 = vld [vmem:[#allocation10 + $0x124] ss:$8 sps:$4 sm:$0xff]  }
 0x45e   :  { %5890 = vmatprep.subr.bf16.mxu0 %v6690_v33 }
 0x460   :  { %3537 = vmatmul.mubr.bf16.gmra.mrb[28].mxu0 %v8734_v29 }
 0x461   :  { %3546 = vmatprep.mubr.bf16.mxu0 %v7643_v21  ;;  %5891 = vmatpush3.bf16.msra.mxu0 %v6690_v33 }
 0x462   :  { %5892 = vmatprep.subr.bf16.mxu0 %v6697_v52 }
 0x465   :  { %5893 = vmatpush3.bf16.msra.mxu0 %v6697_v52 }
 0x468   :  { %3547 = vmatmul.mubr.bf16.gmra.mrb[32].mxu0 %v8744_v48 }
 0x469   :  { %3556 = vmatprep.mubr.bf16.mxu0 %v7643_v21 }
 0x470   :  { %3557 = vmatmul.mubr.bf16.gmra.mrb[36].mxu0 %v8753_v17 }
 0x471   :  { %3566 = vmatprep.mubr.bf16.mxu0 %v7643_v21 }
 0x478   :  { %3567 = vmatmul.mubr.bf16.gmra.mrb[40].mxu0 %v8761_v50 }
 0x479   :  { %3576 = vmatprep.mubr.bf16.mxu0 %v7643_v21 }
 0x480   :  { %3577 = vmatmul.mubr.bf16.gmra.mrb[44].mxu0 %v8769_v54 }
 0x481   :  { %3586 = vmatprep.mubr.bf16.mxu0 %v7643_v21 }
 0x488   :  { %3587 = vmatmul.mubr.bf16.gmra.mrb[48].mxu0 %v8777_v42 }
 0x489   :  { %3596 = vmatprep.mubr.bf16.mxu0 %v7643_v21 }
 0x490   :  { %3597 = vmatmul.mubr.bf16.gmra.mrb[52].mxu0 %v8785_v0 }
 0x491   :  { %3606 = vmatprep.mubr.bf16.mxu0 %v7643_v21 }
 0x498   :  { %3607 = vmatmul.mubr.bf16.gmra.mrb[56].mxu0 %v8793_v34 }
 0x499   :  { %3616 = vmatprep.mubr.bf16.mxu0 %v7643_v21 }
 0x49b   :  { %v3315_v26 = vpop.f32.mrb[208].mxu0 }
 0x49c   :  { %v3316_v35 = vadd.f32 %v3315_v26, %v8866_v60  ;;  %v3317_v30 = vpop.f32.mrb[209].mxu0 }
 0x49d   :  { %v3318_v47 = vadd.f32 %v3317_v30, %v8870_v61  ;;  %v3319_v46 = vpop.f32.mrb[210].mxu0 }
 0x49e   :  { %7148 = vtanh.f32 %v3316_v35  ;;  %v3320_v16 = vadd.f32 %v3319_v46, %v8866_v60  ;;  %v3321_v23 = vpop.f32.mrb[211].mxu0 }
 0x49f   :  { %7150 = vtanh.f32 %v3318_v47  ;;  %v3322_v41 = vadd.f32 %v3321_v23, %v8870_v61 }
 0x4a0   :  { %7152 = vtanh.f32 %v3320_v16  ;;  %3617 = vmatmul.mubr.bf16.gmra.mrb[60].mxu0 %v8801_v3  ;;  %v6698_v16 = vld [vmem:[#allocation10 + $0x120] ss:$8 sps:$4 sm:$0xff]  }
 0x4a1   :  { %7154 = vtanh.f32 %v3322_v41  ;;  %3626 = vmatprep.mubr.bf16.mxu0 %v7643_v21 }
 0x4a3   :  { %v3325_v45 = vpop.f32.mrb[212].mxu0 }
 0x4a4   :  { %v3326_v32 = vadd.f32 %v3325_v45, %v8866_v60  ;;  %v3327_v55 = vpop.f32.mrb[213].mxu0  ;;  %v6703_v45 = vld [vmem:[#allocation10 + $0x134] ss:$8 sps:$4 sm:$0xff]  }
 0x4a5   :  { %v3328_v56 = vadd.f32 %v3327_v55, %v8870_v61  ;;  %v3329_v19 = vpop.f32.mrb[214].mxu0 }
 0x4a6   :  { %7156 = vtanh.f32 %v3326_v32  ;;  %v3330_v4 = vadd.f32 %v3329_v19, %v8866_v60  ;;  %v3331_v38 = vpop.f32.mrb[215].mxu0 }
 0x4a7   :  { %7158 = vtanh.f32 %v3328_v56  ;;  %v3332_v37 = vadd.f32 %v3331_v38, %v8870_v61 }
 0x4a8   :  { %v7149_v24 = vpop.eup %7148  ;;  %7160 = vtanh.f32 %v3330_v4  ;;  %3627 = vmatmul.mubr.bf16.gmra.mrb[64].mxu0 %v8809_v53  ;;  %v6701_v4 = vld [vmem:[#allocation10 + $0x130] ss:$8 sps:$4 sm:$0xff]  }
 0x4a9   :  { %v7151_v1 = vpop.eup %7150  ;;  %7162 = vtanh.f32 %v3332_v37  ;;  %3636 = vmatprep.mubr.bf16.mxu0 %v7643_v21  ;;  %v6706_v37 = vld [vmem:[#allocation10 + $0x144] ss:$8 sps:$4 sm:$0xff]  }
 0x4aa   :  { %v7153_v40 = vpop.eup %7152 }
 0x4ab   :  { %v7155_v18 = vpop.eup %7154  ;;  %v3335_v14 = vpop.f32.mrb[216].mxu0  ;;  %v3988_v20 = vpack.c.bf16 %v7153_v40, %v7149_v24 }
 0x4ac   :  { %v3336_v6 = vadd.f32 %v3335_v14, %v8866_v60  ;;  %v3337_v59 = vpop.f32.mrb[217].mxu0  ;;  %v3989_v36 = vpack.c.bf16 %v7155_v18, %v7151_v1 }
 0x4ad   :  { %v3338_v25 = vadd.f32 %v3337_v59, %v8870_v61  ;;  %v3339_v51 = vpop.f32.mrb[218].mxu0  ;;  %v6704_v59 = vld [vmem:[#allocation10 + $0x140] ss:$8 sps:$4 sm:$0xff]  }
 0x4ae   :  { %7164 = vtanh.f32 %v3336_v6  ;;  %v3340_v7 = vadd.f32 %v3339_v51, %v8866_v60  ;;  %v3341_v27 = vpop.f32.mrb[219].mxu0  ;;  %4592 = vmatprep.mubr.bf16.mxu1 %v3989_v36 }
 0x4af   :  { %7166 = vtanh.f32 %v3338_v25  ;;  %v3342_v39 = vadd.f32 %v3341_v27, %v8870_v61  ;;  %4593 = vmatmul.mubr.bf16.vlgmr.msra.gmra.mrb[64].mxu1 %v3988_v20  ;;  %v6709_v25 = vld [vmem:[#allocation10 + $0x154] ss:$8 sps:$4 sm:$0xff]  }
 0x4b0   :  { %v7157_v44 = vpop.eup %7156  ;;  %7168 = vtanh.f32 %v3340_v7  ;;  %4754 = vmatpush1.bf16.msra.mxu1 %v6691_v10  ;;  %3637 = vmatmul.mubr.bf16.gmra.mrb[68].mxu0 %v8817_v58 }
 0x4b1   :  { %v7159_v9 = vpop.eup %7158  ;;  %7170 = vtanh.f32 %v3342_v39  ;;  %4755 = vmatprep.subr.bf16.mxu1 %v6696_v13  ;;  %3646 = vmatprep.mubr.bf16.mxu0 %v7643_v21  ;;  %v6707_v39 = vld [vmem:[#allocation10 + $0x150] ss:$8 sps:$4 sm:$0xff]  }
 0x4b2   :  { %v7161_v33 = vpop.eup %7160 }
 0x4b3   :  { %v7163_v52 = vpop.eup %7162  ;;  %v3345_v26 = vpop.f32.mrb[220].mxu0  ;;  %v3993_v35 = vpack.c.bf16 %v7161_v33, %v7157_v44 }
 0x4b4   :  { %v3346_v30 = vadd.f32 %v3345_v26, %v8866_v60  ;;  %v3347_v47 = vpop.f32.mrb[221].mxu0  ;;  %v3994_v46 = vpack.c.bf16 %v7163_v52, %v7159_v9  ;;  %4756 = vmatpush1.bf16.msra.mxu1 %v6694_v2  ;;  %v6712_v2 = vld [vmem:[#allocation10 + $0x164] ss:$8 sps:$4 sm:$0xff]  }
 0x4b5   :  { %v3348_v23 = vadd.f32 %v3347_v47, %v8870_v61  ;;  %v3349_v41 = vpop.f32.mrb[222].mxu0  ;;  %4757 = vmatprep.subr.bf16.mxu1 %v6700_v31  ;;  %v6710_v47 = vld [vmem:[#allocation10 + $0x160] ss:$8 sps:$4 sm:$0xff]  }
 0x4b6   :  { %7172 = vtanh.f32 %v3346_v30  ;;  %v3350_v32 = vadd.f32 %v3349_v41, %v8866_v60  ;;  %v3351_v55 = vpop.f32.mrb[223].mxu0  ;;  %4602 = vmatprep.mubr.bf16.mxu1 %v3994_v46 }
 0x4b7   :  { %7174 = vtanh.f32 %v3348_v23  ;;  %v3352_v56 = vadd.f32 %v3351_v55, %v8870_v61  ;;  %4603 = vmatmul.mubr.bf16.gmra.mrb[68].mxu1 %v3993_v35  ;;  %v6715_v23 = vld [vmem:[#allocation10 + $0x174] ss:$8 sps:$4 sm:$0xff]   ;;  %v6713_v55 = vld [vmem:[#allocation10 + $0x170] ss:$8 sps:$4 sm:$0xff]  }
 0x4b8   :  { %v7165_v19 = vpop.eup %7164  ;;  %7176 = vtanh.f32 %v3350_v32  ;;  %3647 = vmatmul.mubr.bf16.gmra.mrb[72].mxu0 %v8825_v62  ;;  %4758 = vmatpush1.bf16.msra.mxu1 %v6698_v16 }
 0x4b9   :  { %v7167_v38 = vpop.eup %7166  ;;  %7178 = vtanh.f32 %v3352_v56  ;;  %3656 = vmatprep.mubr.bf16.mxu0 %v7643_v21  ;;  %4759 = vmatprep.subr.bf16.mxu1 %v6703_v45 }
 0x4ba   :  { %v7169_v24 = vpop.eup %7168 }
 0x4bb   :  { %v7171_v1 = vpop.eup %7170  ;;  %v3355_v40 = vpop.f32.mrb[224].mxu0  ;;  %v3998_v18 = vpack.c.bf16 %v7169_v24, %v7165_v19  ;;  %v6718_v19 = vld [vmem:[#allocation10 + $0x184] ss:$8 sps:$4 sm:$0xff]  }
 0x4bc   :  { %v3356_v14 = vadd.f32 %v3355_v40, %v8866_v60  ;;  %v3357_v20 = vpop.f32.mrb[225].mxu0  ;;  %v3999_v6 = vpack.c.bf16 %v7171_v1, %v7167_v38  ;;  %4760 = vmatpush1.bf16.msra.mxu1 %v6701_v4 }
 0x4bd   :  { %v3358_v36 = vadd.f32 %v3357_v20, %v8870_v61  ;;  %v3359_v10 = vpop.f32.mrb[226].mxu0  ;;  %4761 = vmatprep.subr.bf16.mxu1 %v6706_v37 }
 0x4be   :  { %7180 = vtanh.f32 %v3356_v14  ;;  %v3360_v51 = vadd.f32 %v3359_v10, %v8866_v60  ;;  %v3361_v13 = vpop.f32.mrb[227].mxu0  ;;  %4612 = vmatprep.mubr.bf16.mxu1 %v3999_v6  ;;  %v6716_v14 = vld [vmem:[#allocation10 + $0x180] ss:$8 sps:$4 sm:$0xff]   ;;  %v6721_v6 = vld [vmem:[#allocation10 + $0x194] ss:$8 sps:$4 sm:$0xff]  }
 0x4bf   :  { %7182 = vtanh.f32 %v3358_v36  ;;  %v3362_v7 = vadd.f32 %v3361_v13, %v8870_v61  ;;  %4613 = vmatmul.mubr.bf16.gmra.mrb[72].mxu1 %v3998_v18  ;;  %v6724_v13 = vld [vmem:[#allocation10 + $0x1a4] ss:$8 sps:$4 sm:$0xff]  }
 0x4c0   :  { %v7173_v27 = vpop.eup %7172  ;;  %7184 = vtanh.f32 %v3360_v51  ;;  %3657 = vmatmul.mubr.bf16.gmra.mrb[76].mxu0 %v8833_v8  ;;  %4762 = vmatpush1.bf16.msra.mxu1 %v6704_v59 }
 0x4c1   :  { %v7175_v44 = vpop.eup %7174  ;;  %7186 = vtanh.f32 %v3362_v7  ;;  %5894 = vmatprep.mubr.bf16.mxu0 %v8701_v43  ;;  %4763 = vmatprep.subr.bf16.mxu1 %v6709_v25  ;;  %v6719_v25 = vld [vmem:[#allocation10 + $0x190] ss:$8 sps:$4 sm:$0xff]  }
 0x4c2   :  { %v7177_v9 = vpop.eup %7176 }
 0x4c3   :  { %v7179_v31 = vpop.eup %7178  ;;  %v3365_v33 = vpop.f32.mrb[228].mxu0  ;;  %v4003_v52 = vpack.c.bf16 %v7177_v9, %v7173_v27 }
 0x4c4   :  { %v3366_v26 = vadd.f32 %v3365_v33, %v8866_v60  ;;  %v3367_v35 = vpop.f32.mrb[229].mxu0  ;;  %v4004_v30 = vpack.c.bf16 %v7179_v31, %v7175_v44  ;;  %4764 = vmatpush1.bf16.msra.mxu1 %v6707_v39  ;;  %v6722_v33 = vld [vmem:[#allocation10 + $0x1a0] ss:$8 sps:$4 sm:$0xff]  }
 0x4c5   :  { %v3368_v46 = vadd.f32 %v3367_v35, %v8870_v61  ;;  %v3369_v16 = vpop.f32.mrb[230].mxu0  ;;  %4765 = vmatprep.subr.bf16.mxu1 %v6712_v2 }
 0x4c6   :  { %7188 = vtanh.f32 %v3366_v26  ;;  %v3370_v43 = vadd.f32 %v3369_v16, %v8866_v60  ;;  %v3371_v41 = vpop.f32.mrb[231].mxu0  ;;  %4622 = vmatprep.mubr.bf16.mxu1 %v4004_v30  ;;  %v6727_v26 = vld [vmem:[#allocation10 + $0x1b4] ss:$8 sps:$4 sm:$0xff]  }
 0x4c7   :  { %7190 = vtanh.f32 %v3368_v46  ;;  %v3372_v45 = vadd.f32 %v3371_v41, %v8870_v61  ;;  %4623 = vmatmul.mubr.bf16.gmra.mrb[76].mxu1 %v4003_v52  ;;  %v6725_v46 = vld [vmem:[#allocation10 + $0x1b0] ss:$8 sps:$4 sm:$0xff]  }
 0x4c8   :  { %v7181_v32 = vpop.eup %7180  ;;  %7192 = vtanh.f32 %v3370_v43  ;;  %5895 = vmatmul.mubr.bf16.vlgmr.msra.gmra.mrb[80].mxu0 %v8710_v22  ;;  %4766 = vmatpush1.bf16.msra.mxu1 %v6710_v47 }
 0x4c9   :  { %v7183_v56 = vpop.eup %7182  ;;  %7194 = vtanh.f32 %v3372_v45  ;;  %5898 = vmatprep.mubr.bf16.mxu0 %v8722_v49  ;;  %4767 = vmatprep.subr.bf16.mxu1 %v6715_v23  ;;  %v6730_v23 = vld [vmem:[#allocation10 + $0x1c4] ss:$8 sps:$4 sm:$0xff]  }
 0x4ca   :  { %v7185_v4 = vpop.eup %7184 }
 0x4cb   :  { %v7187_v38 = vpop.eup %7186  ;;  %v3375_v37 = vpop.f32.mrb[232].mxu0  ;;  %v4008_v24 = vpack.c.bf16 %v7185_v4, %v7181_v32  ;;  %v6728_v4 = vld [vmem:[#allocation10 + $0x1c0] ss:$8 sps:$4 sm:$0xff]  }
 0x4cc   :  { %v3376_v1 = vadd.f32 %v3375_v37, %v8866_v60  ;;  %v3377_v40 = vpop.f32.mrb[233].mxu0  ;;  %v4009_v18 = vpack.c.bf16 %v7187_v38, %v7183_v56  ;;  %4768 = vmatpush1.bf16.msra.mxu1 %v6713_v55  ;;  %v6733_v37 = vld [vmem:[#allocation10 + $0x1d4] ss:$8 sps:$4 sm:$0xff]  }
 0x4cd   :  { %v3378_v22 = vadd.f32 %v3377_v40, %v8870_v61  ;;  %v3379_v20 = vpop.f32.mrb[234].mxu0  ;;  %4769 = vmatprep.subr.bf16.mxu1 %v6718_v19 }
 0x4ce   :  { %7196 = vtanh.f32 %v3376_v1  ;;  %v3380_v49 = vadd.f32 %v3379_v20, %v8866_v60  ;;  %v3381_v59 = vpop.f32.mrb[235].mxu0  ;;  %4632 = vmatprep.mubr.bf16.mxu1 %v4009_v18  ;;  %v6731_v18 = vld [vmem:[#allocation10 + $0x1d0] ss:$8 sps:$4 sm:$0xff]  }
 0x4cf   :  { %7198 = vtanh.f32 %v3378_v22  ;;  %v3382_v36 = vadd.f32 %v3381_v59, %v8870_v61  ;;  %4633 = vmatmul.mubr.bf16.gmra.mrb[80].mxu1 %v4008_v24  ;;  %v6736_v22 = vld [vmem:[#allocation10 + $0x1e4] ss:$8 sps:$4 sm:$0xff]  }
 0x4d0   :  { %v7189_v10 = vpop.eup %7188  ;;  %7200 = vtanh.f32 %v3380_v49  ;;  %5899 = vmatmul.mubr.bf16.gmra.mrb[84].mxu0 %v8734_v29  ;;  %4770 = vmatpush1.bf16.msra.mxu1 %v6716_v14 }
 0x4d1   :  { %v7191_v51 = vpop.eup %7190  ;;  %7202 = vtanh.f32 %v3382_v36  ;;  %5902 = vmatprep.mubr.bf16.mxu0 %v8744_v48  ;;  %4771 = vmatprep.subr.bf16.mxu1 %v6721_v6 }
 0x4d2   :  { %v7193_v7 = vpop.eup %7192 }
 0x4d3   :  { %v7195_v27 = vpop.eup %7194  ;;  %v3385_v39 = vpop.f32.mrb[236].mxu0  ;;  %v4013_v44 = vpack.c.bf16 %v7193_v7, %v7189_v10  ;;  %v6739_v7 = vld [vmem:[#allocation10 + $0x1f4] ss:$8 sps:$4 sm:$0xff]  }
 0x4d4   :  { %v3386_v2 = vadd.f32 %v3385_v39, %v8866_v60  ;;  %v3387_v9 = vpop.f32.mrb[237].mxu0  ;;  %v4014_v31 = vpack.c.bf16 %v7195_v27, %v7191_v51  ;;  %4772 = vmatpush1.bf16.msra.mxu1 %v6719_v25  ;;  %v6734_v51 = vld [vmem:[#allocation10 + $0x1e0] ss:$8 sps:$4 sm:$0xff]  }
 0x4d5   :  { %v3388_v29 = vadd.f32 %v3387_v9, %v8870_v61  ;;  %v3389_v52 = vpop.f32.mrb[238].mxu0  ;;  %4773 = vmatprep.subr.bf16.mxu1 %v6724_v13 }
 0x4d6   :  { %7204 = vtanh.f32 %v3386_v2  ;;  %v3390_v48 = vadd.f32 %v3389_v52, %v8866_v60  ;;  %v3391_v35 = vpop.f32.mrb[239].mxu0  ;;  %4642 = vmatprep.mubr.bf16.mxu1 %v4014_v31  ;;  %v6737_v2 = vld [vmem:[#allocation10 + $0x1f0] ss:$8 sps:$4 sm:$0xff]   ;;  %v6742_v31 = vld [vmem:[#allocation10 + $0x204] ss:$8 sps:$4 sm:$0xff]  }
 0x4d7   :  { %7206 = vtanh.f32 %v3388_v29  ;;  %v3392_v30 = vadd.f32 %v3391_v35, %v8870_v61  ;;  %4643 = vmatmul.mubr.bf16.gmra.mrb[84].mxu1 %v4013_v44 }
 0x4d8   :  { %v7197_v47 = vpop.eup %7196  ;;  %7208 = vtanh.f32 %v3390_v48  ;;  %5903 = vmatmul.mubr.bf16.gmra.mrb[88].mxu0 %v8753_v17  ;;  %4774 = vmatpush1.bf16.msra.mxu1 %v6722_v33 }
 0x4d9   :  { %v7199_v16 = vpop.eup %7198  ;;  %7210 = vtanh.f32 %v3392_v30  ;;  %5906 = vmatprep.mubr.bf16.mxu0 %v8761_v50  ;;  %4775 = vmatprep.subr.bf16.mxu1 %v6727_v26 }
 0x4da   :  { %v7201_v43 = vpop.eup %7200 }
 0x4db   :  { %v7203_v41 = vpop.eup %7202  ;;  %v3395_v45 = vpop.f32.mrb[240].mxu0  ;;  %v4018_v32 = vpack.c.bf16 %v7201_v43, %v7197_v47 }
 0x4dc   :  { %v3396_v55 = vadd.f32 %v3395_v45, %v8866_v60  ;;  %v3397_v56 = vpop.f32.mrb[241].mxu0  ;;  %v4019_v19 = vpack.c.bf16 %v7203_v41, %v7199_v16  ;;  %4776 = vmatpush1.bf16.msra.mxu1 %v6725_v46 }
 0x4dd   :  { %v3398_v17 = vadd.f32 %v3397_v56, %v8870_v61  ;;  %v3399_v38 = vpop.f32.mrb[242].mxu0  ;;  %4777 = vmatprep.subr.bf16.mxu1 %v6730_v23 }
 0x4de   :  { %7212 = vtanh.f32 %v3396_v55  ;;  %v3400_v50 = vadd.f32 %v3399_v38, %v8866_v60  ;;  %v3401_v24 = vpop.f32.mrb[243].mxu0  ;;  %4652 = vmatprep.mubr.bf16.mxu1 %v4019_v19 }
 0x4df   :  { %7214 = vtanh.f32 %v3398_v17  ;;  %v3402_v1 = vadd.f32 %v3401_v24, %v8870_v61  ;;  %4653 = vmatmul.mubr.bf16.gmra.mrb[88].mxu1 %v4018_v32 }
 0x4e0   :  { %v7205_v40 = vpop.eup %7204  ;;  %7216 = vtanh.f32 %v3400_v50  ;;  %5907 = vmatmul.mubr.bf16.gmra.mrb[92].mxu0 %v8769_v54  ;;  %4778 = vmatpush1.bf16.msra.mxu1 %v6728_v4 }
 0x4e1   :  { %v7207_v14 = vpop.eup %7206  ;;  %7218 = vtanh.f32 %v3402_v1  ;;  %5910 = vmatprep.mubr.bf16.mxu0 %v8777_v42  ;;  %4779 = vmatprep.subr.bf16.mxu1 %v6733_v37 }
 0x4e2   :  { %v7209_v20 = vpop.eup %7208 }
 0x4e3   :  { %v7211_v6 = vpop.eup %7210  ;;  %v3405_v49 = vpop.f32.mrb[244].mxu0  ;;  %v4023_v59 = vpack.c.bf16 %v7209_v20, %v7205_v40 }
 0x4e4   :  { %v3406_v36 = vadd.f32 %v3405_v49, %v8866_v60  ;;  %v3407_v10 = vpop.f32.mrb[245].mxu0  ;;  %v4024_v25 = vpack.c.bf16 %v7211_v6, %v7207_v14  ;;  %4780 = vmatpush1.bf16.msra.mxu1 %v6731_v18 }
 0x4e5   :  { %v3408_v54 = vadd.f32 %v3407_v10, %v8870_v61  ;;  %v3409_v13 = vpop.f32.mrb[246].mxu0  ;;  %4781 = vmatprep.subr.bf16.mxu1 %v6736_v22 }
 0x4e6   :  { %7220 = vtanh.f32 %v3406_v36  ;;  %v3410_v42 = vadd.f32 %v3409_v13, %v8866_v60  ;;  %v3411_v27 = vpop.f32.mrb[247].mxu0  ;;  %4662 = vmatprep.mubr.bf16.mxu1 %v4024_v25 }
 0x4e7   :  { %7222 = vtanh.f32 %v3408_v54  ;;  %v3412_v39 = vadd.f32 %v3411_v27, %v8870_v61  ;;  %4663 = vmatmul.mubr.bf16.gmra.mrb[92].mxu1 %v4023_v59 }
 0x4e8   :  { %v7213_v44 = vpop.eup %7212  ;;  %7224 = vtanh.f32 %v3410_v42  ;;  %5911 = vmatmul.mubr.bf16.gmra.mrb[96].mxu0 %v8785_v0  ;;  %4782 = vmatpush1.bf16.msra.mxu1 %v6734_v51 }
 0x4e9   :  { %v7215_v9 = vpop.eup %7214  ;;  %7226 = vtanh.f32 %v3412_v39  ;;  %5914 = vmatprep.mubr.bf16.mxu0 %v8793_v34  ;;  %4783 = vmatprep.subr.bf16.mxu1 %v6739_v7 }
 0x4ea   :  { %v7217_v33 = vpop.eup %7216 }
 0x4eb   :  { %v7219_v29 = vpop.eup %7218  ;;  %v3415_v52 = vpop.f32.mrb[248].mxu0  ;;  %v4028_v26 = vpack.c.bf16 %v7217_v33, %v7213_v44 }
 0x4ec   :  { %v3416_v48 = vadd.f32 %v3415_v52, %v8866_v60  ;;  %v3417_v35 = vpop.f32.mrb[249].mxu0  ;;  %v4029_v30 = vpack.c.bf16 %v7219_v29, %v7215_v9  ;;  %4784 = vmatpush1.bf16.msra.mxu1 %v6737_v2 }
 0x4ed   :  { %v3418_v47 = vadd.f32 %v3417_v35, %v8870_v61  ;;  %v3419_v0 = vpop.f32.mrb[250].mxu0  ;;  %4946 = vmatprep.subr.bf16.mxu1 %v6742_v31 }
 0x4ee   :  { %7228 = vtanh.f32 %v3416_v48  ;;  %v3420_v46 = vadd.f32 %v3419_v0, %v8866_v60  ;;  %v3421_v16 = vpop.f32.mrb[251].mxu0  ;;  %4672 = vmatprep.mubr.bf16.mxu1 %v4029_v30 }
 0x4ef   :  { %7230 = vtanh.f32 %v3418_v47  ;;  %v3422_v34 = vadd.f32 %v3421_v16, %v8870_v61  ;;  %4673 = vmatmul.mubr.bf16.gmra.mrb[96].mxu1 %v4028_v26 }
 0x4f0   :  { %v7221_v23 = vpop.eup %7220  ;;  %7232 = vtanh.f32 %v3420_v46  ;;  %5915 = vmatmul.mubr.bf16.gmra.mrb[100].mxu0 %v8801_v3 }
 0x4f1   :  { %v7223_v43 = vpop.eup %7222  ;;  %7234 = vtanh.f32 %v3422_v34  ;;  %5918 = vmatprep.mubr.bf16.mxu0 %v8809_v53 }
 0x4f2   :  { %v7225_v41 = vpop.eup %7224 }
 0x4f3   :  { %v7227_v45 = vpop.eup %7226  ;;  %v3425_v32 = vpop.f32.mrb[252].mxu0  ;;  %v4033_v55 = vpack.c.bf16 %v7225_v41, %v7221_v23 }
 0x4f4   :  { %v3426_v56 = vadd.f32 %v3425_v32, %v8866_v60  ;;  %v3427_v19 = vpop.f32.mrb[253].mxu0  ;;  %v4034_v4 = vpack.c.bf16 %v7227_v45, %v7223_v43 }
 0x4f5   :  { %v3428_v17 = vadd.f32 %v3427_v19, %v8870_v61  ;;  %v3429_v38 = vpop.f32.mrb[254].mxu0 }
 0x4f6   :  { %7236 = vtanh.f32 %v3426_v56  ;;  %v3430_v37 = vadd.f32 %v3429_v38, %v8866_v60  ;;  %v3431_v50 = vpop.f32.mrb[255].mxu0  ;;  %4682 = vmatprep.mubr.bf16.mxu1 %v4034_v4 }
 0x4f7   :  { %7238 = vtanh.f32 %v3428_v17  ;;  %v3432_v3 = vadd.f32 %v3431_v50, %v8870_v61  ;;  %4683 = vmatmul.mubr.bf16.gmra.mrb[100].mxu1 %v4033_v55 }
 0x4f8   :  { %v7229_v53 = vpop.eup %7228  ;;  %7240 = vtanh.f32 %v3430_v37  ;;  %5919 = vmatmul.mubr.bf16.gmra.mrb[104].mxu0 %v8817_v58 }
 0x4f9   :  { %v7231_v24 = vpop.eup %7230  ;;  %7242 = vtanh.f32 %v3432_v3  ;;  %5922 = vmatprep.mubr.bf16.mxu0 %v8825_v62 }
 0x4fa   :  { %v7233_v1 = vpop.eup %7232 }
 0x4fb   :  { %v7235_v40 = vpop.eup %7234  ;;  %v3435_v18 = vpop.f32.mrb[0].mxu0  ;;  %v4038_v14 = vpack.c.bf16 %v7233_v1, %v7229_v53 }
 0x4fc   :  { %v3436_v22 = vadd.f32 %v3435_v18, %v8866_v60  ;;  %v3437_v20 = vpop.f32.mrb[1].mxu0  ;;  %v4039_v6 = vpack.c.bf16 %v7235_v40, %v7231_v24  ;;  %v8965_v40 = vrot.slane %v8861_v5, %v629_v57 }
 0x4fd   :  { %v3438_v49 = vadd.f32 %v3437_v20, %v8870_v61  ;;  %v3439_v59 = vpop.f32.mrb[2].mxu0 }
 0x4fe   :  { %7244 = vtanh.f32 %v3436_v22  ;;  %v3440_v36 = vadd.f32 %v3439_v59, %v8866_v60  ;;  %v3441_v10 = vpop.f32.mrb[3].mxu0  ;;  %4692 = vmatprep.mubr.bf16.mxu1 %v4039_v6 }
 0x4ff   :  { %7246 = vtanh.f32 %v3438_v49  ;;  %v3442_v58 = vadd.f32 %v3441_v10, %v8870_v61  ;;  %4693 = vmatmul.mubr.bf16.gmra.mrb[104].mxu1 %v4038_v14  ;;  %v8970_v14 = vrot.slane %v8861_v5, %v633_v15 }
 0x500   :  { %v7237_v62 = vpop.eup %7236  ;;  %7248 = vtanh.f32 %v3440_v36  ;;  %5923 = vmatmul.mubr.bf16.gmra.mrb[108].mxu0 %v8833_v8 }
 0x501   :  { %v7239_v25 = vpop.eup %7238  ;;  %7250 = vtanh.f32 %v3442_v58 }
 0x502   :  { %v7241_v51 = vpop.eup %7240 }
 0x503   :  { %v7243_v54 = vpop.eup %7242  ;;  %v3445_v13 = vpop.f32.mrb[4].mxu0  ;;  %v4043_v7 = vpack.c.bf16 %v7241_v51, %v7237_v62 }
 0x504   :  { %v3446_v42 = vadd.f32 %v3445_v13, %v8866_v60  ;;  %v3447_v27 = vpop.f32.mrb[5].mxu0  ;;  %v4044_v39 = vpack.c.bf16 %v7243_v54, %v7239_v25 }
 0x505   :  { %v3448_v44 = vadd.f32 %v3447_v27, %v8870_v61  ;;  %v3449_v2 = vpop.f32.mrb[6].mxu0 }
 0x506   :  { %7252 = vtanh.f32 %v3446_v42  ;;  %v3450_v9 = vadd.f32 %v3449_v2, %v8866_v60  ;;  %v3451_v31 = vpop.f32.mrb[7].mxu0  ;;  %4702 = vmatprep.mubr.bf16.mxu1 %v4044_v39 }
 0x507   :  { %7254 = vtanh.f32 %v3448_v44  ;;  %v3452_v8 = vadd.f32 %v3451_v31, %v8870_v61  ;;  %4703 = vmatmul.mubr.bf16.gmra.mrb[108].mxu1 %v4043_v7 }
 0x508   :  { %v7245_v33 = vpop.eup %7244  ;;  %7256 = vtanh.f32 %v3450_v9 }
 0x509   :  { %v7247_v29 = vpop.eup %7246  ;;  %7258 = vtanh.f32 %v3452_v8 }
 0x50a   :  { %v7249_v52 = vpop.eup %7248 }
 0x50b   :  { %v7251_v26 = vpop.eup %7250  ;;  %v3455_v48 = vpop.f32.mrb[8].mxu0  ;;  %v4048_v35 = vpack.c.bf16 %v7249_v52, %v7245_v33 }
 0x50c   :  { %v3456_v30 = vadd.f32 %v3455_v48, %v8866_v60  ;;  %v3457_v47 = vpop.f32.mrb[9].mxu0  ;;  %v4049_v0 = vpack.c.bf16 %v7251_v26, %v7247_v29 }
 0x50d   :  { %v3458_v46 = vadd.f32 %v3457_v47, %v8870_v61  ;;  %v3459_v16 = vpop.f32.mrb[10].mxu0 }
 0x50e   :  { %7260 = vtanh.f32 %v3456_v30  ;;  %v3460_v34 = vadd.f32 %v3459_v16, %v8866_v60  ;;  %v3461_v23 = vpop.f32.mrb[11].mxu0  ;;  %4712 = vmatprep.mubr.bf16.mxu1 %v4049_v0  ;;  %v6740_v0 = vld [vmem:[#allocation10 + $0x200] ss:$8 sps:$4 sm:$0xff]  }
 0x50f   :  { %7262 = vtanh.f32 %v3458_v46  ;;  %v3462_v43 = vadd.f32 %v3461_v23, %v8870_v61  ;;  %4713 = vmatmul.mubr.bf16.gmra.mrb[112].mxu1 %v4048_v35 }
 0x510   :  { %v7253_v41 = vpop.eup %7252  ;;  %7264 = vtanh.f32 %v3460_v34  ;;  %v6745_v34 = vld [vmem:[#allocation10 + $0x214] ss:$8 sps:$4 sm:$0xff]  }
 0x511   :  { %v7255_v45 = vpop.eup %7254  ;;  %7266 = vtanh.f32 %v3462_v43 }
 0x512   :  { %v7257_v32 = vpop.eup %7256 }
 0x513   :  { %v7259_v55 = vpop.eup %7258  ;;  %v3465_v56 = vpop.f32.mrb[12].mxu0  ;;  %v4053_v19 = vpack.c.bf16 %v7257_v32, %v7253_v41  ;;  %v6743_v32 = vld [vmem:[#allocation10 + $0x210] ss:$8 sps:$4 sm:$0xff]  }
 0x514   :  { %v3466_v4 = vadd.f32 %v3465_v56, %v8866_v60  ;;  %v3467_v17 = vpop.f32.mrb[13].mxu0  ;;  %v4054_v38 = vpack.c.bf16 %v7259_v55, %v7255_v45  ;;  %v6748_v56 = vld [vmem:[#allocation10 + $0x224] ss:$8 sps:$4 sm:$0xff]  }
 0x515   :  { %v3468_v37 = vadd.f32 %v3467_v17, %v8870_v61  ;;  %v3469_v50 = vpop.f32.mrb[14].mxu0 }
 0x516   :  { %7268 = vtanh.f32 %v3466_v4  ;;  %v3470_v3 = vadd.f32 %v3469_v50, %v8866_v60  ;;  %v3471_v53 = vpop.f32.mrb[15].mxu0  ;;  %4722 = vmatprep.mubr.bf16.mxu1 %v4054_v38 }
 0x517   :  { %7270 = vtanh.f32 %v3468_v37  ;;  %v3472_v24 = vadd.f32 %v3471_v53, %v8870_v61  ;;  %4723 = vmatmul.mubr.bf16.gmra.mrb[116].mxu1 %v4053_v19  ;;  %v6746_v53 = vld [vmem:[#allocation10 + $0x220] ss:$8 sps:$4 sm:$0xff]  }
 0x518   :  { %v7261_v1 = vpop.eup %7260  ;;  %7272 = vtanh.f32 %v3470_v3 }
 0x519   :  { %v7263_v18 = vpop.eup %7262  ;;  %7274 = vtanh.f32 %v3472_v24 }
 0x51a   :  { %v7265_v60 = vpop.eup %7264 }
 0x51b   :  { %v7267_v22 = vpop.eup %7266  ;;  %v3508_v20 = vpop.f32.mrb[16].mxu0  ;;  %v4058_v6 = vpack.c.bf16 %v7265_v60, %v7261_v1 }
 0x51c   :  { %v3509_v61 = vadd.f32 %v3508_v20, %v8965_v40  ;;  %v3510_v49 = vpop.f32.mrb[17].mxu0  ;;  %v4059_v59 = vpack.c.bf16 %v7267_v22, %v7263_v18  ;;  %v6751_v18 = vld [vmem:[#allocation10 + $0x234] ss:$8 sps:$4 sm:$0xff]  }
 0x51d   :  { %v3511_v36 = vadd.f32 %v3510_v49, %v8970_v14  ;;  %v3512_v10 = vpop.f32.mrb[18].mxu0 }
 0x51e   :  { %7276 = vtanh.f32 %v3509_v61  ;;  %v3513_v57 = vadd.f32 %v3512_v10, %v8965_v40  ;;  %v3514_v58 = vpop.f32.mrb[19].mxu0  ;;  %4732 = vmatprep.mubr.bf16.mxu1 %v4059_v59  ;;  %v6749_v61 = vld [vmem:[#allocation10 + $0x230] ss:$8 sps:$4 sm:$0xff]   ;;  %v6754_v59 = vld [vmem:[#allocation10 + $0x244] ss:$8 sps:$4 sm:$0xff]  }
 0x51f   :  { %7278 = vtanh.f32 %v3511_v36  ;;  %v3515_v15 = vadd.f32 %v3514_v58, %v8970_v14  ;;  %4733 = vmatmul.mubr.bf16.gmra.mrb[120].mxu1 %v4058_v6 }
 0x520   :  { %v7269_v5 = vpop.eup %7268  ;;  %7280 = vtanh.f32 %v3513_v57 }
 0x521   :  { %v7271_v62 = vpop.eup %7270  ;;  %7282 = vtanh.f32 %v3515_v15 }
 0x522   :  { %v7273_v25 = vpop.eup %7272 }
 0x523   :  { %v7275_v51 = vpop.eup %7274  ;;  %v3518_v54 = vpop.f32.mrb[20].mxu0  ;;  %v4063_v13 = vpack.c.bf16 %v7273_v25, %v7269_v5  ;;  %v6752_v25 = vld [vmem:[#allocation10 + $0x240] ss:$8 sps:$4 sm:$0xff]  }
 0x524   :  { %v3519_v7 = vadd.f32 %v3518_v54, %v8965_v40  ;;  %v3520_v42 = vpop.f32.mrb[21].mxu0  ;;  %v4064_v27 = vpack.c.bf16 %v7275_v51, %v7271_v62 }
 0x525   :  { %v3521_v39 = vadd.f32 %v3520_v42, %v8970_v14  ;;  %v3522_v44 = vpop.f32.mrb[22].mxu0 }
 0x526   :  { %7284 = vtanh.f32 %v3519_v7  ;;  %v3523_v2 = vadd.f32 %v3522_v44, %v8965_v40  ;;  %v3524_v9 = vpop.f32.mrb[23].mxu0  ;;  %4742 = vmatprep.mubr.bf16.mxu1 %v4064_v27  ;;  %v6755_v44 = vld [vmem:[#allocation10 + $0x250] ss:$8 sps:$4 sm:$0xff]  }
 0x527   :  { %7286 = vtanh.f32 %v3521_v39  ;;  %v3525_v31 = vadd.f32 %v3524_v9, %v8970_v14  ;;  %4743 = vmatmul.mubr.bf16.gmra.mrb[124].mxu1 %v4063_v13  ;;  %v6757_v13 = vld [vmem:[#allocation10 + $0x254] ss:$8 sps:$4 sm:$0xff]   ;;  %v6760_v9 = vld [vmem:[#allocation10 + $0x264] ss:$8 sps:$4 sm:$0xff]  }
 0x528   :  { %v7277_v8 = vpop.eup %7276  ;;  %7288 = vtanh.f32 %v3523_v2 }
 0x529   :  { %v7279_v33 = vpop.eup %7278  ;;  %7290 = vtanh.f32 %v3525_v31 }
 0x52a   :  { %v7281_v29 = vpop.eup %7280 }
 0x52b   :  { %v7283_v52 = vpop.eup %7282  ;;  %v3528_v26 = vpop.f32.mrb[24].mxu0  ;;  %v3990_v48 = vpack.c.bf16 %v7281_v29, %v7277_v8 }
 0x52c   :  { %v3529_v35 = vadd.f32 %v3528_v26, %v8965_v40  ;;  %v3530_v30 = vpop.f32.mrb[25].mxu0  ;;  %v3991_v47 = vpack.c.bf16 %v7283_v52, %v7279_v33 }
 0x52d   :  { %v3531_v46 = vadd.f32 %v3530_v30, %v8970_v14  ;;  %v3532_v16 = vpop.f32.mrb[26].mxu0 }
 0x52e   :  { %7292 = vtanh.f32 %v3529_v35  ;;  %v3533_v23 = vadd.f32 %v3532_v16, %v8965_v40  ;;  %v3534_v43 = vpop.f32.mrb[27].mxu0  ;;  %4785 = vmatprep.mubr.bf16.mxu1 %v3991_v47  ;;  %v6758_v35 = vld [vmem:[#allocation10 + $0x260] ss:$8 sps:$4 sm:$0xff]  }
 0x52f   :  { %7294 = vtanh.f32 %v3531_v46  ;;  %v3535_v41 = vadd.f32 %v3534_v43, %v8970_v14  ;;  %4786 = vmatmul.mubr.bf16.vlgmr.msra.gmra.mrb[64].mxu1 %v3990_v48  ;;  %v6761_v43 = vld [vmem:[#allocation10 + $0x270] ss:$8 sps:$4 sm:$0xff]  }
 0x530   :  { %v7285_v45 = vpop.eup %7284  ;;  %7296 = vtanh.f32 %v3533_v23  ;;  %4947 = vmatpush1.bf16.msra.mxu1 %v6740_v0  ;;  %v6763_v0 = vld [vmem:[#allocation10 + $0x274] ss:$8 sps:$4 sm:$0xff]  }
 0x531   :  { %v7287_v55 = vpop.eup %7286  ;;  %7298 = vtanh.f32 %v3535_v41  ;;  %4948 = vmatprep.subr.bf16.mxu1 %v6745_v34 }
 0x532   :  { %v7289_v19 = vpop.eup %7288 }
 0x533   :  { %v7291_v4 = vpop.eup %7290  ;;  %v3538_v17 = vpop.f32.mrb[28].mxu0  ;;  %v3995_v38 = vpack.c.bf16 %v7289_v19, %v7285_v45 }
 0x534   :  { %v3539_v37 = vadd.f32 %v3538_v17, %v8965_v40  ;;  %v3540_v50 = vpop.f32.mrb[29].mxu0  ;;  %v3996_v3 = vpack.c.bf16 %v7291_v4, %v7287_v55  ;;  %4949 = vmatpush1.bf16.msra.mxu1 %v6743_v32 }
 0x535   :  { %v3541_v24 = vadd.f32 %v3540_v50, %v8970_v14  ;;  %v3542_v1 = vpop.f32.mrb[30].mxu0  ;;  %4950 = vmatprep.subr.bf16.mxu1 %v6748_v56 }
 0x536   :  { %7300 = vtanh.f32 %v3539_v37  ;;  %v3543_v60 = vadd.f32 %v3542_v1, %v8965_v40  ;;  %v3544_v22 = vpop.f32.mrb[31].mxu0  ;;  %4795 = vmatprep.mubr.bf16.mxu1 %v3996_v3 }
 0x537   :  { %7302 = vtanh.f32 %v3541_v24  ;;  %v3545_v20 = vadd.f32 %v3544_v22, %v8970_v14  ;;  %4796 = vmatmul.mubr.bf16.gmra.mrb[68].mxu1 %v3995_v38 }
 0x538   :  { %v7293_v6 = vpop.eup %7292  ;;  %7304 = vtanh.f32 %v3543_v60  ;;  %4951 = vmatpush1.bf16.msra.mxu1 %v6746_v53 }
 0x539   :  { %v7295_v49 = vpop.eup %7294  ;;  %7306 = vtanh.f32 %v3545_v20  ;;  %4952 = vmatprep.subr.bf16.mxu1 %v6751_v18 }
 0x53a   :  { %v7297_v36 = vpop.eup %7296 }
 0x53b   :  { %v7299_v10 = vpop.eup %7298  ;;  %v3548_v57 = vpop.f32.mrb[32].mxu0  ;;  %v4000_v58 = vpack.c.bf16 %v7297_v36, %v7293_v6 }
 0x53c   :  { %v3549_v15 = vadd.f32 %v3548_v57, %v8965_v40  ;;  %v3550_v5 = vpop.f32.mrb[33].mxu0  ;;  %v4001_v62 = vpack.c.bf16 %v7299_v10, %v7295_v49  ;;  %4953 = vmatpush1.bf16.msra.mxu1 %v6749_v61 }
 0x53d   :  { %v3551_v51 = vadd.f32 %v3550_v5, %v8970_v14  ;;  %v3552_v54 = vpop.f32.mrb[34].mxu0  ;;  %4954 = vmatprep.subr.bf16.mxu1 %v6754_v59 }
 0x53e   :  { %7308 = vtanh.f32 %v3549_v15  ;;  %v3553_v7 = vadd.f32 %v3552_v54, %v8965_v40  ;;  %v3554_v42 = vpop.f32.mrb[35].mxu0  ;;  %4805 = vmatprep.mubr.bf16.mxu1 %v4001_v62 }
 0x53f   :  { %7310 = vtanh.f32 %v3551_v51  ;;  %v3555_v27 = vadd.f32 %v3554_v42, %v8970_v14  ;;  %4806 = vmatmul.mubr.bf16.gmra.mrb[72].mxu1 %v4000_v58 }
 0x540   :  { %v7301_v39 = vpop.eup %7300  ;;  %7312 = vtanh.f32 %v3553_v7  ;;  %4955 = vmatpush1.bf16.msra.mxu1 %v6752_v25 }
 0x541   :  { %v7303_v2 = vpop.eup %7302  ;;  %7314 = vtanh.f32 %v3555_v27  ;;  %4956 = vmatprep.subr.bf16.mxu1 %v6757_v13 }
 0x542   :  { %v7305_v31 = vpop.eup %7304 }
 0x543   :  { %v7307_v8 = vpop.eup %7306  ;;  %v3558_v33 = vpop.f32.mrb[36].mxu0  ;;  %v4005_v29 = vpack.c.bf16 %v7305_v31, %v7301_v39 }
 0x544   :  { %v3559_v52 = vadd.f32 %v3558_v33, %v8965_v40  ;;  %v3560_v26 = vpop.f32.mrb[37].mxu0  ;;  %v4006_v48 = vpack.c.bf16 %v7307_v8, %v7303_v2  ;;  %4957 = vmatpush1.bf16.msra.mxu1 %v6755_v44 }
 0x545   :  { %v3561_v30 = vadd.f32 %v3560_v26, %v8970_v14  ;;  %v3562_v47 = vpop.f32.mrb[38].mxu0  ;;  %4958 = vmatprep.subr.bf16.mxu1 %v6760_v9 }
 0x546   :  { %7316 = vtanh.f32 %v3559_v52  ;;  %v3563_v46 = vadd.f32 %v3562_v47, %v8965_v40  ;;  %v3564_v16 = vpop.f32.mrb[39].mxu0  ;;  %4815 = vmatprep.mubr.bf16.mxu1 %v4006_v48 }
 0x547   :  { %7318 = vtanh.f32 %v3561_v30  ;;  %v3565_v34 = vadd.f32 %v3564_v16, %v8970_v14  ;;  %4816 = vmatmul.mubr.bf16.gmra.mrb[76].mxu1 %v4005_v29 }
 0x548   :  { %v7309_v23 = vpop.eup %7308  ;;  %7320 = vtanh.f32 %v3563_v46  ;;  %4959 = vmatpush1.bf16.msra.mxu1 %v6758_v35 }
 0x549   :  { %v7311_v41 = vpop.eup %7310  ;;  %7322 = vtanh.f32 %v3565_v34  ;;  %4960 = vmatprep.subr.bf16.mxu1 %v6763_v0 }
 0x54a   :  { %v7313_v45 = vpop.eup %7312 }
 0x54b   :  { %v7315_v32 = vpop.eup %7314  ;;  %v3568_v55 = vpop.f32.mrb[40].mxu0  ;;  %v4010_v56 = vpack.c.bf16 %v7313_v45, %v7309_v23 }
 0x54c   :  { %v3569_v19 = vadd.f32 %v3568_v55, %v8965_v40  ;;  %v3570_v4 = vpop.f32.mrb[41].mxu0  ;;  %v4011_v17 = vpack.c.bf16 %v7315_v32, %v7311_v41  ;;  %4961 = vmatpush1.bf16.msra.mxu1 %v6761_v43 }
 0x54d   :  { %v3571_v38 = vadd.f32 %v3570_v4, %v8970_v14  ;;  %v3572_v37 = vpop.f32.mrb[42].mxu0 }
 0x54e   :  { %7324 = vtanh.f32 %v3569_v19  ;;  %v3573_v50 = vadd.f32 %v3572_v37, %v8965_v40  ;;  %v3574_v3 = vpop.f32.mrb[43].mxu0  ;;  %4825 = vmatprep.mubr.bf16.mxu1 %v4011_v17 }
 0x54f   :  { %7326 = vtanh.f32 %v3571_v38  ;;  %v3575_v53 = vadd.f32 %v3574_v3, %v8970_v14  ;;  %4826 = vmatmul.mubr.bf16.gmra.mrb[80].mxu1 %v4010_v56 }
 0x550   :  { %v7317_v24 = vpop.eup %7316  ;;  %7328 = vtanh.f32 %v3573_v50 }
 0x551   :  { %v7319_v1 = vpop.eup %7318  ;;  %7330 = vtanh.f32 %v3575_v53 }
 0x552   :  { %v7321_v18 = vpop.eup %7320 }
 0x553   :  { %v7323_v60 = vpop.eup %7322  ;;  %v3578_v22 = vpop.f32.mrb[44].mxu0  ;;  %v4015_v20 = vpack.c.bf16 %v7321_v18, %v7317_v24 }
 0x554   :  { %v3579_v6 = vadd.f32 %v3578_v22, %v8965_v40  ;;  %v3580_v61 = vpop.f32.mrb[45].mxu0  ;;  %v4016_v49 = vpack.c.bf16 %v7323_v60, %v7319_v1 }
 0x555   :  { %v3581_v59 = vadd.f32 %v3580_v61, %v8970_v14  ;;  %v3582_v36 = vpop.f32.mrb[46].mxu0 }
 0x556   :  { %7332 = vtanh.f32 %v3579_v6  ;;  %v3583_v10 = vadd.f32 %v3582_v36, %v8965_v40  ;;  %v3584_v57 = vpop.f32.mrb[47].mxu0  ;;  %4835 = vmatprep.mubr.bf16.mxu1 %v4016_v49 }
 0x557   :  { %7334 = vtanh.f32 %v3581_v59  ;;  %v3585_v58 = vadd.f32 %v3584_v57, %v8970_v14  ;;  %4836 = vmatmul.mubr.bf16.gmra.mrb[84].mxu1 %v4015_v20 }
 0x558   :  { %v7325_v15 = vpop.eup %7324  ;;  %7336 = vtanh.f32 %v3583_v10 }
 0x559   :  { %v7327_v5 = vpop.eup %7326  ;;  %7338 = vtanh.f32 %v3585_v58 }
 0x55a   :  { %v7329_v62 = vpop.eup %7328 }
 0x55b   :  { %v7331_v25 = vpop.eup %7330  ;;  %v3588_v51 = vpop.f32.mrb[48].mxu0  ;;  %v4020_v54 = vpack.c.bf16 %v7329_v62, %v7325_v15 }
 0x55c   :  { %v3589_v13 = vadd.f32 %v3588_v51, %v8965_v40  ;;  %v3590_v7 = vpop.f32.mrb[49].mxu0  ;;  %v4021_v42 = vpack.c.bf16 %v7331_v25, %v7327_v5 }
 0x55d   :  { %v3591_v27 = vadd.f32 %v3590_v7, %v8970_v14  ;;  %v3592_v39 = vpop.f32.mrb[50].mxu0 }
 0x55e   :  { %7340 = vtanh.f32 %v3589_v13  ;;  %v3593_v44 = vadd.f32 %v3592_v39, %v8965_v40  ;;  %v3594_v2 = vpop.f32.mrb[51].mxu0  ;;  %4845 = vmatprep.mubr.bf16.mxu1 %v4021_v42 }
 0x55f   :  { %7342 = vtanh.f32 %v3591_v27  ;;  %v3595_v9 = vadd.f32 %v3594_v2, %v8970_v14  ;;  %4846 = vmatmul.mubr.bf16.gmra.mrb[88].mxu1 %v4020_v54 }
 0x560   :  { %v7333_v31 = vpop.eup %7332  ;;  %7344 = vtanh.f32 %v3593_v44 }
 0x561   :  { %v7335_v8 = vpop.eup %7334  ;;  %7346 = vtanh.f32 %v3595_v9 }
 0x562   :  { %v7337_v33 = vpop.eup %7336 }
 0x563   :  { %v7339_v29 = vpop.eup %7338  ;;  %v3598_v52 = vpop.f32.mrb[52].mxu0  ;;  %v4025_v26 = vpack.c.bf16 %v7337_v33, %v7333_v31 }
 0x564   :  { %v3599_v48 = vadd.f32 %v3598_v52, %v8965_v40  ;;  %v3600_v35 = vpop.f32.mrb[53].mxu0  ;;  %v4026_v30 = vpack.c.bf16 %v7339_v29, %v7335_v8 }
 0x565   :  { %v3601_v47 = vadd.f32 %v3600_v35, %v8970_v14  ;;  %v3602_v0 = vpop.f32.mrb[54].mxu0 }
 0x566   :  { %7348 = vtanh.f32 %v3599_v48  ;;  %v3603_v46 = vadd.f32 %v3602_v0, %v8965_v40  ;;  %v3604_v16 = vpop.f32.mrb[55].mxu0  ;;  %4855 = vmatprep.mubr.bf16.mxu1 %v4026_v30 }
 0x567   :  { %7350 = vtanh.f32 %v3601_v47  ;;  %v3605_v34 = vadd.f32 %v3604_v16, %v8970_v14  ;;  %4856 = vmatmul.mubr.bf16.gmra.mrb[92].mxu1 %v4025_v26 }
 0x568   :  { %v7341_v23 = vpop.eup %7340  ;;  %7352 = vtanh.f32 %v3603_v46 }
 0x569   :  { %v7343_v43 = vpop.eup %7342  ;;  %7354 = vtanh.f32 %v3605_v34 }
 0x56a   :  { %v7345_v41 = vpop.eup %7344 }
 0x56b   :  { %v7347_v45 = vpop.eup %7346  ;;  %v3608_v32 = vpop.f32.mrb[56].mxu0  ;;  %v4030_v55 = vpack.c.bf16 %v7345_v41, %v7341_v23 }
 0x56c   :  { %v3609_v56 = vadd.f32 %v3608_v32, %v8965_v40  ;;  %v3610_v19 = vpop.f32.mrb[57].mxu0  ;;  %v4031_v4 = vpack.c.bf16 %v7347_v45, %v7343_v43 }
 0x56d   :  { %v3611_v17 = vadd.f32 %v3610_v19, %v8970_v14  ;;  %v3612_v38 = vpop.f32.mrb[58].mxu0 }
 0x56e   :  { %7356 = vtanh.f32 %v3609_v56  ;;  %v3613_v37 = vadd.f32 %v3612_v38, %v8965_v40  ;;  %v3614_v50 = vpop.f32.mrb[59].mxu0  ;;  %4865 = vmatprep.mubr.bf16.mxu1 %v4031_v4 }
 0x56f   :  { %7358 = vtanh.f32 %v3611_v17  ;;  %v3615_v3 = vadd.f32 %v3614_v50, %v8970_v14  ;;  %4866 = vmatmul.mubr.bf16.gmra.mrb[96].mxu1 %v4030_v55 }
 0x570   :  { %v7349_v53 = vpop.eup %7348  ;;  %7360 = vtanh.f32 %v3613_v37 }
 0x571   :  { %v7351_v24 = vpop.eup %7350  ;;  %7362 = vtanh.f32 %v3615_v3 }
 0x572   :  { %v7353_v1 = vpop.eup %7352 }
 0x573   :  { %v7355_v18 = vpop.eup %7354  ;;  %v3618_v60 = vpop.f32.mrb[60].mxu0  ;;  %v4035_v22 = vpack.c.bf16 %v7353_v1, %v7349_v53 }
 0x574   :  { %v3619_v20 = vadd.f32 %v3618_v60, %v8965_v40  ;;  %v3620_v6 = vpop.f32.mrb[61].mxu0  ;;  %v4036_v61 = vpack.c.bf16 %v7355_v18, %v7351_v24 }
 0x575   :  { %v3621_v49 = vadd.f32 %v3620_v6, %v8970_v14  ;;  %v3622_v59 = vpop.f32.mrb[62].mxu0 }
 0x576   :  { %7364 = vtanh.f32 %v3619_v20  ;;  %v3623_v36 = vadd.f32 %v3622_v59, %v8965_v40  ;;  %v3624_v10 = vpop.f32.mrb[63].mxu0  ;;  %4875 = vmatprep.mubr.bf16.mxu1 %v4036_v61 }
 0x577   :  { %7366 = vtanh.f32 %v3621_v49  ;;  %v3625_v57 = vadd.f32 %v3624_v10, %v8970_v14  ;;  %4876 = vmatmul.mubr.bf16.gmra.mrb[100].mxu1 %v4035_v22 }
 0x578   :  { %v7357_v58 = vpop.eup %7356  ;;  %7368 = vtanh.f32 %v3623_v36 }
 0x579   :  { %v7359_v15 = vpop.eup %7358  ;;  %7370 = vtanh.f32 %v3625_v57 }
 0x57a   :  { %v7361_v5 = vpop.eup %7360 }
 0x57b   :  { %v7363_v62 = vpop.eup %7362  ;;  %v3628_v25 = vpop.f32.mrb[64].mxu0  ;;  %v4040_v51 = vpack.c.bf16 %v7361_v5, %v7357_v58  ;;  %v7469_v58 = vld [vmem:[%s9221_s6] sm:$0x1f] }
 0x57c   :  { %v3629_v54 = vadd.f32 %v3628_v25, %v8965_v40  ;;  %v3630_v13 = vpop.f32.mrb[65].mxu0  ;;  %v4041_v7 = vpack.c.bf16 %v7363_v62, %v7359_v15  ;;  %v9041_v15 = vrot.slane %v7469_v58, %v637_v63 }
 0x57d   :  { %v3631_v42 = vadd.f32 %v3630_v13, %v8970_v14  ;;  %v3632_v27 = vpop.f32.mrb[66].mxu0 }
 0x57e   :  { %7372 = vtanh.f32 %v3629_v54  ;;  %v3633_v39 = vadd.f32 %v3632_v27, %v8965_v40  ;;  %v3634_v44 = vpop.f32.mrb[67].mxu0  ;;  %4885 = vmatprep.mubr.bf16.mxu1 %v4041_v7 }
 0x57f   :  { %7374 = vtanh.f32 %v3631_v42  ;;  %v3635_v2 = vadd.f32 %v3634_v44, %v8970_v14  ;;  %4886 = vmatmul.mubr.bf16.gmra.mrb[104].mxu1 %v4040_v51 }
 0x580   :  { %v7365_v9 = vpop.eup %7364  ;;  %7376 = vtanh.f32 %v3633_v39 }
 0x581   :  { %v7367_v31 = vpop.eup %7366  ;;  %7378 = vtanh.f32 %v3635_v2 }
 0x582   :  { %v7369_v8 = vpop.eup %7368 }
 0x583   :  { %v7371_v33 = vpop.eup %7370  ;;  %v3638_v29 = vpop.f32.mrb[68].mxu0  ;;  %v4045_v52 = vpack.c.bf16 %v7369_v8, %v7365_v9 }
 0x584   :  { %v3639_v26 = vadd.f32 %v3638_v29, %v8965_v40  ;;  %v3640_v48 = vpop.f32.mrb[69].mxu0  ;;  %v4046_v35 = vpack.c.bf16 %v7371_v33, %v7367_v31 }
 0x585   :  { %v3641_v30 = vadd.f32 %v3640_v48, %v8970_v14  ;;  %v3642_v47 = vpop.f32.mrb[70].mxu0 }
 0x586   :  { %7380 = vtanh.f32 %v3639_v26  ;;  %v3643_v0 = vadd.f32 %v3642_v47, %v8965_v40  ;;  %v3644_v46 = vpop.f32.mrb[71].mxu0  ;;  %4895 = vmatprep.mubr.bf16.mxu1 %v4046_v35 }
 0x587   :  { %7382 = vtanh.f32 %v3641_v30  ;;  %v3645_v16 = vadd.f32 %v3644_v46, %v8970_v14  ;;  %4896 = vmatmul.mubr.bf16.gmra.mrb[108].mxu1 %v4045_v52 }
 0x588   :  { %v7373_v34 = vpop.eup %7372  ;;  %7384 = vtanh.f32 %v3643_v0 }
 0x589   :  { %v7375_v23 = vpop.eup %7374  ;;  %7386 = vtanh.f32 %v3645_v16 }
 0x58a   :  { %v7377_v43 = vpop.eup %7376 }
 0x58b   :  { %v7379_v41 = vpop.eup %7378  ;;  %v3648_v45 = vpop.f32.mrb[72].mxu0  ;;  %v4050_v32 = vpack.c.bf16 %v7377_v43, %v7373_v34 }
 0x58c   :  { %v3649_v55 = vadd.f32 %v3648_v45, %v8965_v40  ;;  %v3650_v56 = vpop.f32.mrb[73].mxu0  ;;  %v4051_v19 = vpack.c.bf16 %v7379_v41, %v7375_v23 }
 0x58d   :  { %v3651_v4 = vadd.f32 %v3650_v56, %v8970_v14  ;;  %v3652_v17 = vpop.f32.mrb[74].mxu0 }
 0x58e   :  { %7388 = vtanh.f32 %v3649_v55  ;;  %v3653_v38 = vadd.f32 %v3652_v17, %v8965_v40  ;;  %v3654_v37 = vpop.f32.mrb[75].mxu0  ;;  %4905 = vmatprep.mubr.bf16.mxu1 %v4051_v19 }
 0x58f   :  { %7390 = vtanh.f32 %v3651_v4  ;;  %v3655_v50 = vadd.f32 %v3654_v37, %v8970_v14  ;;  %4906 = vmatmul.mubr.bf16.gmra.mrb[112].mxu1 %v4050_v32 }
 0x590   :  { %v7381_v3 = vpop.eup %7380  ;;  %7392 = vtanh.f32 %v3653_v38 }
 0x591   :  { %v7383_v53 = vpop.eup %7382  ;;  %7394 = vtanh.f32 %v3655_v50 }
 0x592   :  { %v7385_v24 = vpop.eup %7384 }
 0x593   :  { %v7387_v1 = vpop.eup %7386  ;;  %v3658_v18 = vpop.f32.mrb[76].mxu0  ;;  %v4055_v60 = vpack.c.bf16 %v7385_v24, %v7381_v3 }
 0x594   :  { %v3659_v22 = vadd.f32 %v3658_v18, %v8965_v40  ;;  %v3660_v20 = vpop.f32.mrb[77].mxu0  ;;  %v4056_v6 = vpack.c.bf16 %v7387_v1, %v7383_v53 }
 0x595   :  { %v3661_v61 = vadd.f32 %v3660_v20, %v8970_v14  ;;  %v3662_v49 = vpop.f32.mrb[78].mxu0 }
 0x596   :  { %7396 = vtanh.f32 %v3659_v22  ;;  %v3663_v59 = vadd.f32 %v3662_v49, %v8965_v40  ;;  %v3664_v36 = vpop.f32.mrb[79].mxu0  ;;  %4915 = vmatprep.mubr.bf16.mxu1 %v4056_v6 }
 0x597   :  { %7398 = vtanh.f32 %v3661_v61  ;;  %v3665_v10 = vadd.f32 %v3664_v36, %v8970_v14  ;;  %4916 = vmatmul.mubr.bf16.gmra.mrb[116].mxu1 %v4055_v60 }
 0x598   :  { %v7389_v57 = vpop.eup %7388  ;;  %7400 = vtanh.f32 %v3663_v59 }
 0x599   :  { %v7391_v5 = vpop.eup %7390  ;;  %7402 = vtanh.f32 %v3665_v10 }
 0x59a   :  { %v7393_v62 = vpop.eup %7392 }
 0x59b   :  { %v7395_v40 = vpop.eup %7394  ;;  %v5896_v25 = vpop.f32.mrb[80].mxu0  ;;  %v4060_v51 = vpack.c.bf16 %v7393_v62, %v7389_v57 }
 0x59c   :  { %v3710_v54 = vadd.f32 %v5896_v25, %v9041_v15  ;;  %v3701_v14 = vpop.f32.mrb[81].mxu0  ;;  %v4061_v13 = vpack.c.bf16 %v7395_v40, %v7391_v5 }
 0x59d   :  { %v3702_v7 = vadd.f32 %v3701_v14, %v9041_v15  ;;  %v5897_v42 = vpop.f32.mrb[82].mxu0 }
 0x59e   :  { %7404 = vtanh.f32 %v3710_v54  ;;  %v3713_v27 = vadd.f32 %v5897_v42, %v9041_v15  ;;  %v3704_v39 = vpop.f32.mrb[83].mxu0  ;;  %4925 = vmatprep.mubr.bf16.mxu1 %v4061_v13 }
 0x59f   :  { %7406 = vtanh.f32 %v3702_v7  ;;  %v3705_v28 = vadd.f32 %v3704_v39, %v9041_v15  ;;  %4926 = vmatmul.mubr.bf16.gmra.mrb[120].mxu1 %v4060_v51 }
 0x5a0   :  { %v7397_v63 = vpop.eup %7396  ;;  %7408 = vtanh.f32 %v3713_v27 }
 0x5a1   :  { %v7399_v44 = vpop.eup %7398  ;;  %7410 = vtanh.f32 %v3705_v28 }
 0x5a2   :  { %v7401_v2 = vpop.eup %7400 }
 0x5a3   :  { %v7403_v9 = vpop.eup %7402  ;;  %v5900_v31 = vpop.f32.mrb[84].mxu0  ;;  %v4065_v8 = vpack.c.bf16 %v7401_v2, %v7397_v63 }
 0x5a4   :  { %v3726_v33 = vadd.f32 %v5900_v31, %v9041_v15  ;;  %v3717_v29 = vpop.f32.mrb[85].mxu0  ;;  %v4066_v52 = vpack.c.bf16 %v7403_v9, %v7399_v44 }
 0x5a5   :  { %v3718_v26 = vadd.f32 %v3717_v29, %v9041_v15  ;;  %v5901_v48 = vpop.f32.mrb[86].mxu0 }
 0x5a6   :  { %7412 = vtanh.f32 %v3726_v33  ;;  %v3729_v35 = vadd.f32 %v5901_v48, %v9041_v15  ;;  %v3720_v30 = vpop.f32.mrb[87].mxu0  ;;  %4935 = vmatprep.mubr.bf16.mxu1 %v4066_v52 }
 0x5a7   :  { %7414 = vtanh.f32 %v3718_v26  ;;  %v3721_v47 = vadd.f32 %v3720_v30, %v9041_v15  ;;  %4936 = vmatmul.mubr.bf16.gmra.mrb[124].mxu1 %v4065_v8 }
 0x5a8   :  { %v7405_v0 = vpop.eup %7404  ;;  %7416 = vtanh.f32 %v3729_v35  ;;  %4978 = vmatprep.mubr.bf16.mxu1 %v7643_v21 }
 0x5a9   :  { %v7407_v46 = vpop.eup %7406  ;;  %7418 = vtanh.f32 %v3721_v47 }
 0x5aa   :  { %v7409_v16 = vpop.eup %7408 }
 0x5ab   :  { %v7411_v34 = vpop.eup %7410  ;;  %v5904_v23 = vpop.f32.mrb[88].mxu0  ;;  %v3997_v43 = vpack.c.bf16 %v7409_v16, %v7405_v0 }
 0x5ac   :  { %v3742_v41 = vadd.f32 %v5904_v23, %v9041_v15  ;;  %v3733_v45 = vpop.f32.mrb[89].mxu0  ;;  %v3992_v32 = vpack.c.bf16 %v7411_v34, %v7407_v46 }
 0x5ad   :  { %v3734_v55 = vadd.f32 %v3733_v45, %v9041_v15  ;;  %v5905_v56 = vpop.f32.mrb[90].mxu0 }
 0x5ae   :  { %7420 = vtanh.f32 %v3742_v41  ;;  %v3745_v19 = vadd.f32 %v5905_v56, %v9041_v15  ;;  %v3736_v4 = vpop.f32.mrb[91].mxu0 }
 0x5af   :  { %7422 = vtanh.f32 %v3734_v55  ;;  %v3737_v17 = vadd.f32 %v3736_v4, %v9041_v15  ;;  %4979 = vmatmul.mubr.bf16.vlgmr.msra.gmra.mrb[64].mxu1 %v3992_v32 }
 0x5b0   :  { %v7413_v38 = vpop.eup %7412  ;;  %7424 = vtanh.f32 %v3745_v19  ;;  %4988 = vmatprep.mubr.bf16.mxu1 %v7643_v21 }
 0x5b1   :  { %v7415_v37 = vpop.eup %7414  ;;  %7426 = vtanh.f32 %v3737_v17 }
 0x5b2   :  { %v7417_v50 = vpop.eup %7416 }
 0x5b3   :  { %v7419_v3 = vpop.eup %7418  ;;  %v5908_v53 = vpop.f32.mrb[92].mxu0  ;;  %v4007_v24 = vpack.c.bf16 %v7417_v50, %v7413_v38 }
 0x5b4   :  { %v3758_v1 = vadd.f32 %v5908_v53, %v9041_v15  ;;  %v3749_v18 = vpop.f32.mrb[93].mxu0  ;;  %v4002_v60 = vpack.c.bf16 %v7419_v3, %v7415_v37 }
 0x5b5   :  { %v3750_v22 = vadd.f32 %v3749_v18, %v9041_v15  ;;  %v5909_v20 = vpop.f32.mrb[94].mxu0 }
 0x5b6   :  { %7428 = vtanh.f32 %v3758_v1  ;;  %v3761_v6 = vadd.f32 %v5909_v20, %v9041_v15  ;;  %v3752_v61 = vpop.f32.mrb[95].mxu0 }
 0x5b7   :  { %7430 = vtanh.f32 %v3750_v22  ;;  %v3753_v49 = vadd.f32 %v3752_v61, %v9041_v15  ;;  %4989 = vmatmul.mubr.bf16.gmra.mrb[68].mxu1 %v3997_v43 }
 0x5b8   :  { %v9061_v59 = vpop.eup %7420  ;;  %7432 = vtanh.f32 %v3761_v6  ;;  %4998 = vmatprep.mubr.bf16.mxu1 %v7643_v21 }
 0x5b9   :  { %v7423_v36 = vpop.eup %7422  ;;  %7434 = vtanh.f32 %v3753_v49 }
 0x5ba   :  { %v9064_v10 = vpop.eup %7424 }
 0x5bb   :  { %v7427_v57 = vpop.eup %7426  ;;  %v5912_v58 = vpop.f32.mrb[96].mxu0  ;;  %v4017_v5 = vpack.c.bf16 %v9064_v10, %v9061_v59  ;;  %v4148_v10 = vld [vmem:[%s9223_s8] sm:$0x3] }
 0x5bc   :  { %v3774_v62 = vadd.f32 %v5912_v58, %v9041_v15  ;;  %v3765_v40 = vpop.f32.mrb[97].mxu0  ;;  %v4012_v25 = vpack.c.bf16 %v7427_v57, %v7423_v36 }
 0x5bd   :  { %v3766_v51 = vadd.f32 %v3765_v40, %v9041_v15  ;;  %v5913_v54 = vpop.f32.mrb[98].mxu0 }
 0x5be   :  { %7436 = vtanh.f32 %v3774_v62  ;;  %v3777_v14 = vadd.f32 %v5913_v54, %v9041_v15  ;;  %v3768_v13 = vpop.f32.mrb[99].mxu0 }
 0x5bf   :  { %7438 = vtanh.f32 %v3766_v51  ;;  %v3769_v7 = vadd.f32 %v3768_v13, %v9041_v15  ;;  %4999 = vmatmul.mubr.bf16.gmra.mrb[72].mxu1 %v4002_v60  ;;  %v9122_v51 = vrot.slane %v4148_v10, %v9393_v12 }
 0x5c0   :  { %v9072_v42 = vpop.eup %7428  ;;  %7440 = vtanh.f32 %v3777_v14  ;;  %5008 = vmatprep.mubr.bf16.mxu1 %v7643_v21 }
 0x5c1   :  { %v9075_v27 = vpop.eup %7430  ;;  %7442 = vtanh.f32 %v3769_v7 }
 0x5c2   :  { %v9077_v39 = vpop.eup %7432 }
 0x5c3   :  { %v9079_v28 = vpop.eup %7434  ;;  %v5916_v63 = vpop.f32.mrb[100].mxu0  ;;  %v4027_v44 = vpack.c.bf16 %v9077_v39, %v9072_v42 }
 0x5c4   :  { %v3790_v2 = vadd.f32 %v5916_v63, %v9041_v15  ;;  %v3781_v9 = vpop.f32.mrb[101].mxu0  ;;  %v4022_v31 = vpack.c.bf16 %v9079_v28, %v9075_v27 }
 0x5c5   :  { %v3782_v8 = vadd.f32 %v3781_v9, %v9041_v15  ;;  %v5917_v33 = vpop.f32.mrb[102].mxu0 }
 0x5c6   :  { %7444 = vtanh.f32 %v3790_v2  ;;  %v3793_v29 = vadd.f32 %v5917_v33, %v9041_v15  ;;  %v3784_v52 = vpop.f32.mrb[103].mxu0 }
 0x5c7   :  { %7446 = vtanh.f32 %v3782_v8  ;;  %v3785_v26 = vadd.f32 %v3784_v52, %v9041_v15  ;;  %5009 = vmatmul.mubr.bf16.gmra.mrb[76].mxu1 %v4007_v24 }
 0x5c8   :  { %v7437_v48 = vpop.eup %7436  ;;  %7448 = vtanh.f32 %v3793_v29  ;;  %5018 = vmatprep.mubr.bf16.mxu1 %v7643_v21 }
 0x5c9   :  { %v7439_v35 = vpop.eup %7438  ;;  %7450 = vtanh.f32 %v3785_v26 }
 0x5ca   :  { %v7441_v30 = vpop.eup %7440 }
 0x5cb   :  { %v7443_v47 = vpop.eup %7442  ;;  %v5920_v0 = vpop.f32.mrb[104].mxu0  ;;  %v4037_v46 = vpack.c.bf16 %v7441_v30, %v7437_v48 }
 0x5cc   :  { %v3806_v16 = vadd.f32 %v5920_v0, %v9041_v15  ;;  %v3797_v34 = vpop.f32.mrb[105].mxu0  ;;  %v4032_v23 = vpack.c.bf16 %v7443_v47, %v7439_v35 }
 0x5cd   :  { %v3798_v43 = vadd.f32 %v3797_v34, %v9041_v15  ;;  %v5921_v41 = vpop.f32.mrb[106].mxu0 }
 0x5ce   :  { %7452 = vtanh.f32 %v3806_v16  ;;  %v3809_v45 = vadd.f32 %v5921_v41, %v9041_v15  ;;  %v3800_v32 = vpop.f32.mrb[107].mxu0 }
 0x5cf   :  { %7454 = vtanh.f32 %v3798_v43  ;;  %v3801_v55 = vadd.f32 %v3800_v32, %v9041_v15  ;;  %5019 = vmatmul.mubr.bf16.gmra.mrb[80].mxu1 %v4012_v25 }
 0x5d0   :  { %v7445_v56 = vpop.eup %7444  ;;  %7456 = vtanh.f32 %v3809_v45  ;;  %5028 = vmatprep.mubr.bf16.mxu1 %v7643_v21 }
 0x5d1   :  { %v7447_v19 = vpop.eup %7446  ;;  %7458 = vtanh.f32 %v3801_v55 }
 0x5d2   :  { %v7449_v4 = vpop.eup %7448 }
 0x5d3   :  { %v7451_v17 = vpop.eup %7450  ;;  %v5924_v38 = vpop.f32.mrb[108].mxu0  ;;  %v4047_v37 = vpack.c.bf16 %v7449_v4, %v7445_v56 }
 0x5d4   :  { %v3822_v50 = vadd.f32 %v5924_v38, %v9041_v15  ;;  %v3813_v3 = vpop.f32.mrb[109].mxu0  ;;  %v4042_v53 = vpack.c.bf16 %v7451_v17, %v7447_v19 }
 0x5d5   :  { %v3814_v24 = vadd.f32 %v3813_v3, %v9041_v15  ;;  %v5925_v1 = vpop.f32.mrb[110].mxu0 }
 0x5d6   :  { %7460 = vtanh.f32 %v3822_v50  ;;  %v3825_v18 = vadd.f32 %v5925_v1, %v9041_v15  ;;  %v3816_v60 = vpop.f32.mrb[111].mxu0 }
 0x5d7   :  { %7462 = vtanh.f32 %v3814_v24  ;;  %v3817_v22 = vadd.f32 %v3816_v60, %v9041_v15  ;;  %5029 = vmatmul.mubr.bf16.gmra.mrb[84].mxu1 %v4017_v5  ;;  %v9119_v5 = vrot.slane %v4148_v10, %v9392_v11 }
 0x5d8   :  { %v7453_v20 = vpop.eup %7452  ;;  %7464 = vtanh.f32 %v3825_v18  ;;  %5038 = vmatprep.mubr.bf16.mxu1 %v7643_v21 }
 0x5d9   :  { %v7455_v6 = vpop.eup %7454  ;;  %7466 = vtanh.f32 %v3817_v22 }
 0x5da   :  { %v7457_v61 = vpop.eup %7456 }
 0x5db   :  { %v7459_v49 = vpop.eup %7458  ;;  %v4057_v36 = vpack.c.bf16 %v7457_v61, %v7453_v20 }
 0x5dc   :  { %v4052_v57 = vpack.c.bf16 %v7459_v49, %v7455_v6 }
 0x5df   :  { %5039 = vmatmul.mubr.bf16.gmra.mrb[88].mxu1 %v4022_v31 }
 0x5e0   :  { %v7461_v58 = vpop.eup %7460  ;;  %5048 = vmatprep.mubr.bf16.mxu1 %v7643_v21 }
 0x5e1   :  { %v7463_v62 = vpop.eup %7462 }
 0x5e2   :  { %v7465_v15 = vpop.eup %7464 }
 0x5e3   :  { %v7467_v40 = vpop.eup %7466  ;;  %v4067_v25 = vpack.c.bf16 %v7465_v15, %v7461_v58 }
 0x5e4   :  { %v4062_v59 = vpack.c.bf16 %v7467_v40, %v7463_v62 }
 0x5e7   :  { %5049 = vmatmul.mubr.bf16.gmra.mrb[92].mxu1 %v4027_v44 }
 0x5e8   :  { %5058 = vmatprep.mubr.bf16.mxu1 %v7643_v21 }
 0x5ef   :  { %5059 = vmatmul.mubr.bf16.gmra.mrb[96].mxu1 %v4032_v23 }
 0x5f0   :  { %5068 = vmatprep.mubr.bf16.mxu1 %v7643_v21 }
 0x5f7   :  { %5069 = vmatmul.mubr.bf16.gmra.mrb[100].mxu1 %v4037_v46 }
 0x5f8   :  { %5078 = vmatprep.mubr.bf16.mxu1 %v7643_v21 }
 0x5ff   :  { %5079 = vmatmul.mubr.bf16.gmra.mrb[104].mxu1 %v4042_v53 }
 0x600   :  { %5088 = vmatprep.mubr.bf16.mxu1 %v7643_v21 }
 0x607   :  { %5089 = vmatmul.mubr.bf16.gmra.mrb[108].mxu1 %v4047_v37 }
 0x608   :  { %5098 = vmatprep.mubr.bf16.mxu1 %v7643_v21 }
 0x60f   :  { %5099 = vmatmul.mubr.bf16.gmra.mrb[112].mxu1 %v4052_v57 }
 0x610   :  { %5108 = vmatprep.mubr.bf16.mxu1 %v7643_v21 }
 0x617   :  { %5109 = vmatmul.mubr.bf16.gmra.mrb[116].mxu1 %v4057_v36 }
 0x618   :  { %5118 = vmatprep.mubr.bf16.mxu1 %v7643_v21 }
 0x61f   :  { %5119 = vmatmul.mubr.bf16.gmra.mrb[120].mxu1 %v4062_v59 }
 0x620   :  { %5128 = vmatprep.mubr.bf16.mxu1 %v7643_v21 }
 0x627   :  { %5129 = vmatmul.mubr.bf16.gmra.mrb[124].mxu1 %v4067_v25 }
 0x682   :  { %v4980_v54 = vpop.f32.mrb[64].mxu1 }
 0x683   :  { %v6038_v14 = vadd.f32 %v4980_v54, %v9119_v5  ;;  %v4982_v13 = vpop.f32.mrb[65].mxu1 }
 0x684   :  { %v6039_v21 = vadd.f32 %v4982_v13, %v9122_v51  ;;  %v4984_v7 = vpop.f32.mrb[66].mxu1 }
 0x685   :  { %7591 = shalt.err (!%p7588_p2)
}
 0x686   :  { %s7592_s25 = scalar_lea.hbm %s9225_s10, 8192 }
 0x687   :  { %p7593_p3 = scmp.ne.s32.totalorder %s9225_s10, %s7592_s25  ;;  %p7596_p4 = scmp.lt.u32.totalorder %s7592_s25, %s9225_s10 }
 0x689   :  { %p7598_p5 = pnand %p7596_p4, %p7593_p3 }
 0x68b   :  { %7601 = shalt.err (!%p7598_p5)
}
 0x68c   :  { %s7645_s24 = smov 256   ;;  %s7646_s28 = smov 16   ;;  %v6040_v11 = vadd.f32 %v4984_v7, %v9119_v5  ;;  %v4986_v12 = vpop.f32.mrb[67].mxu1  ;;  %v5710_v42 = vpack.c.bf16 %v6039_v21, %v6038_v14 }
 0x68d   :  { %5386 = dma.vmem_to_hbm [thread:$0]  %s5381_s0, 8192, %s9225_s10, [#allocation13], %s7645_s24, %s7645_s24, %s7646_s28   ;;  %v6041_v27 = vadd.f32 %v4986_v12, %v9122_v51  ;;  %v4990_v28 = vpop.f32.mrb[68].mxu1 }
 0x68e   :  { %5331 = vst [vmem:[#allocation11] sm:$0xff] %v5710_v42  ;;  %v6042_v63 = vadd.f32 %v4990_v28, %v9119_v5  ;;  %v4992_v44 = vpop.f32.mrb[69].mxu1  ;;  %s7647_s10 = smov [#allocation11]  }
 0x68f   :  { %v5711_v39 = vpack.c.bf16 %v6041_v27, %v6040_v11  ;;  %v6043_v2 = vadd.f32 %v4992_v44, %v9122_v51  ;;  %v4994_v9 = vpop.f32.mrb[70].mxu1  ;;  %s5368_s13 = sshll.u32 %s7647_s10, 4  ;;  %s5369_s13 = int_to_ptr.vmem [resolvable:$true] %s5368_s13 }
 0x690   :  { %v6044_v31 = vadd.f32 %v4994_v9, %v9119_v5  ;;  %v4996_v8 = vpop.f32.mrb[71].mxu1  ;;  %s7602_s7 = scalar_lea.vmem %s5369_s13, 4096  ;;  %p7607_p7 = scmp.lt.s32.totalorder %s5369_s13, %s5369_s13 }
 0x691   :  { %5332 = vst [vmem:[#allocation11 + $0x8] sm:$0xff] %v5711_v39  ;;  %v5712_v33 = vpack.c.bf16 %v6043_v2, %v6042_v63  ;;  %v6045_v29 = vadd.f32 %v4996_v8, %v9122_v51  ;;  %p7603_p6 = scmp.ne.s32.totalorder %s5369_s13, %s7602_s7  ;;  %p7608_p8 = scmp.lt.s32.totalorder %s7602_s7, %s7602_s7 }
 0x692   :  { %v5000_v26 = vpop.f32.mrb[72].mxu1 }
 0x693   :  { %5333 = vst [vmem:[#allocation11 + $0x10] sm:$0xff] %v5712_v33  ;;  %v5713_v52 = vpack.c.bf16 %v6045_v29, %v6044_v31  ;;  %v6046_v48 = vadd.f32 %v5000_v26, %v9119_v5  ;;  %v5002_v35 = vpop.f32.mrb[73].mxu1  ;;  %p7609_p9 = por %p7608_p8, %p7607_p7 }
 0x694   :  { %v6047_v30 = vadd.f32 %v5002_v35, %v9122_v51  ;;  %v5004_v47 = vpop.f32.mrb[74].mxu1 }
 0x695   :  { %5334 = vst [vmem:[#allocation11 + $0x18] sm:$0xff] %v5713_v52  ;;  %v6048_v0 = vadd.f32 %v5004_v47, %v9119_v5  ;;  %v5006_v46 = vpop.f32.mrb[75].mxu1  ;;  %p7610_p10 = pnand %p7609_p9, %p7603_p6 }
 0x696   :  { %v5714_v16 = vpack.c.bf16 %v6047_v30, %v6046_v48  ;;  %v6049_v34 = vadd.f32 %v5006_v46, %v9122_v51 }
 0x698   :  { %5335 = vst [vmem:[#allocation11 + $0x20] sm:$0xff] %v5714_v16  ;;  %v5715_v23 = vpack.c.bf16 %v6049_v34, %v6048_v0 }
 0x69a   :  { %5336 = vst [vmem:[#allocation11 + $0x28] sm:$0xff] %v5715_v23  ;;  %v5010_v43 = vpop.f32.mrb[76].mxu1 }
 0x69b   :  { %v6050_v41 = vadd.f32 %v5010_v43, %v9119_v5  ;;  %v5012_v45 = vpop.f32.mrb[77].mxu1 }
 0x69c   :  { %v6051_v32 = vadd.f32 %v5012_v45, %v9122_v51  ;;  %v5014_v55 = vpop.f32.mrb[78].mxu1 }
 0x69d   :  { %v6052_v56 = vadd.f32 %v5014_v55, %v9119_v5  ;;  %v5016_v19 = vpop.f32.mrb[79].mxu1 }
 0x69e   :  { %v5716_v4 = vpack.c.bf16 %v6051_v32, %v6050_v41  ;;  %v6053_v17 = vadd.f32 %v5016_v19, %v9122_v51 }
 0x6a0   :  { %5337 = vst [vmem:[#allocation11 + $0x30] sm:$0xff] %v5716_v4  ;;  %v5717_v38 = vpack.c.bf16 %v6053_v17, %v6052_v56 }
 0x6a2   :  { %5338 = vst [vmem:[#allocation11 + $0x38] sm:$0xff] %v5717_v38  ;;  %v5020_v37 = vpop.f32.mrb[80].mxu1 }
 0x6a3   :  { %v6054_v50 = vadd.f32 %v5020_v37, %v9119_v5  ;;  %v5022_v3 = vpop.f32.mrb[81].mxu1 }
 0x6a4   :  { %v6055_v53 = vadd.f32 %v5022_v3, %v9122_v51  ;;  %v5024_v24 = vpop.f32.mrb[82].mxu1 }
 0x6a5   :  { %v6056_v1 = vadd.f32 %v5024_v24, %v9119_v5  ;;  %v5026_v18 = vpop.f32.mrb[83].mxu1 }
 0x6a6   :  { %v5718_v60 = vpack.c.bf16 %v6055_v53, %v6054_v50  ;;  %v6057_v22 = vadd.f32 %v5026_v18, %v9122_v51 }
 0x6a8   :  { %5339 = vst [vmem:[#allocation11 + $0x40] sm:$0xff] %v5718_v60  ;;  %v5719_v20 = vpack.c.bf16 %v6057_v22, %v6056_v1 }
 0x6aa   :  { %5340 = vst [vmem:[#allocation11 + $0x48] sm:$0xff] %v5719_v20  ;;  %v5030_v6 = vpop.f32.mrb[84].mxu1 }
 0x6ab   :  { %v6058_v61 = vadd.f32 %v5030_v6, %v9119_v5  ;;  %v5032_v49 = vpop.f32.mrb[85].mxu1 }
 0x6ac   :  { %v6059_v36 = vadd.f32 %v5032_v49, %v9122_v51  ;;  %v5034_v57 = vpop.f32.mrb[86].mxu1 }
 0x6ad   :  { %v6060_v58 = vadd.f32 %v5034_v57, %v9119_v5  ;;  %v5036_v62 = vpop.f32.mrb[87].mxu1 }
 0x6ae   :  { %v5720_v15 = vpack.c.bf16 %v6059_v36, %v6058_v61  ;;  %v6061_v40 = vadd.f32 %v5036_v62, %v9122_v51 }
 0x6b0   :  { %5341 = vst [vmem:[#allocation11 + $0x50] sm:$0xff] %v5720_v15  ;;  %v5721_v25 = vpack.c.bf16 %v6061_v40, %v6060_v58 }
 0x6b2   :  { %5342 = vst [vmem:[#allocation11 + $0x58] sm:$0xff] %v5721_v25  ;;  %v5040_v59 = vpop.f32.mrb[88].mxu1 }
 0x6b3   :  { %v6062_v10 = vadd.f32 %v5040_v59, %v9119_v5  ;;  %v5042_v54 = vpop.f32.mrb[89].mxu1 }
 0x6b4   :  { %v6063_v14 = vadd.f32 %v5042_v54, %v9122_v51  ;;  %v5044_v13 = vpop.f32.mrb[90].mxu1 }
 0x6b5   :  { %v6064_v21 = vadd.f32 %v5044_v13, %v9119_v5  ;;  %v5046_v7 = vpop.f32.mrb[91].mxu1 }
 0x6b6   :  { %v5722_v11 = vpack.c.bf16 %v6063_v14, %v6062_v10  ;;  %v6065_v12 = vadd.f32 %v5046_v7, %v9122_v51 }
 0x6b8   :  { %5343 = vst [vmem:[#allocation11 + $0x60] sm:$0xff] %v5722_v11  ;;  %v5723_v42 = vpack.c.bf16 %v6065_v12, %v6064_v21 }
 0x6ba   :  { %5344 = vst [vmem:[#allocation11 + $0x68] sm:$0xff] %v5723_v42  ;;  %v5050_v27 = vpop.f32.mrb[92].mxu1 }
 0x6bb   :  { %v6066_v39 = vadd.f32 %v5050_v27, %v9119_v5  ;;  %v5052_v28 = vpop.f32.mrb[93].mxu1 }
 0x6bc   :  { %v6067_v63 = vadd.f32 %v5052_v28, %v9122_v51  ;;  %v5054_v44 = vpop.f32.mrb[94].mxu1 }
 0x6bd   :  { %v6068_v2 = vadd.f32 %v5054_v44, %v9119_v5  ;;  %v5056_v9 = vpop.f32.mrb[95].mxu1 }
 0x6be   :  { %v5724_v31 = vpack.c.bf16 %v6067_v63, %v6066_v39  ;;  %v6069_v8 = vadd.f32 %v5056_v9, %v9122_v51 }
 0x6c0   :  { %5345 = vst [vmem:[#allocation11 + $0x70] sm:$0xff] %v5724_v31  ;;  %v5725_v33 = vpack.c.bf16 %v6069_v8, %v6068_v2 }
 0x6c2   :  { %5346 = vst [vmem:[#allocation11 + $0x78] sm:$0xff] %v5725_v33  ;;  %v5060_v29 = vpop.f32.mrb[96].mxu1 }
 0x6c3   :  { %v6070_v52 = vadd.f32 %v5060_v29, %v9119_v5  ;;  %v5062_v26 = vpop.f32.mrb[97].mxu1 }
 0x6c4   :  { %v6071_v48 = vadd.f32 %v5062_v26, %v9122_v51  ;;  %v5064_v35 = vpop.f32.mrb[98].mxu1 }
 0x6c5   :  { %v6072_v30 = vadd.f32 %v5064_v35, %v9119_v5  ;;  %v5066_v47 = vpop.f32.mrb[99].mxu1 }
 0x6c6   :  { %v5726_v0 = vpack.c.bf16 %v6071_v48, %v6070_v52  ;;  %v6073_v46 = vadd.f32 %v5066_v47, %v9122_v51 }
 0x6c8   :  { %5347 = vst [vmem:[#allocation11 + $0x80] sm:$0xff] %v5726_v0  ;;  %v5727_v16 = vpack.c.bf16 %v6073_v46, %v6072_v30 }
 0x6ca   :  { %5348 = vst [vmem:[#allocation11 + $0x88] sm:$0xff] %v5727_v16  ;;  %v5070_v34 = vpop.f32.mrb[100].mxu1 }
 0x6cb   :  { %v6074_v23 = vadd.f32 %v5070_v34, %v9119_v5  ;;  %v5072_v43 = vpop.f32.mrb[101].mxu1 }
 0x6cc   :  { %v6075_v41 = vadd.f32 %v5072_v43, %v9122_v51  ;;  %v5074_v45 = vpop.f32.mrb[102].mxu1 }
 0x6cd   :  { %v6076_v32 = vadd.f32 %v5074_v45, %v9119_v5  ;;  %v5076_v55 = vpop.f32.mrb[103].mxu1 }
 0x6ce   :  { %v5728_v56 = vpack.c.bf16 %v6075_v41, %v6074_v23  ;;  %v6077_v19 = vadd.f32 %v5076_v55, %v9122_v51 }
 0x6d0   :  { %5349 = vst [vmem:[#allocation11 + $0x90] sm:$0xff] %v5728_v56  ;;  %v5729_v4 = vpack.c.bf16 %v6077_v19, %v6076_v32 }
 0x6d2   :  { %5350 = vst [vmem:[#allocation11 + $0x98] sm:$0xff] %v5729_v4  ;;  %v5080_v17 = vpop.f32.mrb[104].mxu1 }
 0x6d3   :  { %v6078_v38 = vadd.f32 %v5080_v17, %v9119_v5  ;;  %v5082_v37 = vpop.f32.mrb[105].mxu1 }
 0x6d4   :  { %v6079_v50 = vadd.f32 %v5082_v37, %v9122_v51  ;;  %v5084_v3 = vpop.f32.mrb[106].mxu1 }
 0x6d5   :  { %v6080_v53 = vadd.f32 %v5084_v3, %v9119_v5  ;;  %v5086_v24 = vpop.f32.mrb[107].mxu1 }
 0x6d6   :  { %v5730_v1 = vpack.c.bf16 %v6079_v50, %v6078_v38  ;;  %v6081_v18 = vadd.f32 %v5086_v24, %v9122_v51 }
 0x6d8   :  { %5351 = vst [vmem:[#allocation11 + $0xa0] sm:$0xff] %v5730_v1  ;;  %v5731_v60 = vpack.c.bf16 %v6081_v18, %v6080_v53 }
 0x6da   :  { %5352 = vst [vmem:[#allocation11 + $0xa8] sm:$0xff] %v5731_v60  ;;  %v5090_v22 = vpop.f32.mrb[108].mxu1 }
 0x6db   :  { %v6082_v20 = vadd.f32 %v5090_v22, %v9119_v5  ;;  %v5092_v6 = vpop.f32.mrb[109].mxu1 }
 0x6dc   :  { %v6083_v61 = vadd.f32 %v5092_v6, %v9122_v51  ;;  %v5094_v49 = vpop.f32.mrb[110].mxu1 }
 0x6dd   :  { %v6084_v36 = vadd.f32 %v5094_v49, %v9119_v5  ;;  %v5096_v57 = vpop.f32.mrb[111].mxu1 }
 0x6de   :  { %v5732_v58 = vpack.c.bf16 %v6083_v61, %v6082_v20  ;;  %v6085_v62 = vadd.f32 %v5096_v57, %v9122_v51 }
 0x6e0   :  { %5353 = vst [vmem:[#allocation11 + $0xb0] sm:$0xff] %v5732_v58  ;;  %v5733_v15 = vpack.c.bf16 %v6085_v62, %v6084_v36 }
 0x6e2   :  { %5354 = vst [vmem:[#allocation11 + $0xb8] sm:$0xff] %v5733_v15  ;;  %v5100_v40 = vpop.f32.mrb[112].mxu1 }
 0x6e3   :  { %v6086_v25 = vadd.f32 %v5100_v40, %v9119_v5  ;;  %v5102_v59 = vpop.f32.mrb[113].mxu1 }
 0x6e4   :  { %v6087_v10 = vadd.f32 %v5102_v59, %v9122_v51  ;;  %v5104_v54 = vpop.f32.mrb[114].mxu1 }
 0x6e5   :  { %v6088_v14 = vadd.f32 %v5104_v54, %v9119_v5  ;;  %v5106_v13 = vpop.f32.mrb[115].mxu1 }
 0x6e6   :  { %v5734_v21 = vpack.c.bf16 %v6087_v10, %v6086_v25  ;;  %v6089_v7 = vadd.f32 %v5106_v13, %v9122_v51 }
 0x6e8   :  { %5355 = vst [vmem:[#allocation11 + $0xc0] sm:$0xff] %v5734_v21  ;;  %v5735_v11 = vpack.c.bf16 %v6089_v7, %v6088_v14 }
 0x6ea   :  { %5356 = vst [vmem:[#allocation11 + $0xc8] sm:$0xff] %v5735_v11  ;;  %v5110_v12 = vpop.f32.mrb[116].mxu1 }
 0x6eb   :  { %v6090_v42 = vadd.f32 %v5110_v12, %v9119_v5  ;;  %v5112_v27 = vpop.f32.mrb[117].mxu1 }
 0x6ec   :  { %v6091_v39 = vadd.f32 %v5112_v27, %v9122_v51  ;;  %v5114_v28 = vpop.f32.mrb[118].mxu1 }
 0x6ed   :  { %v6092_v63 = vadd.f32 %v5114_v28, %v9119_v5  ;;  %v5116_v44 = vpop.f32.mrb[119].mxu1 }
 0x6ee   :  { %v5736_v2 = vpack.c.bf16 %v6091_v39, %v6090_v42  ;;  %v6093_v9 = vadd.f32 %v5116_v44, %v9122_v51 }
 0x6f0   :  { %5357 = vst [vmem:[#allocation11 + $0xd0] sm:$0xff] %v5736_v2  ;;  %v5737_v31 = vpack.c.bf16 %v6093_v9, %v6092_v63 }
 0x6f2   :  { %5358 = vst [vmem:[#allocation11 + $0xd8] sm:$0xff] %v5737_v31  ;;  %v5120_v8 = vpop.f32.mrb[120].mxu1 }
 0x6f3   :  { %v6094_v33 = vadd.f32 %v5120_v8, %v9119_v5  ;;  %v5122_v29 = vpop.f32.mrb[121].mxu1 }
 0x6f4   :  { %v6095_v52 = vadd.f32 %v5122_v29, %v9122_v51  ;;  %v5124_v26 = vpop.f32.mrb[122].mxu1 }
 0x6f5   :  { %v6096_v48 = vadd.f32 %v5124_v26, %v9119_v5  ;;  %v5126_v35 = vpop.f32.mrb[123].mxu1 }
 0x6f6   :  { %v5738_v30 = vpack.c.bf16 %v6095_v52, %v6094_v33  ;;  %v6097_v47 = vadd.f32 %v5126_v35, %v9122_v51 }
 0x6f8   :  { %5359 = vst [vmem:[#allocation11 + $0xe0] sm:$0xff] %v5738_v30  ;;  %v5739_v0 = vpack.c.bf16 %v6097_v47, %v6096_v48 }
 0x6fa   :  { %5360 = vst [vmem:[#allocation11 + $0xe8] sm:$0xff] %v5739_v0  ;;  %v5130_v46 = vpop.f32.mrb[124].mxu1 }
 0x6fb   :  { %v6098_v16 = vadd.f32 %v5130_v46, %v9119_v5  ;;  %v5132_v34 = vpop.f32.mrb[125].mxu1 }
 0x6fc   :  { %v6099_v23 = vadd.f32 %v5132_v34, %v9122_v51  ;;  %v5134_v43 = vpop.f32.mrb[126].mxu1 }
 0x6fd   :  { %v6100_v41 = vadd.f32 %v5134_v43, %v9119_v5  ;;  %v5136_v45 = vpop.f32.mrb[127].mxu1 }
 0x6fe   :  { %v5740_v32 = vpack.c.bf16 %v6099_v23, %v6098_v16  ;;  %v6101_v55 = vadd.f32 %v5136_v45, %v9122_v51 }
 0x700   :  { %5361 = vst [vmem:[#allocation11 + $0xf0] sm:$0xff] %v5740_v32  ;;  %v5741_v56 = vpack.c.bf16 %v6101_v55, %v6100_v41 }
 0x702   :  { %5362 = vst [vmem:[#allocation11 + $0xf8] sm:$0xff] %v5741_v56 }
 0x703   :  { %7613 = shalt.err (!%p7610_p10)
}
 0x704   :  { %s7614_s17 = scalar_lea.hbm %s9224_s9, 4096 }
 0x705   :  { %p7615_p11 = scmp.ne.s32.totalorder %s9224_s9, %s7614_s17  ;;  %p7618_p12 = scmp.lt.u32.totalorder %s7614_s17, %s9224_s9 }
 0x707   :  { %p7620_p13 = pnand %p7618_p12, %p7615_p11 }
 0x709   :  { %7623 = shalt.err (!%p7620_p13)
}
 0x70a   :  { %5374 = dma.vmem_to_hbm [thread:$0]  %s5369_s13, 4096, %s9224_s9, [#allocation4], %s7639_s5, %s7639_s5, %s7640_s23  }
 0x70b   :  { %7630 = dma.done.wait [#allocation4], 4096  }
 0x70c   :  { %7631 = vsyncadd [#allocation4], 4294963200 }
 0x70d   :  { %7632 = dma.done.wait [#allocation13], 8192  }
 0x70e   :  { %7633 = vsyncadd [#allocation13], 4294959104 }
 0x70f   :  { %5393 = vsyncpa [#allocation3], 1 }
 0x710   :  { %5394 = vsyncpa [#allocation6], 1 }
 0x711   :  { %5395 = vsyncpa [#allocation9], 1 }
 0x712   :  { %5396 = vsyncpa [#allocation4], 1 }
 0x713   :  { %5397 = vsyncpa [#allocation13], 1 }

// kernel: tpu_custom_call.1
= control target key start
LH: loop header
LB: loop body
LE: loop exit
PB: predicated region body
PF: predicated region fallthrough
CT: control target
= control target key end

     0   :  { %16 = vsyncpa [#allocation3], 0  ;;  %s9215_s0 = inlined_call_operand.hbm [shape: bf16[256,256], index: 0, kind: input, shape index: {}]   ;;  %s9216_s1 = inlined_call_operand.hbm [shape: bf16[256,640], index: 1, kind: input, shape index: {}]   ;;  %s9217_s2 = inlined_call_operand.vmem [shape: f32[1,640], index: 2, kind: input, shape index: {}]   ;;  %s9218_s3 = inlined_call_operand.hbm [shape: bf16[640,256], index: 3, kind: input, shape index: {}]   ;;  %s9219_s4 = inlined_call_operand.vmem [shape: f32[1,256], index: 4, kind: input, shape index: {}]   ;;  %s9220_s5 = inlined_call_operand.hbm [shape: bf16[128,640], index: 5, kind: input, shape index: {}]   ;;  %s9221_s6 = inlined_call_operand.vmem [shape: f32[1,640], index: 6, kind: input, shape index: {}]   ;;  %s9222_s7 = inlined_call_operand.hbm [shape: bf16[640,256], index: 7, kind: input, shape index: {}]   ;;  %s9223_s8 = inlined_call_operand.vmem [shape: f32[1,256], index: 8, kind: input, shape index: {}]   ;;  %s9224_s9 = inlined_call_operand.hbm [shape: bf16[256,256], index: 9, kind: output, shape index: {0}]   ;;  %s9225_s10 = inlined_call_operand.hbm [shape: f32[256,256], index: 10, kind: output, shape index: {1}]  }
   0x1   :  { %17 = vsyncpa [#allocation6], 0 }
   0x2   :  { %18 = vsyncpa [#allocation9], 0 }
   0x3   :  { %19 = vsyncpa [#allocation4], 0 }
   0x4   :  { %20 = vsyncpa [#allocation13], 0  ;;  %s7634_s13 = smov [#allocation5]   ;;  %s7470_s17 = scalar_lea.hbm %s9216_s1, 10240 }
   0x5   :  { %s38_s14 = sshll.u32 %s7634_s13, 4  ;;  %p7471_p0 = scmp.ne.s32.totalorder %s9216_s1, %s7470_s17  ;;  %s39_s14 = int_to_ptr.vmem [resolvable:$true] %s38_s14 }
   0x6   :  { %p7474_p1 = scmp.lt.u32.totalorder %s7470_s17, %s9216_s1 }
   0x8   :  { %p7476_p2 = pnand %p7474_p1, %p7471_p0 }
   0xa   :  { %7479 = shalt.err (!%p7476_p2)
}
   0xb   :  { %s7480_s22 = scalar_lea.vmem %s39_s14, 10240  ;;  %p7485_p4 = scmp.lt.s32.totalorder %s39_s14, %s39_s14 }
   0xc   :  { %p7481_p3 = scmp.ne.s32.totalorder %s39_s14, %s7480_s22  ;;  %p7486_p5 = scmp.lt.s32.totalorder %s7480_s22, %s7480_s22 }
   0xe   :  { %p7487_p6 = por %p7486_p5, %p7485_p4 }
  0x10   :  { %p7488_p7 = pnand %p7487_p6, %p7481_p3 }
  0x12   :  { %7491 = shalt.err (!%p7488_p7)
}
  0x13   :  { %s7635_s23 = smov 320   ;;  %s7636_s24 = smov 20  }
  0x14   :  { %44 = dma.hbm_to_vmem [thread:$0]  %s9216_s1, 10240, %s39_s14, [#allocation6], %s7635_s23, %s7635_s23, %s7636_s24  }
  0x15   :  { %s7637_s27 = smov [#allocation8]   ;;  %s7638_s29 = smov [#allocation2]  }
  0x16   :  { %s66_s28 = sshll.u32 %s7637_s27, 4  ;;  %s26_s30 = sshll.u32 %s7638_s29, 4  ;;  %s67_s28 = int_to_ptr.vmem [resolvable:$true] %s66_s28  ;;  %s27_s30 = int_to_ptr.vmem [resolvable:$true] %s26_s30 }
  0x17   :  { %s7492_s13 = scalar_lea.hbm %s9220_s5, 5120 }
  0x18   :  { %p7493_p8 = scmp.ne.s32.totalorder %s9220_s5, %s7492_s13  ;;  %p7496_p9 = scmp.lt.u32.totalorder %s7492_s13, %s9220_s5 }
  0x1a   :  { %p7498_p10 = pnand %p7496_p9, %p7493_p8 }
  0x1c   :  { %7501 = shalt.err (!%p7498_p10)
}
  0x1d   :  { %s7502_s1 = scalar_lea.vmem %s67_s28, 5120  ;;  %p7507_p12 = scmp.lt.s32.totalorder %s67_s28, %s67_s28 }
  0x1e   :  { %p7503_p11 = scmp.ne.s32.totalorder %s67_s28, %s7502_s1  ;;  %p7508_p13 = scmp.lt.s32.totalorder %s7502_s1, %s7502_s1 }
  0x20   :  { %p7509_p0 = por %p7508_p13, %p7507_p12 }
  0x22   :  { %p7510_p1 = pnand %p7509_p0, %p7503_p11 }
  0x24   :  { %7513 = shalt.err (!%p7510_p1)
}
  0x25   :  { %72 = dma.hbm_to_vmem [thread:$0]  %s9220_s5, 5120, %s67_s28, [#allocation9], %s7635_s23, %s7635_s23, %s7636_s24  }
  0x26   :  { %s7514_s22 = scalar_lea.hbm %s9215_s0, 4096 }
  0x27   :  { %p7515_p2 = scmp.ne.s32.totalorder %s9215_s0, %s7514_s22  ;;  %p7518_p3 = scmp.lt.u32.totalorder %s7514_s22, %s9215_s0 }
  0x29   :  { %p7520_p4 = pnand %p7518_p3, %p7515_p2 }
  0x2b   :  { %7523 = shalt.err (!%p7520_p4)
}
  0x2c   :  { %s7524_s11 = scalar_lea.vmem %s27_s30, 4096  ;;  %p7529_p6 = scmp.lt.s32.totalorder %s27_s30, %s27_s30 }
  0x2d   :  { %p7525_p5 = scmp.ne.s32.totalorder %s27_s30, %s7524_s11  ;;  %p7530_p7 = scmp.lt.s32.totalorder %s7524_s11, %s7524_s11 }
  0x2f   :  { %p7531_p8 = por %p7530_p7, %p7529_p6 }
  0x31   :  { %p7532_p9 = pnand %p7531_p8, %p7525_p5 }
  0x33   :  { %7535 = shalt.err (!%p7532_p9)
}
  0x34   :  { %s7639_s5 = smov 128   ;;  %s7640_s23 = smov 8  }
  0x35   :  { %32 = dma.hbm_to_vmem [thread:$0]  %s9215_s0, 4096, %s27_s30, [#allocation3], %s7639_s5, %s7639_s5, %s7640_s23  }
  0x36   :  { %s7641_s12 = smov [#allocation7]   ;;  %s7642_s15 = smov [#allocation10]  }
  0x37   :  { %s52_s13 = sshll.u32 %s7641_s12, 4  ;;  %s80_s16 = sshll.u32 %s7642_s15, 4  ;;  %s53_s13 = int_to_ptr.vmem [resolvable:$true] %s52_s13  ;;  %s81_s16 = int_to_ptr.vmem [resolvable:$true] %s80_s16 }
  0x38   :  { %s7536_s1 = scalar_lea.hbm %s9218_s3, 10240 }
  0x39   :  { %p7537_p10 = scmp.ne.s32.totalorder %s9218_s3, %s7536_s1  ;;  %p7540_p11 = scmp.lt.u32.totalorder %s7536_s1, %s9218_s3 }
  0x3b   :  { %p7542_p12 = pnand %p7540_p11, %p7537_p10 }
  0x3d   :  { %7545 = shalt.err (!%p7542_p12)
}
  0x3e   :  { %s7546_s0 = scalar_lea.vmem %s53_s13, 10240  ;;  %p7551_p0 = scmp.lt.s32.totalorder %s53_s13, %s53_s13 }
  0x3f   :  { %p7547_p13 = scmp.ne.s32.totalorder %s53_s13, %s7546_s0  ;;  %p7552_p1 = scmp.lt.s32.totalorder %s7546_s0, %s7546_s0 }
  0x41   :  { %p7553_p2 = por %p7552_p1, %p7551_p0 }
  0x43   :  { %p7554_p3 = pnand %p7553_p2, %p7547_p13 }
  0x45   :  { %7557 = shalt.err (!%p7554_p3)
}
  0x46   :  { %58 = dma.hbm_to_vmem [thread:$0]  %s9218_s3, 10240, %s53_s13, [#allocation6], %s7639_s5, %s7639_s5, %s7640_s23  }
  0x47   :  { %s7558_s27 = scalar_lea.hbm %s9222_s7, 10240 }
  0x48   :  { %p7559_p4 = scmp.ne.s32.totalorder %s9222_s7, %s7558_s27  ;;  %p7562_p5 = scmp.lt.u32.totalorder %s7558_s27, %s9222_s7 }
  0x4a   :  { %p7564_p6 = pnand %p7562_p5, %p7559_p4 }
  0x4c   :  { %7567 = shalt.err (!%p7564_p6)
}
  0x4d   :  { %s7568_s12 = scalar_lea.vmem %s81_s16, 10240  ;;  %p7573_p8 = scmp.lt.s32.totalorder %s81_s16, %s81_s16 }
  0x4e   :  { %p7569_p7 = scmp.ne.s32.totalorder %s81_s16, %s7568_s12  ;;  %p7574_p9 = scmp.lt.s32.totalorder %s7568_s12, %s7568_s12 }
  0x50   :  { %p7575_p10 = por %p7574_p9, %p7573_p8 }
  0x52   :  { %p7576_p11 = pnand %p7575_p10, %p7569_p7 }
  0x54   :  { %7579 = shalt.err (!%p7576_p11)
}
  0x55   :  { %86 = dma.hbm_to_vmem [thread:$0]  %s9222_s7, 10240, %s81_s16, [#allocation9], %s7639_s5, %s7639_s5, %s7640_s23  }
  0x56   :  { %7624 = dma.done.wait [#allocation3], 4096  }
  0x57   :  { %7625 = vsyncadd [#allocation3], 4294963200 }
  0x58   :  { %7626 = dma.done.wait [#allocation6], 20480  }
  0x59   :  { %7627 = vsyncadd [#allocation6], 4294946816 }
  0x5a   :  { %7628 = dma.done.wait [#allocation9], 15360  }
  0x5b   :  { %7629 = vsyncadd [#allocation9], 4294951936  ;;  %v105_v0 = vld [vmem:[#allocation2] sm:$0xff]  ;;  %v107_v1 = vld [vmem:[#allocation2 + $0x10] sm:$0xff]  ;;  %s7644_s21 = smov [#allocation12]  }
  0x5c   :  { %v106_v2 = vld [vmem:[#allocation2 + $0x8] sm:$0xff]  ;;  %v7772_v3 = vunpack.c.l.bf16 %v105_v0  ;;  %v7774_v4 = vunpack.c.h.bf16 %v105_v0  ;;  %v7776_v5 = vunpack.c.l.bf16 %v107_v1  ;;  %v7778_v6 = vunpack.c.h.bf16 %v107_v1  ;;  %v108_v7 = vld [vmem:[#allocation2 + $0x18] sm:$0xff]  ;;  %v109_v17 = vld [vmem:[#allocation2 + $0x20] sm:$0xff]  ;;  %s5380_s0 = sshll.u32 %s7644_s21, 4  ;;  %s5381_s0 = int_to_ptr.vmem [resolvable:$true] %s5380_s0 }
  0x5d   :  { %v7780_v8 = vunpack.c.l.bf16 %v106_v2  ;;  %v7782_v9 = vunpack.c.h.bf16 %v106_v2  ;;  %v7784_v10 = vunpack.c.l.bf16 %v108_v7  ;;  %v7786_v11 = vunpack.c.h.bf16 %v108_v7  ;;  %v110_v12 = vld [vmem:[#allocation2 + $0x28] sm:$0xff]  ;;  %v112_v22 = vld [vmem:[#allocation2 + $0x38] sm:$0xff]  ;;  %v111_v27 = vld [vmem:[#allocation2 + $0x30] sm:$0xff]  ;;  %s7580_s30 = scalar_lea.vmem %s5381_s0, 8192  ;;  %p7585_p13 = scmp.lt.s32.totalorder %s5381_s0, %s5381_s0 }
  0x5e   :  { %v201_v13 = vmul.f32 %v7772_v3, %v7772_v3  ;;  %v202_v14 = vmul.f32 %v7774_v4, %v7774_v4  ;;  %v205_v15 = vmul.f32 %v7776_v5, %v7776_v5  ;;  %v206_v16 = vmul.f32 %v7778_v6, %v7778_v6  ;;  %v114_v32 = vld [vmem:[#allocation2 + $0x48] sm:$0xff]  ;;  %v113_v37 = vld [vmem:[#allocation2 + $0x40] sm:$0xff]  ;;  %v116_v46 = vld [vmem:[#allocation2 + $0x58] sm:$0xff]  ;;  %p7581_p12 = scmp.ne.s32.totalorder %s5381_s0, %s7580_s30  ;;  %p7586_p0 = scmp.lt.s32.totalorder %s7580_s30, %s7580_s30 }
  0x5f   :  { %v203_v18 = vmul.f32 %v7780_v8, %v7780_v8  ;;  %v204_v19 = vmul.f32 %v7782_v9, %v7782_v9  ;;  %v207_v20 = vmul.f32 %v7784_v10, %v7784_v10  ;;  %v208_v21 = vmul.f32 %v7786_v11, %v7786_v11  ;;  %v6356_v42 = vld [vmem:[#allocation5 + $0x4] ss:$20 sps:$4 sm:$0xff]   ;;  %v6358_v47 = vld [vmem:[#allocation5] ss:$20 sps:$4 sm:$0xff]   ;;  %v6361_v57 = vld [vmem:[#allocation5 + $0x28] ss:$20 sps:$4 sm:$0xff]  }
  0x60   :  { %v265_v23 = vadd.f32 %v202_v14, %v201_v13  ;;  %v271_v24 = vadd.f32 %v206_v16, %v205_v15  ;;  %v7804_v25 = vunpack.c.l.bf16 %v110_v12  ;;  %v7806_v26 = vunpack.c.h.bf16 %v110_v12  ;;  %1060 = vmatprep.subr.bf16.mxu0 %v6356_v42  ;;  %v6359_v51 = vld [vmem:[#allocation5 + $0x2c] ss:$20 sps:$4 sm:$0xff]   ;;  %v115_v56 = vld [vmem:[#allocation2 + $0x50] sm:$0xff]  ;;  %v6368_v42 = vld [vmem:[#allocation5 + $0xa4] ss:$20 sps:$4 sm:$0xff]   ;;  %p7587_p1 = por %p7586_p0, %p7585_p13 }
  0x61   :  { %v268_v28 = vadd.f32 %v204_v19, %v203_v18  ;;  %v274_v29 = vadd.f32 %v208_v21, %v207_v20  ;;  %v7808_v30 = vunpack.c.l.bf16 %v109_v17  ;;  %v7810_v31 = vunpack.c.h.bf16 %v109_v17  ;;  %1061 = vmatpush1.bf16.msra.mxu0 %v6358_v47  ;;  %v6362_v61 = vld [vmem:[#allocation5 + $0x54] ss:$20 sps:$4 sm:$0xff]   ;;  %v117_v14 = vld [vmem:[#allocation2 + $0x60] sm:$0xff]  ;;  %v6365_v18 = vld [vmem:[#allocation5 + $0x7c] ss:$20 sps:$4 sm:$0xff]  }
  0x62   :  { %266 = vadd.xlane.f32.xlu0 %v265_v23  ;;  %272 = vadd.xlane.f32.xlu1 %v271_v24  ;;  %v211_v33 = vmul.f32 %v7804_v25, %v7804_v25  ;;  %v212_v34 = vmul.f32 %v7806_v26, %v7806_v26  ;;  %v7816_v35 = vunpack.c.l.bf16 %v112_v22  ;;  %v7818_v36 = vunpack.c.h.bf16 %v112_v22  ;;  %v118_v2 = vld [vmem:[#allocation2 + $0x68] sm:$0xff]  ;;  %v6364_v15 = vld [vmem:[#allocation5 + $0x50] ss:$20 sps:$4 sm:$0xff]   ;;  %v120_v23 = vld [vmem:[#allocation2 + $0x78] sm:$0xff]  ;;  %p7588_p2 = pnand %p7587_p1, %p7581_p12 }
  0x63   :  { %v209_v38 = vmul.f32 %v7808_v30, %v7808_v30  ;;  %v210_v39 = vmul.f32 %v7810_v31, %v7810_v31  ;;  %v7824_v40 = vunpack.c.l.bf16 %v111_v27  ;;  %v7826_v41 = vunpack.c.h.bf16 %v111_v27  ;;  %1062 = vmatprep.subr.bf16.mxu0 %v6359_v51  ;;  %v121_v51 = vld [vmem:[#allocation2 + $0x80] sm:$0xff] }
  0x64   :  { %v215_v43 = vmul.f32 %v7816_v35, %v7816_v35  ;;  %v216_v44 = vmul.f32 %v7818_v36, %v7818_v36  ;;  %v7832_v45 = vunpack.c.l.bf16 %v114_v32  ;;  %v280_v48 = vadd.f32 %v212_v34, %v211_v33  ;;  %v6367_v33 = vld [vmem:[#allocation5 + $0x78] ss:$20 sps:$4 sm:$0xff]  }
  0x65   :  { %v213_v49 = vmul.f32 %v7824_v40, %v7824_v40  ;;  %v214_v50 = vmul.f32 %v7826_v41, %v7826_v41  ;;  %v277_v52 = vadd.f32 %v210_v39, %v209_v38  ;;  %v7838_v53 = vunpack.c.h.bf16 %v114_v32  ;;  %1063 = vmatpush1.bf16.msra.mxu0 %v6361_v57  ;;  %v119_v32 = vld [vmem:[#allocation2 + $0x70] sm:$0xff] }
  0x66   :  { %269 = vadd.xlane.f32.xlu0 %v268_v28  ;;  %275 = vadd.xlane.f32.xlu1 %v274_v29  ;;  %v7840_v54 = vunpack.c.l.bf16 %v113_v37  ;;  %v7842_v55 = vunpack.c.h.bf16 %v113_v37  ;;  %v286_v58 = vadd.f32 %v216_v44, %v215_v43  ;;  %v219_v60 = vmul.f32 %v7832_v45, %v7832_v45 }
  0x67   :  { %v283_v59 = vadd.f32 %v214_v50, %v213_v49  ;;  %v7846_v62 = vunpack.c.l.bf16 %v116_v46  ;;  %v7848_v63 = vunpack.c.h.bf16 %v116_v46  ;;  %v7850_v0 = vunpack.c.l.bf16 %v115_v56  ;;  %1064 = vmatprep.subr.bf16.mxu0 %v6362_v61  ;;  %v122_v50 = vld [vmem:[#allocation2 + $0x88] sm:$0xff] }
  0x68   :  { %v7852_v1 = vunpack.c.h.bf16 %v115_v56  ;;  %v220_v7 = vmul.f32 %v7838_v53, %v7838_v53  ;;  %v217_v12 = vmul.f32 %v7840_v54, %v7840_v54  ;;  %v218_v13 = vmul.f32 %v7842_v55, %v7842_v55 }
  0x69   :  { %v7860_v16 = vunpack.c.l.bf16 %v118_v2  ;;  %v7862_v17 = vunpack.c.h.bf16 %v118_v2  ;;  %v223_v19 = vmul.f32 %v7846_v62, %v7846_v62  ;;  %v224_v20 = vmul.f32 %v7848_v63, %v7848_v63  ;;  %1065 = vmatpush1.bf16.msra.mxu0 %v6364_v15 }
  0x6a   :  { %281 = vadd.xlane.f32.xlu1 %v280_v48  ;;  %278 = vadd.xlane.f32.xlu0 %v277_v52  ;;  %v221_v21 = vmul.f32 %v7850_v0, %v7850_v0  ;;  %v222_v22 = vmul.f32 %v7852_v1, %v7852_v1  ;;  %v292_v24 = vadd.f32 %v220_v7, %v219_v60  ;;  %v7872_v28 = vunpack.c.l.bf16 %v117_v14  ;;  %v6370_v52 = vld [vmem:[#allocation5 + $0xa0] ss:$20 sps:$4 sm:$0xff]  }
  0x6b   :  { %v289_v27 = vadd.f32 %v218_v13, %v217_v12  ;;  %v7874_v29 = vunpack.c.h.bf16 %v117_v14  ;;  %v227_v34 = vmul.f32 %v7860_v16, %v7860_v16  ;;  %v228_v37 = vmul.f32 %v7862_v17, %v7862_v17  ;;  %1066 = vmatprep.subr.bf16.mxu0 %v6365_v18  ;;  %v124_v12 = vld [vmem:[#allocation2 + $0x98] sm:$0xff]  ;;  %v123_v18 = vld [vmem:[#allocation2 + $0x90] sm:$0xff] }
  0x6c   :  { %v7880_v38 = vunpack.c.l.bf16 %v120_v23  ;;  %v7882_v39 = vunpack.c.h.bf16 %v120_v23  ;;  %v298_v43 = vadd.f32 %v224_v20, %v223_v19  ;;  %v295_v44 = vadd.f32 %v222_v22, %v221_v21  ;;  %v6373_v19 = vld [vmem:[#allocation5 + $0xc8] ss:$20 sps:$4 sm:$0xff]  }
  0x6d   :  { %v225_v46 = vmul.f32 %v7872_v28, %v7872_v28  ;;  %v226_v47 = vmul.f32 %v7874_v29, %v7874_v29  ;;  %v7888_v48 = vunpack.c.l.bf16 %v119_v32  ;;  %v7890_v49 = vunpack.c.h.bf16 %v119_v32  ;;  %1067 = vmatpush1.bf16.msra.mxu0 %v6367_v33  ;;  %v6374_v22 = vld [vmem:[#allocation5 + $0xf4] ss:$20 sps:$4 sm:$0xff]  }
  0x6e   :  { %287 = vadd.xlane.f32.xlu1 %v286_v58  ;;  %284 = vadd.xlane.f32.xlu0 %v283_v59  ;;  %v304_v56 = vadd.f32 %v228_v37, %v227_v34  ;;  %v231_v57 = vmul.f32 %v7880_v38, %v7880_v38  ;;  %v232_v58 = vmul.f32 %v7882_v39, %v7882_v39  ;;  %v6371_v59 = vld [vmem:[#allocation5 + $0xcc] ss:$20 sps:$4 sm:$0xff]   ;;  %v7896_v60 = vunpack.c.l.bf16 %v122_v50 }
  0x6f   :  { %1068 = vmatprep.subr.bf16.mxu0 %v6368_v42  ;;  %v7898_v61 = vunpack.c.h.bf16 %v122_v50  ;;  %v7900_v2 = vunpack.c.l.bf16 %v121_v51  ;;  %v7902_v7 = vunpack.c.h.bf16 %v121_v51  ;;  %v301_v13 = vadd.f32 %v226_v47, %v225_v46  ;;  %v126_v33 = vld [vmem:[#allocation2 + $0xa8] sm:$0xff]  ;;  %v125_v34 = vld [vmem:[#allocation2 + $0xa0] sm:$0xff]  ;;  %v6377_v47 = vld [vmem:[#allocation5 + $0x11c] ss:$20 sps:$4 sm:$0xff]  }
  0x70   :  { %v229_v14 = vmul.f32 %v7888_v48, %v7888_v48  ;;  %v230_v15 = vmul.f32 %v7890_v49, %v7890_v49  ;;  %v7908_v20 = vunpack.c.l.bf16 %v124_v12  ;;  %v7910_v21 = vunpack.c.h.bf16 %v124_v12  ;;  %v6376_v46 = vld [vmem:[#allocation5 + $0xf0] ss:$20 sps:$4 sm:$0xff]   ;;  %v128_v50 = vld [vmem:[#allocation2 + $0xb8] sm:$0xff] }
  0x71   :  { %1069 = vmatpush1.bf16.msra.mxu0 %v6370_v52  ;;  %v235_v23 = vmul.f32 %v7896_v60, %v7896_v60  ;;  %v234_v32 = vmul.f32 %v7902_v7, %v7902_v7  ;;  %v310_v37 = vadd.f32 %v232_v58, %v231_v57  ;;  %v7928_v57 = vunpack.c.l.bf16 %v126_v33 }
  0x72   :  { %293 = vadd.xlane.f32.xlu1 %v292_v24  ;;  %290 = vadd.xlane.f32.xlu0 %v289_v27  ;;  %9282 = vst [vmem:[#allocation19_spill] sm:$0xff] %v7908_v20  ;;  %9283 = vst [vmem:[#allocation20_spill] sm:$0xff] %v7910_v21  ;;  %v236_v24 = vmul.f32 %v7898_v61, %v7898_v61  ;;  %v233_v27 = vmul.f32 %v7900_v2, %v7900_v2  ;;  %v7930_v58 = vunpack.c.h.bf16 %v126_v33 }
  0x73   :  { %1070 = vmatprep.subr.bf16.mxu0 %v6371_v59  ;;  %v307_v42 = vadd.f32 %v230_v15, %v229_v14  ;;  %v239_v51 = vmul.f32 %v7908_v20, %v7908_v20  ;;  %v240_v52 = vmul.f32 %v7910_v21, %v7910_v21  ;;  %v127_v59 = vld [vmem:[#allocation2 + $0xb0] sm:$0xff]  ;;  %9285 = vst [vmem:[#allocation22_spill] sm:$0xff] %v7928_v57 }
  0x74   :  { %v313_v12 = vadd.f32 %v234_v32, %v233_v27  ;;  %9286 = vst [vmem:[#allocation23_spill] sm:$0xff] %v7930_v58  ;;  %v7942_v27 = vunpack.c.h.bf16 %v128_v50  ;;  %v130_v32 = vld [vmem:[#allocation2 + $0xc8] sm:$0xff]  ;;  %v243_v33 = vmul.f32 %v7928_v57, %v7928_v57  ;;  %v7950_v20 = vunpack.c.h.bf16 %v127_v59 }
  0x75   :  { %1071 = vmatpush1.bf16.msra.mxu0 %v6373_v19  ;;  %v7938_v19 = vunpack.c.h.bf16 %v125_v34 }
  0x76   :  { %299 = vadd.xlane.f32.xlu1 %v298_v43  ;;  %296 = vadd.xlane.f32.xlu0 %v295_v44  ;;  %v7920_v43 = vunpack.c.l.bf16 %v123_v18  ;;  %v7922_v44 = vunpack.c.h.bf16 %v123_v18  ;;  %v7936_v18 = vunpack.c.l.bf16 %v125_v34  ;;  %9290 = vst [vmem:[#allocation27_spill] sm:$0xff] %v7942_v27  ;;  %9292 = vst [vmem:[#allocation29_spill] sm:$0xff] %v7950_v20  ;;  %v129_v34 = vld [vmem:[#allocation2 + $0xc0] sm:$0xff] }
  0x77   :  { %1072 = vmatprep.subr.bf16.mxu0 %v6374_v22  ;;  %9288 = vst [vmem:[#allocation25_spill] sm:$0xff] %v7938_v19  ;;  %v6380_v22 = vld [vmem:[#allocation5 + $0x144] ss:$20 sps:$4 sm:$0xff]  }
  0x78   :  { %9284 = vst [vmem:[#allocation21_spill] sm:$0xff] %v7920_v43  ;;  %v237_v14 = vmul.f32 %v7920_v43, %v7920_v43  ;;  %v238_v15 = vmul.f32 %v7922_v44, %v7922_v44  ;;  %9287 = vst [vmem:[#allocation24_spill] sm:$0xff] %v7936_v18  ;;  %v6382_v43 = vld [vmem:[#allocation5 + $0x140] ss:$20 sps:$4 sm:$0xff]  }
  0x79   :  { %1073 = vmatpush1.bf16.msra.mxu0 %v6376_v46 }
  0x7a   :  { %305 = vadd.xlane.f32.xlu1 %v304_v56  ;;  %302 = vadd.xlane.f32.xlu0 %v301_v13  ;;  %v316_v56 = vadd.f32 %v236_v24, %v235_v23  ;;  %v6379_v13 = vld [vmem:[#allocation5 + $0x118] ss:$20 sps:$4 sm:$0xff]   ;;  %v322_v23 = vadd.f32 %v240_v52, %v239_v51  ;;  %v7940_v24 = vunpack.c.l.bf16 %v128_v50  ;;  %v319_v46 = vadd.f32 %v238_v15, %v237_v14 }
  0x7b   :  { %1074 = vmatprep.subr.bf16.mxu0 %v6377_v47  ;;  %v241_v50 = vmul.f32 %v7936_v18, %v7936_v18  ;;  %v242_v47 = vmul.f32 %v7938_v19, %v7938_v19  ;;  %v6383_v51 = vld [vmem:[#allocation5 + $0x16c] ss:$20 sps:$4 sm:$0xff]   ;;  %v7964_v14 = vunpack.c.l.bf16 %v130_v32  ;;  %v132_v15 = vld [vmem:[#allocation2 + $0xd8] sm:$0xff]  ;;  %v131_v18 = vld [vmem:[#allocation2 + $0xd0] sm:$0xff] }
  0x7c   :  { %9289 = vst [vmem:[#allocation26_spill] sm:$0xff] %v7940_v24  ;;  %v247_v52 = vmul.f32 %v7940_v24, %v7940_v24  ;;  %v7968_v24 = vunpack.c.l.bf16 %v129_v34  ;;  %v7972_v19 = vunpack.c.l.bf16 %v132_v15 }
  0x7d   :  { %1075 = vmatpush1.bf16.msra.mxu0 %v6379_v13  ;;  %9293 = vst [vmem:[#allocation30_spill] sm:$0xff] %v7964_v14  ;;  %v325_v13 = vadd.f32 %v242_v47, %v241_v50  ;;  %v6388_v50 = vld [vmem:[#allocation5 + $0x190] ss:$20 sps:$4 sm:$0xff]  }
  0x7e   :  { %311 = vadd.xlane.f32.xlu1 %v310_v37  ;;  %308 = vadd.xlane.f32.xlu0 %v307_v42  ;;  %v244_v37 = vmul.f32 %v7930_v58, %v7930_v58  ;;  %v7948_v42 = vunpack.c.l.bf16 %v127_v59  ;;  %v248_v59 = vmul.f32 %v7942_v27, %v7942_v27  ;;  %v7966_v58 = vunpack.c.h.bf16 %v130_v32  ;;  %9295 = vst [vmem:[#allocation32_spill] sm:$0xff] %v7968_v24 }
  0x7f   :  { %1076 = vmatprep.subr.bf16.mxu0 %v6380_v22  ;;  %v7970_v27 = vunpack.c.h.bf16 %v129_v34  ;;  %v134_v22 = vld [vmem:[#allocation2 + $0xe8] sm:$0xff]  ;;  %9297 = vst [vmem:[#allocation34_spill] sm:$0xff] %v7972_v19  ;;  %v7978_v32 = vunpack.c.l.bf16 %v131_v18  ;;  %v133_v34 = vld [vmem:[#allocation2 + $0xe0] sm:$0xff]  ;;  %v249_v47 = vmul.f32 %v7968_v24, %v7968_v24 }
  0x80   :  { %9291 = vst [vmem:[#allocation28_spill] sm:$0xff] %v7948_v42  ;;  %v328_v57 = vadd.f32 %v244_v37, %v243_v33  ;;  %9294 = vst [vmem:[#allocation31_spill] sm:$0xff] %v7966_v58  ;;  %v6385_v33 = vld [vmem:[#allocation5 + $0x168] ss:$20 sps:$4 sm:$0xff]   ;;  %v8000_v24 = vunpack.c.l.bf16 %v133_v34 }
  0x81   :  { %9296 = vst [vmem:[#allocation33_spill] sm:$0xff] %v7970_v27  ;;  %1077 = vmatpush1.bf16.msra.mxu0 %v6382_v43  ;;  %v6386_v37 = vld [vmem:[#allocation5 + $0x194] ss:$20 sps:$4 sm:$0xff]   ;;  %9299 = vst [vmem:[#allocation36_spill] sm:$0xff] %v7978_v32  ;;  %v252_v43 = vmul.f32 %v7966_v58, %v7966_v58  ;;  %v6391_v58 = vld [vmem:[#allocation5 + $0x1b8] ss:$20 sps:$4 sm:$0xff]  }
  0x82   :  { %317 = vadd.xlane.f32.xlu1 %v316_v56  ;;  %314 = vadd.xlane.f32.xlu0 %v313_v12  ;;  %v245_v56 = vmul.f32 %v7948_v42, %v7948_v42  ;;  %v246_v12 = vmul.f32 %v7950_v20, %v7950_v20  ;;  %v334_v42 = vadd.f32 %v248_v59, %v247_v52  ;;  %v7974_v20 = vunpack.c.h.bf16 %v132_v15  ;;  %v6389_v52 = vld [vmem:[#allocation5 + $0x1bc] ss:$20 sps:$4 sm:$0xff]  }
  0x83   :  { %1078 = vmatprep.subr.bf16.mxu0 %v6383_v51  ;;  %v250_v51 = vmul.f32 %v7970_v27, %v7970_v27  ;;  %v255_v59 = vmul.f32 %v7972_v19, %v7972_v19 }
  0x84   :  { %9298 = vst [vmem:[#allocation35_spill] sm:$0xff] %v7974_v20  ;;  %v331_v21 = vadd.f32 %v246_v12, %v245_v56  ;;  %v7992_v56 = vunpack.c.l.bf16 %v134_v22  ;;  %v253_v12 = vmul.f32 %v7978_v32, %v7978_v32 }
  0x85   :  { %1079 = vmatpush1.bf16.msra.mxu0 %v6385_v33  ;;  %v337_v19 = vadd.f32 %v250_v51, %v249_v47  ;;  %v6395_v51 = vld [vmem:[#allocation5 + $0x20c] ss:$20 sps:$4 sm:$0xff]  }
  0x86   :  { %323 = vadd.xlane.f32.xlu1 %v322_v23  ;;  %320 = vadd.xlane.f32.xlu0 %v319_v46  ;;  %v251_v23 = vmul.f32 %v7964_v14, %v7964_v14  ;;  %v7980_v46 = vunpack.c.h.bf16 %v131_v18  ;;  %v256_v18 = vmul.f32 %v7974_v20, %v7974_v20  ;;  %v135_v14 = vld [vmem:[#allocation2 + $0xf0] sm:$0xff]  ;;  %v8002_v20 = vunpack.c.h.bf16 %v133_v34 }
  0x87   :  { %1080 = vmatprep.subr.bf16.mxu0 %v6386_v37  ;;  %v6392_v37 = vld [vmem:[#allocation5 + $0x1e4] ss:$20 sps:$4 sm:$0xff]   ;;  %v259_v32 = vmul.f32 %v7992_v56, %v7992_v56  ;;  %v257_v34 = vmul.f32 %v8000_v24, %v8000_v24  ;;  %v8018_v47 = vunpack.c.h.bf16 %v135_v14 }
  0x88   :  { %9300 = vst [vmem:[#allocation37_spill] sm:$0xff] %v7980_v46  ;;  %v254_v15 = vmul.f32 %v7980_v46, %v7980_v46  ;;  %v340_v33 = vadd.f32 %v252_v43, %v251_v23  ;;  %v346_v27 = vadd.f32 %v256_v18, %v255_v59  ;;  %v6394_v23 = vld [vmem:[#allocation5 + $0x1e0] ss:$20 sps:$4 sm:$0xff]   ;;  %v8016_v43 = vunpack.c.l.bf16 %v135_v14 }
  0x89   :  { %1081 = vmatpush1.bf16.msra.mxu0 %v6388_v50  ;;  %v258_v50 = vmul.f32 %v8002_v20, %v8002_v20  ;;  %v262_v14 = vmul.f32 %v8018_v47, %v8018_v47 }
  0x8a   :  { %329 = vadd.xlane.f32.xlu1 %v328_v57  ;;  %326 = vadd.xlane.f32.xlu0 %v325_v13  ;;  %v136_v57 = vld [vmem:[#allocation2 + $0xf8] sm:$0xff]  ;;  %v7998_v13 = vunpack.c.h.bf16 %v134_v22  ;;  %v343_v46 = vadd.f32 %v254_v15, %v253_v12 }
  0x8b   :  { %1082 = vmatprep.subr.bf16.mxu0 %v6389_v52  ;;  %v349_v18 = vadd.f32 %v258_v50, %v257_v34  ;;  %v6397_v12 = vld [vmem:[#allocation5 + $0x208] ss:$20 sps:$4 sm:$0xff]  }
  0x8c   :  { %v260_v22 = vmul.f32 %v7998_v13, %v7998_v13 }
  0x8d   :  { %1083 = vmatpush1.bf16.msra.mxu0 %v6391_v58  ;;  %v6398_v58 = vld [vmem:[#allocation5 + $0x234] ss:$20 sps:$4 sm:$0xff]  }
  0x8e   :  { %335 = vadd.xlane.f32.xlu1 %v334_v42  ;;  %332 = vadd.xlane.f32.xlu0 %v331_v21  ;;  %v8008_v42 = vunpack.c.l.bf16 %v136_v57  ;;  %v8010_v21 = vunpack.c.h.bf16 %v136_v57  ;;  %v352_v52 = vadd.f32 %v260_v22, %v259_v32  ;;  %v261_v57 = vmul.f32 %v8016_v43, %v8016_v43  ;;  %v6400_v32 = vld [vmem:[#allocation5 + $0x230] ss:$20 sps:$4 sm:$0xff]  }
  0x8f   :  { %1084 = vmatprep.subr.bf16.mxu0 %v6392_v37  ;;  %v6401_v37 = vld [vmem:[#allocation5 + $0x25c] ss:$20 sps:$4 sm:$0xff]  }
  0x90   :  { %v263_v59 = vmul.f32 %v8008_v42, %v8008_v42 }
  0x91   :  { %1085 = vmatpush1.bf16.msra.mxu0 %v6394_v23 }
  0x92   :  { %341 = vadd.xlane.f32.xlu1 %v340_v33  ;;  %338 = vadd.xlane.f32.xlu0 %v337_v19  ;;  %v264_v19 = vmul.f32 %v8010_v21, %v8010_v21  ;;  %v355_v33 = vadd.f32 %v262_v14, %v261_v57 }
  0x93   :  { %1086 = vmatprep.subr.bf16.mxu0 %v6395_v51 }
  0x94   :  { %v358_v15 = vadd.f32 %v264_v19, %v263_v59 }
  0x95   :  { %1087 = vmatpush1.bf16.msra.mxu0 %v6397_v12 }
  0x96   :  { %347 = vadd.xlane.f32.xlu1 %v346_v27  ;;  %344 = vadd.xlane.f32.xlu0 %v343_v46  ;;  %v6403_v27 = vld [vmem:[#allocation5 + $0x258] ss:$20 sps:$4 sm:$0xff]  }
  0x97   :  { %1088 = vmatprep.subr.bf16.mxu0 %v6398_v58  ;;  %v6406_v46 = vld [vmem:[#allocation5 + $0xc] ss:$20 sps:$4 sm:$0xff]  }
  0x99   :  { %1089 = vmatpush1.bf16.msra.mxu0 %v6400_v32 }
  0x9a   :  { %353 = vadd.xlane.f32.xlu1 %v352_v52  ;;  %350 = vadd.xlane.f32.xlu0 %v349_v18 }
  0x9b   :  { %1090 = vmatprep.subr.bf16.mxu0 %v6401_v37 }
  0x9d   :  { %1091 = vmatpush1.bf16.msra.mxu0 %v6403_v27 }
  0x9e   :  { %359 = vadd.xlane.f32.xlu1 %v358_v15  ;;  %356 = vadd.xlane.f32.xlu0 %v355_v33 }
  0x9f   :  { %1253 = vmatprep.subr.bf16.mxu0 %v6406_v46 }
  0xef   :  { %v267_v22 = vpop.xlane.xlu0 %266  ;;  %v273_v23 = vpop.xlane.xlu1 %272 }
  0xf0   :  { %v361_v34 = vmax.f32 %v267_v22, 1e-24  ;;  %v363_v50 = vmax.f32 %v273_v23, 1e-24 }
  0xf2   :  { %6764 = vrsqrt.f32 %v361_v34 }
  0xf3   :  { %6766 = vrsqrt.f32 %v363_v50  ;;  %v270_v51 = vpop.xlane.xlu0 %269  ;;  %v276_v52 = vpop.xlane.xlu1 %275 }
  0xf4   :  { %v362_v59 = vmax.f32 %v270_v51, 1e-24  ;;  %v364_v19 = vmax.f32 %v276_v52, 1e-24 }
  0xf6   :  { %6768 = vrsqrt.f32 %v362_v59 }
  0xf7   :  { %6770 = vrsqrt.f32 %v364_v19  ;;  %v282_v18 = vpop.xlane.xlu1 %281  ;;  %v279_v57 = vpop.xlane.xlu0 %278 }
  0xf8   :  { %v366_v14 = vmax.f32 %v282_v18, 1e-24  ;;  %v365_v12 = vmax.f32 %v279_v57, 1e-24  ;;  %v6404_v57 = vld [vmem:[#allocation5 + $0x8] ss:$20 sps:$4 sm:$0xff]  }
  0xfa   :  { %6772 = vrsqrt.f32 %v366_v14 }
  0xfb   :  { %6774 = vrsqrt.f32 %v365_v12  ;;  %v288_v58 = vpop.xlane.xlu1 %287  ;;  %v285_v32 = vpop.xlane.xlu0 %284 }
  0xfc   :  { %v6765_v15 = vpop.eup %6764  ;;  %v368_v37 = vmax.f32 %v288_v58, 1e-24  ;;  %v367_v27 = vmax.f32 %v285_v32, 1e-24  ;;  %v6409_v58 = vld [vmem:[#allocation5 + $0x34] ss:$20 sps:$4 sm:$0xff]  }
  0xfd   :  { %v6767_v33 = vpop.eup %6766  ;;  %v426_v22 = vmul.f32 %v6765_v15, %v7774_v4  ;;  %v425_v51 = vmul.f32 %v6765_v15, %v7772_v3 }
  0xfe   :  { %v430_v23 = vmul.f32 %v6767_v33, %v7778_v6  ;;  %6776 = vrsqrt.f32 %v368_v37  ;;  %v429_v37 = vmul.f32 %v6767_v33, %v7776_v5 }
  0xff   :  { %6778 = vrsqrt.f32 %v367_v27  ;;  %v294_v19 = vpop.xlane.xlu1 %293  ;;  %v291_v4 = vpop.xlane.xlu0 %290 }
 0x100   :  { %v6769_v46 = vpop.eup %6768  ;;  %v370_v3 = vmax.f32 %v294_v19, 1e-24 }
 0x101   :  { %v6771_v34 = vpop.eup %6770  ;;  %v428_v50 = vmul.f32 %v6769_v46, %v7782_v9  ;;  %v427_v52 = vmul.f32 %v6769_v46, %v7780_v8  ;;  %v369_v8 = vmax.f32 %v291_v4, 1e-24  ;;  %v6412_v46 = vld [vmem:[#allocation5 + $0x5c] ss:$20 sps:$4 sm:$0xff]   ;;  %v6413_v4 = vld [vmem:[#allocation5 + $0x80] ss:$20 sps:$4 sm:$0xff]  }
 0x102   :  { %v432_v59 = vmul.f32 %v6771_v34, %v7786_v11  ;;  %v6407_v11 = vld [vmem:[#allocation5 + $0x30] ss:$20 sps:$4 sm:$0xff]   ;;  %v431_v27 = vmul.f32 %v6771_v34, %v7784_v10  ;;  %6780 = vrsqrt.f32 %v370_v3 }
 0x103   :  { %v8034_v18 = vpack.c.bf16 %v428_v50, %v426_v22  ;;  %v8036_v14 = vpack.c.bf16 %v427_v52, %v425_v51  ;;  %6782 = vrsqrt.f32 %v369_v8  ;;  %v300_v22 = vpop.xlane.xlu1 %299  ;;  %v6410_v51 = vld [vmem:[#allocation5 + $0x58] ss:$20 sps:$4 sm:$0xff]   ;;  %v297_v52 = vpop.xlane.xlu0 %296 }
 0x104   :  { %v6773_v12 = vpop.eup %6772  ;;  %v8038_v6 = vpack.c.bf16 %v432_v59, %v430_v23  ;;  %v8049_v19 = vpack.c.bf16 %v431_v27, %v429_v37  ;;  %v371_v33 = vmax.f32 %v297_v52, 1e-24 }
 0x105   :  { %v6775_v9 = vpop.eup %6774  ;;  %1092 = vmatprep.mubr.bf16.mxu0 %v8034_v18  ;;  %v436_v15 = vmul.f32 %v6773_v12, %v7806_v26  ;;  %v6415_v26 = vld [vmem:[#allocation5 + $0x84] ss:$20 sps:$4 sm:$0xff]   ;;  %v435_v10 = vmul.f32 %v6773_v12, %v7804_v25  ;;  %v6416_v12 = vld [vmem:[#allocation5 + $0xa8] ss:$20 sps:$4 sm:$0xff]  }
 0x106   :  { %1093 = vmatmul.mubr.bf16.vlgmr.msra.gmra.mrb[0].mxu0 %v8036_v14  ;;  %v434_v32 = vmul.f32 %v6775_v9, %v7810_v31  ;;  %v372_v31 = vmax.f32 %v300_v22, 1e-24  ;;  %v433_v5 = vmul.f32 %v6775_v9, %v7808_v30  ;;  %v6419_v22 = vld [vmem:[#allocation5 + $0xd0] ss:$20 sps:$4 sm:$0xff]  }
 0x107   :  { %1254 = vmatpush1.bf16.msra.mxu0 %v6404_v57  ;;  %1102 = vmatprep.mubr.bf16.mxu0 %v8038_v6  ;;  %v306_v8 = vpop.xlane.xlu1 %305  ;;  %v303_v25 = vpop.xlane.xlu0 %302 }
 0x108   :  { %1255 = vmatprep.subr.bf16.mxu0 %v6409_v58  ;;  %v6777_v23 = vpop.eup %6776  ;;  %v8047_v50 = vpack.c.bf16 %v436_v15, %v434_v32  ;;  %v6418_v58 = vld [vmem:[#allocation5 + $0xac] ss:$20 sps:$4 sm:$0xff]   ;;  %6784 = vrsqrt.f32 %v372_v31  ;;  %v8057_v3 = vpack.c.bf16 %v435_v10, %v433_v5  ;;  %v6421_v32 = vld [vmem:[#allocation5 + $0xd4] ss:$20 sps:$4 sm:$0xff]   ;;  %v373_v37 = vmax.f32 %v303_v25, 1e-24 }
 0x109   :  { %v6779_v59 = vpop.eup %6778  ;;  %v440_v57 = vmul.f32 %v6777_v23, %v7818_v36  ;;  %6786 = vrsqrt.f32 %v371_v33  ;;  %v439_v15 = vmul.f32 %v6777_v23, %v7816_v35  ;;  %v6422_v23 = vld [vmem:[#allocation5 + $0xf8] ss:$20 sps:$4 sm:$0xff]  }
 0x10a   :  { %v438_v34 = vmul.f32 %v6779_v59, %v7826_v41  ;;  %v374_v41 = vmax.f32 %v306_v8, 1e-24  ;;  %v437_v36 = vmul.f32 %v6779_v59, %v7824_v40 }
 0x10b   :  { %1256 = vmatpush1.bf16.msra.mxu0 %v6407_v11  ;;  %v309_v35 = vpop.xlane.xlu0 %308 }
 0x10c   :  { %1257 = vmatprep.subr.bf16.mxu0 %v6412_v46  ;;  %v6781_v11 = vpop.eup %6780  ;;  %v8059_v30 = vpack.c.bf16 %v440_v57, %v438_v34  ;;  %6788 = vrsqrt.f32 %v374_v41  ;;  %v8067_v52 = vpack.c.bf16 %v439_v15, %v437_v36  ;;  %v375_v33 = vmax.f32 %v309_v35, 1e-24 }
 0x10d   :  { %v6783_v9 = vpop.eup %6782  ;;  %v444_v46 = vmul.f32 %v6781_v11, %v7838_v53  ;;  %6790 = vrsqrt.f32 %v373_v37  ;;  %v443_v10 = vmul.f32 %v6781_v11, %v7832_v45  ;;  %v6428_v11 = vld [vmem:[#allocation5 + $0x148] ss:$20 sps:$4 sm:$0xff]  }
 0x10e   :  { %1103 = vmatmul.mubr.bf16.gmra.mrb[4].mxu0 %v8049_v19  ;;  %v442_v27 = vmul.f32 %v6783_v9, %v7842_v55  ;;  %v6427_v55 = vld [vmem:[#allocation5 + $0x124] ss:$20 sps:$4 sm:$0xff]   ;;  %v441_v53 = vmul.f32 %v6783_v9, %v7840_v54 }
 0x10f   :  { %1112 = vmatprep.mubr.bf16.mxu0 %v8047_v50  ;;  %1258 = vmatpush1.bf16.msra.mxu0 %v6410_v51  ;;  %v6424_v51 = vld [vmem:[#allocation5 + $0xfc] ss:$20 sps:$4 sm:$0xff]   ;;  %v315_v45 = vpop.xlane.xlu0 %314 }
 0x110   :  { %1259 = vmatprep.subr.bf16.mxu0 %v6415_v26  ;;  %v312_v26 = vpop.xlane.xlu1 %311  ;;  %v8069_v40 = vpack.c.bf16 %v444_v46, %v442_v27  ;;  %v8077_v8 = vpack.c.bf16 %v443_v10, %v441_v53  ;;  %v377_v36 = vmax.f32 %v315_v45, 1e-24  ;;  %v6431_v27 = vld [vmem:[#allocation5 + $0x170] ss:$20 sps:$4 sm:$0xff]   ;;  %v6437_v10 = vld [vmem:[#allocation5 + $0x1c0] ss:$20 sps:$4 sm:$0xff]  }
 0x111   :  { %v376_v5 = vmax.f32 %v312_v26, 1e-24  ;;  %v6436_v46 = vld [vmem:[#allocation5 + $0x19c] ss:$20 sps:$4 sm:$0xff]  }
 0x112   :  { %v6785_v31 = vpop.eup %6784 }
 0x113   :  { %1260 = vmatpush1.bf16.msra.mxu0 %v6413_v4  ;;  %v6787_v59 = vpop.eup %6786  ;;  %v448_v57 = vmul.f32 %v6785_v31, %v7848_v63  ;;  %v6425_v4 = vld [vmem:[#allocation5 + $0x120] ss:$20 sps:$4 sm:$0xff]   ;;  %6792 = vrsqrt.f32 %v376_v5  ;;  %v447_v41 = vmul.f32 %v6785_v31, %v7846_v62  ;;  %v321_v62 = vpop.xlane.xlu0 %320  ;;  %v6434_v31 = vld [vmem:[#allocation5 + $0x198] ss:$20 sps:$4 sm:$0xff]  }
 0x114   :  { %1261 = vmatprep.subr.bf16.mxu0 %v6418_v58  ;;  %v446_v34 = vmul.f32 %v6787_v59, %v7852_v1  ;;  %v6430_v58 = vld [vmem:[#allocation5 + $0x14c] ss:$20 sps:$4 sm:$0xff]   ;;  %6794 = vrsqrt.f32 %v375_v33  ;;  %v318_v25 = vpop.xlane.xlu1 %317  ;;  %v6433_v1 = vld [vmem:[#allocation5 + $0x174] ss:$20 sps:$4 sm:$0xff]   ;;  %v445_v63 = vmul.f32 %v6787_v59, %v7850_v0 }
 0x115   :  { %v6442_v33 = vld [vmem:[#allocation5 + $0x1ec] ss:$20 sps:$4 sm:$0xff]  }
 0x116   :  { %1113 = vmatmul.mubr.bf16.gmra.mrb[8].mxu0 %v8057_v3  ;;  %v8079_v54 = vpack.c.bf16 %v448_v57, %v446_v34 }
 0x117   :  { %1122 = vmatprep.mubr.bf16.mxu0 %v8059_v30  ;;  %1262 = vmatpush1.bf16.msra.mxu0 %v6416_v12  ;;  %v6789_v12 = vpop.eup %6788 }
 0x118   :  { %1263 = vmatprep.subr.bf16.mxu0 %v6421_v32  ;;  %v6791_v9 = vpop.eup %6790  ;;  %v378_v32 = vmax.f32 %v318_v25, 1e-24  ;;  %v452_v37 = vmul.f32 %v6789_v12, %v7862_v17  ;;  %v451_v59 = vmul.f32 %v6789_v12, %v7860_v16  ;;  %v327_v16 = vpop.xlane.xlu0 %326 }
 0x119   :  { %v450_v15 = vmul.f32 %v6791_v9, %v7874_v29  ;;  %v6439_v29 = vld [vmem:[#allocation5 + $0x1c4] ss:$20 sps:$4 sm:$0xff]   ;;  %v449_v17 = vmul.f32 %v6791_v9, %v7872_v28 }
 0x11a   :  { %6796 = vrsqrt.f32 %v378_v32  ;;  %v6443_v32 = vld [vmem:[#allocation5 + $0x210] ss:$20 sps:$4 sm:$0xff]  }
 0x11b   :  { %1264 = vmatpush1.bf16.msra.mxu0 %v6419_v22  ;;  %v8087_v22 = vpack.c.bf16 %v447_v41, %v445_v63  ;;  %6798 = vrsqrt.f32 %v377_v36  ;;  %v8089_v0 = vpack.c.bf16 %v452_v37, %v450_v15  ;;  %v8097_v34 = vpack.c.bf16 %v451_v59, %v449_v17  ;;  %v6448_v63 = vld [vmem:[#allocation5 + $0x23c] ss:$20 sps:$4 sm:$0xff]   ;;  %v6446_v37 = vld [vmem:[#allocation5 + $0x238] ss:$20 sps:$4 sm:$0xff]  }
 0x11c   :  { %1265 = vmatprep.subr.bf16.mxu0 %v6424_v51  ;;  %v324_v51 = vpop.xlane.xlu1 %323 }
 0x11d   :  { %v6793_v26 = vpop.eup %6792 }
 0x11e   :  { %1123 = vmatmul.mubr.bf16.gmra.mrb[12].mxu0 %v8067_v52  ;;  %v6795_v35 = vpop.eup %6794  ;;  %v456_v53 = vmul.f32 %v6793_v26, %v7882_v39  ;;  %v455_v45 = vmul.f32 %v6793_v26, %v7880_v38  ;;  %v333_v38 = vpop.xlane.xlu0 %332 }
 0x11f   :  { %1132 = vmatprep.mubr.bf16.mxu0 %v8069_v40  ;;  %1266 = vmatpush1.bf16.msra.mxu0 %v6422_v23  ;;  %v380_v23 = vmax.f32 %v324_v51, 1e-24  ;;  %v454_v5 = vmul.f32 %v6795_v35, %v7890_v49  ;;  %v6445_v49 = vld [vmem:[#allocation5 + $0x214] ss:$20 sps:$4 sm:$0xff]   ;;  %v453_v39 = vmul.f32 %v6795_v35, %v7888_v48  ;;  %v383_v26 = vmax.f32 %v333_v38, 1e-24 }
 0x120   :  { %1267 = vmatprep.subr.bf16.mxu0 %v6427_v55  ;;  %v379_v55 = vmax.f32 %v321_v62, 1e-24  ;;  %v330_v57 = vpop.xlane.xlu1 %329 }
 0x121   :  { %6800 = vrsqrt.f32 %v380_v23  ;;  %v8099_v28 = vpack.c.bf16 %v456_v53, %v454_v5  ;;  %v382_v12 = vmax.f32 %v330_v57, 1e-24  ;;  %v8107_v41 = vpack.c.bf16 %v455_v45, %v453_v39  ;;  %v6452_v23 = vld [vmem:[#allocation5 + $0x150] ss:$20 sps:$4 sm:$0xff]  }
 0x122   :  { %6802 = vrsqrt.f32 %v379_v55 }
 0x123   :  { %1268 = vmatpush1.bf16.msra.mxu0 %v6425_v4  ;;  %6804 = vrsqrt.f32 %v382_v12  ;;  %v8127_v12 = vld [vmem:[#allocation7 + $0x4] ss:$8 sps:$4 sm:$0xff]  }
 0x124   :  { %1269 = vmatprep.subr.bf16.mxu0 %v6430_v58  ;;  %v6797_v4 = vpop.eup %6796  ;;  %v6440_v58 = vld [vmem:[#allocation5 + $0x1e8] ss:$20 sps:$4 sm:$0xff]   ;;  %v336_v36 = vpop.xlane.xlu1 %335  ;;  %5926 = vmatprep.subr.bf16.mxu1 %v8127_v12 }
 0x125   :  { %v6799_v25 = vpop.eup %6798  ;;  %v459_v51 = vmul.f32 %v6797_v4, %v7896_v60  ;;  %v339_v60 = vpop.xlane.xlu0 %338 }
 0x126   :  { %1133 = vmatmul.mubr.bf16.gmra.mrb[16].mxu0 %v8077_v8  ;;  %v458_v9 = vmul.f32 %v6799_v25, %v7902_v7  ;;  %v6451_v7 = vld [vmem:[#allocation5 + $0x264] ss:$20 sps:$4 sm:$0xff]  }
 0x127   :  { %1142 = vmatprep.mubr.bf16.mxu0 %v8079_v54  ;;  %1270 = vmatpush1.bf16.msra.mxu0 %v6428_v11  ;;  %v381_v11 = vmax.f32 %v327_v16, 1e-24  ;;  %v9304_v16 = vld [vmem:[#allocation25_spill] sm:$0xff] }
 0x128   :  { %1271 = vmatprep.subr.bf16.mxu0 %v6433_v1  ;;  %v460_v1 = vmul.f32 %v6797_v4, %v7898_v61  ;;  %v457_v61 = vmul.f32 %v6799_v25, %v7900_v2  ;;  %v342_v59 = vpop.xlane.xlu1 %341  ;;  %v385_v4 = vmax.f32 %v339_v60, 1e-24  ;;  %v9305_v25 = vld [vmem:[#allocation23_spill] sm:$0xff] }
 0x129   :  { %6806 = vrsqrt.f32 %v381_v11  ;;  %v386_v53 = vmax.f32 %v342_v59, 1e-24 }
 0x12a   :  { %v8109_v48 = vpack.c.bf16 %v460_v1, %v458_v9  ;;  %v8117_v17 = vpack.c.bf16 %v459_v51, %v457_v61  ;;  %v345_v1 = vpop.xlane.xlu0 %344  ;;  %v9309_v51 = vld [vmem:[#allocation27_spill] sm:$0xff] }
 0x12b   :  { %1272 = vmatpush1.bf16.msra.mxu0 %v6431_v27  ;;  %v6801_v15 = vpop.eup %6800 }
 0x12c   :  { %1273 = vmatprep.subr.bf16.mxu0 %v6436_v46  ;;  %v6803_v27 = vpop.eup %6802  ;;  %v384_v46 = vmax.f32 %v336_v36, 1e-24  ;;  %v348_v45 = vpop.xlane.xlu1 %347 }
 0x12d   :  { %v462_v62 = vmul.f32 %v6803_v27, %v7922_v44  ;;  %v6805_v55 = vpop.eup %6804  ;;  %v9302_v44 = vld [vmem:[#allocation21_spill] sm:$0xff]  ;;  %v388_v36 = vmax.f32 %v348_v45, 1e-24 }
 0x12e   :  { %1143 = vmatmul.mubr.bf16.gmra.mrb[20].mxu0 %v8087_v22  ;;  %6808 = vrsqrt.f32 %v384_v46  ;;  %v9308_v46 = vld [vmem:[#allocation29_spill] sm:$0xff]  ;;  %v351_v60 = vpop.xlane.xlu0 %350 }
 0x12f   :  { %1152 = vmatprep.mubr.bf16.mxu0 %v8089_v0  ;;  %1274 = vmatpush1.bf16.msra.mxu0 %v6434_v31  ;;  %v9301_v31 = vld [vmem:[#allocation20_spill] sm:$0xff]  ;;  %6810 = vrsqrt.f32 %v383_v26 }
 0x130   :  { %1275 = vmatprep.subr.bf16.mxu0 %v6439_v29  ;;  %v464_v35 = vmul.f32 %v6801_v15, %v9301_v31  ;;  %v6449_v29 = vld [vmem:[#allocation5 + $0x260] ss:$20 sps:$4 sm:$0xff]   ;;  %6812 = vrsqrt.f32 %v386_v53  ;;  %v8145_v31 = vld [vmem:[#allocation7 + $0x10] ss:$8 sps:$4 sm:$0xff]  }
 0x131   :  { %6814 = vrsqrt.f32 %v385_v4  ;;  %v8156_v53 = vld [vmem:[#allocation7 + $0x20] ss:$8 sps:$4 sm:$0xff]  }
 0x132   :  { %v8119_v2 = vpack.c.bf16 %v464_v35, %v462_v62  ;;  %v8143_v62 = vld [vmem:[#allocation7 + $0x14] ss:$8 sps:$4 sm:$0xff]   ;;  %v8147_v35 = vld [vmem:[#allocation7 + $0x24] ss:$8 sps:$4 sm:$0xff]   ;;  %6816 = vrsqrt.f32 %v388_v36  ;;  %v8167_v36 = vld [vmem:[#allocation7 + $0x30] ss:$8 sps:$4 sm:$0xff]  }
 0x133   :  { %1276 = vmatpush1.bf16.msra.mxu0 %v6437_v10  ;;  %v6807_v5 = vpop.eup %6806  ;;  %v461_v10 = vmul.f32 %v6803_v27, %v9302_v44 }
 0x134   :  { %1277 = vmatprep.subr.bf16.mxu0 %v6442_v33  ;;  %v9303_v33 = vld [vmem:[#allocation19_spill] sm:$0xff] }
 0x135   :  { %v463_v57 = vmul.f32 %v6801_v15, %v9303_v33  ;;  %v9306_v15 = vld [vmem:[#allocation24_spill] sm:$0xff] }
 0x136   :  { %1153 = vmatmul.mubr.bf16.gmra.mrb[24].mxu0 %v8097_v34  ;;  %v465_v38 = vmul.f32 %v6807_v5, %v9306_v15 }
 0x137   :  { %1162 = vmatprep.mubr.bf16.mxu0 %v8099_v28  ;;  %1278 = vmatpush1.bf16.msra.mxu0 %v6440_v58  ;;  %v466_v58 = vmul.f32 %v6807_v5, %v9304_v16  ;;  %v8130_v39 = vpack.c.bf16 %v463_v57, %v461_v10  ;;  %v9312_v10 = vld [vmem:[#allocation28_spill] sm:$0xff]  ;;  %v9313_v57 = vld [vmem:[#allocation26_spill] sm:$0xff]  ;;  %v389_v16 = vmax.f32 %v351_v60, 1e-24 }
 0x138   :  { %1279 = vmatprep.subr.bf16.mxu0 %v6445_v49  ;;  %v468_v49 = vmul.f32 %v6805_v55, %v9305_v25  ;;  %v6809_v11 = vpop.eup %6808 }
 0x139   :  { %v472_v26 = vmul.f32 %v6809_v11, %v9309_v51  ;;  %v471_v4 = vmul.f32 %v6809_v11, %v9313_v57  ;;  %v9318_v51 = vld [vmem:[#allocation32_spill] sm:$0xff]  ;;  %v9321_v57 = vld [vmem:[#allocation35_spill] sm:$0xff] }
 0x13a   :  { %v8132_v9 = vpack.c.bf16 %v468_v49, %v466_v58  ;;  %v9314_v58 = vld [vmem:[#allocation33_spill] sm:$0xff]  ;;  %v9315_v49 = vld [vmem:[#allocation31_spill] sm:$0xff] }
 0x13b   :  { %1280 = vmatpush1.bf16.msra.mxu0 %v6443_v32  ;;  %v6811_v32 = vpop.eup %6810 }
 0x13c   :  { %1281 = vmatprep.subr.bf16.mxu0 %v6448_v63  ;;  %v8134_v63 = vld [vmem:[#allocation7] ss:$8 sps:$4 sm:$0xff]   ;;  %v470_v61 = vmul.f32 %v6811_v32, %v9308_v46  ;;  %v6813_v59 = vpop.eup %6812  ;;  %v469_v33 = vmul.f32 %v6811_v32, %v9312_v10  ;;  %v9320_v10 = vld [vmem:[#allocation37_spill] sm:$0xff] }
 0x13d   :  { %5942 = vmatpush1.bf16.msra.mxu1 %v8134_v63  ;;  %v6815_v5 = vpop.eup %6814  ;;  %v476_v45 = vmul.f32 %v6813_v59, %v9315_v49  ;;  %v8177_v46 = vld [vmem:[#allocation7 + $0x40] ss:$8 sps:$4 sm:$0xff]   ;;  %v8197_v49 = vld [vmem:[#allocation7 + $0x64] ss:$8 sps:$4 sm:$0xff]  }
 0x13e   :  { %1163 = vmatmul.mubr.bf16.gmra.mrb[28].mxu0 %v8107_v41  ;;  %5927 = vmatprep.subr.bf16.mxu1 %v8143_v62  ;;  %v474_v25 = vmul.f32 %v6815_v5, %v9314_v58  ;;  %v8170_v15 = vpack.c.bf16 %v471_v4, %v469_v33  ;;  %v6817_v32 = vpop.eup %6816  ;;  %v8189_v58 = vld [vmem:[#allocation7 + $0x50] ss:$8 sps:$4 sm:$0xff]  }
 0x13f   :  { %1172 = vmatprep.mubr.bf16.mxu0 %v8109_v48  ;;  %1282 = vmatpush1.bf16.msra.mxu0 %v6446_v37  ;;  %v9307_v37 = vld [vmem:[#allocation22_spill] sm:$0xff]  ;;  %v480_v4 = vmul.f32 %v6817_v32, %v9321_v57  ;;  %v8219_v57 = vld [vmem:[#allocation7 + $0x84] ss:$8 sps:$4 sm:$0xff]  }
 0x140   :  { %1283 = vmatprep.subr.bf16.mxu0 %v6451_v7  ;;  %v467_v27 = vmul.f32 %v6805_v55, %v9307_v37  ;;  %v387_v7 = vmax.f32 %v345_v1, 1e-24  ;;  %v8153_v55 = vpack.c.bf16 %v472_v26, %v470_v61  ;;  %v8165_v1 = vld [vmem:[#allocation7 + $0x34] ss:$8 sps:$4 sm:$0xff]   ;;  %9316 = vst [vmem:[#allocation19_spill] sm:$0xff] %v8170_v15  ;;  %v357_v37 = vpop.xlane.xlu0 %356  ;;  %v473_v26 = vmul.f32 %v6815_v5, %v9318_v51 }
 0x141   :  { %5943 = vmatpush1.bf16.msra.mxu1 %v8145_v31  ;;  %v9325_v51 = vld [vmem:[#allocation34_spill] sm:$0xff] }
 0x142   :  { %6818 = vrsqrt.f32 %v387_v7  ;;  %9311 = vst [vmem:[#allocation21_spill] sm:$0xff] %v8153_v55  ;;  %5928 = vmatprep.subr.bf16.mxu1 %v8147_v35 }
 0x143   :  { %1284 = vmatpush1.bf16.msra.mxu0 %v6449_v29  ;;  %v8150_v29 = vpack.c.bf16 %v467_v27, %v465_v38  ;;  %v8173_v38 = vpack.c.bf16 %v476_v45, %v474_v25  ;;  %v8175_v27 = vld [vmem:[#allocation7 + $0x44] ss:$8 sps:$4 sm:$0xff]  }
 0x144   :  { %5742 = vmatprep.subr.bf16.mxu0 %v6452_v23  ;;  %v354_v23 = vpop.xlane.xlu1 %353 }
 0x145   :  { %9310 = vst [vmem:[#allocation20_spill] sm:$0xff] %v8150_v29  ;;  %v390_v44 = vmax.f32 %v354_v23, 1e-24  ;;  %5944 = vmatpush1.bf16.msra.mxu1 %v8156_v53  ;;  %9317 = vst [vmem:[#allocation25_spill] sm:$0xff] %v8173_v38  ;;  %v9319_v23 = vld [vmem:[#allocation30_spill] sm:$0xff] }
 0x146   :  { %1173 = vmatmul.mubr.bf16.gmra.mrb[32].mxu0 %v8117_v17  ;;  %5929 = vmatprep.subr.bf16.mxu1 %v8165_v1  ;;  %v475_v60 = vmul.f32 %v6813_v59, %v9319_v23 }
 0x147   :  { %1182 = vmatprep.mubr.bf16.mxu0 %v8119_v2  ;;  %6820 = vrsqrt.f32 %v390_v44  ;;  %v391_v44 = vmax.f32 %v357_v37, 1e-24  ;;  %v9324_v37 = vld [vmem:[#allocation36_spill] sm:$0xff] }
 0x148   :  { %6822 = vrsqrt.f32 %v389_v16  ;;  %v360_v11 = vpop.xlane.xlu1 %359  ;;  %v8187_v16 = vld [vmem:[#allocation7 + $0x54] ss:$8 sps:$4 sm:$0xff]   ;;  %v8192_v25 = vpack.c.bf16 %v475_v60, %v473_v26  ;;  %v479_v26 = vmul.f32 %v6817_v32, %v9325_v51 }
 0x149   :  { %5945 = vmatpush1.bf16.msra.mxu1 %v8167_v36  ;;  %v392_v61 = vmax.f32 %v360_v11, 1e-24  ;;  %v8199_v11 = vld [vmem:[#allocation7 + $0x60] ss:$8 sps:$4 sm:$0xff]  }
 0x14a   :  { %5930 = vmatprep.subr.bf16.mxu1 %v8175_v27  ;;  %9322 = vst [vmem:[#allocation23_spill] sm:$0xff] %v8192_v25 }
 0x14b   :  { %6824 = vrsqrt.f32 %v392_v61 }
 0x14c   :  { %v6819_v7 = vpop.eup %6818  ;;  %6826 = vrsqrt.f32 %v391_v44  ;;  %v8209_v44 = vld [vmem:[#allocation7 + $0x74] ss:$8 sps:$4 sm:$0xff]  }
 0x14d   :  { %5946 = vmatpush1.bf16.msra.mxu1 %v8177_v46  ;;  %v478_v33 = vmul.f32 %v6819_v7, %v9320_v10  ;;  %v477_v61 = vmul.f32 %v6819_v7, %v9324_v37  ;;  %v8211_v10 = vld [vmem:[#allocation7 + $0x70] ss:$8 sps:$4 sm:$0xff]   ;;  %v8221_v37 = vld [vmem:[#allocation7 + $0x80] ss:$8 sps:$4 sm:$0xff]  }
 0x14e   :  { %1183 = vmatmul.mubr.bf16.gmra.mrb[36].mxu0 %v8130_v39  ;;  %5931 = vmatprep.subr.bf16.mxu1 %v8187_v16 }
 0x14f   :  { %1192 = vmatprep.mubr.bf16.mxu0 %v8132_v9  ;;  %v8195_v5 = vpack.c.bf16 %v480_v4, %v478_v33  ;;  %v8214_v33 = vpack.c.bf16 %v479_v26, %v477_v61  ;;  %v8231_v26 = vld [vmem:[#allocation7 + $0x94] ss:$8 sps:$4 sm:$0xff]  }
 0x151   :  { %5947 = vmatpush1.bf16.msra.mxu1 %v8189_v58  ;;  %v6821_v59 = vpop.eup %6820  ;;  %9323 = vst [vmem:[#allocation24_spill] sm:$0xff] %v8195_v5 }
 0x152   :  { %v6823_v45 = vpop.eup %6822  ;;  %5932 = vmatprep.subr.bf16.mxu1 %v8197_v49  ;;  %v484_v60 = vmul.f32 %v6821_v59, %v7998_v13  ;;  %v483_v13 = vmul.f32 %v6821_v59, %v7992_v56  ;;  %v8241_v56 = vld [vmem:[#allocation7 + $0xa4] ss:$8 sps:$4 sm:$0xff]   ;;  %v8243_v59 = vld [vmem:[#allocation7 + $0xa0] ss:$8 sps:$4 sm:$0xff]  }
 0x153   :  { %v482_v23 = vmul.f32 %v6823_v45, %v8002_v20  ;;  %v481_v20 = vmul.f32 %v6823_v45, %v8000_v24  ;;  %v8251_v45 = vld [vmem:[#allocation7 + $0xb4] ss:$8 sps:$4 sm:$0xff]  }
 0x154   :  { %9326 = vst [vmem:[#allocation22_spill] sm:$0xff] %v8251_v45 }
 0x155   :  { %5948 = vmatpush1.bf16.msra.mxu1 %v8199_v11  ;;  %v6825_v7 = vpop.eup %6824  ;;  %v8217_v32 = vpack.c.bf16 %v484_v60, %v482_v23  ;;  %v8233_v23 = vld [vmem:[#allocation7 + $0x90] ss:$8 sps:$4 sm:$0xff]   ;;  %v8236_v60 = vpack.c.bf16 %v483_v13, %v481_v20 }
 0x156   :  { %1193 = vmatmul.mubr.bf16.gmra.mrb[40].mxu0 %v8150_v29  ;;  %5933 = vmatprep.subr.bf16.mxu1 %v8209_v44  ;;  %v6827_v4 = vpop.eup %6826  ;;  %v488_v51 = vmul.f32 %v6825_v7, %v8010_v21  ;;  %v8253_v20 = vld [vmem:[#allocation7 + $0xb0] ss:$8 sps:$4 sm:$0xff]  }
 0x157   :  { %1202 = vmatprep.mubr.bf16.mxu0 %v8153_v55  ;;  %v486_v61 = vmul.f32 %v6827_v4, %v8018_v47  ;;  %v485_v21 = vmul.f32 %v6827_v4, %v8016_v43  ;;  %v487_v47 = vmul.f32 %v6825_v7, %v8008_v42  ;;  %9327 = vst [vmem:[#allocation29_spill] sm:$0xff] %v8253_v20  ;;  %v8267_v42 = vld [vmem:[#allocation7 + $0xd4] ss:$8 sps:$4 sm:$0xff]   ;;  %v8269_v43 = vld [vmem:[#allocation7 + $0xd0] ss:$8 sps:$4 sm:$0xff]  }
 0x158   :  { %9330 = vst [vmem:[#allocation26_spill] sm:$0xff] %v8267_v42  ;;  %9331 = vst [vmem:[#allocation33_spill] sm:$0xff] %v8269_v43  ;;  %v6453_v7 = vld [vmem:[#allocation5 + $0x10] ss:$20 sps:$4 sm:$0xff]  }
 0x159   :  { %5949 = vmatpush1.bf16.msra.mxu1 %v8211_v10  ;;  %v8239_v24 = vpack.c.bf16 %v488_v51, %v486_v61  ;;  %v8256_v13 = vpack.c.bf16 %v487_v47, %v485_v21  ;;  %v8259_v61 = vld [vmem:[#allocation7 + $0xc4] ss:$8 sps:$4 sm:$0xff]   ;;  %v8261_v51 = vld [vmem:[#allocation7 + $0xc0] ss:$8 sps:$4 sm:$0xff]  }
 0x15a   :  { %5934 = vmatprep.subr.bf16.mxu1 %v8219_v57  ;;  %9328 = vst [vmem:[#allocation27_spill] sm:$0xff] %v8259_v61  ;;  %9329 = vst [vmem:[#allocation28_spill] sm:$0xff] %v8261_v51  ;;  %v8273_v4 = vld [vmem:[#allocation7 + $0xe4] ss:$8 sps:$4 sm:$0xff]   ;;  %v8275_v47 = vld [vmem:[#allocation7 + $0xe0] ss:$8 sps:$4 sm:$0xff]  }
 0x15b   :  { %9332 = vst [vmem:[#allocation31_spill] sm:$0xff] %v8273_v4  ;;  %v6454_v21 = vld [vmem:[#allocation5 + $0x178] ss:$20 sps:$4 sm:$0xff]   ;;  %9333 = vst [vmem:[#allocation32_spill] sm:$0xff] %v8275_v47 }
 0x15d   :  { %5950 = vmatpush1.bf16.msra.mxu1 %v8221_v37 }
 0x15e   :  { %1203 = vmatmul.mubr.bf16.gmra.mrb[44].mxu0 %v8170_v15  ;;  %5935 = vmatprep.subr.bf16.mxu1 %v8231_v26 }
 0x15f   :  { %1212 = vmatprep.mubr.bf16.mxu0 %v8173_v38 }
 0x161   :  { %5951 = vmatpush1.bf16.msra.mxu1 %v8233_v23 }
 0x162   :  { %5936 = vmatprep.subr.bf16.mxu1 %v8241_v56 }
 0x165   :  { %5952 = vmatpush1.bf16.msra.mxu1 %v8243_v59 }
 0x166   :  { %1213 = vmatmul.mubr.bf16.gmra.mrb[48].mxu0 %v8192_v25  ;;  %5937 = vmatprep.subr.bf16.mxu1 %v8251_v45  ;;  %v6461_v45 = vld [vmem:[#allocation5 + $0xb0] ss:$20 sps:$4 sm:$0xff]  }
 0x167   :  { %1222 = vmatprep.mubr.bf16.mxu0 %v8195_v5 }
 0x169   :  { %5953 = vmatpush1.bf16.msra.mxu1 %v8253_v20  ;;  %v6458_v20 = vld [vmem:[#allocation5 + $0x1c8] ss:$20 sps:$4 sm:$0xff]  }
 0x16a   :  { %5938 = vmatprep.subr.bf16.mxu1 %v8259_v61  ;;  %v8281_v61 = vld [vmem:[#allocation7 + $0xf4] ss:$8 sps:$4 sm:$0xff]  }
 0x16b   :  { %9334 = vst [vmem:[#allocation30_spill] sm:$0xff] %v8281_v61 }
 0x16d   :  { %5954 = vmatpush1.bf16.msra.mxu1 %v8261_v51  ;;  %v6455_v51 = vld [vmem:[#allocation5 + $0x38] ss:$20 sps:$4 sm:$0xff]  }
 0x16e   :  { %1223 = vmatmul.mubr.bf16.gmra.mrb[52].mxu0 %v8214_v33  ;;  %5939 = vmatprep.subr.bf16.mxu1 %v8267_v42  ;;  %v8283_v42 = vld [vmem:[#allocation7 + $0xf0] ss:$8 sps:$4 sm:$0xff]  }
 0x16f   :  { %1232 = vmatprep.mubr.bf16.mxu0 %v8217_v32  ;;  %9335 = vst [vmem:[#allocation37_spill] sm:$0xff] %v8283_v42 }
 0x171   :  { %5955 = vmatpush1.bf16.msra.mxu1 %v8269_v43  ;;  %v6456_v43 = vld [vmem:[#allocation5 + $0x1a0] ss:$20 sps:$4 sm:$0xff]  }
 0x172   :  { %5940 = vmatprep.subr.bf16.mxu1 %v8273_v4  ;;  %v6457_v4 = vld [vmem:[#allocation5 + $0x60] ss:$20 sps:$4 sm:$0xff]  }
 0x175   :  { %5956 = vmatpush1.bf16.msra.mxu1 %v8275_v47  ;;  %v6518_v47 = vld [vmem:[#allocation7 + $0x104] ss:$8 sps:$4 sm:$0xff]  }
 0x176   :  { %1233 = vmatmul.mubr.bf16.gmra.mrb[56].mxu0 %v8236_v60  ;;  %5941 = vmatprep.subr.bf16.mxu1 %v8281_v61  ;;  %v6468_v61 = vld [vmem:[#allocation5 + $0x218] ss:$20 sps:$4 sm:$0xff]  }
 0x177   :  { %1242 = vmatprep.mubr.bf16.mxu0 %v8239_v24 }
 0x179   :  { %5957 = vmatpush1.bf16.msra.mxu1 %v8283_v42  ;;  %v6485_v42 = vld [vmem:[#allocation5 + $0x100] ss:$20 sps:$4 sm:$0xff]  }
 0x17a   :  { %2532 = vmatprep.subr.bf16.mxu1 %v6518_v47 }
 0x17e   :  { %1243 = vmatmul.mubr.bf16.gmra.mrb[60].mxu0 %v8256_v13 }
 0x17f   :  { %1285 = vmatprep.mubr.bf16.mxu0 %v8034_v18 }
 0x186   :  { %1286 = vmatmul.mubr.bf16.vlgmr.msra.gmra.mrb[64].mxu0 %v8036_v14 }
 0x187   :  { %5743 = vmatpush3.bf16.msra.mxu0 %v6453_v7  ;;  %1295 = vmatprep.mubr.bf16.mxu0 %v8038_v6  ;;  %v6459_v7 = vld [vmem:[#allocation5 + $0x88] ss:$20 sps:$4 sm:$0xff]  }
 0x188   :  { %5744 = vmatprep.subr.bf16.mxu0 %v6454_v21  ;;  %v6460_v21 = vld [vmem:[#allocation5 + $0x1f0] ss:$20 sps:$4 sm:$0xff]  }
 0x18b   :  { %5745 = vmatpush3.bf16.msra.mxu0 %v6455_v51  ;;  %v6471_v51 = vld [vmem:[#allocation5 + $0xd8] ss:$20 sps:$4 sm:$0xff]  }
 0x18c   :  { %5746 = vmatprep.subr.bf16.mxu0 %v6456_v43  ;;  %v6482_v43 = vld [vmem:[#allocation5 + $0x240] ss:$20 sps:$4 sm:$0xff]  }
 0x18e   :  { %1296 = vmatmul.mubr.bf16.gmra.mrb[68].mxu0 %v8049_v19 }
 0x18f   :  { %1305 = vmatprep.mubr.bf16.mxu0 %v8047_v50  ;;  %5747 = vmatpush3.bf16.msra.mxu0 %v6457_v4  ;;  %v6496_v4 = vld [vmem:[#allocation5 + $0x268] ss:$20 sps:$4 sm:$0xff]  }
 0x190   :  { %5748 = vmatprep.subr.bf16.mxu0 %v6458_v20  ;;  %v6499_v20 = vld [vmem:[#allocation5 + $0x128] ss:$20 sps:$4 sm:$0xff]  }
 0x193   :  { %5749 = vmatpush3.bf16.msra.mxu0 %v6459_v7 }
 0x194   :  { %5750 = vmatprep.subr.bf16.mxu0 %v6460_v21 }
 0x196   :  { %1306 = vmatmul.mubr.bf16.gmra.mrb[72].mxu0 %v8057_v3 }
 0x197   :  { %1315 = vmatprep.mubr.bf16.mxu0 %v8059_v30  ;;  %5751 = vmatpush3.bf16.msra.mxu0 %v6461_v45 }
 0x198   :  { %5752 = vmatprep.subr.bf16.mxu0 %v6468_v61 }
 0x19b   :  { %5753 = vmatpush3.bf16.msra.mxu0 %v6471_v51 }
 0x19c   :  { %5754 = vmatprep.subr.bf16.mxu0 %v6482_v43 }
 0x19e   :  { %1316 = vmatmul.mubr.bf16.gmra.mrb[76].mxu0 %v8067_v52 }
 0x19f   :  { %1325 = vmatprep.mubr.bf16.mxu0 %v8069_v40  ;;  %5755 = vmatpush3.bf16.msra.mxu0 %v6485_v42  ;;  %v8314_v42 = vld [vmem:[%s9217_s2] sm:$0x1f] }
 0x1a0   :  { %5756 = vmatprep.subr.bf16.mxu0 %v6496_v4  ;;  %9338 = vst [vmem:[#allocation34_spill] sm:$0xff] %v8314_v42 }
 0x1a3   :  { %5757 = vmatpush3.bf16.msra.mxu0 %v6499_v20 }
 0x1a4   :  { %2339 = vmatprep.subr.bf16.mxu0 %v8127_v12  ;;  %v619_v12 = vlaneseq }
 0x1a6   :  { %1326 = vmatmul.mubr.bf16.gmra.mrb[80].mxu0 %v8077_v8  ;;  %v8305_v45 = vshrl.u32 %v619_v12, 7 }
 0x1a7   :  { %1335 = vmatprep.mubr.bf16.mxu0 %v8079_v54 }
 0x1a8   :  { %9336 = vst [vmem:[#allocation35_spill] sm:$0xff] %v8305_v45  ;;  %v8309_v61 = vsub.s32 0, %v8305_v45  ;;  %v8317_v47 = vsub.s32 1, %v8305_v45 }
 0x1aa   :  { %9337 = vst [vmem:[#allocation36_spill] sm:$0xff] %v8309_v61  ;;  %9339 = vst [vmem:[#allocation38_spill] sm:$0xff] %v8317_v47  ;;  %v8322_v7 = vrot.slane %v8314_v42, %v8309_v61  ;;  %v8327_v21 = vrot.slane %v8314_v42, %v8317_v47 }
 0x1ae   :  { %1336 = vmatmul.mubr.bf16.gmra.mrb[84].mxu0 %v8087_v22 }
 0x1af   :  { %1345 = vmatprep.mubr.bf16.mxu0 %v8089_v0 }
 0x1b6   :  { %1346 = vmatmul.mubr.bf16.gmra.mrb[88].mxu0 %v8097_v34 }
 0x1b7   :  { %1355 = vmatprep.mubr.bf16.mxu0 %v8099_v28 }
 0x1be   :  { %1356 = vmatmul.mubr.bf16.gmra.mrb[92].mxu0 %v8107_v41 }
 0x1bf   :  { %1365 = vmatprep.mubr.bf16.mxu0 %v8109_v48 }
 0x1c6   :  { %1366 = vmatmul.mubr.bf16.gmra.mrb[96].mxu0 %v8117_v17 }
 0x1c7   :  { %1375 = vmatprep.mubr.bf16.mxu0 %v8119_v2 }
 0x1ce   :  { %1376 = vmatmul.mubr.bf16.gmra.mrb[100].mxu0 %v8130_v39 }
 0x1cf   :  { %1385 = vmatprep.mubr.bf16.mxu0 %v8132_v9 }
 0x1d6   :  { %1386 = vmatmul.mubr.bf16.gmra.mrb[104].mxu0 %v8150_v29 }
 0x1d7   :  { %1395 = vmatprep.mubr.bf16.mxu0 %v8153_v55 }
 0x1d9   :  { %v1094_v51 = vpop.f32.mrb[0].mxu0 }
 0x1da   :  { %v1095_v43 = vadd.f32 %v1094_v51, %v8322_v7  ;;  %v1096_v4 = vpop.f32.mrb[1].mxu0 }
 0x1db   :  { %v1097_v20 = vadd.f32 %v1096_v4, %v8327_v21  ;;  %v1098_v12 = vpop.f32.mrb[2].mxu0 }
 0x1dc   :  { %6828 = vtanh.f32 %v1095_v43  ;;  %v1099_v29 = vadd.f32 %v1098_v12, %v8322_v7  ;;  %v1100_v45 = vpop.f32.mrb[3].mxu0 }
 0x1dd   :  { %6830 = vtanh.f32 %v1097_v20  ;;  %v1101_v61 = vadd.f32 %v1100_v45, %v8327_v21 }
 0x1de   :  { %6832 = vtanh.f32 %v1099_v29  ;;  %1396 = vmatmul.mubr.bf16.gmra.mrb[108].mxu0 %v8170_v15 }
 0x1df   :  { %6834 = vtanh.f32 %v1101_v61  ;;  %1405 = vmatprep.mubr.bf16.mxu0 %v8173_v38 }
 0x1e1   :  { %v1104_v47 = vpop.f32.mrb[4].mxu0 }
 0x1e2   :  { %v1105_v51 = vadd.f32 %v1104_v47, %v8322_v7  ;;  %v1106_v55 = vpop.f32.mrb[5].mxu0 }
 0x1e3   :  { %v1107_v4 = vadd.f32 %v1106_v55, %v8327_v21  ;;  %v1108_v42 = vpop.f32.mrb[6].mxu0 }
 0x1e4   :  { %6836 = vtanh.f32 %v1105_v51  ;;  %v1109_v43 = vadd.f32 %v1108_v42, %v8322_v7  ;;  %v1110_v12 = vpop.f32.mrb[7].mxu0 }
 0x1e5   :  { %6838 = vtanh.f32 %v1107_v4  ;;  %v1111_v45 = vadd.f32 %v1110_v12, %v8327_v21 }
 0x1e6   :  { %v8339_v29 = vpop.eup %6828  ;;  %6840 = vtanh.f32 %v1109_v43  ;;  %1406 = vmatmul.mubr.bf16.gmra.mrb[112].mxu0 %v8192_v25 }
 0x1e7   :  { %9340 = vst [vmem:[#allocation39_spill] sm:$0xff] %v8339_v29  ;;  %v8342_v61 = vpop.eup %6830  ;;  %6842 = vtanh.f32 %v1111_v45  ;;  %1415 = vmatprep.mubr.bf16.mxu0 %v8195_v5 }
 0x1e8   :  { %9341 = vst [vmem:[#allocation40_spill] sm:$0xff] %v8342_v61  ;;  %v8345_v47 = vpop.eup %6832 }
 0x1e9   :  { %9342 = vst [vmem:[#allocation41_spill] sm:$0xff] %v8345_v47  ;;  %v8347_v55 = vpop.eup %6834  ;;  %v1114_v20 = vpop.f32.mrb[8].mxu0 }
 0x1ea   :  { %9343 = vst [vmem:[#allocation42_spill] sm:$0xff] %v8347_v55  ;;  %v1115_v51 = vadd.f32 %v1114_v20, %v8322_v7  ;;  %v1116_v4 = vpop.f32.mrb[9].mxu0 }
 0x1eb   :  { %v1117_v12 = vadd.f32 %v1116_v4, %v8327_v21  ;;  %v1118_v25 = vpop.f32.mrb[10].mxu0 }
 0x1ec   :  { %6844 = vtanh.f32 %v1115_v51  ;;  %v1119_v45 = vadd.f32 %v1118_v25, %v8322_v7  ;;  %v1120_v5 = vpop.f32.mrb[11].mxu0 }
 0x1ed   :  { %6846 = vtanh.f32 %v1117_v12  ;;  %v1121_v38 = vadd.f32 %v1120_v5, %v8327_v21 }
 0x1ee   :  { %v8357_v15 = vpop.eup %6836  ;;  %6848 = vtanh.f32 %v1119_v45  ;;  %1416 = vmatmul.mubr.bf16.gmra.mrb[116].mxu0 %v8214_v33 }
 0x1ef   :  { %9344 = vst [vmem:[#allocation43_spill] sm:$0xff] %v8357_v15  ;;  %v8360_v20 = vpop.eup %6838  ;;  %6850 = vtanh.f32 %v1121_v38  ;;  %1425 = vmatprep.mubr.bf16.mxu0 %v8217_v32 }
 0x1f0   :  { %9345 = vst [vmem:[#allocation44_spill] sm:$0xff] %v8360_v20  ;;  %v8363_v42 = vpop.eup %6840 }
 0x1f1   :  { %9346 = vst [vmem:[#allocation45_spill] sm:$0xff] %v8363_v42  ;;  %v8365_v4 = vpop.eup %6842  ;;  %v1124_v51 = vpop.f32.mrb[12].mxu0 }
 0x1f2   :  { %9347 = vst [vmem:[#allocation46_spill] sm:$0xff] %v8365_v4  ;;  %v1125_v5 = vadd.f32 %v1124_v51, %v8322_v7  ;;  %v1126_v12 = vpop.f32.mrb[13].mxu0 }
 0x1f3   :  { %v1127_v43 = vadd.f32 %v1126_v12, %v8327_v21  ;;  %v1128_v29 = vpop.f32.mrb[14].mxu0 }
 0x1f4   :  { %6852 = vtanh.f32 %v1125_v5  ;;  %v1129_v38 = vadd.f32 %v1128_v29, %v8322_v7  ;;  %v1130_v47 = vpop.f32.mrb[15].mxu0 }
 0x1f5   :  { %6854 = vtanh.f32 %v1127_v43  ;;  %v1131_v61 = vadd.f32 %v1130_v47, %v8327_v21 }
 0x1f6   :  { %v8375_v55 = vpop.eup %6844  ;;  %6856 = vtanh.f32 %v1129_v38  ;;  %1426 = vmatmul.mubr.bf16.gmra.mrb[120].mxu0 %v8236_v60 }
 0x1f7   :  { %9348 = vst [vmem:[#allocation47_spill] sm:$0xff] %v8375_v55  ;;  %v8378_v51 = vpop.eup %6846  ;;  %6858 = vtanh.f32 %v1131_v61  ;;  %1435 = vmatprep.mubr.bf16.mxu0 %v8239_v24 }
 0x1f8   :  { %9349 = vst [vmem:[#allocation48_spill] sm:$0xff] %v8378_v51  ;;  %v8381_v25 = vpop.eup %6848 }
 0x1f9   :  { %9350 = vst [vmem:[#allocation49_spill] sm:$0xff] %v8381_v25  ;;  %v8383_v12 = vpop.eup %6850  ;;  %v1134_v5 = vpop.f32.mrb[16].mxu0 }
 0x1fa   :  { %v1135_v47 = vadd.f32 %v1134_v5, %v8322_v7  ;;  %v1136_v43 = vpop.f32.mrb[17].mxu0 }
 0x1fb   :  { %v1137_v45 = vadd.f32 %v1136_v43, %v8327_v21  ;;  %v1138_v15 = vpop.f32.mrb[18].mxu0 }
 0x1fc   :  { %6860 = vtanh.f32 %v1135_v47  ;;  %v1139_v61 = vadd.f32 %v1138_v15, %v8322_v7  ;;  %v1140_v42 = vpop.f32.mrb[19].mxu0 }
 0x1fd   :  { %6862 = vtanh.f32 %v1137_v45  ;;  %v1141_v20 = vadd.f32 %v1140_v42, %v8327_v21 }
 0x1fe   :  { %v8393_v4 = vpop.eup %6852  ;;  %6864 = vtanh.f32 %v1139_v61  ;;  %1436 = vmatmul.mubr.bf16.gmra.mrb[124].mxu0 %v8256_v13 }
 0x1ff   :  { %9351 = vst [vmem:[#allocation50_spill] sm:$0xff] %v8393_v4  ;;  %v8396_v5 = vpop.eup %6854  ;;  %6866 = vtanh.f32 %v1141_v20  ;;  %1478 = vmatprep.mubr.bf16.mxu0 %v8034_v18  ;;  %v6516_v4 = vld [vmem:[#allocation7 + $0x100] ss:$8 sps:$4 sm:$0xff]  }
 0x200   :  { %v8399_v29 = vpop.eup %6856 }
 0x201   :  { %9352 = vst [vmem:[#allocation51_spill] sm:$0xff] %v8399_v29  ;;  %v8401_v43 = vpop.eup %6858  ;;  %v1144_v47 = vpop.f32.mrb[20].mxu0  ;;  %v6521_v29 = vld [vmem:[#allocation7 + $0x114] ss:$8 sps:$4 sm:$0xff]  }
 0x202   :  { %v1145_v42 = vadd.f32 %v1144_v47, %v8322_v7  ;;  %v1146_v45 = vpop.f32.mrb[21].mxu0 }
 0x203   :  { %v1147_v38 = vadd.f32 %v1146_v45, %v8327_v21  ;;  %v1148_v55 = vpop.f32.mrb[22].mxu0 }
 0x204   :  { %6868 = vtanh.f32 %v1145_v42  ;;  %v1149_v18 = vadd.f32 %v1148_v55, %v8322_v7  ;;  %v1150_v20 = vpop.f32.mrb[23].mxu0 }
 0x205   :  { %6870 = vtanh.f32 %v1147_v38  ;;  %v1151_v25 = vadd.f32 %v1150_v20, %v8327_v21 }
 0x206   :  { %v6861_v51 = vpop.eup %6860  ;;  %6872 = vtanh.f32 %v1149_v18  ;;  %1479 = vmatmul.mubr.bf16.vlgmr.msra.gmra.mrb[128].mxu0 %v8036_v14 }
 0x207   :  { %v6863_v15 = vpop.eup %6862  ;;  %6874 = vtanh.f32 %v1151_v25  ;;  %1486 = vmatprep.mubr.bf16.mxu0 %v8038_v6  ;;  %2340 = vmatpush1.bf16.msra.mxu0 %v8134_v63 }
 0x208   :  { %v6865_v47 = vpop.eup %6864  ;;  %2341 = vmatprep.subr.bf16.mxu0 %v8143_v62 }
 0x209   :  { %v6867_v42 = vpop.eup %6866  ;;  %v1154_v45 = vpop.f32.mrb[24].mxu0  ;;  %v1787_v55 = vpack.c.bf16 %v6865_v47, %v6861_v51  ;;  %v6519_v51 = vld [vmem:[#allocation7 + $0x110] ss:$8 sps:$4 sm:$0xff]  }
 0x20a   :  { %v1155_v38 = vadd.f32 %v1154_v45, %v8322_v7  ;;  %v1156_v61 = vpop.f32.mrb[25].mxu0  ;;  %v1788_v20 = vpack.c.bf16 %v6867_v42, %v6863_v15 }
 0x20b   :  { %v1157_v18 = vadd.f32 %v1156_v61, %v8327_v21  ;;  %v1158_v14 = vpop.f32.mrb[26].mxu0  ;;  %2342 = vmatpush1.bf16.msra.mxu0 %v8145_v31  ;;  %v6524_v31 = vld [vmem:[#allocation7 + $0x124] ss:$8 sps:$4 sm:$0xff]  }
 0x20c   :  { %6876 = vtanh.f32 %v1155_v38  ;;  %v1159_v6 = vadd.f32 %v1158_v14, %v8322_v7  ;;  %v1160_v63 = vpop.f32.mrb[27].mxu0  ;;  %2411 = vmatprep.mubr.bf16.mxu1 %v1788_v20  ;;  %2343 = vmatprep.subr.bf16.mxu0 %v8147_v35  ;;  %v6525_v14 = vld [vmem:[#allocation7 + $0x130] ss:$8 sps:$4 sm:$0xff]  }
 0x20d   :  { %6878 = vtanh.f32 %v1157_v18  ;;  %v1161_v62 = vadd.f32 %v1160_v63, %v8327_v21  ;;  %2412 = vmatmul.mubr.bf16.vlgmr.msra.gmra.mrb[0].mxu1 %v1787_v55  ;;  %v6530_v63 = vld [vmem:[#allocation7 + $0x144] ss:$8 sps:$4 sm:$0xff]  }
 0x20e   :  { %v6869_v25 = vpop.eup %6868  ;;  %6880 = vtanh.f32 %v1159_v6  ;;  %1487 = vmatmul.mubr.bf16.gmra.mrb[132].mxu0 %v8049_v19  ;;  %2533 = vmatpush1.bf16.msra.mxu1 %v6516_v4  ;;  %v6522_v4 = vld [vmem:[#allocation7 + $0x120] ss:$8 sps:$4 sm:$0xff]  }
 0x20f   :  { %v6871_v15 = vpop.eup %6870  ;;  %6882 = vtanh.f32 %v1161_v62  ;;  %1494 = vmatprep.mubr.bf16.mxu0 %v8047_v50  ;;  %2534 = vmatprep.subr.bf16.mxu1 %v6521_v29  ;;  %v6527_v50 = vld [vmem:[#allocation7 + $0x134] ss:$8 sps:$4 sm:$0xff]  }
 0x210   :  { %v6873_v61 = vpop.eup %6872  ;;  %2344 = vmatpush1.bf16.msra.mxu0 %v8156_v53 }
 0x211   :  { %v6875_v35 = vpop.eup %6874  ;;  %v1164_v47 = vpop.f32.mrb[28].mxu0  ;;  %v1792_v42 = vpack.c.bf16 %v6873_v61, %v6869_v25  ;;  %2345 = vmatprep.subr.bf16.mxu0 %v8165_v1 }
 0x212   :  { %v1165_v45 = vadd.f32 %v1164_v47, %v8322_v7  ;;  %v1166_v55 = vpop.f32.mrb[29].mxu0  ;;  %v1793_v19 = vpack.c.bf16 %v6875_v35, %v6871_v15  ;;  %2535 = vmatpush1.bf16.msra.mxu1 %v6519_v51 }
 0x213   :  { %v1167_v38 = vadd.f32 %v1166_v55, %v8327_v21  ;;  %v1168_v20 = vpop.f32.mrb[30].mxu0  ;;  %2536 = vmatprep.subr.bf16.mxu1 %v6524_v31  ;;  %v6528_v31 = vld [vmem:[#allocation7 + $0x140] ss:$8 sps:$4 sm:$0xff]  }
 0x214   :  { %6884 = vtanh.f32 %v1165_v45  ;;  %v1169_v29 = vadd.f32 %v1168_v20, %v8322_v7  ;;  %v1170_v53 = vpop.f32.mrb[31].mxu0  ;;  %2421 = vmatprep.mubr.bf16.mxu1 %v1793_v19  ;;  %2346 = vmatpush1.bf16.msra.mxu0 %v8167_v36  ;;  %v6531_v45 = vld [vmem:[#allocation7 + $0x150] ss:$8 sps:$4 sm:$0xff]   ;;  %v6536_v19 = vld [vmem:[#allocation7 + $0x164] ss:$8 sps:$4 sm:$0xff]  }
 0x215   :  { %6886 = vtanh.f32 %v1167_v38  ;;  %v1171_v1 = vadd.f32 %v1170_v53, %v8327_v21  ;;  %2422 = vmatmul.mubr.bf16.gmra.mrb[4].mxu1 %v1792_v42  ;;  %2347 = vmatprep.subr.bf16.mxu0 %v8175_v27 }
 0x216   :  { %v6877_v18 = vpop.eup %6876  ;;  %6888 = vtanh.f32 %v1169_v29  ;;  %1495 = vmatmul.mubr.bf16.gmra.mrb[136].mxu0 %v8057_v3  ;;  %2537 = vmatpush1.bf16.msra.mxu1 %v6522_v4  ;;  %v6534_v29 = vld [vmem:[#allocation7 + $0x160] ss:$8 sps:$4 sm:$0xff]  }
 0x217   :  { %v6879_v6 = vpop.eup %6878  ;;  %6890 = vtanh.f32 %v1171_v1  ;;  %1502 = vmatprep.mubr.bf16.mxu0 %v8059_v30  ;;  %2538 = vmatprep.subr.bf16.mxu1 %v6527_v50  ;;  %v6533_v30 = vld [vmem:[#allocation7 + $0x154] ss:$8 sps:$4 sm:$0xff]  }
 0x218   :  { %v6881_v62 = vpop.eup %6880  ;;  %2348 = vmatpush1.bf16.msra.mxu0 %v8177_v46 }
 0x219   :  { %v6883_v36 = vpop.eup %6882  ;;  %v1174_v25 = vpop.f32.mrb[32].mxu0  ;;  %v1797_v51 = vpack.c.bf16 %v6881_v62, %v6877_v18  ;;  %2349 = vmatprep.subr.bf16.mxu0 %v8187_v16  ;;  %v6542_v62 = vld [vmem:[#allocation7 + $0x184] ss:$8 sps:$4 sm:$0xff]  }
 0x21a   :  { %v1175_v27 = vadd.f32 %v1174_v25, %v8322_v7  ;;  %v1176_v15 = vpop.f32.mrb[33].mxu0  ;;  %v1798_v3 = vpack.c.bf16 %v6883_v36, %v6879_v6  ;;  %2539 = vmatpush1.bf16.msra.mxu1 %v6525_v14  ;;  %v6537_v6 = vld [vmem:[#allocation7 + $0x170] ss:$8 sps:$4 sm:$0xff]  }
 0x21b   :  { %v1177_v61 = vadd.f32 %v1176_v15, %v8327_v21  ;;  %v1178_v35 = vpop.f32.mrb[34].mxu0  ;;  %2540 = vmatprep.subr.bf16.mxu1 %v6530_v63  ;;  %v6540_v15 = vld [vmem:[#allocation7 + $0x180] ss:$8 sps:$4 sm:$0xff]  }
 0x21c   :  { %6892 = vtanh.f32 %v1175_v27  ;;  %v1179_v47 = vadd.f32 %v1178_v35, %v8322_v7  ;;  %v1180_v46 = vpop.f32.mrb[35].mxu0  ;;  %2431 = vmatprep.mubr.bf16.mxu1 %v1798_v3  ;;  %2350 = vmatpush1.bf16.msra.mxu0 %v8189_v58 }
 0x21d   :  { %6894 = vtanh.f32 %v1177_v61  ;;  %v1181_v16 = vadd.f32 %v1180_v46, %v8327_v21  ;;  %2432 = vmatmul.mubr.bf16.gmra.mrb[8].mxu1 %v1797_v51  ;;  %2351 = vmatprep.subr.bf16.mxu0 %v8197_v49  ;;  %v6548_v46 = vld [vmem:[#allocation7 + $0x1a4] ss:$8 sps:$4 sm:$0xff]  }
 0x21e   :  { %v6885_v42 = vpop.eup %6884  ;;  %6896 = vtanh.f32 %v1179_v47  ;;  %1503 = vmatmul.mubr.bf16.gmra.mrb[140].mxu0 %v8067_v52  ;;  %2541 = vmatpush1.bf16.msra.mxu1 %v6528_v31 }
 0x21f   :  { %v6887_v55 = vpop.eup %6886  ;;  %6898 = vtanh.f32 %v1181_v16  ;;  %1510 = vmatprep.mubr.bf16.mxu0 %v8069_v40  ;;  %2542 = vmatprep.subr.bf16.mxu1 %v6533_v30  ;;  %v6539_v40 = vld [vmem:[#allocation7 + $0x174] ss:$8 sps:$4 sm:$0xff]   ;;  %v6543_v30 = vld [vmem:[#allocation7 + $0x190] ss:$8 sps:$4 sm:$0xff]  }
 0x220   :  { %v6889_v4 = vpop.eup %6888  ;;  %2352 = vmatpush1.bf16.msra.mxu0 %v8199_v11 }
 0x221   :  { %v6891_v58 = vpop.eup %6890  ;;  %v1184_v38 = vpop.f32.mrb[36].mxu0  ;;  %v1802_v20 = vpack.c.bf16 %v6889_v4, %v6885_v42  ;;  %2353 = vmatprep.subr.bf16.mxu0 %v8209_v44  ;;  %v6546_v4 = vld [vmem:[#allocation7 + $0x1a0] ss:$8 sps:$4 sm:$0xff]  }
 0x222   :  { %v1185_v49 = vadd.f32 %v1184_v38, %v8322_v7  ;;  %v1186_v50 = vpop.f32.mrb[37].mxu0  ;;  %v1803_v52 = vpack.c.bf16 %v6891_v58, %v6887_v55  ;;  %2543 = vmatpush1.bf16.msra.mxu1 %v6531_v45  ;;  %v9353_v55 = vld [vmem:[#allocation22_spill] sm:$0xff] }
 0x223   :  { %v1187_v53 = vadd.f32 %v1186_v50, %v8327_v21  ;;  %v1188_v1 = vpop.f32.mrb[38].mxu0  ;;  %2544 = vmatprep.subr.bf16.mxu1 %v6536_v19 }
 0x224   :  { %6900 = vtanh.f32 %v1185_v49  ;;  %v1189_v18 = vadd.f32 %v1188_v1, %v8322_v7  ;;  %v1190_v11 = vpop.f32.mrb[39].mxu0  ;;  %2441 = vmatprep.mubr.bf16.mxu1 %v1803_v52  ;;  %2354 = vmatpush1.bf16.msra.mxu0 %v8211_v10  ;;  %v9354_v49 = vld [vmem:[#allocation29_spill] sm:$0xff]  ;;  %v9355_v52 = vld [vmem:[#allocation27_spill] sm:$0xff] }
 0x225   :  { %6902 = vtanh.f32 %v1187_v53  ;;  %v1191_v44 = vadd.f32 %v1190_v11, %v8327_v21  ;;  %2442 = vmatmul.mubr.bf16.gmra.mrb[12].mxu1 %v1802_v20  ;;  %2355 = vmatprep.subr.bf16.mxu0 %v8219_v57  ;;  %v6549_v53 = vld [vmem:[#allocation7 + $0x1b0] ss:$8 sps:$4 sm:$0xff]   ;;  %v9356_v11 = vld [vmem:[#allocation28_spill] sm:$0xff] }
 0x226   :  { %v6893_v14 = vpop.eup %6892  ;;  %6904 = vtanh.f32 %v1189_v18  ;;  %1511 = vmatmul.mubr.bf16.gmra.mrb[144].mxu0 %v8077_v8  ;;  %2545 = vmatpush1.bf16.msra.mxu1 %v6534_v29 }
 0x227   :  { %v6895_v63 = vpop.eup %6894  ;;  %6906 = vtanh.f32 %v1191_v44  ;;  %1518 = vmatprep.mubr.bf16.mxu0 %v8079_v54  ;;  %2546 = vmatprep.subr.bf16.mxu1 %v6539_v40  ;;  %v6545_v54 = vld [vmem:[#allocation7 + $0x194] ss:$8 sps:$4 sm:$0xff]   ;;  %v6554_v40 = vld [vmem:[#allocation7 + $0x1c4] ss:$8 sps:$4 sm:$0xff]  }
 0x228   :  { %v6897_v36 = vpop.eup %6896  ;;  %2356 = vmatpush1.bf16.msra.mxu0 %v8221_v37 }
 0x229   :  { %v6899_v10 = vpop.eup %6898  ;;  %v1194_v25 = vpop.f32.mrb[40].mxu0  ;;  %v1807_v51 = vpack.c.bf16 %v6897_v36, %v6893_v14  ;;  %2357 = vmatprep.subr.bf16.mxu0 %v8231_v26 }
 0x22a   :  { %v1195_v57 = vadd.f32 %v1194_v25, %v8322_v7  ;;  %v1196_v27 = vpop.f32.mrb[41].mxu0  ;;  %v1808_v8 = vpack.c.bf16 %v6899_v10, %v6895_v63  ;;  %2547 = vmatpush1.bf16.msra.mxu1 %v6537_v6  ;;  %v9357_v63 = vld [vmem:[#allocation26_spill] sm:$0xff]  ;;  %v6552_v10 = vld [vmem:[#allocation7 + $0x1c0] ss:$8 sps:$4 sm:$0xff]  }
 0x22b   :  { %v1197_v3 = vadd.f32 %v1196_v27, %v8327_v21  ;;  %v1198_v31 = vpop.f32.mrb[42].mxu0  ;;  %2548 = vmatprep.subr.bf16.mxu1 %v6542_v62 }
 0x22c   :  { %6908 = vtanh.f32 %v1195_v57  ;;  %v1199_v61 = vadd.f32 %v1198_v31, %v8322_v7  ;;  %v1200_v37 = vpop.f32.mrb[43].mxu0  ;;  %2451 = vmatprep.mubr.bf16.mxu1 %v1808_v8  ;;  %2358 = vmatpush1.bf16.msra.mxu0 %v8233_v23  ;;  %v9358_v8 = vld [vmem:[#allocation33_spill] sm:$0xff] }
 0x22d   :  { %6910 = vtanh.f32 %v1197_v3  ;;  %v1201_v26 = vadd.f32 %v1200_v37, %v8327_v21  ;;  %2452 = vmatmul.mubr.bf16.gmra.mrb[16].mxu1 %v1807_v51  ;;  %2359 = vmatprep.subr.bf16.mxu0 %v8241_v56  ;;  %v9359_v3 = vld [vmem:[#allocation31_spill] sm:$0xff] }
 0x22e   :  { %v6901_v35 = vpop.eup %6900  ;;  %6912 = vtanh.f32 %v1199_v61  ;;  %1519 = vmatmul.mubr.bf16.gmra.mrb[148].mxu0 %v8087_v22  ;;  %2549 = vmatpush1.bf16.msra.mxu1 %v6540_v15  ;;  %v6560_v37 = vld [vmem:[#allocation7 + $0x1e4] ss:$8 sps:$4 sm:$0xff]  }
 0x22f   :  { %v6903_v47 = vpop.eup %6902  ;;  %6914 = vtanh.f32 %v1201_v26  ;;  %1526 = vmatprep.mubr.bf16.mxu0 %v8089_v0  ;;  %2550 = vmatprep.subr.bf16.mxu1 %v6545_v54  ;;  %v6551_v0 = vld [vmem:[#allocation7 + $0x1b4] ss:$8 sps:$4 sm:$0xff]   ;;  %v6555_v54 = vld [vmem:[#allocation7 + $0x1d0] ss:$8 sps:$4 sm:$0xff]  }
 0x230   :  { %v6905_v16 = vpop.eup %6904  ;;  %2360 = vmatpush1.bf16.msra.mxu0 %v8243_v59 }
 0x231   :  { %v6907_v23 = vpop.eup %6906  ;;  %v1204_v42 = vpop.f32.mrb[44].mxu0  ;;  %v1812_v45 = vpack.c.bf16 %v6905_v16, %v6901_v35  ;;  %2361 = vmatprep.subr.bf16.mxu0 %v9353_v55  ;;  %v9360_v35 = vld [vmem:[#allocation32_spill] sm:$0xff]  ;;  %v9361_v16 = vld [vmem:[#allocation30_spill] sm:$0xff] }
 0x232   :  { %v1205_v56 = vadd.f32 %v1204_v42, %v8322_v7  ;;  %v1206_v19 = vpop.f32.mrb[45].mxu0  ;;  %v1813_v22 = vpack.c.bf16 %v6907_v23, %v6903_v47  ;;  %2551 = vmatpush1.bf16.msra.mxu1 %v6543_v30 }
 0x233   :  { %v1207_v58 = vadd.f32 %v1206_v19, %v8327_v21  ;;  %v1208_v38 = vpop.f32.mrb[46].mxu0  ;;  %2552 = vmatprep.subr.bf16.mxu1 %v6548_v46 }
 0x234   :  { %6916 = vtanh.f32 %v1205_v56  ;;  %v1209_v20 = vadd.f32 %v1208_v38, %v8322_v7  ;;  %v1210_v59 = vpop.f32.mrb[47].mxu0  ;;  %2461 = vmatprep.mubr.bf16.mxu1 %v1813_v22  ;;  %2362 = vmatpush1.bf16.msra.mxu0 %v9354_v49 }
 0x235   :  { %6918 = vtanh.f32 %v1207_v58  ;;  %v1211_v50 = vadd.f32 %v1210_v59, %v8327_v21  ;;  %2462 = vmatmul.mubr.bf16.gmra.mrb[20].mxu1 %v1812_v45  ;;  %2363 = vmatprep.subr.bf16.mxu0 %v9355_v52  ;;  %v6558_v45 = vld [vmem:[#allocation7 + $0x1e0] ss:$8 sps:$4 sm:$0xff]   ;;  %v6566_v59 = vld [vmem:[#allocation7 + $0x204] ss:$8 sps:$4 sm:$0xff]  }
 0x236   :  { %v6909_v29 = vpop.eup %6908  ;;  %6920 = vtanh.f32 %v1209_v20  ;;  %1527 = vmatmul.mubr.bf16.gmra.mrb[152].mxu0 %v8097_v34  ;;  %2553 = vmatpush1.bf16.msra.mxu1 %v6546_v4  ;;  %v9362_v4 = vld [vmem:[#allocation37_spill] sm:$0xff] }
 0x237   :  { %v6911_v1 = vpop.eup %6910  ;;  %6922 = vtanh.f32 %v1211_v50  ;;  %1534 = vmatprep.mubr.bf16.mxu0 %v8099_v28  ;;  %2554 = vmatprep.subr.bf16.mxu1 %v6551_v0  ;;  %v6557_v28 = vld [vmem:[#allocation7 + $0x1d4] ss:$8 sps:$4 sm:$0xff]   ;;  %v6561_v0 = vld [vmem:[#allocation7 + $0x1f0] ss:$8 sps:$4 sm:$0xff]  }
 0x238   :  { %v6913_v18 = vpop.eup %6912  ;;  %2364 = vmatpush1.bf16.msra.mxu0 %v9356_v11 }
 0x239   :  { %v6915_v44 = vpop.eup %6914  ;;  %v1214_v14 = vpop.f32.mrb[48].mxu0  ;;  %v1817_v6 = vpack.c.bf16 %v6913_v18, %v6909_v29  ;;  %2365 = vmatprep.subr.bf16.mxu0 %v9357_v63 }
 0x23a   :  { %v1215_v62 = vadd.f32 %v1214_v14, %v8322_v7  ;;  %v1216_v36 = vpop.f32.mrb[49].mxu0  ;;  %v1818_v34 = vpack.c.bf16 %v6915_v44, %v6911_v1  ;;  %2555 = vmatpush1.bf16.msra.mxu1 %v6549_v53 }
 0x23b   :  { %v1217_v25 = vadd.f32 %v1216_v36, %v8327_v21  ;;  %v1218_v51 = vpop.f32.mrb[50].mxu0  ;;  %2556 = vmatprep.subr.bf16.mxu1 %v6554_v40 }
 0x23c   :  { %6924 = vtanh.f32 %v1215_v62  ;;  %v1219_v57 = vadd.f32 %v1218_v51, %v8322_v7  ;;  %v1220_v27 = vpop.f32.mrb[51].mxu0  ;;  %2471 = vmatprep.mubr.bf16.mxu1 %v1818_v34  ;;  %2366 = vmatpush1.bf16.msra.mxu0 %v9358_v8 }
 0x23d   :  { %6926 = vtanh.f32 %v1217_v25  ;;  %v1221_v15 = vadd.f32 %v1220_v27, %v8327_v21  ;;  %2472 = vmatmul.mubr.bf16.gmra.mrb[24].mxu1 %v1817_v6  ;;  %2367 = vmatprep.subr.bf16.mxu0 %v9359_v3 }
 0x23e   :  { %v6917_v31 = vpop.eup %6916  ;;  %6928 = vtanh.f32 %v1219_v57  ;;  %1535 = vmatmul.mubr.bf16.gmra.mrb[156].mxu0 %v8107_v41  ;;  %2557 = vmatpush1.bf16.msra.mxu1 %v6552_v10 }
 0x23f   :  { %v6919_v61 = vpop.eup %6918  ;;  %6930 = vtanh.f32 %v1221_v15  ;;  %1542 = vmatprep.mubr.bf16.mxu0 %v8109_v48  ;;  %2558 = vmatprep.subr.bf16.mxu1 %v6557_v28  ;;  %v6563_v48 = vld [vmem:[#allocation7 + $0x1f4] ss:$8 sps:$4 sm:$0xff]   ;;  %v9363_v28 = vld [vmem:[#allocation35_spill] sm:$0xff] }
 0x240   :  { %v6921_v26 = vpop.eup %6920  ;;  %2368 = vmatpush1.bf16.msra.mxu0 %v9360_v35  ;;  %v629_v57 = vsub.s32 2, %v9363_v28  ;;  %v633_v15 = vsub.s32 3, %v9363_v28  ;;  %v9366_v35 = vld [vmem:[#allocation21_spill] sm:$0xff] }
 0x241   :  { %v6923_v30 = vpop.eup %6922  ;;  %v1224_v47 = vpop.f32.mrb[52].mxu0  ;;  %v1822_v46 = vpack.c.bf16 %v6921_v26, %v6917_v31  ;;  %2369 = vmatprep.subr.bf16.mxu0 %v9361_v16 }
 0x242   :  { %v1225_v23 = vadd.f32 %v1224_v47, %v8322_v7  ;;  %v1226_v42 = vpop.f32.mrb[53].mxu0  ;;  %v1823_v41 = vpack.c.bf16 %v6923_v30, %v6919_v61  ;;  %2559 = vmatpush1.bf16.msra.mxu1 %v6555_v54  ;;  %v9364_v54 = vld [vmem:[#allocation20_spill] sm:$0xff]  ;;  %v9365_v61 = vld [vmem:[#allocation34_spill] sm:$0xff] }
 0x243   :  { %v1227_v55 = vadd.f32 %v1226_v42, %v8327_v21  ;;  %v1228_v56 = vpop.f32.mrb[54].mxu0  ;;  %2560 = vmatprep.subr.bf16.mxu1 %v6560_v37  ;;  %v8508_v37 = vrot.slane %v9365_v61, %v629_v57 }
 0x244   :  { %6932 = vtanh.f32 %v1225_v23  ;;  %v1229_v19 = vadd.f32 %v1228_v56, %v8322_v7  ;;  %v1230_v22 = vpop.f32.mrb[55].mxu0  ;;  %2481 = vmatprep.mubr.bf16.mxu1 %v1823_v41  ;;  %2370 = vmatpush1.bf16.msra.mxu0 %v9362_v4 }
 0x245   :  { %6934 = vtanh.f32 %v1227_v55  ;;  %v1231_v58 = vadd.f32 %v1230_v22, %v8327_v21  ;;  %2482 = vmatmul.mubr.bf16.gmra.mrb[28].mxu1 %v1822_v46  ;;  %v9367_v22 = vld [vmem:[#allocation19_spill] sm:$0xff] }
 0x246   :  { %v6925_v38 = vpop.eup %6924  ;;  %6936 = vtanh.f32 %v1229_v19  ;;  %1543 = vmatmul.mubr.bf16.gmra.mrb[160].mxu0 %v8117_v17  ;;  %2561 = vmatpush1.bf16.msra.mxu1 %v6558_v45 }
 0x247   :  { %v6927_v20 = vpop.eup %6926  ;;  %6938 = vtanh.f32 %v1231_v58  ;;  %1550 = vmatprep.mubr.bf16.mxu0 %v8119_v2  ;;  %2562 = vmatprep.subr.bf16.mxu1 %v6563_v48  ;;  %v9368_v58 = vld [vmem:[#allocation25_spill] sm:$0xff] }
 0x248   :  { %v6929_v49 = vpop.eup %6928 }
 0x249   :  { %v6931_v50 = vpop.eup %6930  ;;  %v1234_v52 = vpop.f32.mrb[56].mxu0  ;;  %v1827_v29 = vpack.c.bf16 %v6929_v49, %v6925_v38 }
 0x24a   :  { %v1235_v53 = vadd.f32 %v1234_v52, %v8322_v7  ;;  %v1236_v1 = vpop.f32.mrb[57].mxu0  ;;  %v1828_v40 = vpack.c.bf16 %v6931_v50, %v6927_v20  ;;  %2563 = vmatpush1.bf16.msra.mxu1 %v6561_v0 }
 0x24b   :  { %v1237_v18 = vadd.f32 %v1236_v1, %v8327_v21  ;;  %v1238_v17 = vpop.f32.mrb[58].mxu0  ;;  %2725 = vmatprep.subr.bf16.mxu1 %v6566_v59 }
 0x24c   :  { %6940 = vtanh.f32 %v1235_v53  ;;  %v1239_v11 = vadd.f32 %v1238_v17, %v8322_v7  ;;  %v1240_v44 = vpop.f32.mrb[59].mxu0  ;;  %2491 = vmatprep.mubr.bf16.mxu1 %v1828_v40 }
 0x24d   :  { %6942 = vtanh.f32 %v1237_v18  ;;  %v1241_v2 = vadd.f32 %v1240_v44, %v8327_v21  ;;  %2492 = vmatmul.mubr.bf16.gmra.mrb[32].mxu1 %v1827_v29 }
 0x24e   :  { %v6933_v14 = vpop.eup %6932  ;;  %6944 = vtanh.f32 %v1239_v11  ;;  %1551 = vmatmul.mubr.bf16.gmra.mrb[164].mxu0 %v8130_v39  ;;  %v9369_v11 = vld [vmem:[#allocation23_spill] sm:$0xff] }
 0x24f   :  { %v6935_v6 = vpop.eup %6934  ;;  %6946 = vtanh.f32 %v1241_v2  ;;  %1558 = vmatprep.mubr.bf16.mxu0 %v8132_v9  ;;  %v9370_v2 = vld [vmem:[#allocation24_spill] sm:$0xff] }
 0x250   :  { %v6937_v63 = vpop.eup %6936 }
 0x251   :  { %v6939_v62 = vpop.eup %6938  ;;  %v1244_v36 = vpop.f32.mrb[60].mxu0  ;;  %v1832_v34 = vpack.c.bf16 %v6937_v63, %v6933_v14 }
 0x252   :  { %v1245_v10 = vadd.f32 %v1244_v36, %v8322_v7  ;;  %v1246_v25 = vpop.f32.mrb[61].mxu0  ;;  %v1833_v51 = vpack.c.bf16 %v6939_v62, %v6935_v6 }
 0x253   :  { %v1247_v27 = vadd.f32 %v1246_v25, %v8327_v21  ;;  %v1248_v8 = vpop.f32.mrb[62].mxu0  ;;  %v6564_v25 = vld [vmem:[#allocation7 + $0x200] ss:$8 sps:$4 sm:$0xff]  }
 0x254   :  { %6948 = vtanh.f32 %v1245_v10  ;;  %v1249_v39 = vadd.f32 %v1248_v8, %v8322_v7  ;;  %v1250_v3 = vpop.f32.mrb[63].mxu0  ;;  %2501 = vmatprep.mubr.bf16.mxu1 %v1833_v51  ;;  %v8514_v7 = vrot.slane %v9365_v61, %v633_v15  ;;  %v6569_v8 = vld [vmem:[#allocation7 + $0x214] ss:$8 sps:$4 sm:$0xff]  }
 0x255   :  { %6950 = vtanh.f32 %v1247_v27  ;;  %v1251_v9 = vadd.f32 %v1250_v3, %v8327_v21  ;;  %2502 = vmatmul.mubr.bf16.gmra.mrb[36].mxu1 %v1832_v34 }
 0x256   :  { %v6941_v31 = vpop.eup %6940  ;;  %6952 = vtanh.f32 %v1249_v39  ;;  %1559 = vmatmul.mubr.bf16.gmra.mrb[168].mxu0 %v9364_v54  ;;  %v6567_v54 = vld [vmem:[#allocation7 + $0x210] ss:$8 sps:$4 sm:$0xff]  }
 0x257   :  { %v6943_v26 = vpop.eup %6942  ;;  %6954 = vtanh.f32 %v1251_v9  ;;  %1566 = vmatprep.mubr.bf16.mxu0 %v9366_v35 }
 0x258   :  { %v6945_v21 = vpop.eup %6944 }
 0x259   :  { %v6947_v30 = vpop.eup %6946  ;;  %v1287_v47 = vpop.f32.mrb[64].mxu0  ;;  %v1837_v46 = vpack.c.bf16 %v6945_v21, %v6941_v31 }
 0x25a   :  { %v1288_v16 = vadd.f32 %v1287_v47, %v8508_v37  ;;  %v1289_v23 = vpop.f32.mrb[65].mxu0  ;;  %v1838_v42 = vpack.c.bf16 %v6947_v30, %v6943_v26  ;;  %v6572_v26 = vld [vmem:[#allocation7 + $0x224] ss:$8 sps:$4 sm:$0xff]  }
 0x25b   :  { %v1290_v41 = vadd.f32 %v1289_v23, %v8514_v7  ;;  %v1291_v45 = vpop.f32.mrb[66].mxu0 }
 0x25c   :  { %6956 = vtanh.f32 %v1288_v16  ;;  %v1292_v55 = vadd.f32 %v1291_v45, %v8508_v37  ;;  %v1293_v56 = vpop.f32.mrb[67].mxu0  ;;  %2511 = vmatprep.mubr.bf16.mxu1 %v1838_v42  ;;  %v6570_v42 = vld [vmem:[#allocation7 + $0x220] ss:$8 sps:$4 sm:$0xff]   ;;  %v6575_v45 = vld [vmem:[#allocation7 + $0x234] ss:$8 sps:$4 sm:$0xff]  }
 0x25d   :  { %6958 = vtanh.f32 %v1290_v41  ;;  %v1294_v48 = vadd.f32 %v1293_v56, %v8514_v7  ;;  %2512 = vmatmul.mubr.bf16.gmra.mrb[40].mxu1 %v1837_v46 }
 0x25e   :  { %v6949_v19 = vpop.eup %6948  ;;  %6960 = vtanh.f32 %v1292_v55  ;;  %1567 = vmatmul.mubr.bf16.gmra.mrb[172].mxu0 %v9367_v22 }
 0x25f   :  { %v6951_v4 = vpop.eup %6950  ;;  %6962 = vtanh.f32 %v1294_v48  ;;  %1574 = vmatprep.mubr.bf16.mxu0 %v9368_v58 }
 0x260   :  { %v6953_v38 = vpop.eup %6952 }
 0x261   :  { %v6955_v0 = vpop.eup %6954  ;;  %v1297_v20 = vpop.f32.mrb[68].mxu0  ;;  %v1842_v59 = vpack.c.bf16 %v6953_v38, %v6949_v19  ;;  %v6573_v19 = vld [vmem:[#allocation7 + $0x230] ss:$8 sps:$4 sm:$0xff]  }
 0x262   :  { %v1298_v49 = vadd.f32 %v1297_v20, %v8508_v37  ;;  %v1299_v50 = vpop.f32.mrb[69].mxu0  ;;  %v1843_v52 = vpack.c.bf16 %v6955_v0, %v6951_v4  ;;  %v6578_v4 = vld [vmem:[#allocation7 + $0x244] ss:$8 sps:$4 sm:$0xff]  }
 0x263   :  { %v1300_v29 = vadd.f32 %v1299_v50, %v8514_v7  ;;  %v1301_v53 = vpop.f32.mrb[70].mxu0 }
 0x264   :  { %6964 = vtanh.f32 %v1298_v49  ;;  %v1302_v1 = vadd.f32 %v1301_v53, %v8508_v37  ;;  %v1303_v40 = vpop.f32.mrb[71].mxu0  ;;  %2521 = vmatprep.mubr.bf16.mxu1 %v1843_v52  ;;  %v6576_v52 = vld [vmem:[#allocation7 + $0x240] ss:$8 sps:$4 sm:$0xff]   ;;  %v6581_v53 = vld [vmem:[#allocation7 + $0x254] ss:$8 sps:$4 sm:$0xff]  }
 0x265   :  { %6966 = vtanh.f32 %v1300_v29  ;;  %v1304_v18 = vadd.f32 %v1303_v40, %v8514_v7  ;;  %2522 = vmatmul.mubr.bf16.gmra.mrb[44].mxu1 %v1842_v59 }
 0x266   :  { %v6957_v17 = vpop.eup %6956  ;;  %6968 = vtanh.f32 %v1302_v1  ;;  %1575 = vmatmul.mubr.bf16.gmra.mrb[176].mxu0 %v9369_v11 }
 0x267   :  { %v6959_v44 = vpop.eup %6958  ;;  %6970 = vtanh.f32 %v1304_v18  ;;  %1582 = vmatprep.mubr.bf16.mxu0 %v9370_v2  ;;  %v9372_v2 = vld [vmem:[#allocation40_spill] sm:$0xff] }
 0x268   :  { %v6961_v14 = vpop.eup %6960 }
 0x269   :  { %v6963_v6 = vpop.eup %6962  ;;  %v1307_v63 = vpop.f32.mrb[72].mxu0  ;;  %v1769_v62 = vpack.c.bf16 %v6961_v14, %v6957_v17  ;;  %v6579_v17 = vld [vmem:[#allocation7 + $0x250] ss:$8 sps:$4 sm:$0xff]  }
 0x26a   :  { %v1308_v36 = vadd.f32 %v1307_v63, %v8508_v37  ;;  %v1309_v34 = vpop.f32.mrb[73].mxu0  ;;  %v1770_v10 = vpack.c.bf16 %v6963_v6, %v6959_v44  ;;  %v9371_v44 = vld [vmem:[#allocation42_spill] sm:$0xff]  ;;  %v6584_v6 = vld [vmem:[#allocation7 + $0x264] ss:$8 sps:$4 sm:$0xff]  }
 0x26b   :  { %v1310_v51 = vadd.f32 %v1309_v34, %v8514_v7  ;;  %v1311_v27 = vpop.f32.mrb[74].mxu0  ;;  %v9373_v14 = vpack.c.bf16 %v9371_v44, %v9372_v2 }
 0x26c   :  { %6972 = vtanh.f32 %v1308_v36  ;;  %v1312_v39 = vadd.f32 %v1311_v27, %v8508_v37  ;;  %v1313_v3 = vpop.f32.mrb[75].mxu0  ;;  %2564 = vmatprep.mubr.bf16.mxu1 %v1770_v10 }
 0x26d   :  { %6974 = vtanh.f32 %v1310_v51  ;;  %v1314_v9 = vadd.f32 %v1313_v3, %v8514_v7  ;;  %2565 = vmatmul.mubr.bf16.vlgmr.msra.gmra.mrb[48].mxu1 %v1769_v62 }
 0x26e   :  { %v6965_v31 = vpop.eup %6964  ;;  %6976 = vtanh.f32 %v1312_v39  ;;  %1583 = vmatmul.mubr.bf16.gmra.mrb[180].mxu0 %v8214_v33  ;;  %2726 = vmatpush1.bf16.msra.mxu1 %v6564_v25  ;;  %v6587_v39 = vld [vmem:[#allocation7 + $0x274] ss:$8 sps:$4 sm:$0xff]  }
 0x26f   :  { %v6967_v61 = vpop.eup %6966  ;;  %6978 = vtanh.f32 %v1314_v9  ;;  %1590 = vmatprep.mubr.bf16.mxu0 %v8217_v32  ;;  %2727 = vmatprep.subr.bf16.mxu1 %v6569_v8 }
 0x270   :  { %v6969_v35 = vpop.eup %6968 }
 0x271   :  { %v6971_v21 = vpop.eup %6970  ;;  %v1317_v30 = vpop.f32.mrb[76].mxu0  ;;  %v1774_v47 = vpack.c.bf16 %v6969_v35, %v6965_v31 }
 0x272   :  { %v1318_v46 = vadd.f32 %v1317_v30, %v8508_v37  ;;  %v1319_v16 = vpop.f32.mrb[77].mxu0  ;;  %v1775_v23 = vpack.c.bf16 %v6971_v21, %v6967_v61  ;;  %2728 = vmatpush1.bf16.msra.mxu1 %v6567_v54  ;;  %v9374_v61 = vld [vmem:[#allocation41_spill] sm:$0xff] }
 0x273   :  { %v1320_v33 = vadd.f32 %v1319_v16, %v8514_v7  ;;  %v1321_v41 = vpop.f32.mrb[78].mxu0  ;;  %2729 = vmatprep.subr.bf16.mxu1 %v6572_v26  ;;  %v9375_v26 = vld [vmem:[#allocation39_spill] sm:$0xff]  ;;  %v6585_v21 = vld [vmem:[#allocation7 + $0x270] ss:$8 sps:$4 sm:$0xff]  }
 0x274   :  { %6980 = vtanh.f32 %v1318_v46  ;;  %v1322_v32 = vadd.f32 %v1321_v41, %v8508_v37  ;;  %v1323_v55 = vpop.f32.mrb[79].mxu0  ;;  %2574 = vmatprep.mubr.bf16.mxu1 %v1775_v23  ;;  %v9376_v35 = vpack.c.bf16 %v9374_v61, %v9375_v26  ;;  %v9378_v46 = vld [vmem:[#allocation44_spill] sm:$0xff]  ;;  %v9390_v61 = vld [vmem:[#allocation50_spill] sm:$0xff] }
 0x275   :  { %6982 = vtanh.f32 %v1320_v33  ;;  %v1324_v56 = vadd.f32 %v1323_v55, %v8514_v7  ;;  %2575 = vmatmul.mubr.bf16.gmra.mrb[52].mxu1 %v1774_v47  ;;  %v9377_v47 = vld [vmem:[#allocation46_spill] sm:$0xff] }
 0x276   :  { %v6973_v48 = vpop.eup %6972  ;;  %6984 = vtanh.f32 %v1322_v32  ;;  %1591 = vmatmul.mubr.bf16.gmra.mrb[184].mxu0 %v8236_v60  ;;  %2730 = vmatpush1.bf16.msra.mxu1 %v6570_v42  ;;  %v9379_v16 = vpack.c.bf16 %v9377_v47, %v9378_v46 }
 0x277   :  { %v6975_v22 = vpop.eup %6974  ;;  %6986 = vtanh.f32 %v1324_v56  ;;  %1598 = vmatprep.mubr.bf16.mxu0 %v8239_v24  ;;  %2731 = vmatprep.subr.bf16.mxu1 %v6575_v45 }
 0x278   :  { %v6977_v58 = vpop.eup %6976 }
 0x279   :  { %v6979_v38 = vpop.eup %6978  ;;  %v1327_v0 = vpop.f32.mrb[80].mxu0  ;;  %v1779_v20 = vpack.c.bf16 %v6977_v58, %v6973_v48 }
 0x27a   :  { %v1328_v59 = vadd.f32 %v1327_v0, %v8508_v37  ;;  %v1329_v49 = vpop.f32.mrb[81].mxu0  ;;  %v1780_v50 = vpack.c.bf16 %v6979_v38, %v6975_v22  ;;  %2732 = vmatpush1.bf16.msra.mxu1 %v6573_v19  ;;  %v9380_v38 = vld [vmem:[#allocation45_spill] sm:$0xff]  ;;  %v9381_v0 = vld [vmem:[#allocation43_spill] sm:$0xff] }
 0x27b   :  { %v1330_v60 = vadd.f32 %v1329_v49, %v8514_v7  ;;  %v1331_v29 = vpop.f32.mrb[82].mxu0  ;;  %2733 = vmatprep.subr.bf16.mxu1 %v6578_v4  ;;  %v9383_v49 = vld [vmem:[#allocation48_spill] sm:$0xff] }
 0x27c   :  { %6988 = vtanh.f32 %v1328_v59  ;;  %v1332_v24 = vadd.f32 %v1331_v29, %v8508_v37  ;;  %v1333_v1 = vpop.f32.mrb[83].mxu0  ;;  %2584 = vmatprep.mubr.bf16.mxu1 %v1780_v50  ;;  %v9384_v50 = vpack.c.bf16 %v8383_v12, %v9383_v49 }
 0x27d   :  { %6990 = vtanh.f32 %v1330_v60  ;;  %v1334_v40 = vadd.f32 %v1333_v1, %v8514_v7  ;;  %2585 = vmatmul.mubr.bf16.gmra.mrb[56].mxu1 %v1779_v20  ;;  %v9382_v20 = vpack.c.bf16 %v9380_v38, %v9381_v0 }
 0x27e   :  { %v6981_v18 = vpop.eup %6980  ;;  %6992 = vtanh.f32 %v1332_v24  ;;  %1599 = vmatmul.mubr.bf16.gmra.mrb[188].mxu0 %v8256_v13  ;;  %2734 = vmatpush1.bf16.msra.mxu1 %v6576_v52  ;;  %v6582_v13 = vld [vmem:[#allocation7 + $0x260] ss:$8 sps:$4 sm:$0xff]  }
 0x27f   :  { %v6983_v11 = vpop.eup %6982  ;;  %6994 = vtanh.f32 %v1334_v40  ;;  %2371 = vmatprep.mubr.bf16.mxu0 %v9373_v14  ;;  %2735 = vmatprep.subr.bf16.mxu1 %v6581_v53  ;;  %v9385_v14 = vld [vmem:[#allocation49_spill] sm:$0xff] }
 0x280   :  { %v6985_v63 = vpop.eup %6984 }
 0x281   :  { %v6987_v62 = vpop.eup %6986  ;;  %v1337_v36 = vpop.f32.mrb[84].mxu0  ;;  %v1784_v34 = vpack.c.bf16 %v6985_v63, %v6981_v18 }
 0x282   :  { %v1338_v10 = vadd.f32 %v1337_v36, %v8508_v37  ;;  %v1339_v25 = vpop.f32.mrb[85].mxu0  ;;  %v1785_v51 = vpack.c.bf16 %v6987_v62, %v6983_v11  ;;  %2736 = vmatpush1.bf16.msra.mxu1 %v6579_v17  ;;  %v9388_v36 = vpack.c.bf16 %v8401_v43, %v8396_v5 }
 0x283   :  { %v1340_v27 = vadd.f32 %v1339_v25, %v8514_v7  ;;  %v1341_v8 = vpop.f32.mrb[86].mxu0  ;;  %2737 = vmatprep.subr.bf16.mxu1 %v6584_v6  ;;  %v9386_v6 = vld [vmem:[#allocation47_spill] sm:$0xff] }
 0x284   :  { %6996 = vtanh.f32 %v1338_v10  ;;  %v1342_v3 = vadd.f32 %v1341_v8, %v8508_v37  ;;  %v1343_v9 = vpop.f32.mrb[87].mxu0  ;;  %2594 = vmatprep.mubr.bf16.mxu1 %v1785_v51  ;;  %v9387_v63 = vpack.c.bf16 %v9385_v14, %v9386_v6 }
 0x285   :  { %6998 = vtanh.f32 %v1340_v27  ;;  %v1344_v31 = vadd.f32 %v1343_v9, %v8514_v7  ;;  %2595 = vmatmul.mubr.bf16.gmra.mrb[60].mxu1 %v1784_v34 }
 0x286   :  { %v6989_v54 = vpop.eup %6988  ;;  %7000 = vtanh.f32 %v1342_v3  ;;  %2372 = vmatmul.mubr.bf16.vlgmr.msra.gmra.mrb[192].mxu0 %v9376_v35  ;;  %2738 = vmatpush1.bf16.msra.mxu1 %v6582_v13 }
 0x287   :  { %v6991_v30 = vpop.eup %6990  ;;  %7002 = vtanh.f32 %v1344_v31  ;;  %2381 = vmatprep.mubr.bf16.mxu0 %v9379_v16  ;;  %2739 = vmatprep.subr.bf16.mxu1 %v6587_v39 }
 0x288   :  { %v6993_v23 = vpop.eup %6992 }
 0x289   :  { %v6995_v42 = vpop.eup %6994  ;;  %v1347_v33 = vpop.f32.mrb[88].mxu0  ;;  %v1789_v41 = vpack.c.bf16 %v6993_v23, %v6989_v54  ;;  %v9389_v54 = vld [vmem:[#allocation51_spill] sm:$0xff] }
 0x28a   :  { %v1348_v45 = vadd.f32 %v1347_v33, %v8508_v37  ;;  %v1349_v32 = vpop.f32.mrb[89].mxu0  ;;  %v1790_v55 = vpack.c.bf16 %v6995_v42, %v6991_v30  ;;  %2740 = vmatpush1.bf16.msra.mxu1 %v6585_v21  ;;  %v9391_v26 = vpack.c.bf16 %v9389_v54, %v9390_v61  ;;  %v7643_v21 = vmov 0  }
 0x28b   :  { %v1350_v56 = vadd.f32 %v1349_v32, %v8514_v7  ;;  %v1351_v48 = vpop.f32.mrb[90].mxu0 }
 0x28c   :  { %7004 = vtanh.f32 %v1348_v45  ;;  %v1352_v19 = vadd.f32 %v1351_v48, %v8508_v37  ;;  %v1353_v22 = vpop.f32.mrb[91].mxu0  ;;  %2604 = vmatprep.mubr.bf16.mxu1 %v1790_v55 }
 0x28d   :  { %7006 = vtanh.f32 %v1350_v56  ;;  %v1354_v4 = vadd.f32 %v1353_v22, %v8514_v7  ;;  %2605 = vmatmul.mubr.bf16.gmra.mrb[0].mxu1 %v1789_v41 }
 0x28e   :  { %v6997_v58 = vpop.eup %6996  ;;  %7008 = vtanh.f32 %v1352_v19  ;;  %2382 = vmatmul.mubr.bf16.gmra.mrb[196].mxu0 %v9382_v20 }
 0x28f   :  { %v6999_v59 = vpop.eup %6998  ;;  %7010 = vtanh.f32 %v1354_v4  ;;  %2391 = vmatprep.mubr.bf16.mxu0 %v9384_v50 }
 0x290   :  { %v7001_v52 = vpop.eup %7000 }
 0x291   :  { %v7003_v60 = vpop.eup %7002  ;;  %v1357_v29 = vpop.f32.mrb[92].mxu0  ;;  %v1794_v53 = vpack.c.bf16 %v7001_v52, %v6997_v58 }
 0x292   :  { %v1358_v24 = vadd.f32 %v1357_v29, %v8508_v37  ;;  %v1359_v1 = vpop.f32.mrb[93].mxu0  ;;  %v1795_v40 = vpack.c.bf16 %v7003_v60, %v6999_v59 }
 0x293   :  { %v1360_v18 = vadd.f32 %v1359_v1, %v8514_v7  ;;  %v1361_v17 = vpop.f32.mrb[94].mxu0 }
 0x294   :  { %7012 = vtanh.f32 %v1358_v24  ;;  %v1362_v11 = vadd.f32 %v1361_v17, %v8508_v37  ;;  %v1363_v44 = vpop.f32.mrb[95].mxu0  ;;  %2614 = vmatprep.mubr.bf16.mxu1 %v1795_v40 }
 0x295   :  { %7014 = vtanh.f32 %v1360_v18  ;;  %v1364_v12 = vadd.f32 %v1363_v44, %v8514_v7  ;;  %2615 = vmatmul.mubr.bf16.gmra.mrb[4].mxu1 %v1794_v53 }
 0x296   :  { %v7005_v2 = vpop.eup %7004  ;;  %7016 = vtanh.f32 %v1362_v11  ;;  %2392 = vmatmul.mubr.bf16.gmra.mrb[200].mxu0 %v9387_v63 }
 0x297   :  { %v7007_v62 = vpop.eup %7006  ;;  %7018 = vtanh.f32 %v1364_v12  ;;  %2401 = vmatprep.mubr.bf16.mxu0 %v9388_v36 }
 0x298   :  { %v7009_v34 = vpop.eup %7008 }
 0x299   :  { %v7011_v10 = vpop.eup %7010  ;;  %v1367_v25 = vpop.f32.mrb[96].mxu0  ;;  %v1799_v51 = vpack.c.bf16 %v7009_v34, %v7005_v2 }
 0x29a   :  { %v1368_v13 = vadd.f32 %v1367_v25, %v8508_v37  ;;  %v1369_v27 = vpop.f32.mrb[97].mxu0  ;;  %v1800_v8 = vpack.c.bf16 %v7011_v10, %v7007_v62 }
 0x29b   :  { %v1370_v39 = vadd.f32 %v1369_v27, %v8514_v7  ;;  %v1371_v3 = vpop.f32.mrb[98].mxu0 }
 0x29c   :  { %7020 = vtanh.f32 %v1368_v13  ;;  %v1372_v9 = vadd.f32 %v1371_v3, %v8508_v37  ;;  %v1373_v31 = vpop.f32.mrb[99].mxu0  ;;  %2624 = vmatprep.mubr.bf16.mxu1 %v1800_v8 }
 0x29d   :  { %7022 = vtanh.f32 %v1370_v39  ;;  %v1374_v5 = vadd.f32 %v1373_v31, %v8514_v7  ;;  %2625 = vmatmul.mubr.bf16.gmra.mrb[8].mxu1 %v1799_v51 }
 0x29e   :  { %v7013_v43 = vpop.eup %7012  ;;  %7024 = vtanh.f32 %v1372_v9  ;;  %2402 = vmatmul.mubr.bf16.gmra.mrb[204].mxu0 %v9391_v26 }
 0x29f   :  { %v7015_v35 = vpop.eup %7014  ;;  %7026 = vtanh.f32 %v1374_v5  ;;  %3313 = vmatprep.mubr.bf16.mxu0 %v7643_v21 }
 0x2a0   :  { %v7017_v30 = vpop.eup %7016 }
 0x2a1   :  { %v7019_v47 = vpop.eup %7018  ;;  %v1377_v46 = vpop.f32.mrb[100].mxu0  ;;  %v1804_v16 = vpack.c.bf16 %v7017_v30, %v7013_v43 }
 0x2a2   :  { %v1378_v23 = vadd.f32 %v1377_v46, %v8508_v37  ;;  %v1379_v42 = vpop.f32.mrb[101].mxu0  ;;  %v1805_v33 = vpack.c.bf16 %v7019_v47, %v7015_v35 }
 0x2a3   :  { %v1380_v41 = vadd.f32 %v1379_v42, %v8514_v7  ;;  %v1381_v45 = vpop.f32.mrb[102].mxu0 }
 0x2a4   :  { %7028 = vtanh.f32 %v1378_v23  ;;  %v1382_v32 = vadd.f32 %v1381_v45, %v8508_v37  ;;  %v1383_v55 = vpop.f32.mrb[103].mxu0  ;;  %2634 = vmatprep.mubr.bf16.mxu1 %v1805_v33 }
 0x2a5   :  { %7030 = vtanh.f32 %v1380_v41  ;;  %v1384_v56 = vadd.f32 %v1383_v55, %v8514_v7  ;;  %2635 = vmatmul.mubr.bf16.gmra.mrb[12].mxu1 %v1804_v16 }
 0x2a6   :  { %v7021_v48 = vpop.eup %7020  ;;  %7032 = vtanh.f32 %v1382_v32 }
 0x2a7   :  { %v7023_v19 = vpop.eup %7022  ;;  %7034 = vtanh.f32 %v1384_v56 }
 0x2a8   :  { %v7025_v22 = vpop.eup %7024 }
 0x2a9   :  { %v7027_v4 = vpop.eup %7026  ;;  %v1387_v58 = vpop.f32.mrb[104].mxu0  ;;  %v1809_v38 = vpack.c.bf16 %v7025_v22, %v7021_v48 }
 0x2aa   :  { %v1388_v0 = vadd.f32 %v1387_v58, %v8508_v37  ;;  %v1389_v20 = vpop.f32.mrb[105].mxu0  ;;  %v1810_v59 = vpack.c.bf16 %v7027_v4, %v7023_v19 }
 0x2ab   :  { %v1390_v49 = vadd.f32 %v1389_v20, %v8514_v7  ;;  %v1391_v50 = vpop.f32.mrb[106].mxu0 }
 0x2ac   :  { %7036 = vtanh.f32 %v1388_v0  ;;  %v1392_v52 = vadd.f32 %v1391_v50, %v8508_v37  ;;  %v1393_v60 = vpop.f32.mrb[107].mxu0  ;;  %2644 = vmatprep.mubr.bf16.mxu1 %v1810_v59 }
 0x2ad   :  { %7038 = vtanh.f32 %v1390_v49  ;;  %v1394_v29 = vadd.f32 %v1393_v60, %v8514_v7  ;;  %2645 = vmatmul.mubr.bf16.gmra.mrb[16].mxu1 %v1809_v38 }
 0x2ae   :  { %v7029_v53 = vpop.eup %7028  ;;  %7040 = vtanh.f32 %v1392_v52 }
 0x2af   :  { %v7031_v24 = vpop.eup %7030  ;;  %7042 = vtanh.f32 %v1394_v29 }
 0x2b0   :  { %v7033_v1 = vpop.eup %7032 }
 0x2b1   :  { %v7035_v40 = vpop.eup %7034  ;;  %v1397_v18 = vpop.f32.mrb[108].mxu0  ;;  %v1814_v17 = vpack.c.bf16 %v7033_v1, %v7029_v53 }
 0x2b2   :  { %v1398_v11 = vadd.f32 %v1397_v18, %v8508_v37  ;;  %v1399_v44 = vpop.f32.mrb[109].mxu0  ;;  %v1815_v12 = vpack.c.bf16 %v7035_v40, %v7031_v24 }
 0x2b3   :  { %v1400_v2 = vadd.f32 %v1399_v44, %v8514_v7  ;;  %v1401_v14 = vpop.f32.mrb[110].mxu0 }
 0x2b4   :  { %7044 = vtanh.f32 %v1398_v11  ;;  %v1402_v6 = vadd.f32 %v1401_v14, %v8508_v37  ;;  %v1403_v63 = vpop.f32.mrb[111].mxu0  ;;  %2654 = vmatprep.mubr.bf16.mxu1 %v1815_v12 }
 0x2b5   :  { %7046 = vtanh.f32 %v1400_v2  ;;  %v1404_v62 = vadd.f32 %v1403_v63, %v8514_v7  ;;  %2655 = vmatmul.mubr.bf16.gmra.mrb[20].mxu1 %v1814_v17  ;;  %v637_v63 = vsub.s32 4, %v9363_v28 }
 0x2b6   :  { %v7037_v36 = vpop.eup %7036  ;;  %7048 = vtanh.f32 %v1402_v6 }
 0x2b7   :  { %v7039_v34 = vpop.eup %7038  ;;  %7050 = vtanh.f32 %v1404_v62 }
 0x2b8   :  { %v7041_v10 = vpop.eup %7040 }
 0x2b9   :  { %v7043_v25 = vpop.eup %7042  ;;  %v1407_v51 = vpop.f32.mrb[112].mxu0  ;;  %v1819_v13 = vpack.c.bf16 %v7041_v10, %v7037_v36 }
 0x2ba   :  { %v1408_v27 = vadd.f32 %v1407_v51, %v8508_v37  ;;  %v1409_v8 = vpop.f32.mrb[113].mxu0  ;;  %v1820_v39 = vpack.c.bf16 %v7043_v25, %v7039_v34  ;;  %v7468_v51 = vld [vmem:[%s9217_s2] sm:$0x1f] }
 0x2bb   :  { %v1410_v3 = vadd.f32 %v1409_v8, %v8514_v7  ;;  %v1411_v9 = vpop.f32.mrb[114].mxu0 }
 0x2bc   :  { %7052 = vtanh.f32 %v1408_v27  ;;  %v1412_v31 = vadd.f32 %v1411_v9, %v8508_v37  ;;  %v1413_v5 = vpop.f32.mrb[115].mxu0  ;;  %2664 = vmatprep.mubr.bf16.mxu1 %v1820_v39 }
 0x2bd   :  { %7054 = vtanh.f32 %v1410_v3  ;;  %v1414_v43 = vadd.f32 %v1413_v5, %v8514_v7  ;;  %2665 = vmatmul.mubr.bf16.gmra.mrb[24].mxu1 %v1819_v13 }
 0x2be   :  { %v7045_v54 = vpop.eup %7044  ;;  %7056 = vtanh.f32 %v1412_v31 }
 0x2bf   :  { %v7047_v61 = vpop.eup %7046  ;;  %7058 = vtanh.f32 %v1414_v43 }
 0x2c0   :  { %v7049_v26 = vpop.eup %7048 }
 0x2c1   :  { %v7051_v35 = vpop.eup %7050  ;;  %v1417_v30 = vpop.f32.mrb[116].mxu0  ;;  %v1824_v47 = vpack.c.bf16 %v7049_v26, %v7045_v54 }
 0x2c2   :  { %v1418_v46 = vadd.f32 %v1417_v30, %v8508_v37  ;;  %v1419_v16 = vpop.f32.mrb[117].mxu0  ;;  %v1825_v23 = vpack.c.bf16 %v7051_v35, %v7047_v61 }
 0x2c3   :  { %v1420_v42 = vadd.f32 %v1419_v16, %v8514_v7  ;;  %v1421_v33 = vpop.f32.mrb[118].mxu0 }
 0x2c4   :  { %7060 = vtanh.f32 %v1418_v46  ;;  %v1422_v41 = vadd.f32 %v1421_v33, %v8508_v37  ;;  %v1423_v45 = vpop.f32.mrb[119].mxu0  ;;  %2674 = vmatprep.mubr.bf16.mxu1 %v1825_v23 }
 0x2c5   :  { %7062 = vtanh.f32 %v1420_v42  ;;  %v1424_v32 = vadd.f32 %v1423_v45, %v8514_v7  ;;  %2675 = vmatmul.mubr.bf16.gmra.mrb[28].mxu1 %v1824_v47 }
 0x2c6   :  { %v7053_v55 = vpop.eup %7052  ;;  %7064 = vtanh.f32 %v1422_v41 }
 0x2c7   :  { %v7055_v56 = vpop.eup %7054  ;;  %7066 = vtanh.f32 %v1424_v32 }
 0x2c8   :  { %v7057_v48 = vpop.eup %7056 }
 0x2c9   :  { %v7059_v19 = vpop.eup %7058  ;;  %v1427_v22 = vpop.f32.mrb[120].mxu0  ;;  %v1829_v4 = vpack.c.bf16 %v7057_v48, %v7053_v55 }
 0x2ca   :  { %v1428_v58 = vadd.f32 %v1427_v22, %v8508_v37  ;;  %v1429_v38 = vpop.f32.mrb[121].mxu0  ;;  %v1830_v0 = vpack.c.bf16 %v7059_v19, %v7055_v56 }
 0x2cb   :  { %v1430_v20 = vadd.f32 %v1429_v38, %v8514_v7  ;;  %v1431_v59 = vpop.f32.mrb[122].mxu0 }
 0x2cc   :  { %7068 = vtanh.f32 %v1428_v58  ;;  %v1432_v49 = vadd.f32 %v1431_v59, %v8508_v37  ;;  %v1433_v50 = vpop.f32.mrb[123].mxu0  ;;  %2684 = vmatprep.mubr.bf16.mxu1 %v1830_v0 }
 0x2cd   :  { %7070 = vtanh.f32 %v1430_v20  ;;  %v1434_v52 = vadd.f32 %v1433_v50, %v8514_v7  ;;  %2685 = vmatmul.mubr.bf16.gmra.mrb[32].mxu1 %v1829_v4 }
 0x2ce   :  { %v7061_v60 = vpop.eup %7060  ;;  %7072 = vtanh.f32 %v1432_v49 }
 0x2cf   :  { %v7063_v29 = vpop.eup %7062  ;;  %7074 = vtanh.f32 %v1434_v52 }
 0x2d0   :  { %v7065_v53 = vpop.eup %7064 }
 0x2d1   :  { %v7067_v24 = vpop.eup %7066  ;;  %v1437_v1 = vpop.f32.mrb[124].mxu0  ;;  %v1834_v40 = vpack.c.bf16 %v7065_v53, %v7061_v60 }
 0x2d2   :  { %v1438_v18 = vadd.f32 %v1437_v1, %v8508_v37  ;;  %v1439_v17 = vpop.f32.mrb[125].mxu0  ;;  %v1835_v11 = vpack.c.bf16 %v7067_v24, %v7063_v29 }
 0x2d3   :  { %v1440_v44 = vadd.f32 %v1439_v17, %v8514_v7  ;;  %v1441_v12 = vpop.f32.mrb[126].mxu0  ;;  %v6590_v17 = vld [vmem:[#allocation8 + $0x4] ss:$20 sps:$4 sm:$0xff]  }
 0x2d4   :  { %7076 = vtanh.f32 %v1438_v18  ;;  %v1442_v2 = vadd.f32 %v1441_v12, %v8508_v37  ;;  %v1443_v14 = vpop.f32.mrb[127].mxu0  ;;  %2694 = vmatprep.mubr.bf16.mxu1 %v1835_v11  ;;  %v8620_v37 = vrot.slane %v7468_v51, %v637_v63  ;;  %v6588_v18 = vld [vmem:[#allocation8] ss:$20 sps:$4 sm:$0xff]   ;;  %3281 = vmatprep.subr.bf16.mxu0 %v6590_v17  ;;  %v6591_v12 = vld [vmem:[#allocation8 + $0x28] ss:$20 sps:$4 sm:$0xff]  }
 0x2d5   :  { %7078 = vtanh.f32 %v1440_v44  ;;  %v1444_v6 = vadd.f32 %v1443_v14, %v8514_v7  ;;  %2695 = vmatmul.mubr.bf16.gmra.mrb[36].mxu1 %v1834_v40  ;;  %v6593_v11 = vld [vmem:[#allocation8 + $0x2c] ss:$20 sps:$4 sm:$0xff]   ;;  %3282 = vmatpush1.bf16.msra.mxu0 %v6588_v18  ;;  %v6596_v14 = vld [vmem:[#allocation8 + $0x54] ss:$20 sps:$4 sm:$0xff]  }
 0x2d6   :  { %v7069_v62 = vpop.eup %7068  ;;  %7080 = vtanh.f32 %v1442_v2  ;;  %3283 = vmatprep.subr.bf16.mxu0 %v6593_v11 }
 0x2d7   :  { %v7071_v36 = vpop.eup %7070  ;;  %7082 = vtanh.f32 %v1444_v6 }
 0x2d8   :  { %v7073_v34 = vpop.eup %7072 }
 0x2d9   :  { %v7075_v10 = vpop.eup %7074  ;;  %v5758_v25 = vpop.f32.mrb[128].mxu0  ;;  %v1839_v13 = vpack.c.bf16 %v7073_v34, %v7069_v62  ;;  %3284 = vmatpush1.bf16.msra.mxu0 %v6591_v12 }
 0x2da   :  { %v5759_v7 = vpop.f32.mrb[129].mxu0  ;;  %v1840_v27 = vpack.c.bf16 %v7075_v10, %v7071_v36  ;;  %3285 = vmatprep.subr.bf16.mxu0 %v6596_v14 }
 0x2db   :  { %v5760_v8 = vadd.f32 %v5759_v7, %v5758_v25  ;;  %v5761_v39 = vpop.f32.mrb[130].mxu0 }
 0x2dc   :  { %v5762_v3 = vpop.f32.mrb[131].mxu0  ;;  %2704 = vmatprep.mubr.bf16.mxu1 %v1840_v27 }
 0x2dd   :  { %v1481_v9 = vadd.f32 %v5760_v8, %v8620_v37  ;;  %v5763_v31 = vadd.f32 %v5762_v3, %v5761_v39  ;;  %2705 = vmatmul.mubr.bf16.gmra.mrb[40].mxu1 %v1839_v13  ;;  %v6594_v13 = vld [vmem:[#allocation8 + $0x50] ss:$20 sps:$4 sm:$0xff]   ;;  %v6597_v3 = vld [vmem:[#allocation8 + $0x78] ss:$20 sps:$4 sm:$0xff]  }
 0x2de   :  { %v7077_v5 = vpop.eup %7076  ;;  %v6599_v8 = vld [vmem:[#allocation8 + $0x7c] ss:$20 sps:$4 sm:$0xff]   ;;  %3286 = vmatpush1.bf16.msra.mxu0 %v6594_v13 }
 0x2df   :  { %v7079_v43 = vpop.eup %7078  ;;  %v1484_v54 = vadd.f32 %v5763_v31, %v8620_v37  ;;  %7084 = vtanh.f32 %v1481_v9  ;;  %3287 = vmatprep.subr.bf16.mxu0 %v6599_v8  ;;  %v6602_v31 = vld [vmem:[#allocation8 + $0xa4] ss:$20 sps:$4 sm:$0xff]  }
 0x2e0   :  { %v7081_v61 = vpop.eup %7080 }
 0x2e1   :  { %v7083_v26 = vpop.eup %7082  ;;  %7086 = vtanh.f32 %v1484_v54  ;;  %v5764_v35 = vpop.f32.mrb[132].mxu0  ;;  %v1844_v30 = vpack.c.bf16 %v7081_v61, %v7077_v5 }
 0x2e2   :  { %v5765_v47 = vpop.f32.mrb[133].mxu0  ;;  %v1845_v46 = vpack.c.bf16 %v7083_v26, %v7079_v43  ;;  %3288 = vmatpush1.bf16.msra.mxu0 %v6597_v3 }
 0x2e3   :  { %v5766_v16 = vadd.f32 %v5765_v47, %v5764_v35  ;;  %v5767_v23 = vpop.f32.mrb[134].mxu0  ;;  %v6600_v47 = vld [vmem:[#allocation8 + $0xa0] ss:$20 sps:$4 sm:$0xff]   ;;  %3289 = vmatprep.subr.bf16.mxu0 %v6602_v31 }
 0x2e4   :  { %v5768_v42 = vpop.f32.mrb[135].mxu0  ;;  %2714 = vmatprep.mubr.bf16.mxu1 %v1845_v46 }
 0x2e5   :  { %v1489_v33 = vadd.f32 %v5766_v16, %v8620_v37  ;;  %v5769_v41 = vadd.f32 %v5768_v42, %v5767_v23  ;;  %2715 = vmatmul.mubr.bf16.gmra.mrb[44].mxu1 %v1844_v30  ;;  %v6605_v23 = vld [vmem:[#allocation8 + $0xcc] ss:$20 sps:$4 sm:$0xff]  }
 0x2e6   :  { %2757 = vmatprep.mubr.bf16.mxu1 %v7643_v21  ;;  %3290 = vmatpush1.bf16.msra.mxu0 %v6600_v47 }
 0x2e7   :  { %v1492_v45 = vadd.f32 %v5769_v41, %v8620_v37  ;;  %7088 = vtanh.f32 %v1489_v33  ;;  %v6603_v33 = vld [vmem:[#allocation8 + $0xc8] ss:$20 sps:$4 sm:$0xff]   ;;  %3291 = vmatprep.subr.bf16.mxu0 %v6605_v23 }
 0x2e9   :  { %7090 = vtanh.f32 %v1492_v45  ;;  %v5770_v32 = vpop.f32.mrb[136].mxu0  ;;  %v7085_v55 = vpop.eup %7084  ;;  %v6608_v45 = vld [vmem:[#allocation8 + $0xf4] ss:$20 sps:$4 sm:$0xff]  }
 0x2ea   :  { %v5771_v56 = vpop.f32.mrb[137].mxu0  ;;  %3292 = vmatpush1.bf16.msra.mxu0 %v6603_v33 }
 0x2eb   :  { %v7087_v48 = vpop.eup %7086  ;;  %v5772_v19 = vadd.f32 %v5771_v56, %v5770_v32  ;;  %v5773_v22 = vpop.f32.mrb[138].mxu0  ;;  %3293 = vmatprep.subr.bf16.mxu0 %v6608_v45 }
 0x2ec   :  { %v5774_v4 = vpop.f32.mrb[139].mxu0  ;;  %v1771_v58 = vpack.c.bf16 %v7087_v48, %v7085_v55 }
 0x2ed   :  { %v1497_v38 = vadd.f32 %v5772_v19, %v8620_v37  ;;  %v5775_v0 = vadd.f32 %v5774_v4, %v5773_v22 }
 0x2ee   :  { %2758 = vmatmul.mubr.bf16.vlgmr.msra.gmra.mrb[48].mxu1 %v1771_v58  ;;  %v6606_v58 = vld [vmem:[#allocation8 + $0xf0] ss:$20 sps:$4 sm:$0xff]  }
 0x2ef   :  { %v1500_v20 = vadd.f32 %v5775_v0, %v8620_v37  ;;  %2767 = vmatprep.mubr.bf16.mxu1 %v7643_v21  ;;  %7092 = vtanh.f32 %v1497_v38  ;;  %3294 = vmatpush1.bf16.msra.mxu0 %v6606_v58 }
 0x2f1   :  { %7094 = vtanh.f32 %v1500_v20  ;;  %v5776_v59 = vpop.f32.mrb[140].mxu0  ;;  %v7089_v49 = vpop.eup %7088 }
 0x2f2   :  { %v5777_v50 = vpop.f32.mrb[141].mxu0 }
 0x2f3   :  { %v7091_v52 = vpop.eup %7090  ;;  %v5778_v60 = vadd.f32 %v5777_v50, %v5776_v59  ;;  %v5779_v29 = vpop.f32.mrb[142].mxu0 }
 0x2f4   :  { %v5780_v53 = vpop.f32.mrb[143].mxu0  ;;  %v1776_v24 = vpack.c.bf16 %v7091_v52, %v7089_v49 }
 0x2f5   :  { %v1505_v1 = vadd.f32 %v5778_v60, %v8620_v37  ;;  %v5781_v40 = vadd.f32 %v5780_v53, %v5779_v29 }
 0x2f6   :  { %2768 = vmatmul.mubr.bf16.gmra.mrb[52].mxu1 %v1776_v24 }
 0x2f7   :  { %v1508_v44 = vadd.f32 %v5781_v40, %v8620_v37  ;;  %2777 = vmatprep.mubr.bf16.mxu1 %v7643_v21  ;;  %7096 = vtanh.f32 %v1505_v1 }
 0x2f9   :  { %7098 = vtanh.f32 %v1508_v44  ;;  %v5782_v2 = vpop.f32.mrb[144].mxu0  ;;  %v7093_v6 = vpop.eup %7092 }
 0x2fa   :  { %v5783_v62 = vpop.f32.mrb[145].mxu0 }
 0x2fb   :  { %v7095_v36 = vpop.eup %7094  ;;  %v5784_v34 = vadd.f32 %v5783_v62, %v5782_v2  ;;  %v5785_v10 = vpop.f32.mrb[146].mxu0 }
 0x2fc   :  { %v5786_v25 = vpop.f32.mrb[147].mxu0  ;;  %v1781_v51 = vpack.c.bf16 %v7095_v36, %v7093_v6 }
 0x2fd   :  { %v1513_v7 = vadd.f32 %v5784_v34, %v8620_v37  ;;  %v5787_v27 = vadd.f32 %v5786_v25, %v5785_v10 }
 0x2fe   :  { %2778 = vmatmul.mubr.bf16.gmra.mrb[56].mxu1 %v1781_v51 }
 0x2ff   :  { %v1516_v39 = vadd.f32 %v5787_v27, %v8620_v37  ;;  %2787 = vmatprep.mubr.bf16.mxu1 %v7643_v21  ;;  %7100 = vtanh.f32 %v1513_v7 }
 0x301   :  { %7102 = vtanh.f32 %v1516_v39  ;;  %v5788_v9 = vpop.f32.mrb[148].mxu0  ;;  %v7097_v5 = vpop.eup %7096 }
 0x302   :  { %v5789_v43 = vpop.f32.mrb[149].mxu0 }
 0x303   :  { %v7099_v54 = vpop.eup %7098  ;;  %v5790_v61 = vadd.f32 %v5789_v43, %v5788_v9  ;;  %v5791_v26 = vpop.f32.mrb[150].mxu0 }
 0x304   :  { %v5792_v35 = vpop.f32.mrb[151].mxu0  ;;  %v1786_v30 = vpack.c.bf16 %v7099_v54, %v7097_v5 }
 0x305   :  { %v1521_v46 = vadd.f32 %v5790_v61, %v8620_v37  ;;  %v5793_v16 = vadd.f32 %v5792_v35, %v5791_v26 }
 0x306   :  { %2788 = vmatmul.mubr.bf16.gmra.mrb[60].mxu1 %v1786_v30 }
 0x307   :  { %v1524_v42 = vadd.f32 %v5793_v16, %v8620_v37  ;;  %2797 = vmatprep.mubr.bf16.mxu1 %v7643_v21  ;;  %7104 = vtanh.f32 %v1521_v46 }
 0x309   :  { %7106 = vtanh.f32 %v1524_v42  ;;  %v5794_v41 = vpop.f32.mrb[152].mxu0  ;;  %v7101_v32 = vpop.eup %7100 }
 0x30a   :  { %v5795_v55 = vpop.f32.mrb[153].mxu0 }
 0x30b   :  { %v7103_v56 = vpop.eup %7102  ;;  %v5796_v48 = vadd.f32 %v5795_v55, %v5794_v41  ;;  %v5797_v19 = vpop.f32.mrb[154].mxu0 }
 0x30c   :  { %v5798_v22 = vpop.f32.mrb[155].mxu0  ;;  %v1791_v4 = vpack.c.bf16 %v7103_v56, %v7101_v32 }
 0x30d   :  { %v1529_v38 = vadd.f32 %v5796_v48, %v8620_v37  ;;  %v5799_v0 = vadd.f32 %v5798_v22, %v5797_v19 }
 0x30e   :  { %2798 = vmatmul.mubr.bf16.gmra.mrb[0].mxu1 %v1791_v4 }
 0x30f   :  { %v1532_v20 = vadd.f32 %v5799_v0, %v8620_v37  ;;  %2807 = vmatprep.mubr.bf16.mxu1 %v7643_v21  ;;  %7108 = vtanh.f32 %v1529_v38 }
 0x311   :  { %7110 = vtanh.f32 %v1532_v20  ;;  %v5800_v59 = vpop.f32.mrb[156].mxu0  ;;  %v7105_v49 = vpop.eup %7104 }
 0x312   :  { %v5801_v50 = vpop.f32.mrb[157].mxu0 }
 0x313   :  { %v7107_v52 = vpop.eup %7106  ;;  %v5802_v60 = vadd.f32 %v5801_v50, %v5800_v59  ;;  %v5803_v29 = vpop.f32.mrb[158].mxu0 }
 0x314   :  { %v5804_v53 = vpop.f32.mrb[159].mxu0  ;;  %v1796_v24 = vpack.c.bf16 %v7107_v52, %v7105_v49 }
 0x315   :  { %v1537_v1 = vadd.f32 %v5802_v60, %v8620_v37  ;;  %v5805_v40 = vadd.f32 %v5804_v53, %v5803_v29 }
 0x316   :  { %2808 = vmatmul.mubr.bf16.gmra.mrb[4].mxu1 %v1796_v24 }
 0x317   :  { %v1540_v18 = vadd.f32 %v5805_v40, %v8620_v37  ;;  %2817 = vmatprep.mubr.bf16.mxu1 %v7643_v21  ;;  %7112 = vtanh.f32 %v1537_v1 }
 0x319   :  { %7114 = vtanh.f32 %v1540_v18  ;;  %v5806_v17 = vpop.f32.mrb[160].mxu0  ;;  %v7109_v11 = vpop.eup %7108 }
 0x31a   :  { %v5807_v44 = vpop.f32.mrb[161].mxu0 }
 0x31b   :  { %v7111_v12 = vpop.eup %7110  ;;  %v5808_v2 = vadd.f32 %v5807_v44, %v5806_v17  ;;  %v5809_v14 = vpop.f32.mrb[162].mxu0  ;;  %v6611_v17 = vld [vmem:[#allocation8 + $0x11c] ss:$20 sps:$4 sm:$0xff]  }
 0x31c   :  { %v5810_v6 = vpop.f32.mrb[163].mxu0  ;;  %v1801_v62 = vpack.c.bf16 %v7111_v12, %v7109_v11  ;;  %3295 = vmatprep.subr.bf16.mxu0 %v6611_v17  ;;  %v1927_v17 = vld [vmem:[%s9219_s4] sm:$0x3] }
 0x31d   :  { %v1545_v36 = vadd.f32 %v5808_v2, %v8620_v37  ;;  %v5811_v34 = vadd.f32 %v5810_v6, %v5809_v14  ;;  %v6609_v2 = vld [vmem:[#allocation8 + $0x118] ss:$20 sps:$4 sm:$0xff]  }
 0x31e   :  { %2818 = vmatmul.mubr.bf16.gmra.mrb[8].mxu1 %v1801_v62  ;;  %3296 = vmatpush1.bf16.msra.mxu0 %v6609_v2 }
 0x31f   :  { %v1548_v10 = vadd.f32 %v5811_v34, %v8620_v37  ;;  %2827 = vmatprep.mubr.bf16.mxu1 %v7643_v21  ;;  %7116 = vtanh.f32 %v1545_v36 }
 0x321   :  { %7118 = vtanh.f32 %v1548_v10  ;;  %v5812_v25 = vpop.f32.mrb[164].mxu0  ;;  %v7113_v51 = vpop.eup %7112  ;;  %v6614_v10 = vld [vmem:[#allocation8 + $0xc] ss:$20 sps:$4 sm:$0xff]  }
 0x322   :  { %v5813_v13 = vpop.f32.mrb[165].mxu0  ;;  %3474 = vmatprep.subr.bf16.mxu0 %v6614_v10 }
 0x323   :  { %v7115_v7 = vpop.eup %7114  ;;  %v5814_v27 = vadd.f32 %v5813_v13, %v5812_v25  ;;  %v5815_v8 = vpop.f32.mrb[166].mxu0 }
 0x324   :  { %v5816_v39 = vpop.f32.mrb[167].mxu0  ;;  %v1806_v3 = vpack.c.bf16 %v7115_v7, %v7113_v51 }
 0x325   :  { %v1553_v9 = vadd.f32 %v5814_v27, %v8620_v37  ;;  %v5817_v31 = vadd.f32 %v5816_v39, %v5815_v8 }
 0x326   :  { %2828 = vmatmul.mubr.bf16.gmra.mrb[12].mxu1 %v1806_v3 }
 0x327   :  { %v1556_v5 = vadd.f32 %v5817_v31, %v8620_v37  ;;  %2837 = vmatprep.mubr.bf16.mxu1 %v7643_v21  ;;  %7120 = vtanh.f32 %v1553_v9 }
 0x329   :  { %7122 = vtanh.f32 %v1556_v5  ;;  %v5818_v43 = vpop.f32.mrb[168].mxu0  ;;  %v7117_v54 = vpop.eup %7116 }
 0x32a   :  { %v5819_v61 = vpop.f32.mrb[169].mxu0 }
 0x32b   :  { %v7119_v26 = vpop.eup %7118  ;;  %v5820_v35 = vadd.f32 %v5819_v61, %v5818_v43  ;;  %v5821_v30 = vpop.f32.mrb[170].mxu0 }
 0x32c   :  { %v5822_v47 = vpop.f32.mrb[171].mxu0  ;;  %v1811_v46 = vpack.c.bf16 %v7119_v26, %v7117_v54 }
 0x32d   :  { %v1561_v16 = vadd.f32 %v5820_v35, %v8620_v37  ;;  %v5823_v23 = vadd.f32 %v5822_v47, %v5821_v30 }
 0x32e   :  { %2838 = vmatmul.mubr.bf16.gmra.mrb[16].mxu1 %v1811_v46 }
 0x32f   :  { %v1564_v42 = vadd.f32 %v5823_v23, %v8620_v37  ;;  %2847 = vmatprep.mubr.bf16.mxu1 %v7643_v21  ;;  %7124 = vtanh.f32 %v1561_v16 }
 0x331   :  { %7126 = vtanh.f32 %v1564_v42  ;;  %v5824_v33 = vpop.f32.mrb[172].mxu0  ;;  %v7121_v41 = vpop.eup %7120 }
 0x332   :  { %v5825_v45 = vpop.f32.mrb[173].mxu0 }
 0x333   :  { %v7123_v32 = vpop.eup %7122  ;;  %v5826_v55 = vadd.f32 %v5825_v45, %v5824_v33  ;;  %v5827_v56 = vpop.f32.mrb[174].mxu0 }
 0x334   :  { %v5828_v48 = vpop.f32.mrb[175].mxu0  ;;  %v1816_v19 = vpack.c.bf16 %v7123_v32, %v7121_v41 }
 0x335   :  { %v1569_v22 = vadd.f32 %v5826_v55, %v8620_v37  ;;  %v5829_v4 = vadd.f32 %v5828_v48, %v5827_v56 }
 0x336   :  { %2848 = vmatmul.mubr.bf16.gmra.mrb[20].mxu1 %v1816_v19 }
 0x337   :  { %v1572_v58 = vadd.f32 %v5829_v4, %v8620_v37  ;;  %2857 = vmatprep.mubr.bf16.mxu1 %v7643_v21  ;;  %7128 = vtanh.f32 %v1569_v22 }
 0x339   :  { %7130 = vtanh.f32 %v1572_v58  ;;  %v5830_v38 = vpop.f32.mrb[176].mxu0  ;;  %v7125_v0 = vpop.eup %7124 }
 0x33a   :  { %v5831_v20 = vpop.f32.mrb[177].mxu0 }
 0x33b   :  { %v7127_v59 = vpop.eup %7126  ;;  %v5832_v49 = vadd.f32 %v5831_v20, %v5830_v38  ;;  %v5833_v50 = vpop.f32.mrb[178].mxu0 }
 0x33c   :  { %v5834_v52 = vpop.f32.mrb[179].mxu0  ;;  %v1821_v60 = vpack.c.bf16 %v7127_v59, %v7125_v0 }
 0x33d   :  { %v1577_v29 = vadd.f32 %v5832_v49, %v8620_v37  ;;  %v5835_v53 = vadd.f32 %v5834_v52, %v5833_v50 }
 0x33e   :  { %2858 = vmatmul.mubr.bf16.gmra.mrb[24].mxu1 %v1821_v60 }
 0x33f   :  { %v1580_v24 = vadd.f32 %v5835_v53, %v8620_v37  ;;  %2867 = vmatprep.mubr.bf16.mxu1 %v7643_v21  ;;  %7132 = vtanh.f32 %v1577_v29 }
 0x341   :  { %7134 = vtanh.f32 %v1580_v24  ;;  %v5836_v1 = vpop.f32.mrb[180].mxu0  ;;  %v7129_v40 = vpop.eup %7128  ;;  %v6633_v24 = vld [vmem:[#allocation10] ss:$8 sps:$4 sm:$0xff]  }
 0x342   :  { %v5837_v18 = vpop.f32.mrb[181].mxu0 }
 0x343   :  { %v7131_v11 = vpop.eup %7130  ;;  %v5838_v44 = vadd.f32 %v5837_v18, %v5836_v1  ;;  %v5839_v12 = vpop.f32.mrb[182].mxu0  ;;  %v6635_v1 = vld [vmem:[#allocation10 + $0x4] ss:$8 sps:$4 sm:$0xff]   ;;  %v6638_v18 = vld [vmem:[#allocation10 + $0x14] ss:$8 sps:$4 sm:$0xff]  }
 0x344   :  { %v5840_v14 = vpop.f32.mrb[183].mxu0  ;;  %v1826_v6 = vpack.c.bf16 %v7131_v11, %v7129_v40  ;;  %4560 = vmatprep.subr.bf16.mxu1 %v6635_v1  ;;  %v6636_v40 = vld [vmem:[#allocation10 + $0x10] ss:$8 sps:$4 sm:$0xff]   ;;  %v9392_v11 = vld [vmem:[#allocation36_spill] sm:$0xff]  ;;  %v6621_v1 = vld [vmem:[#allocation8 + $0x80] ss:$20 sps:$4 sm:$0xff]  }
 0x345   :  { %v1585_v62 = vadd.f32 %v5838_v44, %v8620_v37  ;;  %v5841_v36 = vadd.f32 %v5840_v14, %v5839_v12  ;;  %4561 = vmatpush1.bf16.msra.mxu1 %v6633_v24  ;;  %v8692_v44 = vrot.slane %v1927_v17, %v9392_v11  ;;  %v9393_v12 = vld [vmem:[#allocation38_spill] sm:$0xff]  ;;  %v6642_v14 = vld [vmem:[#allocation10 + $0x20] ss:$8 sps:$4 sm:$0xff]  }
 0x346   :  { %2868 = vmatmul.mubr.bf16.gmra.mrb[28].mxu1 %v1826_v6  ;;  %4562 = vmatprep.subr.bf16.mxu1 %v6638_v18  ;;  %v8695_v2 = vrot.slane %v1927_v17, %v9393_v12  ;;  %v6644_v6 = vld [vmem:[#allocation10 + $0x24] ss:$8 sps:$4 sm:$0xff]  }
 0x347   :  { %v1588_v34 = vadd.f32 %v5841_v36, %v8620_v37  ;;  %2877 = vmatprep.mubr.bf16.mxu1 %v7643_v21  ;;  %7136 = vtanh.f32 %v1585_v62  ;;  %v6647_v36 = vld [vmem:[#allocation10 + $0x34] ss:$8 sps:$4 sm:$0xff]  }
 0x349   :  { %7138 = vtanh.f32 %v1588_v34  ;;  %v5842_v25 = vpop.f32.mrb[184].mxu0  ;;  %v7133_v51 = vpop.eup %7132  ;;  %4563 = vmatpush1.bf16.msra.mxu1 %v6636_v40 }
 0x34a   :  { %v5843_v13 = vpop.f32.mrb[185].mxu0  ;;  %4564 = vmatprep.subr.bf16.mxu1 %v6644_v6 }
 0x34b   :  { %v7135_v7 = vpop.eup %7134  ;;  %v5844_v27 = vadd.f32 %v5843_v13, %v5842_v25  ;;  %v5845_v8 = vpop.f32.mrb[186].mxu0 }
 0x34c   :  { %v5846_v39 = vpop.f32.mrb[187].mxu0  ;;  %v1831_v3 = vpack.c.bf16 %v7135_v7, %v7133_v51  ;;  %v6645_v7 = vld [vmem:[#allocation10 + $0x30] ss:$8 sps:$4 sm:$0xff]  }
 0x34d   :  { %v1593_v9 = vadd.f32 %v5844_v27, %v8620_v37  ;;  %v5847_v31 = vadd.f32 %v5846_v39, %v5845_v8  ;;  %4565 = vmatpush1.bf16.msra.mxu1 %v6642_v14  ;;  %v6626_v14 = vld [vmem:[#allocation8 + $0xac] ss:$20 sps:$4 sm:$0xff]  }
 0x34e   :  { %2878 = vmatmul.mubr.bf16.gmra.mrb[32].mxu1 %v1831_v3  ;;  %4566 = vmatprep.subr.bf16.mxu1 %v6647_v36 }
 0x34f   :  { %v1596_v5 = vadd.f32 %v5847_v31, %v8620_v37  ;;  %2887 = vmatprep.mubr.bf16.mxu1 %v7643_v21  ;;  %7140 = vtanh.f32 %v1593_v9 }
 0x351   :  { %7142 = vtanh.f32 %v1596_v5  ;;  %v5848_v43 = vpop.f32.mrb[188].mxu0  ;;  %v7137_v54 = vpop.eup %7136  ;;  %v6612_v5 = vld [vmem:[#allocation8 + $0x8] ss:$20 sps:$4 sm:$0xff]   ;;  %4567 = vmatpush1.bf16.msra.mxu1 %v6645_v7 }
 0x352   :  { %v5849_v61 = vpop.f32.mrb[189].mxu0 }
 0x353   :  { %v7139_v26 = vpop.eup %7138  ;;  %v5850_v35 = vadd.f32 %v5849_v61, %v5848_v43  ;;  %v5851_v30 = vpop.f32.mrb[190].mxu0 }
 0x354   :  { %v5852_v47 = vpop.f32.mrb[191].mxu0  ;;  %v1836_v46 = vpack.c.bf16 %v7139_v26, %v7137_v54  ;;  %v6617_v54 = vld [vmem:[#allocation8 + $0x34] ss:$20 sps:$4 sm:$0xff]   ;;  %v6615_v26 = vld [vmem:[#allocation8 + $0x30] ss:$20 sps:$4 sm:$0xff]  }
 0x355   :  { %v1601_v16 = vadd.f32 %v5850_v35, %v8620_v37  ;;  %v5853_v23 = vadd.f32 %v5852_v47, %v5851_v30  ;;  %v6649_v47 = vld [vmem:[#allocation10 + $0x40] ss:$8 sps:$4 sm:$0xff]  }
 0x356   :  { %2888 = vmatmul.mubr.bf16.gmra.mrb[36].mxu1 %v1836_v46  ;;  %v6651_v46 = vld [vmem:[#allocation10 + $0x44] ss:$8 sps:$4 sm:$0xff]  }
 0x357   :  { %v1604_v42 = vadd.f32 %v5853_v23, %v8620_v37  ;;  %2897 = vmatprep.mubr.bf16.mxu1 %v7643_v21  ;;  %7144 = vtanh.f32 %v1601_v16  ;;  %4568 = vmatprep.subr.bf16.mxu1 %v6651_v46 }
 0x358   :  { %4569 = vmatpush1.bf16.msra.mxu1 %v6649_v47  ;;  %v6659_v47 = vld [vmem:[#allocation10 + $0x70] ss:$8 sps:$4 sm:$0xff]  }
 0x359   :  { %7146 = vtanh.f32 %v1604_v42  ;;  %v2373_v33 = vpop.f32.mrb[192].mxu0  ;;  %v7141_v41 = vpop.eup %7140 }
 0x35a   :  { %v2375_v45 = vpop.f32.mrb[193].mxu0  ;;  %v2374_v62 = vadd.f32 %v2373_v33, %v8692_v44  ;;  %v6620_v33 = vld [vmem:[#allocation8 + $0x5c] ss:$20 sps:$4 sm:$0xff]  }
 0x35b   :  { %v7143_v32 = vpop.eup %7142  ;;  %v2377_v55 = vpop.f32.mrb[194].mxu0  ;;  %v2376_v34 = vadd.f32 %v2375_v45, %v8695_v2 }
 0x35c   :  { %v2379_v56 = vpop.f32.mrb[195].mxu0  ;;  %v1841_v48 = vpack.c.bf16 %v7143_v32, %v7141_v41  ;;  %v2378_v25 = vadd.f32 %v2377_v55, %v8692_v44 }
 0x35d   :  { %v2380_v27 = vadd.f32 %v2379_v56, %v8695_v2 }
 0x35e   :  { %2898 = vmatmul.mubr.bf16.gmra.mrb[40].mxu1 %v1841_v48 }
 0x35f   :  { %2907 = vmatprep.mubr.bf16.mxu1 %v7643_v21 }
 0x361   :  { %v2383_v19 = vpop.f32.mrb[196].mxu0  ;;  %v7145_v22 = vpop.eup %7144 }
 0x362   :  { %v2385_v4 = vpop.f32.mrb[197].mxu0  ;;  %v2384_v61 = vadd.f32 %v2383_v19, %v8692_v44  ;;  %v6618_v19 = vld [vmem:[#allocation8 + $0x58] ss:$20 sps:$4 sm:$0xff]  }
 0x363   :  { %v7147_v58 = vpop.eup %7146  ;;  %v2387_v38 = vpop.f32.mrb[198].mxu0  ;;  %v2386_v35 = vadd.f32 %v2385_v4, %v8695_v2  ;;  %v6623_v4 = vld [vmem:[#allocation8 + $0x84] ss:$20 sps:$4 sm:$0xff]  }
 0x364   :  { %v8670_v37 = vpop.f32.mrb[199].mxu0  ;;  %v1846_v0 = vpack.c.bf16 %v7147_v58, %v7145_v22  ;;  %v2388_v16 = vadd.f32 %v2387_v38, %v8692_v44  ;;  %v6652_v38 = vld [vmem:[#allocation10 + $0x50] ss:$8 sps:$4 sm:$0xff]  }
 0x365   :  { %v2390_v41 = vadd.f32 %v8670_v37, %v8695_v2  ;;  %v6654_v37 = vld [vmem:[#allocation10 + $0x54] ss:$8 sps:$4 sm:$0xff]  }
 0x366   :  { %2908 = vmatmul.mubr.bf16.gmra.mrb[44].mxu1 %v1846_v0  ;;  %4570 = vmatprep.subr.bf16.mxu1 %v6654_v37 }
 0x367   :  { %4571 = vmatpush1.bf16.msra.mxu1 %v6652_v38 }
 0x369   :  { %v8672_v20 = vpop.f32.mrb[200].mxu0 }
 0x36a   :  { %v8674_v59 = vpop.f32.mrb[201].mxu0  ;;  %v2394_v58 = vadd.f32 %v8672_v20, %v8692_v44 }
 0x36b   :  { %v8676_v49 = vpop.f32.mrb[202].mxu0  ;;  %v2396_v0 = vadd.f32 %v8674_v59, %v8695_v2 }
 0x36c   :  { %v8678_v50 = vpop.f32.mrb[203].mxu0  ;;  %v2398_v40 = vadd.f32 %v8676_v49, %v8692_v44 }
 0x36d   :  { %v2400_v20 = vadd.f32 %v8678_v50, %v8695_v2  ;;  %v6656_v50 = vld [vmem:[#allocation10 + $0x60] ss:$8 sps:$4 sm:$0xff]  }
 0x371   :  { %v8680_v52 = vpop.f32.mrb[204].mxu0 }
 0x372   :  { %v8682_v60 = vpop.f32.mrb[205].mxu0 }
 0x373   :  { %v8684_v29 = vpop.f32.mrb[206].mxu0  ;;  %v2406_v7 = vadd.f32 %v8682_v60, %v8695_v2 }
 0x374   :  { %v8686_v53 = vpop.f32.mrb[207].mxu0 }
 0x3c1   :  { %v2759_v10 = vpop.f32.mrb[48].mxu1 }
 0x3c2   :  { %v5959_v51 = vadd.f32 %v2759_v10, %v2374_v62  ;;  %v2761_v13 = vpop.f32.mrb[49].mxu1  ;;  %v6624_v10 = vld [vmem:[#allocation8 + $0xa8] ss:$20 sps:$4 sm:$0xff]  }
 0x3c3   :  { %v5961_v8 = vadd.f32 %v2761_v13, %v2376_v34  ;;  %v2763_v39 = vpop.f32.mrb[50].mxu1  ;;  %v6658_v13 = vld [vmem:[#allocation10 + $0x64] ss:$8 sps:$4 sm:$0xff]  }
 0x3c4   :  { %2918 = vst [vmem:[#allocation12] sm:$0xff] %v5959_v51  ;;  %v5963_v3 = vadd.f32 %v2763_v39, %v2378_v25  ;;  %v2765_v9 = vpop.f32.mrb[51].mxu1  ;;  %v6629_v25 = vld [vmem:[#allocation8 + $0xd4] ss:$20 sps:$4 sm:$0xff]   ;;  %v2408_v39 = vadd.f32 %v8684_v29, %v8692_v44  ;;  %4572 = vmatprep.subr.bf16.mxu1 %v6658_v13 }
 0x3c5   :  { %2919 = vst [vmem:[#allocation12 + $0x8] sm:$0xff] %v5961_v8  ;;  %v5965_v31 = vadd.f32 %v2765_v9, %v2380_v27  ;;  %v6627_v8 = vld [vmem:[#allocation8 + $0xd0] ss:$20 sps:$4 sm:$0xff]   ;;  %4573 = vmatpush1.bf16.msra.mxu1 %v6656_v50  ;;  %v6670_v13 = vld [vmem:[#allocation10 + $0xa0] ss:$8 sps:$4 sm:$0xff]  }
 0x3c6   :  { %2920 = vst [vmem:[#allocation12 + $0x10] sm:$0xff] %v5963_v3  ;;  %v8701_v43 = vpack.c.bf16 %v5963_v3, %v5959_v51  ;;  %v2404_v51 = vadd.f32 %v8680_v52, %v8692_v44  ;;  %v2410_v52 = vadd.f32 %v8686_v53, %v8695_v2  ;;  %v6661_v53 = vld [vmem:[#allocation10 + $0x74] ss:$8 sps:$4 sm:$0xff]  }
 0x3c7   :  { %2921 = vst [vmem:[#allocation12 + $0x18] sm:$0xff] %v5965_v31  ;;  %v6632_v31 = vld [vmem:[#allocation8 + $0xfc] ss:$20 sps:$4 sm:$0xff]   ;;  %4574 = vmatprep.subr.bf16.mxu1 %v6661_v53 }
 0x3c8   :  { %3314 = vmatmul.mubr.bf16.vlgmr.msra.gmra.mrb[208].mxu0 %v8701_v43 }
 0x3c9   :  { %3475 = vmatpush1.bf16.msra.mxu0 %v6612_v5  ;;  %v2769_v30 = vpop.f32.mrb[52].mxu1  ;;  %3323 = vmatprep.mubr.bf16.mxu0 %v7643_v21 }
 0x3ca   :  { %v5967_v23 = vadd.f32 %v2769_v30, %v2384_v61  ;;  %v2771_v42 = vpop.f32.mrb[53].mxu1  ;;  %3476 = vmatprep.subr.bf16.mxu0 %v6617_v54  ;;  %v6641_v30 = vld [vmem:[#allocation8 + $0x124] ss:$20 sps:$4 sm:$0xff]   ;;  %4575 = vmatpush1.bf16.msra.mxu1 %v6659_v47 }
 0x3cb   :  { %v5969_v45 = vadd.f32 %v2771_v42, %v2386_v35  ;;  %v2773_v32 = vpop.f32.mrb[54].mxu1  ;;  %v6630_v35 = vld [vmem:[#allocation8 + $0xf8] ss:$20 sps:$4 sm:$0xff]  }
 0x3cc   :  { %2922 = vst [vmem:[#allocation12 + $0x20] sm:$0xff] %v5967_v23  ;;  %v5971_v55 = vadd.f32 %v2773_v32, %v2388_v16  ;;  %v2775_v56 = vpop.f32.mrb[55].mxu1  ;;  %v6639_v16 = vld [vmem:[#allocation8 + $0x120] ss:$20 sps:$4 sm:$0xff]  }
 0x3cd   :  { %2923 = vst [vmem:[#allocation12 + $0x28] sm:$0xff] %v5969_v45  ;;  %v5973_v48 = vadd.f32 %v2775_v56, %v2390_v41  ;;  %3477 = vmatpush1.bf16.msra.mxu0 %v6615_v26 }
 0x3ce   :  { %2924 = vst [vmem:[#allocation12 + $0x30] sm:$0xff] %v5971_v55  ;;  %v8710_v22 = vpack.c.bf16 %v5971_v55, %v5967_v23  ;;  %3478 = vmatprep.subr.bf16.mxu0 %v6620_v33  ;;  %v8739_v33 = vld [vmem:[#allocation8 + $0x10] ss:$20 sps:$4 sm:$0xff]  }
 0x3cf   :  { %2925 = vst [vmem:[#allocation12 + $0x38] sm:$0xff] %v5973_v48 }
 0x3d0   :  { %3324 = vmatmul.mubr.bf16.gmra.mrb[212].mxu0 %v8710_v22 }
 0x3d1   :  { %v2779_v24 = vpop.f32.mrb[56].mxu1  ;;  %3333 = vmatprep.mubr.bf16.mxu0 %v7643_v21  ;;  %3479 = vmatpush1.bf16.msra.mxu0 %v6618_v19  ;;  %v6663_v19 = vld [vmem:[#allocation10 + $0x80] ss:$8 sps:$4 sm:$0xff]  }
 0x3d2   :  { %v5975_v18 = vadd.f32 %v2779_v24, %v2394_v58  ;;  %v2781_v17 = vpop.f32.mrb[57].mxu1  ;;  %3480 = vmatprep.subr.bf16.mxu0 %v6623_v4  ;;  %v6665_v4 = vld [vmem:[#allocation10 + $0x84] ss:$8 sps:$4 sm:$0xff]  }
 0x3d3   :  { %v5977_v6 = vadd.f32 %v2781_v17, %v2396_v0  ;;  %v2783_v62 = vpop.f32.mrb[58].mxu1  ;;  %4576 = vmatprep.subr.bf16.mxu1 %v6665_v4 }
 0x3d4   :  { %2926 = vst [vmem:[#allocation12 + $0x40] sm:$0xff] %v5975_v18  ;;  %v5979_v59 = vadd.f32 %v2783_v62, %v2398_v40  ;;  %v2785_v36 = vpop.f32.mrb[59].mxu1  ;;  %4577 = vmatpush1.bf16.msra.mxu1 %v6663_v19 }
 0x3d5   :  { %2927 = vst [vmem:[#allocation12 + $0x48] sm:$0xff] %v5977_v6  ;;  %v5981_v34 = vadd.f32 %v2785_v36, %v2400_v20  ;;  %3481 = vmatpush1.bf16.msra.mxu0 %v6621_v1  ;;  %v6668_v20 = vld [vmem:[#allocation10 + $0x94] ss:$8 sps:$4 sm:$0xff]  }
 0x3d6   :  { %2928 = vst [vmem:[#allocation12 + $0x50] sm:$0xff] %v5979_v59  ;;  %v8722_v49 = vpack.c.bf16 %v5979_v59, %v5975_v18  ;;  %3482 = vmatprep.subr.bf16.mxu0 %v6626_v14  ;;  %v6666_v14 = vld [vmem:[#allocation10 + $0x90] ss:$8 sps:$4 sm:$0xff]   ;;  %4578 = vmatprep.subr.bf16.mxu1 %v6668_v20 }
 0x3d7   :  { %2929 = vst [vmem:[#allocation12 + $0x58] sm:$0xff] %v5981_v34 }
 0x3d8   :  { %3334 = vmatmul.mubr.bf16.gmra.mrb[216].mxu0 %v8722_v49  ;;  %4579 = vmatpush1.bf16.msra.mxu1 %v6666_v14 }
 0x3d9   :  { %v2789_v27 = vpop.f32.mrb[60].mxu1  ;;  %3343 = vmatprep.mubr.bf16.mxu0 %v7643_v21  ;;  %3483 = vmatpush1.bf16.msra.mxu0 %v6624_v10 }
 0x3da   :  { %v5983_v3 = vadd.f32 %v2789_v27, %v2404_v51  ;;  %v2791_v9 = vpop.f32.mrb[61].mxu1  ;;  %3484 = vmatprep.subr.bf16.mxu0 %v6629_v25 }
 0x3db   :  { %v5985_v5 = vadd.f32 %v2791_v9, %v2406_v7  ;;  %v2793_v54 = vpop.f32.mrb[62].mxu1  ;;  %v6672_v7 = vld [vmem:[#allocation10 + $0xa4] ss:$8 sps:$4 sm:$0xff]  }
 0x3dc   :  { %2930 = vst [vmem:[#allocation12 + $0x60] sm:$0xff] %v5983_v3  ;;  %v5987_v60 = vadd.f32 %v2793_v54, %v2408_v39  ;;  %v2795_v61 = vpop.f32.mrb[63].mxu1  ;;  %4580 = vmatprep.subr.bf16.mxu1 %v6672_v7 }
 0x3dd   :  { %2931 = vst [vmem:[#allocation12 + $0x68] sm:$0xff] %v5985_v5  ;;  %v5989_v26 = vadd.f32 %v2795_v61, %v2410_v52  ;;  %3485 = vmatpush1.bf16.msra.mxu0 %v6627_v8  ;;  %4581 = vmatpush1.bf16.msra.mxu1 %v6670_v13  ;;  %v6675_v61 = vld [vmem:[#allocation10 + $0xb4] ss:$8 sps:$4 sm:$0xff]  }
 0x3de   :  { %2932 = vst [vmem:[#allocation12 + $0x70] sm:$0xff] %v5987_v60  ;;  %v8734_v29 = vpack.c.bf16 %v5987_v60, %v5983_v3  ;;  %3486 = vmatprep.subr.bf16.mxu0 %v6632_v31  ;;  %v6673_v60 = vld [vmem:[#allocation10 + $0xb0] ss:$8 sps:$4 sm:$0xff]   ;;  %4582 = vmatprep.subr.bf16.mxu1 %v6675_v61 }
 0x3df   :  { %2933 = vst [vmem:[#allocation12 + $0x78] sm:$0xff] %v5989_v26 }
 0x3e0   :  { %3344 = vmatmul.mubr.bf16.gmra.mrb[220].mxu0 %v8734_v29 }
 0x3e1   :  { %v2799_v46 = vpop.f32.mrb[0].mxu1  ;;  %3353 = vmatprep.mubr.bf16.mxu0 %v7643_v21  ;;  %3487 = vmatpush1.bf16.msra.mxu0 %v6630_v35 }
 0x3e2   :  { %v5990_v23 = vadd.f32 %v2799_v46, %v8692_v44  ;;  %v2801_v42 = vpop.f32.mrb[1].mxu1  ;;  %3488 = vmatprep.subr.bf16.mxu0 %v6641_v30  ;;  %4583 = vmatpush1.bf16.msra.mxu1 %v6673_v60 }
 0x3e3   :  { %v5991_v41 = vadd.f32 %v2801_v42, %v8695_v2  ;;  %v2803_v45 = vpop.f32.mrb[2].mxu1 }
 0x3e4   :  { %2934 = vst [vmem:[#allocation12 + $0x80] sm:$0xff] %v5990_v23  ;;  %v5992_v32 = vadd.f32 %v2803_v45, %v8692_v44  ;;  %v2805_v55 = vpop.f32.mrb[3].mxu1  ;;  %v6679_v45 = vld [vmem:[#allocation10 + $0xc4] ss:$8 sps:$4 sm:$0xff]  }
 0x3e5   :  { %2935 = vst [vmem:[#allocation12 + $0x88] sm:$0xff] %v5991_v41  ;;  %v5993_v56 = vadd.f32 %v2805_v55, %v8695_v2  ;;  %3489 = vmatpush1.bf16.msra.mxu0 %v6639_v16  ;;  %v6677_v41 = vld [vmem:[#allocation10 + $0xc0] ss:$8 sps:$4 sm:$0xff]   ;;  %4584 = vmatprep.subr.bf16.mxu1 %v6679_v45 }
 0x3e6   :  { %2936 = vst [vmem:[#allocation12 + $0x90] sm:$0xff] %v5992_v32  ;;  %v8744_v48 = vpack.c.bf16 %v5992_v32, %v5990_v23  ;;  %5878 = vmatprep.subr.bf16.mxu0 %v8739_v33  ;;  %4585 = vmatpush1.bf16.msra.mxu1 %v6677_v41 }
 0x3e7   :  { %2937 = vst [vmem:[#allocation12 + $0x98] sm:$0xff] %v5993_v56 }
 0x3e8   :  { %3354 = vmatmul.mubr.bf16.gmra.mrb[224].mxu0 %v8744_v48 }
 0x3e9   :  { %v2809_v58 = vpop.f32.mrb[4].mxu1  ;;  %3363 = vmatprep.mubr.bf16.mxu0 %v7643_v21 }
 0x3ea   :  { %v5994_v38 = vadd.f32 %v2809_v58, %v8692_v44  ;;  %v2811_v37 = vpop.f32.mrb[5].mxu1 }
 0x3eb   :  { %v5995_v0 = vadd.f32 %v2811_v37, %v8695_v2  ;;  %v2813_v24 = vpop.f32.mrb[6].mxu1 }
 0x3ec   :  { %2938 = vst [vmem:[#allocation12 + $0xa0] sm:$0xff] %v5994_v38  ;;  %v5996_v1 = vadd.f32 %v2813_v24, %v8692_v44  ;;  %v2815_v40 = vpop.f32.mrb[7].mxu1  ;;  %v6680_v24 = vld [vmem:[#allocation10 + $0xd0] ss:$8 sps:$4 sm:$0xff]  }
 0x3ed   :  { %2939 = vst [vmem:[#allocation12 + $0xa8] sm:$0xff] %v5995_v0  ;;  %v5997_v18 = vadd.f32 %v2815_v40, %v8695_v2 }
 0x3ee   :  { %2940 = vst [vmem:[#allocation12 + $0xb0] sm:$0xff] %v5996_v1  ;;  %v8753_v17 = vpack.c.bf16 %v5996_v1, %v5994_v38  ;;  %v6682_v1 = vld [vmem:[#allocation10 + $0xd4] ss:$8 sps:$4 sm:$0xff]  }
 0x3ef   :  { %2941 = vst [vmem:[#allocation12 + $0xb8] sm:$0xff] %v5997_v18  ;;  %4586 = vmatprep.subr.bf16.mxu1 %v6682_v1 }
 0x3f0   :  { %3364 = vmatmul.mubr.bf16.gmra.mrb[228].mxu0 %v8753_v17  ;;  %4587 = vmatpush1.bf16.msra.mxu1 %v6680_v24 }
 0x3f1   :  { %v2819_v6 = vpop.f32.mrb[8].mxu1  ;;  %3373 = vmatprep.mubr.bf16.mxu0 %v7643_v21 }
 0x3f2   :  { %v5998_v62 = vadd.f32 %v2819_v6, %v8692_v44  ;;  %v2821_v59 = vpop.f32.mrb[9].mxu1 }
 0x3f3   :  { %v5999_v36 = vadd.f32 %v2821_v59, %v8695_v2  ;;  %v2823_v34 = vpop.f32.mrb[10].mxu1 }
 0x3f4   :  { %2942 = vst [vmem:[#allocation12 + $0xc0] sm:$0xff] %v5998_v62  ;;  %v6000_v10 = vadd.f32 %v2823_v34, %v8692_v44  ;;  %v2825_v25 = vpop.f32.mrb[11].mxu1 }
 0x3f5   :  { %2943 = vst [vmem:[#allocation12 + $0xc8] sm:$0xff] %v5999_v36  ;;  %v6001_v51 = vadd.f32 %v2825_v25, %v8695_v2 }
 0x3f6   :  { %2944 = vst [vmem:[#allocation12 + $0xd0] sm:$0xff] %v6000_v10  ;;  %v8761_v50 = vpack.c.bf16 %v6000_v10, %v5998_v62 }
 0x3f7   :  { %2945 = vst [vmem:[#allocation12 + $0xd8] sm:$0xff] %v6001_v51 }
 0x3f8   :  { %3374 = vmatmul.mubr.bf16.gmra.mrb[232].mxu0 %v8761_v50 }
 0x3f9   :  { %v2829_v27 = vpop.f32.mrb[12].mxu1  ;;  %3383 = vmatprep.mubr.bf16.mxu0 %v7643_v21 }
 0x3fa   :  { %v6002_v8 = vadd.f32 %v2829_v27, %v8692_v44  ;;  %v2831_v39 = vpop.f32.mrb[13].mxu1 }
 0x3fb   :  { %v6003_v3 = vadd.f32 %v2831_v39, %v8695_v2  ;;  %v2833_v9 = vpop.f32.mrb[14].mxu1 }
 0x3fc   :  { %2946 = vst [vmem:[#allocation12 + $0xe0] sm:$0xff] %v6002_v8  ;;  %v6004_v31 = vadd.f32 %v2833_v9, %v8692_v44  ;;  %v2835_v52 = vpop.f32.mrb[15].mxu1 }
 0x3fd   :  { %2947 = vst [vmem:[#allocation12 + $0xe8] sm:$0xff] %v6003_v3  ;;  %v6005_v5 = vadd.f32 %v2835_v52, %v8695_v2  ;;  %v6686_v52 = vld [vmem:[#allocation10 + $0xe4] ss:$8 sps:$4 sm:$0xff]  }
 0x3fe   :  { %2948 = vst [vmem:[#allocation12 + $0xf0] sm:$0xff] %v6004_v31  ;;  %v8769_v54 = vpack.c.bf16 %v6004_v31, %v6002_v8  ;;  %v6684_v31 = vld [vmem:[#allocation10 + $0xe0] ss:$8 sps:$4 sm:$0xff]   ;;  %4588 = vmatprep.subr.bf16.mxu1 %v6686_v52 }
 0x3ff   :  { %2949 = vst [vmem:[#allocation12 + $0xf8] sm:$0xff] %v6005_v5  ;;  %4589 = vmatpush1.bf16.msra.mxu1 %v6684_v31  ;;  %v6683_v31 = vld [vmem:[#allocation8 + $0xd8] ss:$20 sps:$4 sm:$0xff]   ;;  %v6697_v52 = vld [vmem:[#allocation8 + $0x128] ss:$20 sps:$4 sm:$0xff]  }
 0x400   :  { %3384 = vmatmul.mubr.bf16.gmra.mrb[236].mxu0 %v8769_v54 }
 0x401   :  { %v2839_v26 = vpop.f32.mrb[16].mxu1  ;;  %3393 = vmatprep.mubr.bf16.mxu0 %v7643_v21 }
 0x402   :  { %v6006_v35 = vadd.f32 %v2839_v26, %v8692_v44  ;;  %v2841_v30 = vpop.f32.mrb[17].mxu1 }
 0x403   :  { %v6007_v47 = vadd.f32 %v2841_v30, %v8695_v2  ;;  %v2843_v53 = vpop.f32.mrb[18].mxu1 }
 0x404   :  { %2950 = vst [vmem:[#allocation12 + $0x100] sm:$0xff] %v6006_v35  ;;  %v6008_v46 = vadd.f32 %v2843_v53, %v8692_v44  ;;  %v2845_v16 = vpop.f32.mrb[19].mxu1 }
 0x405   :  { %2951 = vst [vmem:[#allocation12 + $0x108] sm:$0xff] %v6007_v47  ;;  %v6009_v23 = vadd.f32 %v2845_v16, %v8695_v2  ;;  %v6687_v16 = vld [vmem:[#allocation10 + $0xf0] ss:$8 sps:$4 sm:$0xff]  }
 0x406   :  { %2952 = vst [vmem:[#allocation12 + $0x110] sm:$0xff] %v6008_v46  ;;  %v8777_v42 = vpack.c.bf16 %v6008_v46, %v6006_v35 }
 0x407   :  { %2953 = vst [vmem:[#allocation12 + $0x118] sm:$0xff] %v6009_v23  ;;  %v6689_v23 = vld [vmem:[#allocation10 + $0xf4] ss:$8 sps:$4 sm:$0xff]  }
 0x408   :  { %3394 = vmatmul.mubr.bf16.gmra.mrb[240].mxu0 %v8777_v42  ;;  %4590 = vmatprep.subr.bf16.mxu1 %v6689_v23 }
 0x409   :  { %v2849_v32 = vpop.f32.mrb[20].mxu1  ;;  %3403 = vmatprep.mubr.bf16.mxu0 %v7643_v21  ;;  %4591 = vmatpush1.bf16.msra.mxu1 %v6687_v16 }
 0x40a   :  { %v6010_v55 = vadd.f32 %v2849_v32, %v8692_v44  ;;  %v2851_v56 = vpop.f32.mrb[21].mxu1 }
 0x40b   :  { %v6011_v19 = vadd.f32 %v2851_v56, %v8695_v2  ;;  %v2853_v4 = vpop.f32.mrb[22].mxu1 }
 0x40c   :  { %2954 = vst [vmem:[#allocation12 + $0x120] sm:$0xff] %v6010_v55  ;;  %v6012_v58 = vadd.f32 %v2853_v4, %v8692_v44  ;;  %v2855_v38 = vpop.f32.mrb[23].mxu1 }
 0x40d   :  { %2955 = vst [vmem:[#allocation12 + $0x128] sm:$0xff] %v6011_v19  ;;  %v6013_v37 = vadd.f32 %v2855_v38, %v8695_v2 }
 0x40e   :  { %2956 = vst [vmem:[#allocation12 + $0x130] sm:$0xff] %v6012_v58  ;;  %v8785_v0 = vpack.c.bf16 %v6012_v58, %v6010_v55 }
 0x40f   :  { %2957 = vst [vmem:[#allocation12 + $0x138] sm:$0xff] %v6013_v37  ;;  %v6693_v37 = vld [vmem:[#allocation10 + $0x104] ss:$8 sps:$4 sm:$0xff]  }
 0x410   :  { %3404 = vmatmul.mubr.bf16.gmra.mrb[244].mxu0 %v8785_v0  ;;  %4753 = vmatprep.subr.bf16.mxu1 %v6693_v37 }
 0x411   :  { %v2859_v40 = vpop.f32.mrb[24].mxu1  ;;  %3413 = vmatprep.mubr.bf16.mxu0 %v7643_v21 }
 0x412   :  { %v6014_v18 = vadd.f32 %v2859_v40, %v8692_v44  ;;  %v2861_v14 = vpop.f32.mrb[25].mxu1 }
 0x413   :  { %v6015_v20 = vadd.f32 %v2861_v14, %v8695_v2  ;;  %v2863_v6 = vpop.f32.mrb[26].mxu1 }
 0x414   :  { %2958 = vst [vmem:[#allocation12 + $0x140] sm:$0xff] %v6014_v18  ;;  %v6016_v62 = vadd.f32 %v2863_v6, %v8692_v44  ;;  %v2865_v59 = vpop.f32.mrb[27].mxu1 }
 0x415   :  { %2959 = vst [vmem:[#allocation12 + $0x148] sm:$0xff] %v6015_v20  ;;  %v6017_v36 = vadd.f32 %v2865_v59, %v8695_v2 }
 0x416   :  { %2960 = vst [vmem:[#allocation12 + $0x150] sm:$0xff] %v6016_v62  ;;  %v8793_v34 = vpack.c.bf16 %v6016_v62, %v6014_v18 }
 0x417   :  { %2961 = vst [vmem:[#allocation12 + $0x158] sm:$0xff] %v6017_v36 }
 0x418   :  { %3414 = vmatmul.mubr.bf16.gmra.mrb[248].mxu0 %v8793_v34 }
 0x419   :  { %v2869_v10 = vpop.f32.mrb[28].mxu1  ;;  %3423 = vmatprep.mubr.bf16.mxu0 %v7643_v21 }
 0x41a   :  { %v6018_v25 = vadd.f32 %v2869_v10, %v8692_v44  ;;  %v2871_v51 = vpop.f32.mrb[29].mxu1 }
 0x41b   :  { %v6019_v13 = vadd.f32 %v2871_v51, %v8695_v2  ;;  %v2873_v7 = vpop.f32.mrb[30].mxu1 }
 0x41c   :  { %2962 = vst [vmem:[#allocation12 + $0x160] sm:$0xff] %v6018_v25  ;;  %v6020_v27 = vadd.f32 %v2873_v7, %v8692_v44  ;;  %v2875_v8 = vpop.f32.mrb[31].mxu1 }
 0x41d   :  { %2963 = vst [vmem:[#allocation12 + $0x168] sm:$0xff] %v6019_v13  ;;  %v6021_v39 = vadd.f32 %v2875_v8, %v8695_v2 }
 0x41e   :  { %2964 = vst [vmem:[#allocation12 + $0x170] sm:$0xff] %v6020_v27  ;;  %v8801_v3 = vpack.c.bf16 %v6020_v27, %v6018_v25 }
 0x41f   :  { %2965 = vst [vmem:[#allocation12 + $0x178] sm:$0xff] %v6021_v39  ;;  %v6655_v39 = vld [vmem:[#allocation8 + $0x38] ss:$20 sps:$4 sm:$0xff]  }
 0x420   :  { %3424 = vmatmul.mubr.bf16.gmra.mrb[252].mxu0 %v8801_v3 }
 0x421   :  { %v2879_v9 = vpop.f32.mrb[32].mxu1  ;;  %3433 = vmatprep.mubr.bf16.mxu0 %v7643_v21 }
 0x422   :  { %v6022_v5 = vadd.f32 %v2879_v9, %v8692_v44  ;;  %v2881_v60 = vpop.f32.mrb[33].mxu1  ;;  %v6676_v9 = vld [vmem:[#allocation8 + $0xb0] ss:$20 sps:$4 sm:$0xff]  }
 0x423   :  { %v6023_v61 = vadd.f32 %v2881_v60, %v8695_v2  ;;  %v2883_v26 = vpop.f32.mrb[34].mxu1 }
 0x424   :  { %2966 = vst [vmem:[#allocation12 + $0x180] sm:$0xff] %v6022_v5  ;;  %v6024_v35 = vadd.f32 %v2883_v26, %v8692_v44  ;;  %v2885_v30 = vpop.f32.mrb[35].mxu1 }
 0x425   :  { %2967 = vst [vmem:[#allocation12 + $0x188] sm:$0xff] %v6023_v61  ;;  %v6025_v47 = vadd.f32 %v2885_v30, %v8695_v2 }
 0x426   :  { %2968 = vst [vmem:[#allocation12 + $0x190] sm:$0xff] %v6024_v35  ;;  %v8809_v53 = vpack.c.bf16 %v6024_v35, %v6022_v5  ;;  %v8861_v5 = vld [vmem:[%s9221_s6] sm:$0x1f] }
 0x427   :  { %2969 = vst [vmem:[#allocation12 + $0x198] sm:$0xff] %v6025_v47  ;;  %v8866_v60 = vrot.slane %v8861_v5, %v9392_v11  ;;  %v8870_v61 = vrot.slane %v8861_v5, %v9393_v12 }
 0x428   :  { %3434 = vmatmul.mubr.bf16.gmra.mrb[0].mxu0 %v8809_v53 }
 0x429   :  { %v2889_v46 = vpop.f32.mrb[36].mxu1  ;;  %3443 = vmatprep.mubr.bf16.mxu0 %v7643_v21 }
 0x42a   :  { %v6026_v41 = vadd.f32 %v2889_v46, %v8692_v44  ;;  %v2891_v45 = vpop.f32.mrb[37].mxu1 }
 0x42b   :  { %v6027_v32 = vadd.f32 %v2891_v45, %v8695_v2  ;;  %v2893_v55 = vpop.f32.mrb[38].mxu1 }
 0x42c   :  { %2970 = vst [vmem:[#allocation12 + $0x1a0] sm:$0xff] %v6026_v41  ;;  %v6028_v56 = vadd.f32 %v2893_v55, %v8692_v44  ;;  %v2895_v19 = vpop.f32.mrb[39].mxu1 }
 0x42d   :  { %2971 = vst [vmem:[#allocation12 + $0x1a8] sm:$0xff] %v6027_v32  ;;  %v6029_v4 = vadd.f32 %v2895_v19, %v8695_v2 }
 0x42e   :  { %2972 = vst [vmem:[#allocation12 + $0x1b0] sm:$0xff] %v6028_v56  ;;  %v8817_v58 = vpack.c.bf16 %v6028_v56, %v6026_v41 }
 0x42f   :  { %2973 = vst [vmem:[#allocation12 + $0x1b8] sm:$0xff] %v6029_v4 }
 0x430   :  { %3444 = vmatmul.mubr.bf16.gmra.mrb[4].mxu0 %v8817_v58 }
 0x431   :  { %v2899_v38 = vpop.f32.mrb[40].mxu1  ;;  %3453 = vmatprep.mubr.bf16.mxu0 %v7643_v21 }
 0x432   :  { %v6030_v24 = vadd.f32 %v2899_v38, %v8692_v44  ;;  %v2901_v1 = vpop.f32.mrb[41].mxu1 }
 0x433   :  { %v6031_v40 = vadd.f32 %v2901_v1, %v8695_v2  ;;  %v2903_v18 = vpop.f32.mrb[42].mxu1 }
 0x434   :  { %2974 = vst [vmem:[#allocation12 + $0x1c0] sm:$0xff] %v6030_v24  ;;  %v6032_v14 = vadd.f32 %v2903_v18, %v8692_v44  ;;  %v2905_v20 = vpop.f32.mrb[43].mxu1 }
 0x435   :  { %2975 = vst [vmem:[#allocation12 + $0x1c8] sm:$0xff] %v6031_v40  ;;  %v6033_v6 = vadd.f32 %v2905_v20, %v8695_v2 }
 0x436   :  { %2976 = vst [vmem:[#allocation12 + $0x1d0] sm:$0xff] %v6032_v14  ;;  %v8825_v62 = vpack.c.bf16 %v6032_v14, %v6030_v24 }
 0x437   :  { %2977 = vst [vmem:[#allocation12 + $0x1d8] sm:$0xff] %v6033_v6 }
 0x438   :  { %3454 = vmatmul.mubr.bf16.gmra.mrb[8].mxu0 %v8825_v62 }
 0x439   :  { %v2909_v59 = vpop.f32.mrb[44].mxu1  ;;  %3463 = vmatprep.mubr.bf16.mxu0 %v7643_v21 }
 0x43a   :  { %v6034_v36 = vadd.f32 %v2909_v59, %v8692_v44  ;;  %v2911_v10 = vpop.f32.mrb[45].mxu1 }
 0x43b   :  { %v6035_v25 = vadd.f32 %v2911_v10, %v8695_v2  ;;  %v2913_v51 = vpop.f32.mrb[46].mxu1  ;;  %v6691_v10 = vld [vmem:[#allocation10 + $0x100] ss:$8 sps:$4 sm:$0xff]  }
 0x43c   :  { %2978 = vst [vmem:[#allocation12 + $0x1e0] sm:$0xff] %v6034_v36  ;;  %v6036_v13 = vadd.f32 %v2913_v51, %v8692_v44  ;;  %v2915_v7 = vpop.f32.mrb[47].mxu1  ;;  %v6662_v44 = vld [vmem:[#allocation8 + $0x60] ss:$20 sps:$4 sm:$0xff]  }
 0x43d   :  { %2979 = vst [vmem:[#allocation12 + $0x1e8] sm:$0xff] %v6035_v25  ;;  %v6037_v27 = vadd.f32 %v2915_v7, %v8695_v2  ;;  %v6669_v2 = vld [vmem:[#allocation8 + $0x88] ss:$20 sps:$4 sm:$0xff]  }
 0x43e   :  { %2980 = vst [vmem:[#allocation12 + $0x1f0] sm:$0xff] %v6036_v13  ;;  %v8833_v8 = vpack.c.bf16 %v6036_v13, %v6034_v36  ;;  %v6696_v13 = vld [vmem:[#allocation10 + $0x114] ss:$8 sps:$4 sm:$0xff]  }
 0x43f   :  { %2981 = vst [vmem:[#allocation12 + $0x1f8] sm:$0xff] %v6037_v27 }
 0x440   :  { %3464 = vmatmul.mubr.bf16.gmra.mrb[12].mxu0 %v8833_v8 }
 0x441   :  { %3506 = vmatprep.mubr.bf16.mxu0 %v7643_v21 }
 0x448   :  { %3507 = vmatmul.mubr.bf16.vlgmr.msra.gmra.mrb[16].mxu0 %v8701_v43 }
 0x449   :  { %5879 = vmatpush3.bf16.msra.mxu0 %v8739_v33  ;;  %3516 = vmatprep.mubr.bf16.mxu0 %v7643_v21  ;;  %v6690_v33 = vld [vmem:[#allocation8 + $0x100] ss:$20 sps:$4 sm:$0xff]  }
 0x44a   :  { %5880 = vmatprep.subr.bf16.mxu0 %v6655_v39 }
 0x44d   :  { %5881 = vmatpush3.bf16.msra.mxu0 %v6655_v39 }
 0x44e   :  { %5882 = vmatprep.subr.bf16.mxu0 %v6662_v44 }
 0x450   :  { %3517 = vmatmul.mubr.bf16.gmra.mrb[20].mxu0 %v8710_v22 }
 0x451   :  { %3526 = vmatprep.mubr.bf16.mxu0 %v7643_v21  ;;  %5883 = vmatpush3.bf16.msra.mxu0 %v6662_v44 }
 0x452   :  { %5884 = vmatprep.subr.bf16.mxu0 %v6669_v2 }
 0x455   :  { %5885 = vmatpush3.bf16.msra.mxu0 %v6669_v2  ;;  %v6694_v2 = vld [vmem:[#allocation10 + $0x110] ss:$8 sps:$4 sm:$0xff]  }
 0x456   :  { %5886 = vmatprep.subr.bf16.mxu0 %v6676_v9 }
 0x458   :  { %3527 = vmatmul.mubr.bf16.gmra.mrb[24].mxu0 %v8722_v49 }
 0x459   :  { %3536 = vmatprep.mubr.bf16.mxu0 %v7643_v21  ;;  %5887 = vmatpush3.bf16.msra.mxu0 %v6676_v9 }
 0x45a   :  { %5888 = vmatprep.subr.bf16.mxu0 %v6683_v31 }
 0x45d   :  { %5889 = vmatpush3.bf16.msra.mxu0 %v6683_v31  ;;  %v6700_v31 = vld [vmem:[#allocation10 + $0x124] ss:$8 sps:$4 sm:$0xff]  }
 0x45e   :  { %5890 = vmatprep.subr.bf16.mxu0 %v6690_v33 }
 0x460   :  { %3537 = vmatmul.mubr.bf16.gmra.mrb[28].mxu0 %v8734_v29 }
 0x461   :  { %3546 = vmatprep.mubr.bf16.mxu0 %v7643_v21  ;;  %5891 = vmatpush3.bf16.msra.mxu0 %v6690_v33 }
 0x462   :  { %5892 = vmatprep.subr.bf16.mxu0 %v6697_v52 }
 0x465   :  { %5893 = vmatpush3.bf16.msra.mxu0 %v6697_v52 }
 0x468   :  { %3547 = vmatmul.mubr.bf16.gmra.mrb[32].mxu0 %v8744_v48 }
 0x469   :  { %3556 = vmatprep.mubr.bf16.mxu0 %v7643_v21 }
 0x470   :  { %3557 = vmatmul.mubr.bf16.gmra.mrb[36].mxu0 %v8753_v17 }
 0x471   :  { %3566 = vmatprep.mubr.bf16.mxu0 %v7643_v21 }
 0x478   :  { %3567 = vmatmul.mubr.bf16.gmra.mrb[40].mxu0 %v8761_v50 }
 0x479   :  { %3576 = vmatprep.mubr.bf16.mxu0 %v7643_v21 }
 0x480   :  { %3577 = vmatmul.mubr.bf16.gmra.mrb[44].mxu0 %v8769_v54 }
 0x481   :  { %3586 = vmatprep.mubr.bf16.mxu0 %v7643_v21 }
 0x488   :  { %3587 = vmatmul.mubr.bf16.gmra.mrb[48].mxu0 %v8777_v42 }
 0x489   :  { %3596 = vmatprep.mubr.bf16.mxu0 %v7643_v21 }
 0x490   :  { %3597 = vmatmul.mubr.bf16.gmra.mrb[52].mxu0 %v8785_v0 }
 0x491   :  { %3606 = vmatprep.mubr.bf16.mxu0 %v7643_v21 }
 0x498   :  { %3607 = vmatmul.mubr.bf16.gmra.mrb[56].mxu0 %v8793_v34 }
 0x499   :  { %3616 = vmatprep.mubr.bf16.mxu0 %v7643_v21 }
 0x49b   :  { %v3315_v26 = vpop.f32.mrb[208].mxu0 }
 0x49c   :  { %v3316_v35 = vadd.f32 %v3315_v26, %v8866_v60  ;;  %v3317_v30 = vpop.f32.mrb[209].mxu0 }
 0x49d   :  { %v3318_v47 = vadd.f32 %v3317_v30, %v8870_v61  ;;  %v3319_v46 = vpop.f32.mrb[210].mxu0 }
 0x49e   :  { %7148 = vtanh.f32 %v3316_v35  ;;  %v3320_v16 = vadd.f32 %v3319_v46, %v8866_v60  ;;  %v3321_v23 = vpop.f32.mrb[211].mxu0 }
 0x49f   :  { %7150 = vtanh.f32 %v3318_v47  ;;  %v3322_v41 = vadd.f32 %v3321_v23, %v8870_v61 }
 0x4a0   :  { %7152 = vtanh.f32 %v3320_v16  ;;  %3617 = vmatmul.mubr.bf16.gmra.mrb[60].mxu0 %v8801_v3  ;;  %v6698_v16 = vld [vmem:[#allocation10 + $0x120] ss:$8 sps:$4 sm:$0xff]  }
 0x4a1   :  { %7154 = vtanh.f32 %v3322_v41  ;;  %3626 = vmatprep.mubr.bf16.mxu0 %v7643_v21 }
 0x4a3   :  { %v3325_v45 = vpop.f32.mrb[212].mxu0 }
 0x4a4   :  { %v3326_v32 = vadd.f32 %v3325_v45, %v8866_v60  ;;  %v3327_v55 = vpop.f32.mrb[213].mxu0  ;;  %v6703_v45 = vld [vmem:[#allocation10 + $0x134] ss:$8 sps:$4 sm:$0xff]  }
 0x4a5   :  { %v3328_v56 = vadd.f32 %v3327_v55, %v8870_v61  ;;  %v3329_v19 = vpop.f32.mrb[214].mxu0 }
 0x4a6   :  { %7156 = vtanh.f32 %v3326_v32  ;;  %v3330_v4 = vadd.f32 %v3329_v19, %v8866_v60  ;;  %v3331_v38 = vpop.f32.mrb[215].mxu0 }
 0x4a7   :  { %7158 = vtanh.f32 %v3328_v56  ;;  %v3332_v37 = vadd.f32 %v3331_v38, %v8870_v61 }
 0x4a8   :  { %v7149_v24 = vpop.eup %7148  ;;  %7160 = vtanh.f32 %v3330_v4  ;;  %3627 = vmatmul.mubr.bf16.gmra.mrb[64].mxu0 %v8809_v53  ;;  %v6701_v4 = vld [vmem:[#allocation10 + $0x130] ss:$8 sps:$4 sm:$0xff]  }
 0x4a9   :  { %v7151_v1 = vpop.eup %7150  ;;  %7162 = vtanh.f32 %v3332_v37  ;;  %3636 = vmatprep.mubr.bf16.mxu0 %v7643_v21  ;;  %v6706_v37 = vld [vmem:[#allocation10 + $0x144] ss:$8 sps:$4 sm:$0xff]  }
 0x4aa   :  { %v7153_v40 = vpop.eup %7152 }
 0x4ab   :  { %v7155_v18 = vpop.eup %7154  ;;  %v3335_v14 = vpop.f32.mrb[216].mxu0  ;;  %v3988_v20 = vpack.c.bf16 %v7153_v40, %v7149_v24 }
 0x4ac   :  { %v3336_v6 = vadd.f32 %v3335_v14, %v8866_v60  ;;  %v3337_v59 = vpop.f32.mrb[217].mxu0  ;;  %v3989_v36 = vpack.c.bf16 %v7155_v18, %v7151_v1 }
 0x4ad   :  { %v3338_v25 = vadd.f32 %v3337_v59, %v8870_v61  ;;  %v3339_v51 = vpop.f32.mrb[218].mxu0  ;;  %v6704_v59 = vld [vmem:[#allocation10 + $0x140] ss:$8 sps:$4 sm:$0xff]  }
 0x4ae   :  { %7164 = vtanh.f32 %v3336_v6  ;;  %v3340_v7 = vadd.f32 %v3339_v51, %v8866_v60  ;;  %v3341_v27 = vpop.f32.mrb[219].mxu0  ;;  %4592 = vmatprep.mubr.bf16.mxu1 %v3989_v36 }
 0x4af   :  { %7166 = vtanh.f32 %v3338_v25  ;;  %v3342_v39 = vadd.f32 %v3341_v27, %v8870_v61  ;;  %4593 = vmatmul.mubr.bf16.vlgmr.msra.gmra.mrb[64].mxu1 %v3988_v20  ;;  %v6709_v25 = vld [vmem:[#allocation10 + $0x154] ss:$8 sps:$4 sm:$0xff]  }
 0x4b0   :  { %v7157_v44 = vpop.eup %7156  ;;  %7168 = vtanh.f32 %v3340_v7  ;;  %4754 = vmatpush1.bf16.msra.mxu1 %v6691_v10  ;;  %3637 = vmatmul.mubr.bf16.gmra.mrb[68].mxu0 %v8817_v58 }
 0x4b1   :  { %v7159_v9 = vpop.eup %7158  ;;  %7170 = vtanh.f32 %v3342_v39  ;;  %4755 = vmatprep.subr.bf16.mxu1 %v6696_v13  ;;  %3646 = vmatprep.mubr.bf16.mxu0 %v7643_v21  ;;  %v6707_v39 = vld [vmem:[#allocation10 + $0x150] ss:$8 sps:$4 sm:$0xff]  }
 0x4b2   :  { %v7161_v33 = vpop.eup %7160 }
 0x4b3   :  { %v7163_v52 = vpop.eup %7162  ;;  %v3345_v26 = vpop.f32.mrb[220].mxu0  ;;  %v3993_v35 = vpack.c.bf16 %v7161_v33, %v7157_v44 }
 0x4b4   :  { %v3346_v30 = vadd.f32 %v3345_v26, %v8866_v60  ;;  %v3347_v47 = vpop.f32.mrb[221].mxu0  ;;  %v3994_v46 = vpack.c.bf16 %v7163_v52, %v7159_v9  ;;  %4756 = vmatpush1.bf16.msra.mxu1 %v6694_v2  ;;  %v6712_v2 = vld [vmem:[#allocation10 + $0x164] ss:$8 sps:$4 sm:$0xff]  }
 0x4b5   :  { %v3348_v23 = vadd.f32 %v3347_v47, %v8870_v61  ;;  %v3349_v41 = vpop.f32.mrb[222].mxu0  ;;  %4757 = vmatprep.subr.bf16.mxu1 %v6700_v31  ;;  %v6710_v47 = vld [vmem:[#allocation10 + $0x160] ss:$8 sps:$4 sm:$0xff]  }
 0x4b6   :  { %7172 = vtanh.f32 %v3346_v30  ;;  %v3350_v32 = vadd.f32 %v3349_v41, %v8866_v60  ;;  %v3351_v55 = vpop.f32.mrb[223].mxu0  ;;  %4602 = vmatprep.mubr.bf16.mxu1 %v3994_v46 }
 0x4b7   :  { %7174 = vtanh.f32 %v3348_v23  ;;  %v3352_v56 = vadd.f32 %v3351_v55, %v8870_v61  ;;  %4603 = vmatmul.mubr.bf16.gmra.mrb[68].mxu1 %v3993_v35  ;;  %v6715_v23 = vld [vmem:[#allocation10 + $0x174] ss:$8 sps:$4 sm:$0xff]   ;;  %v6713_v55 = vld [vmem:[#allocation10 + $0x170] ss:$8 sps:$4 sm:$0xff]  }
 0x4b8   :  { %v7165_v19 = vpop.eup %7164  ;;  %7176 = vtanh.f32 %v3350_v32  ;;  %3647 = vmatmul.mubr.bf16.gmra.mrb[72].mxu0 %v8825_v62  ;;  %4758 = vmatpush1.bf16.msra.mxu1 %v6698_v16 }
 0x4b9   :  { %v7167_v38 = vpop.eup %7166  ;;  %7178 = vtanh.f32 %v3352_v56  ;;  %3656 = vmatprep.mubr.bf16.mxu0 %v7643_v21  ;;  %4759 = vmatprep.subr.bf16.mxu1 %v6703_v45 }
 0x4ba   :  { %v7169_v24 = vpop.eup %7168 }
 0x4bb   :  { %v7171_v1 = vpop.eup %7170  ;;  %v3355_v40 = vpop.f32.mrb[224].mxu0  ;;  %v3998_v18 = vpack.c.bf16 %v7169_v24, %v7165_v19  ;;  %v6718_v19 = vld [vmem:[#allocation10 + $0x184] ss:$8 sps:$4 sm:$0xff]  }
 0x4bc   :  { %v3356_v14 = vadd.f32 %v3355_v40, %v8866_v60  ;;  %v3357_v20 = vpop.f32.mrb[225].mxu0  ;;  %v3999_v6 = vpack.c.bf16 %v7171_v1, %v7167_v38  ;;  %4760 = vmatpush1.bf16.msra.mxu1 %v6701_v4 }
 0x4bd   :  { %v3358_v36 = vadd.f32 %v3357_v20, %v8870_v61  ;;  %v3359_v10 = vpop.f32.mrb[226].mxu0  ;;  %4761 = vmatprep.subr.bf16.mxu1 %v6706_v37 }
 0x4be   :  { %7180 = vtanh.f32 %v3356_v14  ;;  %v3360_v51 = vadd.f32 %v3359_v10, %v8866_v60  ;;  %v3361_v13 = vpop.f32.mrb[227].mxu0  ;;  %4612 = vmatprep.mubr.bf16.mxu1 %v3999_v6  ;;  %v6716_v14 = vld [vmem:[#allocation10 + $0x180] ss:$8 sps:$4 sm:$0xff]   ;;  %v6721_v6 = vld [vmem:[#allocation10 + $0x194] ss:$8 sps:$4 sm:$0xff]  }
 0x4bf   :  { %7182 = vtanh.f32 %v3358_v36  ;;  %v3362_v7 = vadd.f32 %v3361_v13, %v8870_v61  ;;  %4613 = vmatmul.mubr.bf16.gmra.mrb[72].mxu1 %v3998_v18  ;;  %v6724_v13 = vld [vmem:[#allocation10 + $0x1a4] ss:$8 sps:$4 sm:$0xff]  }
 0x4c0   :  { %v7173_v27 = vpop.eup %7172  ;;  %7184 = vtanh.f32 %v3360_v51  ;;  %3657 = vmatmul.mubr.bf16.gmra.mrb[76].mxu0 %v8833_v8  ;;  %4762 = vmatpush1.bf16.msra.mxu1 %v6704_v59 }
 0x4c1   :  { %v7175_v44 = vpop.eup %7174  ;;  %7186 = vtanh.f32 %v3362_v7  ;;  %5894 = vmatprep.mubr.bf16.mxu0 %v8701_v43  ;;  %4763 = vmatprep.subr.bf16.mxu1 %v6709_v25  ;;  %v6719_v25 = vld [vmem:[#allocation10 + $0x190] ss:$8 sps:$4 sm:$0xff]  }
 0x4c2   :  { %v7177_v9 = vpop.eup %7176 }
 0x4c3   :  { %v7179_v31 = vpop.eup %7178  ;;  %v3365_v33 = vpop.f32.mrb[228].mxu0  ;;  %v4003_v52 = vpack.c.bf16 %v7177_v9, %v7173_v27 }
 0x4c4   :  { %v3366_v26 = vadd.f32 %v3365_v33, %v8866_v60  ;;  %v3367_v35 = vpop.f32.mrb[229].mxu0  ;;  %v4004_v30 = vpack.c.bf16 %v7179_v31, %v7175_v44  ;;  %4764 = vmatpush1.bf16.msra.mxu1 %v6707_v39  ;;  %v6722_v33 = vld [vmem:[#allocation10 + $0x1a0] ss:$8 sps:$4 sm:$0xff]  }
 0x4c5   :  { %v3368_v46 = vadd.f32 %v3367_v35, %v8870_v61  ;;  %v3369_v16 = vpop.f32.mrb[230].mxu0  ;;  %4765 = vmatprep.subr.bf16.mxu1 %v6712_v2 }
 0x4c6   :  { %7188 = vtanh.f32 %v3366_v26  ;;  %v3370_v43 = vadd.f32 %v3369_v16, %v8866_v60  ;;  %v3371_v41 = vpop.f32.mrb[231].mxu0  ;;  %4622 = vmatprep.mubr.bf16.mxu1 %v4004_v30  ;;  %v6727_v26 = vld [vmem:[#allocation10 + $0x1b4] ss:$8 sps:$4 sm:$0xff]  }
 0x4c7   :  { %7190 = vtanh.f32 %v3368_v46  ;;  %v3372_v45 = vadd.f32 %v3371_v41, %v8870_v61  ;;  %4623 = vmatmul.mubr.bf16.gmra.mrb[76].mxu1 %v4003_v52  ;;  %v6725_v46 = vld [vmem:[#allocation10 + $0x1b0] ss:$8 sps:$4 sm:$0xff]  }
 0x4c8   :  { %v7181_v32 = vpop.eup %7180  ;;  %7192 = vtanh.f32 %v3370_v43  ;;  %5895 = vmatmul.mubr.bf16.vlgmr.msra.gmra.mrb[80].mxu0 %v8710_v22  ;;  %4766 = vmatpush1.bf16.msra.mxu1 %v6710_v47 }
 0x4c9   :  { %v7183_v56 = vpop.eup %7182  ;;  %7194 = vtanh.f32 %v3372_v45  ;;  %5898 = vmatprep.mubr.bf16.mxu0 %v8722_v49  ;;  %4767 = vmatprep.subr.bf16.mxu1 %v6715_v23  ;;  %v6730_v23 = vld [vmem:[#allocation10 + $0x1c4] ss:$8 sps:$4 sm:$0xff]  }
 0x4ca   :  { %v7185_v4 = vpop.eup %7184 }
 0x4cb   :  { %v7187_v38 = vpop.eup %7186  ;;  %v3375_v37 = vpop.f32.mrb[232].mxu0  ;;  %v4008_v24 = vpack.c.bf16 %v7185_v4, %v7181_v32  ;;  %v6728_v4 = vld [vmem:[#allocation10 + $0x1c0] ss:$8 sps:$4 sm:$0xff]  }
 0x4cc   :  { %v3376_v1 = vadd.f32 %v3375_v37, %v8866_v60  ;;  %v3377_v40 = vpop.f32.mrb[233].mxu0  ;;  %v4009_v18 = vpack.c.bf16 %v7187_v38, %v7183_v56  ;;  %4768 = vmatpush1.bf16.msra.mxu1 %v6713_v55  ;;  %v6733_v37 = vld [vmem:[#allocation10 + $0x1d4] ss:$8 sps:$4 sm:$0xff]  }
 0x4cd   :  { %v3378_v22 = vadd.f32 %v3377_v40, %v8870_v61  ;;  %v3379_v20 = vpop.f32.mrb[234].mxu0  ;;  %4769 = vmatprep.subr.bf16.mxu1 %v6718_v19 }
 0x4ce   :  { %7196 = vtanh.f32 %v3376_v1  ;;  %v3380_v49 = vadd.f32 %v3379_v20, %v8866_v60  ;;  %v3381_v59 = vpop.f32.mrb[235].mxu0  ;;  %4632 = vmatprep.mubr.bf16.mxu1 %v4009_v18  ;;  %v6731_v18 = vld [vmem:[#allocation10 + $0x1d0] ss:$8 sps:$4 sm:$0xff]  }
 0x4cf   :  { %7198 = vtanh.f32 %v3378_v22  ;;  %v3382_v36 = vadd.f32 %v3381_v59, %v8870_v61  ;;  %4633 = vmatmul.mubr.bf16.gmra.mrb[80].mxu1 %v4008_v24  ;;  %v6736_v22 = vld [vmem:[#allocation10 + $0x1e4] ss:$8 sps:$4 sm:$0xff]  }
 0x4d0   :  { %v7189_v10 = vpop.eup %7188  ;;  %7200 = vtanh.f32 %v3380_v49  ;;  %5899 = vmatmul.mubr.bf16.gmra.mrb[84].mxu0 %v8734_v29  ;;  %4770 = vmatpush1.bf16.msra.mxu1 %v6716_v14 }
 0x4d1   :  { %v7191_v51 = vpop.eup %7190  ;;  %7202 = vtanh.f32 %v3382_v36  ;;  %5902 = vmatprep.mubr.bf16.mxu0 %v8744_v48  ;;  %4771 = vmatprep.subr.bf16.mxu1 %v6721_v6 }
 0x4d2   :  { %v7193_v7 = vpop.eup %7192 }
 0x4d3   :  { %v7195_v27 = vpop.eup %7194  ;;  %v3385_v39 = vpop.f32.mrb[236].mxu0  ;;  %v4013_v44 = vpack.c.bf16 %v7193_v7, %v7189_v10  ;;  %v6739_v7 = vld [vmem:[#allocation10 + $0x1f4] ss:$8 sps:$4 sm:$0xff]  }
 0x4d4   :  { %v3386_v2 = vadd.f32 %v3385_v39, %v8866_v60  ;;  %v3387_v9 = vpop.f32.mrb[237].mxu0  ;;  %v4014_v31 = vpack.c.bf16 %v7195_v27, %v7191_v51  ;;  %4772 = vmatpush1.bf16.msra.mxu1 %v6719_v25  ;;  %v6734_v51 = vld [vmem:[#allocation10 + $0x1e0] ss:$8 sps:$4 sm:$0xff]  }
 0x4d5   :  { %v3388_v29 = vadd.f32 %v3387_v9, %v8870_v61  ;;  %v3389_v52 = vpop.f32.mrb[238].mxu0  ;;  %4773 = vmatprep.subr.bf16.mxu1 %v6724_v13 }
 0x4d6   :  { %7204 = vtanh.f32 %v3386_v2  ;;  %v3390_v48 = vadd.f32 %v3389_v52, %v8866_v60  ;;  %v3391_v35 = vpop.f32.mrb[239].mxu0  ;;  %4642 = vmatprep.mubr.bf16.mxu1 %v4014_v31  ;;  %v6737_v2 = vld [vmem:[#allocation10 + $0x1f0] ss:$8 sps:$4 sm:$0xff]   ;;  %v6742_v31 = vld [vmem:[#allocation10 + $0x204] ss:$8 sps:$4 sm:$0xff]  }
 0x4d7   :  { %7206 = vtanh.f32 %v3388_v29  ;;  %v3392_v30 = vadd.f32 %v3391_v35, %v8870_v61  ;;  %4643 = vmatmul.mubr.bf16.gmra.mrb[84].mxu1 %v4013_v44 }
 0x4d8   :  { %v7197_v47 = vpop.eup %7196  ;;  %7208 = vtanh.f32 %v3390_v48  ;;  %5903 = vmatmul.mubr.bf16.gmra.mrb[88].mxu0 %v8753_v17  ;;  %4774 = vmatpush1.bf16.msra.mxu1 %v6722_v33 }
 0x4d9   :  { %v7199_v16 = vpop.eup %7198  ;;  %7210 = vtanh.f32 %v3392_v30  ;;  %5906 = vmatprep.mubr.bf16.mxu0 %v8761_v50  ;;  %4775 = vmatprep.subr.bf16.mxu1 %v6727_v26 }
 0x4da   :  { %v7201_v43 = vpop.eup %7200 }
 0x4db   :  { %v7203_v41 = vpop.eup %7202  ;;  %v3395_v45 = vpop.f32.mrb[240].mxu0  ;;  %v4018_v32 = vpack.c.bf16 %v7201_v43, %v7197_v47 }
 0x4dc   :  { %v3396_v55 = vadd.f32 %v3395_v45, %v8866_v60  ;;  %v3397_v56 = vpop.f32.mrb[241].mxu0  ;;  %v4019_v19 = vpack.c.bf16 %v7203_v41, %v7199_v16  ;;  %4776 = vmatpush1.bf16.msra.mxu1 %v6725_v46 }
 0x4dd   :  { %v3398_v17 = vadd.f32 %v3397_v56, %v8870_v61  ;;  %v3399_v38 = vpop.f32.mrb[242].mxu0  ;;  %4777 = vmatprep.subr.bf16.mxu1 %v6730_v23 }
 0x4de   :  { %7212 = vtanh.f32 %v3396_v55  ;;  %v3400_v50 = vadd.f32 %v3399_v38, %v8866_v60  ;;  %v3401_v24 = vpop.f32.mrb[243].mxu0  ;;  %4652 = vmatprep.mubr.bf16.mxu1 %v4019_v19 }
 0x4df   :  { %7214 = vtanh.f32 %v3398_v17  ;;  %v3402_v1 = vadd.f32 %v3401_v24, %v8870_v61  ;;  %4653 = vmatmul.mubr.bf16.gmra.mrb[88].mxu1 %v4018_v32 }
 0x4e0   :  { %v7205_v40 = vpop.eup %7204  ;;  %7216 = vtanh.f32 %v3400_v50  ;;  %5907 = vmatmul.mubr.bf16.gmra.mrb[92].mxu0 %v8769_v54  ;;  %4778 = vmatpush1.bf16.msra.mxu1 %v6728_v4 }
 0x4e1   :  { %v7207_v14 = vpop.eup %7206  ;;  %7218 = vtanh.f32 %v3402_v1  ;;  %5910 = vmatprep.mubr.bf16.mxu0 %v8777_v42  ;;  %4779 = vmatprep.subr.bf16.mxu1 %v6733_v37 }
 0x4e2   :  { %v7209_v20 = vpop.eup %7208 }
 0x4e3   :  { %v7211_v6 = vpop.eup %7210  ;;  %v3405_v49 = vpop.f32.mrb[244].mxu0  ;;  %v4023_v59 = vpack.c.bf16 %v7209_v20, %v7205_v40 }
 0x4e4   :  { %v3406_v36 = vadd.f32 %v3405_v49, %v8866_v60  ;;  %v3407_v10 = vpop.f32.mrb[245].mxu0  ;;  %v4024_v25 = vpack.c.bf16 %v7211_v6, %v7207_v14  ;;  %4780 = vmatpush1.bf16.msra.mxu1 %v6731_v18 }
 0x4e5   :  { %v3408_v54 = vadd.f32 %v3407_v10, %v8870_v61  ;;  %v3409_v13 = vpop.f32.mrb[246].mxu0  ;;  %4781 = vmatprep.subr.bf16.mxu1 %v6736_v22 }
 0x4e6   :  { %7220 = vtanh.f32 %v3406_v36  ;;  %v3410_v42 = vadd.f32 %v3409_v13, %v8866_v60  ;;  %v3411_v27 = vpop.f32.mrb[247].mxu0  ;;  %4662 = vmatprep.mubr.bf16.mxu1 %v4024_v25 }
 0x4e7   :  { %7222 = vtanh.f32 %v3408_v54  ;;  %v3412_v39 = vadd.f32 %v3411_v27, %v8870_v61  ;;  %4663 = vmatmul.mubr.bf16.gmra.mrb[92].mxu1 %v4023_v59 }
 0x4e8   :  { %v7213_v44 = vpop.eup %7212  ;;  %7224 = vtanh.f32 %v3410_v42  ;;  %5911 = vmatmul.mubr.bf16.gmra.mrb[96].mxu0 %v8785_v0  ;;  %4782 = vmatpush1.bf16.msra.mxu1 %v6734_v51 }
 0x4e9   :  { %v7215_v9 = vpop.eup %7214  ;;  %7226 = vtanh.f32 %v3412_v39  ;;  %5914 = vmatprep.mubr.bf16.mxu0 %v8793_v34  ;;  %4783 = vmatprep.subr.bf16.mxu1 %v6739_v7 }
 0x4ea   :  { %v7217_v33 = vpop.eup %7216 }
 0x4eb   :  { %v7219_v29 = vpop.eup %7218  ;;  %v3415_v52 = vpop.f32.mrb[248].mxu0  ;;  %v4028_v26 = vpack.c.bf16 %v7217_v33, %v7213_v44 }
 0x4ec   :  { %v3416_v48 = vadd.f32 %v3415_v52, %v8866_v60  ;;  %v3417_v35 = vpop.f32.mrb[249].mxu0  ;;  %v4029_v30 = vpack.c.bf16 %v7219_v29, %v7215_v9  ;;  %4784 = vmatpush1.bf16.msra.mxu1 %v6737_v2 }
 0x4ed   :  { %v3418_v47 = vadd.f32 %v3417_v35, %v8870_v61  ;;  %v3419_v0 = vpop.f32.mrb[250].mxu0  ;;  %4946 = vmatprep.subr.bf16.mxu1 %v6742_v31 }
 0x4ee   :  { %7228 = vtanh.f32 %v3416_v48  ;;  %v3420_v46 = vadd.f32 %v3419_v0, %v8866_v60  ;;  %v3421_v16 = vpop.f32.mrb[251].mxu0  ;;  %4672 = vmatprep.mubr.bf16.mxu1 %v4029_v30 }
 0x4ef   :  { %7230 = vtanh.f32 %v3418_v47  ;;  %v3422_v34 = vadd.f32 %v3421_v16, %v8870_v61  ;;  %4673 = vmatmul.mubr.bf16.gmra.mrb[96].mxu1 %v4028_v26 }
 0x4f0   :  { %v7221_v23 = vpop.eup %7220  ;;  %7232 = vtanh.f32 %v3420_v46  ;;  %5915 = vmatmul.mubr.bf16.gmra.mrb[100].mxu0 %v8801_v3 }
 0x4f1   :  { %v7223_v43 = vpop.eup %7222  ;;  %7234 = vtanh.f32 %v3422_v34  ;;  %5918 = vmatprep.mubr.bf16.mxu0 %v8809_v53 }
 0x4f2   :  { %v7225_v41 = vpop.eup %7224 }
 0x4f3   :  { %v7227_v45 = vpop.eup %7226  ;;  %v3425_v32 = vpop.f32.mrb[252].mxu0  ;;  %v4033_v55 = vpack.c.bf16 %v7225_v41, %v7221_v23 }
 0x4f4   :  { %v3426_v56 = vadd.f32 %v3425_v32, %v8866_v60  ;;  %v3427_v19 = vpop.f32.mrb[253].mxu0  ;;  %v4034_v4 = vpack.c.bf16 %v7227_v45, %v7223_v43 }
 0x4f5   :  { %v3428_v17 = vadd.f32 %v3427_v19, %v8870_v61  ;;  %v3429_v38 = vpop.f32.mrb[254].mxu0 }
 0x4f6   :  { %7236 = vtanh.f32 %v3426_v56  ;;  %v3430_v37 = vadd.f32 %v3429_v38, %v8866_v60  ;;  %v3431_v50 = vpop.f32.mrb[255].mxu0  ;;  %4682 = vmatprep.mubr.bf16.mxu1 %v4034_v4 }
 0x4f7   :  { %7238 = vtanh.f32 %v3428_v17  ;;  %v3432_v3 = vadd.f32 %v3431_v50, %v8870_v61  ;;  %4683 = vmatmul.mubr.bf16.gmra.mrb[100].mxu1 %v4033_v55 }
 0x4f8   :  { %v7229_v53 = vpop.eup %7228  ;;  %7240 = vtanh.f32 %v3430_v37  ;;  %5919 = vmatmul.mubr.bf16.gmra.mrb[104].mxu0 %v8817_v58 }
 0x4f9   :  { %v7231_v24 = vpop.eup %7230  ;;  %7242 = vtanh.f32 %v3432_v3  ;;  %5922 = vmatprep.mubr.bf16.mxu0 %v8825_v62 }
 0x4fa   :  { %v7233_v1 = vpop.eup %7232 }
 0x4fb   :  { %v7235_v40 = vpop.eup %7234  ;;  %v3435_v18 = vpop.f32.mrb[0].mxu0  ;;  %v4038_v14 = vpack.c.bf16 %v7233_v1, %v7229_v53 }
 0x4fc   :  { %v3436_v22 = vadd.f32 %v3435_v18, %v8866_v60  ;;  %v3437_v20 = vpop.f32.mrb[1].mxu0  ;;  %v4039_v6 = vpack.c.bf16 %v7235_v40, %v7231_v24  ;;  %v8965_v40 = vrot.slane %v8861_v5, %v629_v57 }
 0x4fd   :  { %v3438_v49 = vadd.f32 %v3437_v20, %v8870_v61  ;;  %v3439_v59 = vpop.f32.mrb[2].mxu0 }
 0x4fe   :  { %7244 = vtanh.f32 %v3436_v22  ;;  %v3440_v36 = vadd.f32 %v3439_v59, %v8866_v60  ;;  %v3441_v10 = vpop.f32.mrb[3].mxu0  ;;  %4692 = vmatprep.mubr.bf16.mxu1 %v4039_v6 }
 0x4ff   :  { %7246 = vtanh.f32 %v3438_v49  ;;  %v3442_v58 = vadd.f32 %v3441_v10, %v8870_v61  ;;  %4693 = vmatmul.mubr.bf16.gmra.mrb[104].mxu1 %v4038_v14  ;;  %v8970_v14 = vrot.slane %v8861_v5, %v633_v15 }
 0x500   :  { %v7237_v62 = vpop.eup %7236  ;;  %7248 = vtanh.f32 %v3440_v36  ;;  %5923 = vmatmul.mubr.bf16.gmra.mrb[108].mxu0 %v8833_v8 }
 0x501   :  { %v7239_v25 = vpop.eup %7238  ;;  %7250 = vtanh.f32 %v3442_v58 }
 0x502   :  { %v7241_v51 = vpop.eup %7240 }
 0x503   :  { %v7243_v54 = vpop.eup %7242  ;;  %v3445_v13 = vpop.f32.mrb[4].mxu0  ;;  %v4043_v7 = vpack.c.bf16 %v7241_v51, %v7237_v62 }
 0x504   :  { %v3446_v42 = vadd.f32 %v3445_v13, %v8866_v60  ;;  %v3447_v27 = vpop.f32.mrb[5].mxu0  ;;  %v4044_v39 = vpack.c.bf16 %v7243_v54, %v7239_v25 }
 0x505   :  { %v3448_v44 = vadd.f32 %v3447_v27, %v8870_v61  ;;  %v3449_v2 = vpop.f32.mrb[6].mxu0 }
 0x506   :  { %7252 = vtanh.f32 %v3446_v42  ;;  %v3450_v9 = vadd.f32 %v3449_v2, %v8866_v60  ;;  %v3451_v31 = vpop.f32.mrb[7].mxu0  ;;  %4702 = vmatprep.mubr.bf16.mxu1 %v4044_v39 }
 0x507   :  { %7254 = vtanh.f32 %v3448_v44  ;;  %v3452_v8 = vadd.f32 %v3451_v31, %v8870_v61  ;;  %4703 = vmatmul.mubr.bf16.gmra.mrb[108].mxu1 %v4043_v7 }
 0x508   :  { %v7245_v33 = vpop.eup %7244  ;;  %7256 = vtanh.f32 %v3450_v9 }
 0x509   :  { %v7247_v29 = vpop.eup %7246  ;;  %7258 = vtanh.f32 %v3452_v8 }
 0x50a   :  { %v7249_v52 = vpop.eup %7248 }
 0x50b   :  { %v7251_v26 = vpop.eup %7250  ;;  %v3455_v48 = vpop.f32.mrb[8].mxu0  ;;  %v4048_v35 = vpack.c.bf16 %v7249_v52, %v7245_v33 }
 0x50c   :  { %v3456_v30 = vadd.f32 %v3455_v48, %v8866_v60  ;;  %v3457_v47 = vpop.f32.mrb[9].mxu0  ;;  %v4049_v0 = vpack.c.bf16 %v7251_v26, %v7247_v29 }
 0x50d   :  { %v3458_v46 = vadd.f32 %v3457_v47, %v8870_v61  ;;  %v3459_v16 = vpop.f32.mrb[10].mxu0 }
 0x50e   :  { %7260 = vtanh.f32 %v3456_v30  ;;  %v3460_v34 = vadd.f32 %v3459_v16, %v8866_v60  ;;  %v3461_v23 = vpop.f32.mrb[11].mxu0  ;;  %4712 = vmatprep.mubr.bf16.mxu1 %v4049_v0  ;;  %v6740_v0 = vld [vmem:[#allocation10 + $0x200] ss:$8 sps:$4 sm:$0xff]  }
 0x50f   :  { %7262 = vtanh.f32 %v3458_v46  ;;  %v3462_v43 = vadd.f32 %v3461_v23, %v8870_v61  ;;  %4713 = vmatmul.mubr.bf16.gmra.mrb[112].mxu1 %v4048_v35 }
 0x510   :  { %v7253_v41 = vpop.eup %7252  ;;  %7264 = vtanh.f32 %v3460_v34  ;;  %v6745_v34 = vld [vmem:[#allocation10 + $0x214] ss:$8 sps:$4 sm:$0xff]  }
 0x511   :  { %v7255_v45 = vpop.eup %7254  ;;  %7266 = vtanh.f32 %v3462_v43 }
 0x512   :  { %v7257_v32 = vpop.eup %7256 }
 0x513   :  { %v7259_v55 = vpop.eup %7258  ;;  %v3465_v56 = vpop.f32.mrb[12].mxu0  ;;  %v4053_v19 = vpack.c.bf16 %v7257_v32, %v7253_v41  ;;  %v6743_v32 = vld [vmem:[#allocation10 + $0x210] ss:$8 sps:$4 sm:$0xff]  }
 0x514   :  { %v3466_v4 = vadd.f32 %v3465_v56, %v8866_v60  ;;  %v3467_v17 = vpop.f32.mrb[13].mxu0  ;;  %v4054_v38 = vpack.c.bf16 %v7259_v55, %v7255_v45  ;;  %v6748_v56 = vld [vmem:[#allocation10 + $0x224] ss:$8 sps:$4 sm:$0xff]  }
 0x515   :  { %v3468_v37 = vadd.f32 %v3467_v17, %v8870_v61  ;;  %v3469_v50 = vpop.f32.mrb[14].mxu0 }
 0x516   :  { %7268 = vtanh.f32 %v3466_v4  ;;  %v3470_v3 = vadd.f32 %v3469_v50, %v8866_v60  ;;  %v3471_v53 = vpop.f32.mrb[15].mxu0  ;;  %4722 = vmatprep.mubr.bf16.mxu1 %v4054_v38 }
 0x517   :  { %7270 = vtanh.f32 %v3468_v37  ;;  %v3472_v24 = vadd.f32 %v3471_v53, %v8870_v61  ;;  %4723 = vmatmul.mubr.bf16.gmra.mrb[116].mxu1 %v4053_v19  ;;  %v6746_v53 = vld [vmem:[#allocation10 + $0x220] ss:$8 sps:$4 sm:$0xff]  }
 0x518   :  { %v7261_v1 = vpop.eup %7260  ;;  %7272 = vtanh.f32 %v3470_v3 }
 0x519   :  { %v7263_v18 = vpop.eup %7262  ;;  %7274 = vtanh.f32 %v3472_v24 }
 0x51a   :  { %v7265_v60 = vpop.eup %7264 }
 0x51b   :  { %v7267_v22 = vpop.eup %7266  ;;  %v3508_v20 = vpop.f32.mrb[16].mxu0  ;;  %v4058_v6 = vpack.c.bf16 %v7265_v60, %v7261_v1 }
 0x51c   :  { %v3509_v61 = vadd.f32 %v3508_v20, %v8965_v40  ;;  %v3510_v49 = vpop.f32.mrb[17].mxu0  ;;  %v4059_v59 = vpack.c.bf16 %v7267_v22, %v7263_v18  ;;  %v6751_v18 = vld [vmem:[#allocation10 + $0x234] ss:$8 sps:$4 sm:$0xff]  }
 0x51d   :  { %v3511_v36 = vadd.f32 %v3510_v49, %v8970_v14  ;;  %v3512_v10 = vpop.f32.mrb[18].mxu0 }
 0x51e   :  { %7276 = vtanh.f32 %v3509_v61  ;;  %v3513_v57 = vadd.f32 %v3512_v10, %v8965_v40  ;;  %v3514_v58 = vpop.f32.mrb[19].mxu0  ;;  %4732 = vmatprep.mubr.bf16.mxu1 %v4059_v59  ;;  %v6749_v61 = vld [vmem:[#allocation10 + $0x230] ss:$8 sps:$4 sm:$0xff]   ;;  %v6754_v59 = vld [vmem:[#allocation10 + $0x244] ss:$8 sps:$4 sm:$0xff]  }
 0x51f   :  { %7278 = vtanh.f32 %v3511_v36  ;;  %v3515_v15 = vadd.f32 %v3514_v58, %v8970_v14  ;;  %4733 = vmatmul.mubr.bf16.gmra.mrb[120].mxu1 %v4058_v6 }
 0x520   :  { %v7269_v5 = vpop.eup %7268  ;;  %7280 = vtanh.f32 %v3513_v57 }
 0x521   :  { %v7271_v62 = vpop.eup %7270  ;;  %7282 = vtanh.f32 %v3515_v15 }
 0x522   :  { %v7273_v25 = vpop.eup %7272 }
 0x523   :  { %v7275_v51 = vpop.eup %7274  ;;  %v3518_v54 = vpop.f32.mrb[20].mxu0  ;;  %v4063_v13 = vpack.c.bf16 %v7273_v25, %v7269_v5  ;;  %v6752_v25 = vld [vmem:[#allocation10 + $0x240] ss:$8 sps:$4 sm:$0xff]  }
 0x524   :  { %v3519_v7 = vadd.f32 %v3518_v54, %v8965_v40  ;;  %v3520_v42 = vpop.f32.mrb[21].mxu0  ;;  %v4064_v27 = vpack.c.bf16 %v7275_v51, %v7271_v62 }
 0x525   :  { %v3521_v39 = vadd.f32 %v3520_v42, %v8970_v14  ;;  %v3522_v44 = vpop.f32.mrb[22].mxu0 }
 0x526   :  { %7284 = vtanh.f32 %v3519_v7  ;;  %v3523_v2 = vadd.f32 %v3522_v44, %v8965_v40  ;;  %v3524_v9 = vpop.f32.mrb[23].mxu0  ;;  %4742 = vmatprep.mubr.bf16.mxu1 %v4064_v27  ;;  %v6755_v44 = vld [vmem:[#allocation10 + $0x250] ss:$8 sps:$4 sm:$0xff]  }
 0x527   :  { %7286 = vtanh.f32 %v3521_v39  ;;  %v3525_v31 = vadd.f32 %v3524_v9, %v8970_v14  ;;  %4743 = vmatmul.mubr.bf16.gmra.mrb[124].mxu1 %v4063_v13  ;;  %v6757_v13 = vld [vmem:[#allocation10 + $0x254] ss:$8 sps:$4 sm:$0xff]   ;;  %v6760_v9 = vld [vmem:[#allocation10 + $0x264] ss:$8 sps:$4 sm:$0xff]  }
 0x528   :  { %v7277_v8 = vpop.eup %7276  ;;  %7288 = vtanh.f32 %v3523_v2 }
 0x529   :  { %v7279_v33 = vpop.eup %7278  ;;  %7290 = vtanh.f32 %v3525_v31 }
 0x52a   :  { %v7281_v29 = vpop.eup %7280 }
 0x52b   :  { %v7283_v52 = vpop.eup %7282  ;;  %v3528_v26 = vpop.f32.mrb[24].mxu0  ;;  %v3990_v48 = vpack.c.bf16 %v7281_v29, %v7277_v8 }
 0x52c   :  { %v3529_v35 = vadd.f32 %v3528_v26, %v8965_v40  ;;  %v3530_v30 = vpop.f32.mrb[25].mxu0  ;;  %v3991_v47 = vpack.c.bf16 %v7283_v52, %v7279_v33 }
 0x52d   :  { %v3531_v46 = vadd.f32 %v3530_v30, %v8970_v14  ;;  %v3532_v16 = vpop.f32.mrb[26].mxu0 }
 0x52e   :  { %7292 = vtanh.f32 %v3529_v35  ;;  %v3533_v23 = vadd.f32 %v3532_v16, %v8965_v40  ;;  %v3534_v43 = vpop.f32.mrb[27].mxu0  ;;  %4785 = vmatprep.mubr.bf16.mxu1 %v3991_v47  ;;  %v6758_v35 = vld [vmem:[#allocation10 + $0x260] ss:$8 sps:$4 sm:$0xff]  }
 0x52f   :  { %7294 = vtanh.f32 %v3531_v46  ;;  %v3535_v41 = vadd.f32 %v3534_v43, %v8970_v14  ;;  %4786 = vmatmul.mubr.bf16.vlgmr.msra.gmra.mrb[64].mxu1 %v3990_v48  ;;  %v6761_v43 = vld [vmem:[#allocation10 + $0x270] ss:$8 sps:$4 sm:$0xff]  }
 0x530   :  { %v7285_v45 = vpop.eup %7284  ;;  %7296 = vtanh.f32 %v3533_v23  ;;  %4947 = vmatpush1.bf16.msra.mxu1 %v6740_v0  ;;  %v6763_v0 = vld [vmem:[#allocation10 + $0x274] ss:$8 sps:$4 sm:$0xff]  }
 0x531   :  { %v7287_v55 = vpop.eup %7286  ;;  %7298 = vtanh.f32 %v3535_v41  ;;  %4948 = vmatprep.subr.bf16.mxu1 %v6745_v34 }
 0x532   :  { %v7289_v19 = vpop.eup %7288 }
 0x533   :  { %v7291_v4 = vpop.eup %7290  ;;  %v3538_v17 = vpop.f32.mrb[28].mxu0  ;;  %v3995_v38 = vpack.c.bf16 %v7289_v19, %v7285_v45 }
 0x534   :  { %v3539_v37 = vadd.f32 %v3538_v17, %v8965_v40  ;;  %v3540_v50 = vpop.f32.mrb[29].mxu0  ;;  %v3996_v3 = vpack.c.bf16 %v7291_v4, %v7287_v55  ;;  %4949 = vmatpush1.bf16.msra.mxu1 %v6743_v32 }
 0x535   :  { %v3541_v24 = vadd.f32 %v3540_v50, %v8970_v14  ;;  %v3542_v1 = vpop.f32.mrb[30].mxu0  ;;  %4950 = vmatprep.subr.bf16.mxu1 %v6748_v56 }
 0x536   :  { %7300 = vtanh.f32 %v3539_v37  ;;  %v3543_v60 = vadd.f32 %v3542_v1, %v8965_v40  ;;  %v3544_v22 = vpop.f32.mrb[31].mxu0  ;;  %4795 = vmatprep.mubr.bf16.mxu1 %v3996_v3 }
 0x537   :  { %7302 = vtanh.f32 %v3541_v24  ;;  %v3545_v20 = vadd.f32 %v3544_v22, %v8970_v14  ;;  %4796 = vmatmul.mubr.bf16.gmra.mrb[68].mxu1 %v3995_v38 }
 0x538   :  { %v7293_v6 = vpop.eup %7292  ;;  %7304 = vtanh.f32 %v3543_v60  ;;  %4951 = vmatpush1.bf16.msra.mxu1 %v6746_v53 }
 0x539   :  { %v7295_v49 = vpop.eup %7294  ;;  %7306 = vtanh.f32 %v3545_v20  ;;  %4952 = vmatprep.subr.bf16.mxu1 %v6751_v18 }
 0x53a   :  { %v7297_v36 = vpop.eup %7296 }
 0x53b   :  { %v7299_v10 = vpop.eup %7298  ;;  %v3548_v57 = vpop.f32.mrb[32].mxu0  ;;  %v4000_v58 = vpack.c.bf16 %v7297_v36, %v7293_v6 }
 0x53c   :  { %v3549_v15 = vadd.f32 %v3548_v57, %v8965_v40  ;;  %v3550_v5 = vpop.f32.mrb[33].mxu0  ;;  %v4001_v62 = vpack.c.bf16 %v7299_v10, %v7295_v49  ;;  %4953 = vmatpush1.bf16.msra.mxu1 %v6749_v61 }
 0x53d   :  { %v3551_v51 = vadd.f32 %v3550_v5, %v8970_v14  ;;  %v3552_v54 = vpop.f32.mrb[34].mxu0  ;;  %4954 = vmatprep.subr.bf16.mxu1 %v6754_v59 }
 0x53e   :  { %7308 = vtanh.f32 %v3549_v15  ;;  %v3553_v7 = vadd.f32 %v3552_v54, %v8965_v40  ;;  %v3554_v42 = vpop.f32.mrb[35].mxu0  ;;  %4805 = vmatprep.mubr.bf16.mxu1 %v4001_v62 }
 0x53f   :  { %7310 = vtanh.f32 %v3551_v51  ;;  %v3555_v27 = vadd.f32 %v3554_v42, %v8970_v14  ;;  %4806 = vmatmul.mubr.bf16.gmra.mrb[72].mxu1 %v4000_v58 }
 0x540   :  { %v7301_v39 = vpop.eup %7300  ;;  %7312 = vtanh.f32 %v3553_v7  ;;  %4955 = vmatpush1.bf16.msra.mxu1 %v6752_v25 }
 0x541   :  { %v7303_v2 = vpop.eup %7302  ;;  %7314 = vtanh.f32 %v3555_v27  ;;  %4956 = vmatprep.subr.bf16.mxu1 %v6757_v13 }
 0x542   :  { %v7305_v31 = vpop.eup %7304 }
 0x543   :  { %v7307_v8 = vpop.eup %7306  ;;  %v3558_v33 = vpop.f32.mrb[36].mxu0  ;;  %v4005_v29 = vpack.c.bf16 %v7305_v31, %v7301_v39 }
 0x544   :  { %v3559_v52 = vadd.f32 %v3558_v33, %v8965_v40  ;;  %v3560_v26 = vpop.f32.mrb[37].mxu0  ;;  %v4006_v48 = vpack.c.bf16 %v7307_v8, %v7303_v2  ;;  %4957 = vmatpush1.bf16.msra.mxu1 %v6755_v44 }
 0x545   :  { %v3561_v30 = vadd.f32 %v3560_v26, %v8970_v14  ;;  %v3562_v47 = vpop.f32.mrb[38].mxu0  ;;  %4958 = vmatprep.subr.bf16.mxu1 %v6760_v9 }
 0x546   :  { %7316 = vtanh.f32 %v3559_v52  ;;  %v3563_v46 = vadd.f32 %v3562_v47, %v8965_v40  ;;  %v3564_v16 = vpop.f32.mrb[39].mxu0  ;;  %4815 = vmatprep.mubr.bf16.mxu1 %v4006_v48 }
 0x547   :  { %7318 = vtanh.f32 %v3561_v30  ;;  %v3565_v34 = vadd.f32 %v3564_v16, %v8970_v14  ;;  %4816 = vmatmul.mubr.bf16.gmra.mrb[76].mxu1 %v4005_v29 }
 0x548   :  { %v7309_v23 = vpop.eup %7308  ;;  %7320 = vtanh.f32 %v3563_v46  ;;  %4959 = vmatpush1.bf16.msra.mxu1 %v6758_v35 }
 0x549   :  { %v7311_v41 = vpop.eup %7310  ;;  %7322 = vtanh.f32 %v3565_v34  ;;  %4960 = vmatprep.subr.bf16.mxu1 %v6763_v0 }
 0x54a   :  { %v7313_v45 = vpop.eup %7312 }
 0x54b   :  { %v7315_v32 = vpop.eup %7314  ;;  %v3568_v55 = vpop.f32.mrb[40].mxu0  ;;  %v4010_v56 = vpack.c.bf16 %v7313_v45, %v7309_v23 }
 0x54c   :  { %v3569_v19 = vadd.f32 %v3568_v55, %v8965_v40  ;;  %v3570_v4 = vpop.f32.mrb[41].mxu0  ;;  %v4011_v17 = vpack.c.bf16 %v7315_v32, %v7311_v41  ;;  %4961 = vmatpush1.bf16.msra.mxu1 %v6761_v43 }
 0x54d   :  { %v3571_v38 = vadd.f32 %v3570_v4, %v8970_v14  ;;  %v3572_v37 = vpop.f32.mrb[42].mxu0 }
 0x54e   :  { %7324 = vtanh.f32 %v3569_v19  ;;  %v3573_v50 = vadd.f32 %v3572_v37, %v8965_v40  ;;  %v3574_v3 = vpop.f32.mrb[43].mxu0  ;;  %4825 = vmatprep.mubr.bf16.mxu1 %v4011_v17 }
 0x54f   :  { %7326 = vtanh.f32 %v3571_v38  ;;  %v3575_v53 = vadd.f32 %v3574_v3, %v8970_v14  ;;  %4826 = vmatmul.mubr.bf16.gmra.mrb[80].mxu1 %v4010_v56 }
 0x550   :  { %v7317_v24 = vpop.eup %7316  ;;  %7328 = vtanh.f32 %v3573_v50 }
 0x551   :  { %v7319_v1 = vpop.eup %7318  ;;  %7330 = vtanh.f32 %v3575_v53 }
 0x552   :  { %v7321_v18 = vpop.eup %7320 }
 0x553   :  { %v7323_v60 = vpop.eup %7322  ;;  %v3578_v22 = vpop.f32.mrb[44].mxu0  ;;  %v4015_v20 = vpack.c.bf16 %v7321_v18, %v7317_v24 }
 0x554   :  { %v3579_v6 = vadd.f32 %v3578_v22, %v8965_v40  ;;  %v3580_v61 = vpop.f32.mrb[45].mxu0  ;;  %v4016_v49 = vpack.c.bf16 %v7323_v60, %v7319_v1 }
 0x555   :  { %v3581_v59 = vadd.f32 %v3580_v61, %v8970_v14  ;;  %v3582_v36 = vpop.f32.mrb[46].mxu0 }
 0x556   :  { %7332 = vtanh.f32 %v3579_v6  ;;  %v3583_v10 = vadd.f32 %v3582_v36, %v8965_v40  ;;  %v3584_v57 = vpop.f32.mrb[47].mxu0  ;;  %4835 = vmatprep.mubr.bf16.mxu1 %v4016_v49 }
 0x557   :  { %7334 = vtanh.f32 %v3581_v59  ;;  %v3585_v58 = vadd.f32 %v3584_v57, %v8970_v14  ;;  %4836 = vmatmul.mubr.bf16.gmra.mrb[84].mxu1 %v4015_v20 }
 0x558   :  { %v7325_v15 = vpop.eup %7324  ;;  %7336 = vtanh.f32 %v3583_v10 }
 0x559   :  { %v7327_v5 = vpop.eup %7326  ;;  %7338 = vtanh.f32 %v3585_v58 }
 0x55a   :  { %v7329_v62 = vpop.eup %7328 }
 0x55b   :  { %v7331_v25 = vpop.eup %7330  ;;  %v3588_v51 = vpop.f32.mrb[48].mxu0  ;;  %v4020_v54 = vpack.c.bf16 %v7329_v62, %v7325_v15 }
 0x55c   :  { %v3589_v13 = vadd.f32 %v3588_v51, %v8965_v40  ;;  %v3590_v7 = vpop.f32.mrb[49].mxu0  ;;  %v4021_v42 = vpack.c.bf16 %v7331_v25, %v7327_v5 }
 0x55d   :  { %v3591_v27 = vadd.f32 %v3590_v7, %v8970_v14  ;;  %v3592_v39 = vpop.f32.mrb[50].mxu0 }
 0x55e   :  { %7340 = vtanh.f32 %v3589_v13  ;;  %v3593_v44 = vadd.f32 %v3592_v39, %v8965_v40  ;;  %v3594_v2 = vpop.f32.mrb[51].mxu0  ;;  %4845 = vmatprep.mubr.bf16.mxu1 %v4021_v42 }
 0x55f   :  { %7342 = vtanh.f32 %v3591_v27  ;;  %v3595_v9 = vadd.f32 %v3594_v2, %v8970_v14  ;;  %4846 = vmatmul.mubr.bf16.gmra.mrb[88].mxu1 %v4020_v54 }
 0x560   :  { %v7333_v31 = vpop.eup %7332  ;;  %7344 = vtanh.f32 %v3593_v44 }
 0x561   :  { %v7335_v8 = vpop.eup %7334  ;;  %7346 = vtanh.f32 %v3595_v9 }
 0x562   :  { %v7337_v33 = vpop.eup %7336 }
 0x563   :  { %v7339_v29 = vpop.eup %7338  ;;  %v3598_v52 = vpop.f32.mrb[52].mxu0  ;;  %v4025_v26 = vpack.c.bf16 %v7337_v33, %v7333_v31 }
 0x564   :  { %v3599_v48 = vadd.f32 %v3598_v52, %v8965_v40  ;;  %v3600_v35 = vpop.f32.mrb[53].mxu0  ;;  %v4026_v30 = vpack.c.bf16 %v7339_v29, %v7335_v8 }
 0x565   :  { %v3601_v47 = vadd.f32 %v3600_v35, %v8970_v14  ;;  %v3602_v0 = vpop.f32.mrb[54].mxu0 }
 0x566   :  { %7348 = vtanh.f32 %v3599_v48  ;;  %v3603_v46 = vadd.f32 %v3602_v0, %v8965_v40  ;;  %v3604_v16 = vpop.f32.mrb[55].mxu0  ;;  %4855 = vmatprep.mubr.bf16.mxu1 %v4026_v30 }
 0x567   :  { %7350 = vtanh.f32 %v3601_v47  ;;  %v3605_v34 = vadd.f32 %v3604_v16, %v8970_v14  ;;  %4856 = vmatmul.mubr.bf16.gmra.mrb[92].mxu1 %v4025_v26 }
 0x568   :  { %v7341_v23 = vpop.eup %7340  ;;  %7352 = vtanh.f32 %v3603_v46 }
 0x569   :  { %v7343_v43 = vpop.eup %7342  ;;  %7354 = vtanh.f32 %v3605_v34 }
 0x56a   :  { %v7345_v41 = vpop.eup %7344 }
 0x56b   :  { %v7347_v45 = vpop.eup %7346  ;;  %v3608_v32 = vpop.f32.mrb[56].mxu0  ;;  %v4030_v55 = vpack.c.bf16 %v7345_v41, %v7341_v23 }
 0x56c   :  { %v3609_v56 = vadd.f32 %v3608_v32, %v8965_v40  ;;  %v3610_v19 = vpop.f32.mrb[57].mxu0  ;;  %v4031_v4 = vpack.c.bf16 %v7347_v45, %v7343_v43 }
 0x56d   :  { %v3611_v17 = vadd.f32 %v3610_v19, %v8970_v14  ;;  %v3612_v38 = vpop.f32.mrb[58].mxu0 }
 0x56e   :  { %7356 = vtanh.f32 %v3609_v56  ;;  %v3613_v37 = vadd.f32 %v3612_v38, %v8965_v40  ;;  %v3614_v50 = vpop.f32.mrb[59].mxu0  ;;  %4865 = vmatprep.mubr.bf16.mxu1 %v4031_v4 }
 0x56f   :  { %7358 = vtanh.f32 %v3611_v17  ;;  %v3615_v3 = vadd.f32 %v3614_v50, %v8970_v14  ;;  %4866 = vmatmul.mubr.bf16.gmra.mrb[96].mxu1 %v4030_v55 }
 0x570   :  { %v7349_v53 = vpop.eup %7348  ;;  %7360 = vtanh.f32 %v3613_v37 }
 0x571   :  { %v7351_v24 = vpop.eup %7350  ;;  %7362 = vtanh.f32 %v3615_v3 }
 0x572   :  { %v7353_v1 = vpop.eup %7352 }
 0x573   :  { %v7355_v18 = vpop.eup %7354  ;;  %v3618_v60 = vpop.f32.mrb[60].mxu0  ;;  %v4035_v22 = vpack.c.bf16 %v7353_v1, %v7349_v53 }
 0x574   :  { %v3619_v20 = vadd.f32 %v3618_v60, %v8965_v40  ;;  %v3620_v6 = vpop.f32.mrb[61].mxu0  ;;  %v4036_v61 = vpack.c.bf16 %v7355_v18, %v7351_v24 }
 0x575   :  { %v3621_v49 = vadd.f32 %v3620_v6, %v8970_v14  ;;  %v3622_v59 = vpop.f32.mrb[62].mxu0 }
 0x576   :  { %7364 = vtanh.f32 %v3619_v20  ;;  %v3623_v36 = vadd.f32 %v3622_v59, %v8965_v40  ;;  %v3624_v10 = vpop.f32.mrb[63].mxu0  ;;  %4875 = vmatprep.mubr.bf16.mxu1 %v4036_v61 }
 0x577   :  { %7366 = vtanh.f32 %v3621_v49  ;;  %v3625_v57 = vadd.f32 %v3624_v10, %v8970_v14  ;;  %4876 = vmatmul.mubr.bf16.gmra.mrb[100].mxu1 %v4035_v22 }
 0x578   :  { %v7357_v58 = vpop.eup %7356  ;;  %7368 = vtanh.f32 %v3623_v36 }
 0x579   :  { %v7359_v15 = vpop.eup %7358  ;;  %7370 = vtanh.f32 %v3625_v57 }
 0x57a   :  { %v7361_v5 = vpop.eup %7360 }
 0x57b   :  { %v7363_v62 = vpop.eup %7362  ;;  %v3628_v25 = vpop.f32.mrb[64].mxu0  ;;  %v4040_v51 = vpack.c.bf16 %v7361_v5, %v7357_v58  ;;  %v7469_v58 = vld [vmem:[%s9221_s6] sm:$0x1f] }
 0x57c   :  { %v3629_v54 = vadd.f32 %v3628_v25, %v8965_v40  ;;  %v3630_v13 = vpop.f32.mrb[65].mxu0  ;;  %v4041_v7 = vpack.c.bf16 %v7363_v62, %v7359_v15  ;;  %v9041_v15 = vrot.slane %v7469_v58, %v637_v63 }
 0x57d   :  { %v3631_v42 = vadd.f32 %v3630_v13, %v8970_v14  ;;  %v3632_v27 = vpop.f32.mrb[66].mxu0 }
 0x57e   :  { %7372 = vtanh.f32 %v3629_v54  ;;  %v3633_v39 = vadd.f32 %v3632_v27, %v8965_v40  ;;  %v3634_v44 = vpop.f32.mrb[67].mxu0  ;;  %4885 = vmatprep.mubr.bf16.mxu1 %v4041_v7 }
 0x57f   :  { %7374 = vtanh.f32 %v3631_v42  ;;  %v3635_v2 = vadd.f32 %v3634_v44, %v8970_v14  ;;  %4886 = vmatmul.mubr.bf16.gmra.mrb[104].mxu1 %v4040_v51 }
 0x580   :  { %v7365_v9 = vpop.eup %7364  ;;  %7376 = vtanh.f32 %v3633_v39 }
 0x581   :  { %v7367_v31 = vpop.eup %7366  ;;  %7378 = vtanh.f32 %v3635_v2 }
 0x582   :  { %v7369_v8 = vpop.eup %7368 }
 0x583   :  { %v7371_v33 = vpop.eup %7370  ;;  %v3638_v29 = vpop.f32.mrb[68].mxu0  ;;  %v4045_v52 = vpack.c.bf16 %v7369_v8, %v7365_v9 }
 0x584   :  { %v3639_v26 = vadd.f32 %v3638_v29, %v8965_v40  ;;  %v3640_v48 = vpop.f32.mrb[69].mxu0  ;;  %v4046_v35 = vpack.c.bf16 %v7371_v33, %v7367_v31 }
 0x585   :  { %v3641_v30 = vadd.f32 %v3640_v48, %v8970_v14  ;;  %v3642_v47 = vpop.f32.mrb[70].mxu0 }
 0x586   :  { %7380 = vtanh.f32 %v3639_v26  ;;  %v3643_v0 = vadd.f32 %v3642_v47, %v8965_v40  ;;  %v3644_v46 = vpop.f32.mrb[71].mxu0  ;;  %4895 = vmatprep.mubr.bf16.mxu1 %v4046_v35 }
 0x587   :  { %7382 = vtanh.f32 %v3641_v30  ;;  %v3645_v16 = vadd.f32 %v3644_v46, %v8970_v14  ;;  %4896 = vmatmul.mubr.bf16.gmra.mrb[108].mxu1 %v4045_v52 }
 0x588   :  { %v7373_v34 = vpop.eup %7372  ;;  %7384 = vtanh.f32 %v3643_v0 }
 0x589   :  { %v7375_v23 = vpop.eup %7374  ;;  %7386 = vtanh.f32 %v3645_v16 }
 0x58a   :  { %v7377_v43 = vpop.eup %7376 }
 0x58b   :  { %v7379_v41 = vpop.eup %7378  ;;  %v3648_v45 = vpop.f32.mrb[72].mxu0  ;;  %v4050_v32 = vpack.c.bf16 %v7377_v43, %v7373_v34 }
 0x58c   :  { %v3649_v55 = vadd.f32 %v3648_v45, %v8965_v40  ;;  %v3650_v56 = vpop.f32.mrb[73].mxu0  ;;  %v4051_v19 = vpack.c.bf16 %v7379_v41, %v7375_v23 }
 0x58d   :  { %v3651_v4 = vadd.f32 %v3650_v56, %v8970_v14  ;;  %v3652_v17 = vpop.f32.mrb[74].mxu0 }
 0x58e   :  { %7388 = vtanh.f32 %v3649_v55  ;;  %v3653_v38 = vadd.f32 %v3652_v17, %v8965_v40  ;;  %v3654_v37 = vpop.f32.mrb[75].mxu0  ;;  %4905 = vmatprep.mubr.bf16.mxu1 %v4051_v19 }
 0x58f   :  { %7390 = vtanh.f32 %v3651_v4  ;;  %v3655_v50 = vadd.f32 %v3654_v37, %v8970_v14  ;;  %4906 = vmatmul.mubr.bf16.gmra.mrb[112].mxu1 %v4050_v32 }
 0x590   :  { %v7381_v3 = vpop.eup %7380  ;;  %7392 = vtanh.f32 %v3653_v38 }
 0x591   :  { %v7383_v53 = vpop.eup %7382  ;;  %7394 = vtanh.f32 %v3655_v50 }
 0x592   :  { %v7385_v24 = vpop.eup %7384 }
 0x593   :  { %v7387_v1 = vpop.eup %7386  ;;  %v3658_v18 = vpop.f32.mrb[76].mxu0  ;;  %v4055_v60 = vpack.c.bf16 %v7385_v24, %v7381_v3 }
 0x594   :  { %v3659_v22 = vadd.f32 %v3658_v18, %v8965_v40  ;;  %v3660_v20 = vpop.f32.mrb[77].mxu0  ;;  %v4056_v6 = vpack.c.bf16 %v7387_v1, %v7383_v53 }
 0x595   :  { %v3661_v61 = vadd.f32 %v3660_v20, %v8970_v14  ;;  %v3662_v49 = vpop.f32.mrb[78].mxu0 }
 0x596   :  { %7396 = vtanh.f32 %v3659_v22  ;;  %v3663_v59 = vadd.f32 %v3662_v49, %v8965_v40  ;;  %v3664_v36 = vpop.f32.mrb[79].mxu0  ;;  %4915 = vmatprep.mubr.bf16.mxu1 %v4056_v6 }
 0x597   :  { %7398 = vtanh.f32 %v3661_v61  ;;  %v3665_v10 = vadd.f32 %v3664_v36, %v8970_v14  ;;  %4916 = vmatmul.mubr.bf16.gmra.mrb[116].mxu1 %v4055_v60 }
 0x598   :  { %v7389_v57 = vpop.eup %7388  ;;  %7400 = vtanh.f32 %v3663_v59 }
 0x599   :  { %v7391_v5 = vpop.eup %7390  ;;  %7402 = vtanh.f32 %v3665_v10 }
 0x59a   :  { %v7393_v62 = vpop.eup %7392 }
 0x59b   :  { %v7395_v40 = vpop.eup %7394  ;;  %v5896_v25 = vpop.f32.mrb[80].mxu0  ;;  %v4060_v51 = vpack.c.bf16 %v7393_v62, %v7389_v57 }
 0x59c   :  { %v3710_v54 = vadd.f32 %v5896_v25, %v9041_v15  ;;  %v3701_v14 = vpop.f32.mrb[81].mxu0  ;;  %v4061_v13 = vpack.c.bf16 %v7395_v40, %v7391_v5 }
 0x59d   :  { %v3702_v7 = vadd.f32 %v3701_v14, %v9041_v15  ;;  %v5897_v42 = vpop.f32.mrb[82].mxu0 }
 0x59e   :  { %7404 = vtanh.f32 %v3710_v54  ;;  %v3713_v27 = vadd.f32 %v5897_v42, %v9041_v15  ;;  %v3704_v39 = vpop.f32.mrb[83].mxu0  ;;  %4925 = vmatprep.mubr.bf16.mxu1 %v4061_v13 }
 0x59f   :  { %7406 = vtanh.f32 %v3702_v7  ;;  %v3705_v28 = vadd.f32 %v3704_v39, %v9041_v15  ;;  %4926 = vmatmul.mubr.bf16.gmra.mrb[120].mxu1 %v4060_v51 }
 0x5a0   :  { %v7397_v63 = vpop.eup %7396  ;;  %7408 = vtanh.f32 %v3713_v27 }
 0x5a1   :  { %v7399_v44 = vpop.eup %7398  ;;  %7410 = vtanh.f32 %v3705_v28 }
 0x5a2   :  { %v7401_v2 = vpop.eup %7400 }
 0x5a3   :  { %v7403_v9 = vpop.eup %7402  ;;  %v5900_v31 = vpop.f32.mrb[84].mxu0  ;;  %v4065_v8 = vpack.c.bf16 %v7401_v2, %v7397_v63 }
 0x5a4   :  { %v3726_v33 = vadd.f32 %v5900_v31, %v9041_v15  ;;  %v3717_v29 = vpop.f32.mrb[85].mxu0  ;;  %v4066_v52 = vpack.c.bf16 %v7403_v9, %v7399_v44 }
 0x5a5   :  { %v3718_v26 = vadd.f32 %v3717_v29, %v9041_v15  ;;  %v5901_v48 = vpop.f32.mrb[86].mxu0 }
 0x5a6   :  { %7412 = vtanh.f32 %v3726_v33  ;;  %v3729_v35 = vadd.f32 %v5901_v48, %v9041_v15  ;;  %v3720_v30 = vpop.f32.mrb[87].mxu0  ;;  %4935 = vmatprep.mubr.bf16.mxu1 %v4066_v52 }
 0x5a7   :  { %7414 = vtanh.f32 %v3718_v26  ;;  %v3721_v47 = vadd.f32 %v3720_v30, %v9041_v15  ;;  %4936 = vmatmul.mubr.bf16.gmra.mrb[124].mxu1 %v4065_v8 }
 0x5a8   :  { %v7405_v0 = vpop.eup %7404  ;;  %7416 = vtanh.f32 %v3729_v35  ;;  %4978 = vmatprep.mubr.bf16.mxu1 %v7643_v21 }
 0x5a9   :  { %v7407_v46 = vpop.eup %7406  ;;  %7418 = vtanh.f32 %v3721_v47 }
 0x5aa   :  { %v7409_v16 = vpop.eup %7408 }
 0x5ab   :  { %v7411_v34 = vpop.eup %7410  ;;  %v5904_v23 = vpop.f32.mrb[88].mxu0  ;;  %v3997_v43 = vpack.c.bf16 %v7409_v16, %v7405_v0 }
 0x5ac   :  { %v3742_v41 = vadd.f32 %v5904_v23, %v9041_v15  ;;  %v3733_v45 = vpop.f32.mrb[89].mxu0  ;;  %v3992_v32 = vpack.c.bf16 %v7411_v34, %v7407_v46 }
 0x5ad   :  { %v3734_v55 = vadd.f32 %v3733_v45, %v9041_v15  ;;  %v5905_v56 = vpop.f32.mrb[90].mxu0 }
 0x5ae   :  { %7420 = vtanh.f32 %v3742_v41  ;;  %v3745_v19 = vadd.f32 %v5905_v56, %v9041_v15  ;;  %v3736_v4 = vpop.f32.mrb[91].mxu0 }
 0x5af   :  { %7422 = vtanh.f32 %v3734_v55  ;;  %v3737_v17 = vadd.f32 %v3736_v4, %v9041_v15  ;;  %4979 = vmatmul.mubr.bf16.vlgmr.msra.gmra.mrb[64].mxu1 %v3992_v32 }
 0x5b0   :  { %v7413_v38 = vpop.eup %7412  ;;  %7424 = vtanh.f32 %v3745_v19  ;;  %4988 = vmatprep.mubr.bf16.mxu1 %v7643_v21 }
 0x5b1   :  { %v7415_v37 = vpop.eup %7414  ;;  %7426 = vtanh.f32 %v3737_v17 }
 0x5b2   :  { %v7417_v50 = vpop.eup %7416 }
 0x5b3   :  { %v7419_v3 = vpop.eup %7418  ;;  %v5908_v53 = vpop.f32.mrb[92].mxu0  ;;  %v4007_v24 = vpack.c.bf16 %v7417_v50, %v7413_v38 }
 0x5b4   :  { %v3758_v1 = vadd.f32 %v5908_v53, %v9041_v15  ;;  %v3749_v18 = vpop.f32.mrb[93].mxu0  ;;  %v4002_v60 = vpack.c.bf16 %v7419_v3, %v7415_v37 }
 0x5b5   :  { %v3750_v22 = vadd.f32 %v3749_v18, %v9041_v15  ;;  %v5909_v20 = vpop.f32.mrb[94].mxu0 }
 0x5b6   :  { %7428 = vtanh.f32 %v3758_v1  ;;  %v3761_v6 = vadd.f32 %v5909_v20, %v9041_v15  ;;  %v3752_v61 = vpop.f32.mrb[95].mxu0 }
 0x5b7   :  { %7430 = vtanh.f32 %v3750_v22  ;;  %v3753_v49 = vadd.f32 %v3752_v61, %v9041_v15  ;;  %4989 = vmatmul.mubr.bf16.gmra.mrb[68].mxu1 %v3997_v43 }
 0x5b8   :  { %v9061_v59 = vpop.eup %7420  ;;  %7432 = vtanh.f32 %v3761_v6  ;;  %4998 = vmatprep.mubr.bf16.mxu1 %v7643_v21 }
 0x5b9   :  { %v7423_v36 = vpop.eup %7422  ;;  %7434 = vtanh.f32 %v3753_v49 }
 0x5ba   :  { %v9064_v10 = vpop.eup %7424 }
 0x5bb   :  { %v7427_v57 = vpop.eup %7426  ;;  %v5912_v58 = vpop.f32.mrb[96].mxu0  ;;  %v4017_v5 = vpack.c.bf16 %v9064_v10, %v9061_v59  ;;  %v4148_v10 = vld [vmem:[%s9223_s8] sm:$0x3] }
 0x5bc   :  { %v3774_v62 = vadd.f32 %v5912_v58, %v9041_v15  ;;  %v3765_v40 = vpop.f32.mrb[97].mxu0  ;;  %v4012_v25 = vpack.c.bf16 %v7427_v57, %v7423_v36 }
 0x5bd   :  { %v3766_v51 = vadd.f32 %v3765_v40, %v9041_v15  ;;  %v5913_v54 = vpop.f32.mrb[98].mxu0 }
 0x5be   :  { %7436 = vtanh.f32 %v3774_v62  ;;  %v3777_v14 = vadd.f32 %v5913_v54, %v9041_v15  ;;  %v3768_v13 = vpop.f32.mrb[99].mxu0 }
 0x5bf   :  { %7438 = vtanh.f32 %v3766_v51  ;;  %v3769_v7 = vadd.f32 %v3768_v13, %v9041_v15  ;;  %4999 = vmatmul.mubr.bf16.gmra.mrb[72].mxu1 %v4002_v60  ;;  %v9122_v51 = vrot.slane %v4148_v10, %v9393_v12 }
 0x5c0   :  { %v9072_v42 = vpop.eup %7428  ;;  %7440 = vtanh.f32 %v3777_v14  ;;  %5008 = vmatprep.mubr.bf16.mxu1 %v7643_v21 }
 0x5c1   :  { %v9075_v27 = vpop.eup %7430  ;;  %7442 = vtanh.f32 %v3769_v7 }
 0x5c2   :  { %v9077_v39 = vpop.eup %7432 }
 0x5c3   :  { %v9079_v28 = vpop.eup %7434  ;;  %v5916_v63 = vpop.f32.mrb[100].mxu0  ;;  %v4027_v44 = vpack.c.bf16 %v9077_v39, %v9072_v42 }
 0x5c4   :  { %v3790_v2 = vadd.f32 %v5916_v63, %v9041_v15  ;;  %v3781_v9 = vpop.f32.mrb[101].mxu0  ;;  %v4022_v31 = vpack.c.bf16 %v9079_v28, %v9075_v27 }
 0x5c5   :  { %v3782_v8 = vadd.f32 %v3781_v9, %v9041_v15  ;;  %v5917_v33 = vpop.f32.mrb[102].mxu0 }
 0x5c6   :  { %7444 = vtanh.f32 %v3790_v2  ;;  %v3793_v29 = vadd.f32 %v5917_v33, %v9041_v15  ;;  %v3784_v52 = vpop.f32.mrb[103].mxu0 }
 0x5c7   :  { %7446 = vtanh.f32 %v3782_v8  ;;  %v3785_v26 = vadd.f32 %v3784_v52, %v9041_v15  ;;  %5009 = vmatmul.mubr.bf16.gmra.mrb[76].mxu1 %v4007_v24 }
 0x5c8   :  { %v7437_v48 = vpop.eup %7436  ;;  %7448 = vtanh.f32 %v3793_v29  ;;  %5018 = vmatprep.mubr.bf16.mxu1 %v7643_v21 }
 0x5c9   :  { %v7439_v35 = vpop.eup %7438  ;;  %7450 = vtanh.f32 %v3785_v26 }
 0x5ca   :  { %v7441_v30 = vpop.eup %7440 }
 0x5cb   :  { %v7443_v47 = vpop.eup %7442  ;;  %v5920_v0 = vpop.f32.mrb[104].mxu0  ;;  %v4037_v46 = vpack.c.bf16 %v7441_v30, %v7437_v48 }
 0x5cc   :  { %v3806_v16 = vadd.f32 %v5920_v0, %v9041_v15  ;;  %v3797_v34 = vpop.f32.mrb[105].mxu0  ;;  %v4032_v23 = vpack.c.bf16 %v7443_v47, %v7439_v35 }
 0x5cd   :  { %v3798_v43 = vadd.f32 %v3797_v34, %v9041_v15  ;;  %v5921_v41 = vpop.f32.mrb[106].mxu0 }
 0x5ce   :  { %7452 = vtanh.f32 %v3806_v16  ;;  %v3809_v45 = vadd.f32 %v5921_v41, %v9041_v15  ;;  %v3800_v32 = vpop.f32.mrb[107].mxu0 }
 0x5cf   :  { %7454 = vtanh.f32 %v3798_v43  ;;  %v3801_v55 = vadd.f32 %v3800_v32, %v9041_v15  ;;  %5019 = vmatmul.mubr.bf16.gmra.mrb[80].mxu1 %v4012_v25 }
 0x5d0   :  { %v7445_v56 = vpop.eup %7444  ;;  %7456 = vtanh.f32 %v3809_v45  ;;  %5028 = vmatprep.mubr.bf16.mxu1 %v7643_v21 }
 0x5d1   :  { %v7447_v19 = vpop.eup %7446  ;;  %7458 = vtanh.f32 %v3801_v55 }
 0x5d2   :  { %v7449_v4 = vpop.eup %7448 }
 0x5d3   :  { %v7451_v17 = vpop.eup %7450  ;;  %v5924_v38 = vpop.f32.mrb[108].mxu0  ;;  %v4047_v37 = vpack.c.bf16 %v7449_v4, %v7445_v56 }
 0x5d4   :  { %v3822_v50 = vadd.f32 %v5924_v38, %v9041_v15  ;;  %v3813_v3 = vpop.f32.mrb[109].mxu0  ;;  %v4042_v53 = vpack.c.bf16 %v7451_v17, %v7447_v19 }
 0x5d5   :  { %v3814_v24 = vadd.f32 %v3813_v3, %v9041_v15  ;;  %v5925_v1 = vpop.f32.mrb[110].mxu0 }
 0x5d6   :  { %7460 = vtanh.f32 %v3822_v50  ;;  %v3825_v18 = vadd.f32 %v5925_v1, %v9041_v15  ;;  %v3816_v60 = vpop.f32.mrb[111].mxu0 }
 0x5d7   :  { %7462 = vtanh.f32 %v3814_v24  ;;  %v3817_v22 = vadd.f32 %v3816_v60, %v9041_v15  ;;  %5029 = vmatmul.mubr.bf16.gmra.mrb[84].mxu1 %v4017_v5  ;;  %v9119_v5 = vrot.slane %v4148_v10, %v9392_v11 }
 0x5d8   :  { %v7453_v20 = vpop.eup %7452  ;;  %7464 = vtanh.f32 %v3825_v18  ;;  %5038 = vmatprep.mubr.bf16.mxu1 %v7643_v21 }
 0x5d9   :  { %v7455_v6 = vpop.eup %7454  ;;  %7466 = vtanh.f32 %v3817_v22 }
 0x5da   :  { %v7457_v61 = vpop.eup %7456 }
 0x5db   :  { %v7459_v49 = vpop.eup %7458  ;;  %v4057_v36 = vpack.c.bf16 %v7457_v61, %v7453_v20 }
 0x5dc   :  { %v4052_v57 = vpack.c.bf16 %v7459_v49, %v7455_v6 }
 0x5df   :  { %5039 = vmatmul.mubr.bf16.gmra.mrb[88].mxu1 %v4022_v31 }
 0x5e0   :  { %v7461_v58 = vpop.eup %7460  ;;  %5048 = vmatprep.mubr.bf16.mxu1 %v7643_v21 }
 0x5e1   :  { %v7463_v62 = vpop.eup %7462 }
 0x5e2   :  { %v7465_v15 = vpop.eup %7464 }
 0x5e3   :  { %v7467_v40 = vpop.eup %7466  ;;  %v4067_v25 = vpack.c.bf16 %v7465_v15, %v7461_v58 }
 0x5e4   :  { %v4062_v59 = vpack.c.bf16 %v7467_v40, %v7463_v62 }
 0x5e7   :  { %5049 = vmatmul.mubr.bf16.gmra.mrb[92].mxu1 %v4027_v44 }
 0x5e8   :  { %5058 = vmatprep.mubr.bf16.mxu1 %v7643_v21 }
 0x5ef   :  { %5059 = vmatmul.mubr.bf16.gmra.mrb[96].mxu1 %v4032_v23 }
 0x5f0   :  { %5068 = vmatprep.mubr.bf16.mxu1 %v7643_v21 }
 0x5f7   :  { %5069 = vmatmul.mubr.bf16.gmra.mrb[100].mxu1 %v4037_v46 }
 0x5f8   :  { %5078 = vmatprep.mubr.bf16.mxu1 %v7643_v21 }
 0x5ff   :  { %5079 = vmatmul.mubr.bf16.gmra.mrb[104].mxu1 %v4042_v53 }
 0x600   :  { %5088 = vmatprep.mubr.bf16.mxu1 %v7643_v21 }
 0x607   :  { %5089 = vmatmul.mubr.bf16.gmra.mrb[108].mxu1 %v4047_v37 }
 0x608   :  { %5098 = vmatprep.mubr.bf16.mxu1 %v7643_v21 }
 0x60f   :  { %5099 = vmatmul.mubr.bf16.gmra.mrb[112].mxu1 %v4052_v57 }
 0x610   :  { %5108 = vmatprep.mubr.bf16.mxu1 %v7643_v21 }
 0x617   :  { %5109 = vmatmul.mubr.bf16.gmra.mrb[116].mxu1 %v4057_v36 }
 0x618   :  { %5118 = vmatprep.mubr.bf16.mxu1 %v7643_v21 }
 0x61f   :  { %5119 = vmatmul.mubr.bf16.gmra.mrb[120].mxu1 %v4062_v59 }
 0x620   :  { %5128 = vmatprep.mubr.bf16.mxu1 %v7643_v21 }
 0x627   :  { %5129 = vmatmul.mubr.bf16.gmra.mrb[124].mxu1 %v4067_v25 }
 0x682   :  { %v4980_v54 = vpop.f32.mrb[64].mxu1 }
 0x683   :  { %v6038_v14 = vadd.f32 %v4980_v54, %v9119_v5  ;;  %v4982_v13 = vpop.f32.mrb[65].mxu1 }
 0x684   :  { %v6039_v21 = vadd.f32 %v4982_v13, %v9122_v51  ;;  %v4984_v7 = vpop.f32.mrb[66].mxu1 }
 0x685   :  { %7591 = shalt.err (!%p7588_p2)
}
 0x686   :  { %s7592_s25 = scalar_lea.hbm %s9225_s10, 8192 }
 0x687   :  { %p7593_p3 = scmp.ne.s32.totalorder %s9225_s10, %s7592_s25  ;;  %p7596_p4 = scmp.lt.u32.totalorder %s7592_s25, %s9225_s10 }
 0x689   :  { %p7598_p5 = pnand %p7596_p4, %p7593_p3 }
 0x68b   :  { %7601 = shalt.err (!%p7598_p5)
}
 0x68c   :  { %s7645_s24 = smov 256   ;;  %s7646_s28 = smov 16   ;;  %v6040_v11 = vadd.f32 %v4984_v7, %v9119_v5  ;;  %v4986_v12 = vpop.f32.mrb[67].mxu1  ;;  %v5710_v42 = vpack.c.bf16 %v6039_v21, %v6038_v14 }
 0x68d   :  { %5386 = dma.vmem_to_hbm [thread:$0]  %s5381_s0, 8192, %s9225_s10, [#allocation13], %s7645_s24, %s7645_s24, %s7646_s28   ;;  %v6041_v27 = vadd.f32 %v4986_v12, %v9122_v51  ;;  %v4990_v28 = vpop.f32.mrb[68].mxu1 }
 0x68e   :  { %5331 = vst [vmem:[#allocation11] sm:$0xff] %v5710_v42  ;;  %v6042_v63 = vadd.f32 %v4990_v28, %v9119_v5  ;;  %v4992_v44 = vpop.f32.mrb[69].mxu1  ;;  %s7647_s10 = smov [#allocation11]  }
 0x68f   :  { %v5711_v39 = vpack.c.bf16 %v6041_v27, %v6040_v11  ;;  %v6043_v2 = vadd.f32 %v4992_v44, %v9122_v51  ;;  %v4994_v9 = vpop.f32.mrb[70].mxu1  ;;  %s5368_s13 = sshll.u32 %s7647_s10, 4  ;;  %s5369_s13 = int_to_ptr.vmem [resolvable:$true] %s5368_s13 }
 0x690   :  { %v6044_v31 = vadd.f32 %v4994_v9, %v9119_v5  ;;  %v4996_v8 = vpop.f32.mrb[71].mxu1  ;;  %s7602_s7 = scalar_lea.vmem %s5369_s13, 4096  ;;  %p7607_p7 = scmp.lt.s32.totalorder %s5369_s13, %s5369_s13 }
 0x691   :  { %5332 = vst [vmem:[#allocation11 + $0x8] sm:$0xff] %v5711_v39  ;;  %v5712_v33 = vpack.c.bf16 %v6043_v2, %v6042_v63  ;;  %v6045_v29 = vadd.f32 %v4996_v8, %v9122_v51  ;;  %p7603_p6 = scmp.ne.s32.totalorder %s5369_s13, %s7602_s7  ;;  %p7608_p8 = scmp.lt.s32.totalorder %s7602_s7, %s7602_s7 }
 0x692   :  { %v5000_v26 = vpop.f32.mrb[72].mxu1 }
 0x693   :  { %5333 = vst [vmem:[#allocation11 + $0x10] sm:$0xff] %v5712_v33  ;;  %v5713_v52 = vpack.c.bf16 %v6045_v29, %v6044_v31  ;;  %v6046_v48 = vadd.f32 %v5000_v26, %v9119_v5  ;;  %v5002_v35 = vpop.f32.mrb[73].mxu1  ;;  %p7609_p9 = por %p7608_p8, %p7607_p7 }
 0x694   :  { %v6047_v30 = vadd.f32 %v5002_v35, %v9122_v51  ;;  %v5004_v47 = vpop.f32.mrb[74].mxu1 }
 0x695   :  { %5334 = vst [vmem:[#allocation11 + $0x18] sm:$0xff] %v5713_v52  ;;  %v6048_v0 = vadd.f32 %v5004_v47, %v9119_v5  ;;  %v5006_v46 = vpop.f32.mrb[75].mxu1  ;;  %p7610_p10 = pnand %p7609_p9, %p7603_p6 }
 0x696   :  { %v5714_v16 = vpack.c.bf16 %v6047_v30, %v6046_v48  ;;  %v6049_v34 = vadd.f32 %v5006_v46, %v9122_v51 }
 0x698   :  { %5335 = vst [vmem:[#allocation11 + $0x20] sm:$0xff] %v5714_v16  ;;  %v5715_v23 = vpack.c.bf16 %v6049_v34, %v6048_v0 }
 0x69a   :  { %5336 = vst [vmem:[#allocation11 + $0x28] sm:$0xff] %v5715_v23  ;;  %v5010_v43 = vpop.f32.mrb[76].mxu1 }
 0x69b   :  { %v6050_v41 = vadd.f32 %v5010_v43, %v9119_v5  ;;  %v5012_v45 = vpop.f32.mrb[77].mxu1 }
 0x69c   :  { %v6051_v32 = vadd.f32 %v5012_v45, %v9122_v51  ;;  %v5014_v55 = vpop.f32.mrb[78].mxu1 }
 0x69d   :  { %v6052_v56 = vadd.f32 %v5014_v55, %v9119_v5  ;;  %v5016_v19 = vpop.f32.mrb[79].mxu1 }
 0x69e   :  { %v5716_v4 = vpack.c.bf16 %v6051_v32, %v6050_v41  ;;  %v6053_v17 = vadd.f32 %v5016_v19, %v9122_v51 }
 0x6a0   :  { %5337 = vst [vmem:[#allocation11 + $0x30] sm:$0xff] %v5716_v4  ;;  %v5717_v38 = vpack.c.bf16 %v6053_v17, %v6052_v56 }
 0x6a2   :  { %5338 = vst [vmem:[#allocation11 + $0x38] sm:$0xff] %v5717_v38  ;;  %v5020_v37 = vpop.f32.mrb[80].mxu1 }
 0x6a3   :  { %v6054_v50 = vadd.f32 %v5020_v37, %v9119_v5  ;;  %v5022_v3 = vpop.f32.mrb[81].mxu1 }
 0x6a4   :  { %v6055_v53 = vadd.f32 %v5022_v3, %v9122_v51  ;;  %v5024_v24 = vpop.f32.mrb[82].mxu1 }
 0x6a5   :  { %v6056_v1 = vadd.f32 %v5024_v24, %v9119_v5  ;;  %v5026_v18 = vpop.f32.mrb[83].mxu1 }
 0x6a6   :  { %v5718_v60 = vpack.c.bf16 %v6055_v53, %v6054_v50  ;;  %v6057_v22 = vadd.f32 %v5026_v18, %v9122_v51 }
 0x6a8   :  { %5339 = vst [vmem:[#allocation11 + $0x40] sm:$0xff] %v5718_v60  ;;  %v5719_v20 = vpack.c.bf16 %v6057_v22, %v6056_v1 }
 0x6aa   :  { %5340 = vst [vmem:[#allocation11 + $0x48] sm:$0xff] %v5719_v20  ;;  %v5030_v6 = vpop.f32.mrb[84].mxu1 }
 0x6ab   :  { %v6058_v61 = vadd.f32 %v5030_v6, %v9119_v5  ;;  %v5032_v49 = vpop.f32.mrb[85].mxu1 }
 0x6ac   :  { %v6059_v36 = vadd.f32 %v5032_v49, %v9122_v51  ;;  %v5034_v57 = vpop.f32.mrb[86].mxu1 }
 0x6ad   :  { %v6060_v58 = vadd.f32 %v5034_v57, %v9119_v5  ;;  %v5036_v62 = vpop.f32.mrb[87].mxu1 }
 0x6ae   :  { %v5720_v15 = vpack.c.bf16 %v6059_v36, %v6058_v61  ;;  %v6061_v40 = vadd.f32 %v5036_v62, %v9122_v51 }
 0x6b0   :  { %5341 = vst [vmem:[#allocation11 + $0x50] sm:$0xff] %v5720_v15  ;;  %v5721_v25 = vpack.c.bf16 %v6061_v40, %v6060_v58 }
 0x6b2   :  { %5342 = vst [vmem:[#allocation11 + $0x58] sm:$0xff] %v5721_v25  ;;  %v5040_v59 = vpop.f32.mrb[88].mxu1 }
 0x6b3   :  { %v6062_v10 = vadd.f32 %v5040_v59, %v9119_v5  ;;  %v5042_v54 = vpop.f32.mrb[89].mxu1 }
 0x6b4   :  { %v6063_v14 = vadd.f32 %v5042_v54, %v9122_v51  ;;  %v5044_v13 = vpop.f32.mrb[90].mxu1 }
 0x6b5   :  { %v6064_v21 = vadd.f32 %v5044_v13, %v9119_v5  ;;  %v5046_v7 = vpop.f32.mrb[91].mxu1 }
 0x6b6   :  { %v5722_v11 = vpack.c.bf16 %v6063_v14, %v6062_v10  ;;  %v6065_v12 = vadd.f32 %v5046_v7, %v9122_v51 }
 0x6b8   :  { %5343 = vst [vmem:[#allocation11 + $0x60] sm:$0xff] %v5722_v11  ;;  %v5723_v42 = vpack.c.bf16 %v6065_v12, %v6064_v21 }
 0x6ba   :  { %5344 = vst [vmem:[#allocation11 + $0x68] sm:$0xff] %v5723_v42  ;;  %v5050_v27 = vpop.f32.mrb[92].mxu1 }
 0x6bb   :  { %v6066_v39 = vadd.f32 %v5050_v27, %v9119_v5  ;;  %v5052_v28 = vpop.f32.mrb[93].mxu1 }
 0x6bc   :  { %v6067_v63 = vadd.f32 %v5052_v28, %v9122_v51  ;;  %v5054_v44 = vpop.f32.mrb[94].mxu1 }
 0x6bd   :  { %v6068_v2 = vadd.f32 %v5054_v44, %v9119_v5  ;;  %v5056_v9 = vpop.f32.mrb[95].mxu1 }
 0x6be   :  { %v5724_v31 = vpack.c.bf16 %v6067_v63, %v6066_v39  ;;  %v6069_v8 = vadd.f32 %v5056_v9, %v9122_v51 }
 0x6c0   :  { %5345 = vst [vmem:[#allocation11 + $0x70] sm:$0xff] %v5724_v31  ;;  %v5725_v33 = vpack.c.bf16 %v6069_v8, %v6068_v2 }
 0x6c2   :  { %5346 = vst [vmem:[#allocation11 + $0x78] sm:$0xff] %v5725_v33  ;;  %v5060_v29 = vpop.f32.mrb[96].mxu1 }
 0x6c3   :  { %v6070_v52 = vadd.f32 %v5060_v29, %v9119_v5  ;;  %v5062_v26 = vpop.f32.mrb[97].mxu1 }
 0x6c4   :  { %v6071_v48 = vadd.f32 %v5062_v26, %v9122_v51  ;;  %v5064_v35 = vpop.f32.mrb[98].mxu1 }
 0x6c5   :  { %v6072_v30 = vadd.f32 %v5064_v35, %v9119_v5  ;;  %v5066_v47 = vpop.f32.mrb[99].mxu1 }
 0x6c6   :  { %v5726_v0 = vpack.c.bf16 %v6071_v48, %v6070_v52  ;;  %v6073_v46 = vadd.f32 %v5066_v47, %v9122_v51 }
 0x6c8   :  { %5347 = vst [vmem:[#allocation11 + $0x80] sm:$0xff] %v5726_v0  ;;  %v5727_v16 = vpack.c.bf16 %v6073_v46, %v6072_v30 }
 0x6ca   :  { %5348 = vst [vmem:[#allocation11 + $0x88] sm:$0xff] %v5727_v16  ;;  %v5070_v34 = vpop.f32.mrb[100].mxu1 }
 0x6cb   :  { %v6074_v23 = vadd.f32 %v5070_v34, %v9119_v5  ;;  %v5072_v43 = vpop.f32.mrb[101].mxu1 }
 0x6cc   :  { %v6075_v41 = vadd.f32 %v5072_v43, %v9122_v51  ;;  %v5074_v45 = vpop.f32.mrb[102].mxu1 }
 0x6cd   :  { %v6076_v32 = vadd.f32 %v5074_v45, %v9119_v5  ;;  %v5076_v55 = vpop.f32.mrb[103].mxu1 }
 0x6ce   :  { %v5728_v56 = vpack.c.bf16 %v6075_v41, %v6074_v23  ;;  %v6077_v19 = vadd.f32 %v5076_v55, %v9122_v51 }
 0x6d0   :  { %5349 = vst [vmem:[#allocation11 + $0x90] sm:$0xff] %v5728_v56  ;;  %v5729_v4 = vpack.c.bf16 %v6077_v19, %v6076_v32 }
 0x6d2   :  { %5350 = vst [vmem:[#allocation11 + $0x98] sm:$0xff] %v5729_v4  ;;  %v5080_v17 = vpop.f32.mrb[104].mxu1 }
 0x6d3   :  { %v6078_v38 = vadd.f32 %v5080_v17, %v9119_v5  ;;  %v5082_v37 = vpop.f32.mrb[105].mxu1 }
 0x6d4   :  { %v6079_v50 = vadd.f32 %v5082_v37, %v9122_v51  ;;  %v5084_v3 = vpop.f32.mrb[106].mxu1 }
 0x6d5   :  { %v6080_v53 = vadd.f32 %v5084_v3, %v9119_v5  ;;  %v5086_v24 = vpop.f32.mrb[107].mxu1 }
 0x6d6   :  { %v5730_v1 = vpack.c.bf16 %v6079_v50, %v6078_v38  ;;  %v6081_v18 = vadd.f32 %v5086_v24, %v9122_v51 }
 0x6d8   :  { %5351 = vst [vmem:[#allocation11 + $0xa0] sm:$0xff] %v5730_v1  ;;  %v5731_v60 = vpack.c.bf16 %v6081_v18, %v6080_v53 }
 0x6da   :  { %5352 = vst [vmem:[#allocation11 + $0xa8] sm:$0xff] %v5731_v60  ;;  %v5090_v22 = vpop.f32.mrb[108].mxu1 }
 0x6db   :  { %v6082_v20 = vadd.f32 %v5090_v22, %v9119_v5  ;;  %v5092_v6 = vpop.f32.mrb[109].mxu1 }
 0x6dc   :  { %v6083_v61 = vadd.f32 %v5092_v6, %v9122_v51  ;;  %v5094_v49 = vpop.f32.mrb[110].mxu1 }
 0x6dd   :  { %v6084_v36 = vadd.f32 %v5094_v49, %v9119_v5  ;;  %v5096_v57 = vpop.f32.mrb[111].mxu1 }
 0x6de   :  { %v5732_v58 = vpack.c.bf16 %v6083_v61, %v6082_v20  ;;  %v6085_v62 = vadd.f32 %v5096_v57, %v9122_v51 }
 0x6e0   :  { %5353 = vst [vmem:[#allocation11 + $0xb0] sm:$0xff] %v5732_v58  ;;  %v5733_v15 = vpack.c.bf16 %v6085_v62, %v6084_v36 }
 0x6e2   :  { %5354 = vst [vmem:[#allocation11 + $0xb8] sm:$0xff] %v5733_v15  ;;  %v5100_v40 = vpop.f32.mrb[112].mxu1 }
 0x6e3   :  { %v6086_v25 = vadd.f32 %v5100_v40, %v9119_v5  ;;  %v5102_v59 = vpop.f32.mrb[113].mxu1 }
 0x6e4   :  { %v6087_v10 = vadd.f32 %v5102_v59, %v9122_v51  ;;  %v5104_v54 = vpop.f32.mrb[114].mxu1 }
 0x6e5   :  { %v6088_v14 = vadd.f32 %v5104_v54, %v9119_v5  ;;  %v5106_v13 = vpop.f32.mrb[115].mxu1 }
 0x6e6   :  { %v5734_v21 = vpack.c.bf16 %v6087_v10, %v6086_v25  ;;  %v6089_v7 = vadd.f32 %v5106_v13, %v9122_v51 }
 0x6e8   :  { %5355 = vst [vmem:[#allocation11 + $0xc0] sm:$0xff] %v5734_v21  ;;  %v5735_v11 = vpack.c.bf16 %v6089_v7, %v6088_v14 }
 0x6ea   :  { %5356 = vst [vmem:[#allocation11 + $0xc8] sm:$0xff] %v5735_v11  ;;  %v5110_v12 = vpop.f32.mrb[116].mxu1 }
 0x6eb   :  { %v6090_v42 = vadd.f32 %v5110_v12, %v9119_v5  ;;  %v5112_v27 = vpop.f32.mrb[117].mxu1 }
 0x6ec   :  { %v6091_v39 = vadd.f32 %v5112_v27, %v9122_v51  ;;  %v5114_v28 = vpop.f32.mrb[118].mxu1 }
 0x6ed   :  { %v6092_v63 = vadd.f32 %v5114_v28, %v9119_v5  ;;  %v5116_v44 = vpop.f32.mrb[119].mxu1 }
 0x6ee   :  { %v5736_v2 = vpack.c.bf16 %v6091_v39, %v6090_v42  ;;  %v6093_v9 = vadd.f32 %v5116_v44, %v9122_v51 }
 0x6f0   :  { %5357 = vst [vmem:[#allocation11 + $0xd0] sm:$0xff] %v5736_v2  ;;  %v5737_v31 = vpack.c.bf16 %v6093_v9, %v6092_v63 }
 0x6f2   :  { %5358 = vst [vmem:[#allocation11 + $0xd8] sm:$0xff] %v5737_v31  ;;  %v5120_v8 = vpop.f32.mrb[120].mxu1 }
 0x6f3   :  { %v6094_v33 = vadd.f32 %v5120_v8, %v9119_v5  ;;  %v5122_v29 = vpop.f32.mrb[121].mxu1 }
 0x6f4   :  { %v6095_v52 = vadd.f32 %v5122_v29, %v9122_v51  ;;  %v5124_v26 = vpop.f32.mrb[122].mxu1 }
 0x6f5   :  { %v6096_v48 = vadd.f32 %v5124_v26, %v9119_v5  ;;  %v5126_v35 = vpop.f32.mrb[123].mxu1 }
 0x6f6   :  { %v5738_v30 = vpack.c.bf16 %v6095_v52, %v6094_v33  ;;  %v6097_v47 = vadd.f32 %v5126_v35, %v9122_v51 }
 0x6f8   :  { %5359 = vst [vmem:[#allocation11 + $0xe0] sm:$0xff] %v5738_v30  ;;  %v5739_v0 = vpack.c.bf16 %v6097_v47, %v6096_v48 }
 0x6fa   :  { %5360 = vst [vmem:[#allocation11 + $0xe8] sm:$0xff] %v5739_v0  ;;  %v5130_v46 = vpop.f32.mrb[124].mxu1 }
 0x6fb   :  { %v6098_v16 = vadd.f32 %v5130_v46, %v9119_v5  ;;  %v5132_v34 = vpop.f32.mrb[125].mxu1 }
 0x6fc   :  { %v6099_v23 = vadd.f32 %v5132_v34, %v9122_v51  ;;  %v5134_v43 = vpop.f32.mrb[126].mxu1 }
 0x6fd   :  { %v6100_v41 = vadd.f32 %v5134_v43, %v9119_v5  ;;  %v5136_v45 = vpop.f32.mrb[127].mxu1 }
 0x6fe   :  { %v5740_v32 = vpack.c.bf16 %v6099_v23, %v6098_v16  ;;  %v6101_v55 = vadd.f32 %v5136_v45, %v9122_v51 }
 0x700   :  { %5361 = vst [vmem:[#allocation11 + $0xf0] sm:$0xff] %v5740_v32  ;;  %v5741_v56 = vpack.c.bf16 %v6101_v55, %v6100_v41 }
 0x702   :  { %5362 = vst [vmem:[#allocation11 + $0xf8] sm:$0xff] %v5741_v56 }
 0x703   :  { %7613 = shalt.err (!%p7610_p10)
}
 0x704   :  { %s7614_s17 = scalar_lea.hbm %s9224_s9, 4096 }
 0x705   :  { %p7615_p11 = scmp.ne.s32.totalorder %s9224_s9, %s7614_s17  ;;  %p7618_p12 = scmp.lt.u32.totalorder %s7614_s17, %s9224_s9 }
 0x707   :  { %p7620_p13 = pnand %p7618_p12, %p7615_p11 }
 0x709   :  { %7623 = shalt.err (!%p7620_p13)
}
 0x70a   :  { %5374 = dma.vmem_to_hbm [thread:$0]  %s5369_s13, 4096, %s9224_s9, [#allocation4], %s7639_s5, %s7639_s5, %s7640_s23  }
 0x70b   :  { %7630 = dma.done.wait [#allocation4], 4096  }
 0x70c   :  { %7631 = vsyncadd [#allocation4], 4294963200 }
 0x70d   :  { %7632 = dma.done.wait [#allocation13], 8192  }
 0x70e   :  { %7633 = vsyncadd [#allocation13], 4294959104 }
 0x70f   :  { %5393 = vsyncpa [#allocation3], 1 }
 0x710   :  { %5394 = vsyncpa [#allocation6], 1 }
 0x711   :  { %5395 = vsyncpa [#allocation9], 1 }
 0x712   :  { %5396 = vsyncpa [#allocation4], 1 }
 0x713   :  { %5397 = vsyncpa [#allocation13], 1 }

</bundles_post_ra>
